<compile_context>
chip_gen: v6e
topology: v6e:2x2x1
jax: 0.10.0
libtpu: 0.0.40
codegen_flags: <defaults>
</compile_context>

<pallas_src>
import functools

import jax
import jax.numpy as jnp
from jax.experimental import pallas as pl
from jax.experimental.pallas import tpu as pltpu


# Static ResNet-34 stage layout: (out_channels, num_blocks, first_stride).
RESNET34_STAGES = ((64, 3, 1), (128, 4, 2), (256, 6, 2), (512, 3, 2))

_VMEM_LIMIT = 32 * 1024 * 1024  # explicit scoped-VMEM budget (safe on v5e/v6e/v7x)


# ----------------------------------------------------------------------------
# Pallas tiled matmul with fused bias + ReLU epilogue (bf16 MXU / f32 acc)
# ----------------------------------------------------------------------------
def _round_up(x, m):
    return ((x + m - 1) // m) * m


def _matmul_kernel_1k(a_ref, b_ref, bias_ref, o_ref, *, act):
    """Single k-step fast path: no accumulator scratch, no init/finalize RMW."""
    r = jnp.dot(a_ref[...], b_ref[...], preferred_element_type=jnp.float32)
    r = r + bias_ref[...]
    if act == "relu":
        r = jnp.maximum(r, 0.0)
    o_ref[...] = r.astype(o_ref.dtype)


def _matmul_kernel_acc(a_ref, b_ref, bias_ref, o_ref, acc_ref, *, act):
    """K-looped path (only used when K > 4608)."""
    @pl.when(pl.program_id(2) == 0)
    def _():
        acc_ref[...] = jnp.zeros_like(acc_ref)

    acc_ref[...] += jnp.dot(a_ref[...], b_ref[...],
                            preferred_element_type=jnp.float32)

    @pl.when(pl.program_id(2) == pl.num_programs(2) - 1)
    def _():
        r = acc_ref[...] + bias_ref[...]
        if act == "relu":
            r = jnp.maximum(r, 0.0)
        o_ref[...] = r.astype(o_ref.dtype)


def _pallas_matmul(a, b, bias, act, out_dtype, tm=256, tn=256, tk=512):
    """out = act(A @ B + bias).  bf16 MXU operands, f32 accumulate/epilogue."""
    M, K = a.shape
    K2, N = b.shape
    assert K == K2
    tm = min(tm, _round_up(M, 16))          # 16: bf16 sublane packing
    tn = min(tn, _round_up(N, 128))
    Kr = _round_up(K, 128)
    tk = Kr if Kr <= 4608 else tk           # full-K resident when it fits
    # Megacore (v7x): expose >=2 blocks on a parallel axis, but only when each
    # half still fills >=128 MXU rows (pure overhead on 1-TC chips otherwise).
    if _round_up(M, tm) // tm == 1 and _round_up(N, tn) // tn == 1 and M >= 256:
        tm = _round_up((M + 1) // 2, 16)
    Mp, Np, Kp = _round_up(M, tm), _round_up(N, tn), _round_up(K, tk)

    a_p = jnp.pad(a.astype(jnp.bfloat16), ((0, Mp - M), (0, Kp - K)))
    b_p = jnp.pad(b.astype(jnp.bfloat16), ((0, Kp - K), (0, Np - N)))
    if bias is None:
        bias_p = jnp.zeros((1, Np), jnp.float32)
    else:
        bias_p = jnp.pad(bias.astype(jnp.float32).reshape(1, N),
                         ((0, 0), (0, Np - N)))

    nk = Kp // tk
    if nk == 1:
        out = pl.pallas_call(
            functools.partial(_matmul_kernel_1k, act=act),
            out_shape=jax.ShapeDtypeStruct((Mp, Np), out_dtype),
            grid_spec=pltpu.PrefetchScalarGridSpec(
                num_scalar_prefetch=0,
                grid=(Mp // tm, Np // tn),
                in_specs=[pl.BlockSpec((tm, Kp), lambda i, j: (i, 0)),
                          pl.BlockSpec((Kp, tn), lambda i, j: (0, j)),
                          pl.BlockSpec((1, tn), lambda i, j: (0, j))],
                out_specs=pl.BlockSpec((tm, tn), lambda i, j: (i, j))),
            compiler_params=pltpu.CompilerParams(
                dimension_semantics=("parallel", "parallel"),
                vmem_limit_bytes=_VMEM_LIMIT),
        )(a_p, b_p, bias_p)
    else:
        # TODO(synk): bias block is re-fetched on every k step (minor; only the
        # rare K>4608 path).
        out = pl.pallas_call(
            functools.partial(_matmul_kernel_acc, act=act),
            out_shape=jax.ShapeDtypeStruct((Mp, Np), out_dtype),
            grid_spec=pltpu.PrefetchScalarGridSpec(
                num_scalar_prefetch=0,
                grid=(Mp // tm, Np // tn, nk),
                in_specs=[pl.BlockSpec((tm, tk), lambda i, j, k: (i, k)),
                          pl.BlockSpec((tk, tn), lambda i, j, k: (k, j)),
                          pl.BlockSpec((1, tn), lambda i, j, k: (0, j))],
                out_specs=pl.BlockSpec((tm, tn), lambda i, j, k: (i, j)),
                scratch_shapes=[pltpu.VMEM((tm, tn), jnp.float32)]),
            compiler_params=pltpu.CompilerParams(
                dimension_semantics=("parallel", "parallel", "arbitrary"),
                vmem_limit_bytes=_VMEM_LIMIT),
        )(a_p, b_p, bias_p)
    return out[:M, :N]


def matmul(a, b, bias=None, act=None, out_dtype=jnp.float32):
    """Dispatch: big GEMMs -> Pallas MXU kernel; tiny ones -> plain XLA dot
    (Pallas launch + pad/unpad overhead would dominate)."""
    M, K = a.shape
    N = b.shape[1]
    if M < 64 or N < 64 or M * N * K < (1 << 20):
        out = jnp.dot(a, b, preferred_element_type=jnp.float32)
        if bias is not None:
            out = out + bias
        if act == "relu":
            out = jnp.maximum(out, 0.0)
        return out.astype(out_dtype)
    return _pallas_matmul(a, b, bias, act, out_dtype)


# ----------------------------------------------------------------------------
# Conv / pool helpers (NHWC im2col glue + Pallas matmul with fused epilogue)
# ----------------------------------------------------------------------------
def relu(x):
    return jnp.maximum(x, jnp.zeros((), x.dtype))


def conv2d(x, w_mat, b, kh, kw, stride=1, padding=0, act=None,
           out_dtype=jnp.bfloat16):
    """NHWC conv via im2col + matmul.  kh/kw/stride/padding MUST be Python ints.
    x: (N,H,W,Cin); w_mat: (kh*kw*Cin, Cout) pre-reshaped (kh,kw,cin ordering)."""
    N, H, W, Cin = x.shape
    Cout = w_mat.shape[1]
    OH = (H + 2 * padding - kh) // stride + 1
    OW = (W + 2 * padding - kw) // stride + 1
    if kh == 1 and kw == 1 and padding == 0:
        pt = x[:, ::stride, ::stride, :].reshape(N * OH * OW, Cin)
    else:
        # TODO(synk): im2col materializes a kh*kw-times blown-up activation in
        # HBM; negligible at these sizes, fold (kh,kw) into the matmul K grid
        # axis for production image sizes.
        xp = jnp.pad(x, ((0, 0), (padding, padding), (padding, padding), (0, 0)))
        patches = [xp[:, i:i + OH * stride:stride, j:j + OW * stride:stride, :]
                   for i in range(kh) for j in range(kw)]
        pt = jnp.concatenate(patches, axis=-1).reshape(N * OH * OW,
                                                       kh * kw * Cin)
    out = matmul(pt, w_mat, bias=b, act=act, out_dtype=out_dtype)
    return out.reshape(N, OH, OW, Cout)


def maxpool2d(x, kernel, stride, padding):
    N, H, W, C = x.shape
    if padding:
        xp = jnp.pad(x, ((0, 0), (padding, padding), (padding, padding),
                         (0, 0)), constant_values=-jnp.inf)
    else:
        xp = x
    OH = (H + 2 * padding - kernel) // stride + 1
    OW = (W + 2 * padding - kernel) // stride + 1
    out = None
    for kh in range(kernel):
        for kw in range(kernel):
            v = xp[:, kh:kh + OH * stride:stride, kw:kw + OW * stride:stride, :]
            out = v if out is None else jnp.maximum(out, v)
    return out


def adaptive_avg_pool_1xS(p, out_w):
    """AdaptiveAvgPool2d((1, out_w)) on NHWC input -> (N, out_w, C)."""
    N, H, W, C = p.shape
    ph = jnp.mean(p, axis=1)                          # (N, W, C)
    cols = []
    for j in range(out_w):
        start = (j * W) // out_w
        end = -((-(j + 1) * W) // out_w)              # ceil((j+1)*W/out_w)
        cols.append(jnp.mean(ph[:, start:end, :], axis=1))
    return jnp.stack(cols, axis=1)                    # (N, out_w, C)


# ----------------------------------------------------------------------------
# STN geometry (affine_grid / grid_sample, align_corners=False, zeros padding)
# ----------------------------------------------------------------------------
# TODO(synk): affine_grid/grid_sample stay in plain JAX (data-dependent bilinear
# gather has no clean rectangular-BlockSpec Pallas mapping).
def affine_grid(theta, size):
    N, C, H, W = size
    xs = (jnp.arange(W, dtype=jnp.float32) * 2.0 + 1.0) / W - 1.0
    ys = (jnp.arange(H, dtype=jnp.float32) * 2.0 + 1.0) / H - 1.0
    gx, gy = jnp.meshgrid(xs, ys)                     # (H, W) each
    base = jnp.stack([gx, gy, jnp.ones_like(gx)], axis=-1)     # (H, W, 3)
    return jnp.einsum('hwk,nik->nhwi', base, theta)            # (N, H, W, 2)


def grid_sample_nhwc(x, grid):
    """x: (N,H,W,C), grid: (N,H,W,2) -> (N,H,W,C); zeros padding, bilinear."""
    N, H, W, C = x.shape
    gx, gy = grid[..., 0], grid[..., 1]
    ix = ((gx + 1.0) * W - 1.0) / 2.0
    iy = ((gy + 1.0) * H - 1.0) / 2.0
    x0 = jnp.floor(ix)
    y0 = jnp.floor(iy)
    x1, y1 = x0 + 1.0, y0 + 1.0
    wx1, wy1 = ix - x0, iy - y0
    wx0, wy0 = 1.0 - wx1, 1.0 - wy1
    bidx = jnp.arange(N)[:, None, None]

    def corner(xi, yi, wgt):
        valid = (xi >= 0) & (xi <= W - 1) & (yi >= 0) & (yi <= H - 1)
        xc = jnp.clip(xi, 0, W - 1).astype(jnp.int32)
        yc = jnp.clip(yi, 0, H - 1).astype(jnp.int32)
        v = x[bidx, yc, xc]                           # (N, H, W, C)
        return v * (wgt * valid.astype(x.dtype))[..., None]

    return (corner(x0, y0, wx0 * wy0) + corner(x1, y0, wx1 * wy0)
            + corner(x0, y1, wx0 * wy1) + corner(x1, y1, wx1 * wy1))


# ----------------------------------------------------------------------------
# Bidirectional LSTM layer: ONE Pallas kernel per layer, time loop in-kernel
# ----------------------------------------------------------------------------
def _bilstm_kernel(xpf_ref, xpb_ref, whf_ref, whb_ref, of_ref, ob_ref):
    """xp{f,b}: (T,B,4H) f32 pre-projected inputs (bwd already time-reversed);
    wh{f,b}: (H,4H) bf16 recurrent weights; o{f,b}: (T,B,H) f32 hidden states.
    Everything stays resident in VMEM; lax.fori_loop carries h/c in vregs."""
    T, B, G = xpf_ref.shape
    H = whf_ref.shape[0]

    def cell(gates, c):
        i_g = jax.nn.sigmoid(gates[:, 0 * H:1 * H])
        f_g = jax.nn.sigmoid(gates[:, 1 * H:2 * H])
        g_g = jnp.tanh(gates[:, 2 * H:3 * H])
        o_g = jax.nn.sigmoid(gates[:, 3 * H:4 * H])
        c_new = f_g * c + i_g * g_g
        h_new = o_g * jnp.tanh(c_new)
        return h_new, c_new

    def step(t, carry):
        h_f, c_f, h_b, c_b = carry
        # bf16 MXU operands, f32 accumulation; gate nonlinearities stay in f32.
        gf = xpf_ref[t] + jnp.dot(h_f.astype(jnp.bfloat16), whf_ref[...],
                                  preferred_element_type=jnp.float32)
        gb = xpb_ref[t] + jnp.dot(h_b.astype(jnp.bfloat16), whb_ref[...],
                                  preferred_element_type=jnp.float32)
        h_f, c_f = cell(gf, c_f)
        h_b, c_b = cell(gb, c_b)
        of_ref[t] = h_f
        ob_ref[t] = h_b
        return h_f, c_f, h_b, c_b

    z = jnp.zeros((B, H), jnp.float32)
    jax.lax.fori_loop(0, T, step, (z, z, z, z))


def bilstm_layer(x_tbi, lp):
    """One bidirectional LSTM layer.  x_tbi: (T,B,In) f32 -> (T,B,2H) f32."""
    T, B, In = x_tbi.shape
    H = lp['fwd']['w_hh_T'].shape[0]
    G = 4 * H
    x_rev = x_tbi[::-1]
    # Input projections for every timestep at once (tiny M -> plain XLA dot).
    xp_f = (jnp.dot(x_tbi.reshape(T * B, In), lp['fwd']['w_ih_T'],
                    preferred_element_type=jnp.float32)
            + lp['fwd']['bias']).reshape(T, B, G)
    xp_b = (jnp.dot(x_rev.reshape(T * B, In), lp['bwd']['w_ih_T'],
                    preferred_element_type=jnp.float32)
            + lp['bwd']['bias']).reshape(T, B, G)

    out_f, out_b = pl.pallas_call(
        _bilstm_kernel,
        out_shape=(jax.ShapeDtypeStruct((T, B, H), jnp.float32),
                   jax.ShapeDtypeStruct((T, B, H), jnp.float32)),
        in_specs=[pl.BlockSpec(memory_space=pltpu.MemorySpace.VMEM)] * 4,
        out_specs=(pl.BlockSpec(memory_space=pltpu.MemorySpace.VMEM),
                   pl.BlockSpec(memory_space=pltpu.MemorySpace.VMEM)),
        compiler_params=pltpu.CompilerParams(vmem_limit_bytes=_VMEM_LIMIT),
    )(xp_f, xp_b, lp['fwd']['w_hh_T'], lp['bwd']['w_hh_T'])
    return jnp.concatenate([out_f, out_b[::-1]], axis=-1)     # (T, B, 2H)


# ----------------------------------------------------------------------------
# ResNet-34 backbone (torchvision structure, children()[:-2]); BN pre-folded
# ----------------------------------------------------------------------------
def basic_block(x, blk, stride):
    identity = x
    out = conv2d(x, blk['conv1_w'], blk['conv1_b'], 3, 3,
                 stride=stride, padding=1, act="relu")
    out = conv2d(out, blk['conv2_w'], blk['conv2_b'], 3, 3, stride=1, padding=1)
    if 'down_w' in blk:
        identity = conv2d(x, blk['down_w'], blk['down_b'], 1, 1,
                          stride=stride, padding=0)
    return relu(out + identity)            # bf16 residual add + ReLU


def resnet34_backbone(x, bp):
    out = conv2d(x, bp['conv1_w'], bp['conv1_b'], 7, 7, stride=2, padding=3,
                 act="relu")
    out = maxpool2d(out, kernel=3, stride=2, padding=1)
    for (_, nblocks, stage_stride), layer in zip(RESNET34_STAGES, bp['layers']):
        for bidx, blk in enumerate(layer):
            out = basic_block(out, blk, stage_stride if bidx == 0 else 1)
    return out


# ----------------------------------------------------------------------------
# Full CRNN_CTC forward (NHWC internally)
# ----------------------------------------------------------------------------
def crnn_ctc_forward(x, params, seq_len):
    """x: (N, 3, H, W) NCHW float32 (PyTorch layout)."""
    N = x.shape[0]
    xh = x.transpose(0, 2, 3, 1)                      # NHWC for all conv work

    # --- STN localisation net (tiny; f32, XLA-dot path) ---
    s = conv2d(xh, params['stn_c1_w'], params['stn_c1_b'], 7, 7,
               padding=3, out_dtype=jnp.float32)
    s = relu(maxpool2d(s, 2, 2, 0))
    s = conv2d(s, params['stn_c2_w'], params['stn_c2_b'], 5, 5,
               padding=2, out_dtype=jnp.float32)
    s = relu(maxpool2d(s, 2, 2, 0))
    s = s.transpose(0, 3, 1, 2).reshape(N, -1)        # PyTorch Flatten (C,H,W)
    s = matmul(s, params['stn_l1_w'], bias=params['stn_l1_b'], act="relu")
    theta = matmul(s, params['stn_l2_w'],
                   bias=params['stn_l2_b']).reshape(-1, 2, 3)
    grid = affine_grid(theta, x.shape)
    xh = grid_sample_nhwc(xh, grid)

    # --- backbone (eval-mode BN already folded; activations bf16) ---
    f = resnet34_backbone(xh.astype(jnp.bfloat16), params['backbone'])

    # --- proj: 1x1 conv (+folded BN) + ReLU ---
    p = conv2d(f, params['proj_w'], params['proj_b'], 1, 1, act="relu")

    # --- SE block (tiny: plain dots, f32) ---
    pf = p.astype(jnp.float32)
    se = jnp.mean(pf, axis=(1, 2))                                 # (N, 512)
    se = relu(jnp.dot(se, params['se_c1_w']) + params['se_c1_b'])
    se = jax.nn.sigmoid(jnp.dot(se, params['se_c2_w']) + params['se_c2_b'])
    pf = pf * se[:, None, None, :]

    # --- AdaptiveAvgPool2d((1, seq_len)) -> (N, seq_len, 512) ---
    t = adaptive_avg_pool_1xS(pf, seq_len)

    # --- 3-layer bidirectional LSTM + classifier ---
    h = t.transpose(1, 0, 2)                          # (T, B, 512)
    for layer_p in params['lstm']:
        h = bilstm_layer(h, layer_p)
        # TODO(synk): inter-layer dropout(0.2) omitted (eval-mode forward).
    out = h.transpose(1, 0, 2)                        # (B, T, 1024)

    B, T, D = out.shape
    logits = matmul(out.reshape(B * T, D), params['cls_w'],
                    bias=params['cls_b'])
    return logits.reshape(B, T, -1)


# ----------------------------------------------------------------------------
# Parameter init (shapes from CRNN_CTC.__init__) + eval-mode folding/relayout
# ----------------------------------------------------------------------------
class KeyGen:
    def __init__(self, seed):
        self._key = jax.random.PRNGKey(seed)

    def __call__(self):
        self._key, sub = jax.random.split(self._key)
        return sub


def _init(kg, shape, fan_in):
    return jax.random.normal(kg(), shape, jnp.float32) * (float(fan_in) ** -0.5)


def _bn(c):
    return (jnp.ones((c,), jnp.float32), jnp.zeros((c,), jnp.float32),
            jnp.zeros((c,), jnp.float32), jnp.ones((c,), jnp.float32))


def _fold_bn(w, b, bn, eps=1e-5):
    """Fold eval-mode BatchNorm (gamma,beta,mean,var) into the preceding conv."""
    gamma, beta, mean, var = bn
    scale = gamma / jnp.sqrt(var + eps)
    w_f = w * scale[:, None, None, None]
    b0 = jnp.zeros_like(mean) if b is None else b
    b_f = (b0 - mean) * scale + beta
    return w_f, b_f


def _conv_mat(w, dtype=jnp.bfloat16):
    """(Cout,Cin,KH,KW) PyTorch conv weight -> (KH*KW*Cin, Cout) im2col matrix."""
    cout, cin, kh, kw = w.shape
    return w.transpose(2, 3, 1, 0).reshape(kh * kw * cin, cout).astype(dtype)


def fold_inference_params(p):
    """Hoist ALL per-forward weight relayout/cast/fold out of the forward."""
    q = {}
    # STN
    q['stn_c1_w'] = _conv_mat(p['stn_c1_w'])
    q['stn_c1_b'] = p['stn_c1_b']
    q['stn_c2_w'] = _conv_mat(p['stn_c2_w'])
    q['stn_c2_b'] = p['stn_c2_b']
    q['stn_l1_w'] = p['stn_l1_w'].T
    q['stn_l1_b'] = p['stn_l1_b']
    q['stn_l2_w'] = p['stn_l2_w'].T
    q['stn_l2_b'] = p['stn_l2_b']

    # Backbone: fold eval BN, reshape to im2col matrices, cast bf16.
    bb = p['backbone']
    cw, cb = _fold_bn(bb['conv1_w'], None, bb['bn1'])
    fb = {'conv1_w': _conv_mat(cw), 'conv1_b': cb, 'layers': []}
    for layer in bb['layers']:
        fl = []
        for blk in layer:
            nb = {}
            w1, b1 = _fold_bn(blk['conv1_w'], None, blk['bn1'])
            w2, b2 = _fold_bn(blk['conv2_w'], None, blk['bn2'])
            nb['conv1_w'], nb['conv1_b'] = _conv_mat(w1), b1
            nb['conv2_w'], nb['conv2_b'] = _conv_mat(w2), b2
            if 'down_w' in blk:
                wd, bd = _fold_bn(blk['down_w'], None, blk['down_bn'])
                nb['down_w'], nb['down_b'] = _conv_mat(wd), bd
            fl.append(nb)
        fb['layers'].append(fl)
    q['backbone'] = fb

    # proj (1x1 conv, BN folded)
    pw, pb = _fold_bn(p['proj_w'], None, p['proj_bn'])
    q['proj_w'], q['proj_b'] = _conv_mat(pw), pb

    # SE (tiny 1x1 convs -> plain (in,out) f32 matrices)
    q['se_c1_w'] = p['se_c1_w'].reshape(p['se_c1_w'].shape[0], -1).T
    q['se_c1_b'] = p['se_c1_b']
    q['se_c2_w'] = p['se_c2_w'].reshape(p['se_c2_w'].shape[0], -1).T
    q['se_c2_b'] = p['se_c2_b']

    # LSTM: pre-transpose W_ih/W_hh (bf16), pre-sum biases (f32).
    lstm = []
    for lp in p['lstm']:
        nl = {}
        for d in ('fwd', 'bwd'):
            w_ih, w_hh, b_ih, b_hh = lp[d]
            nl[d] = {'w_ih_T': w_ih.T.astype(jnp.bfloat16),
                     'w_hh_T': w_hh.T.astype(jnp.bfloat16),
                     'bias': (b_ih + b_hh).astype(jnp.float32)}
        lstm.append(nl)
    q['lstm'] = lstm

    # classifier
    q['cls_w'] = p['cls_w'].T
    q['cls_b'] = p['cls_b']
    return q


def init_params(num_chars, seq_len, img_h, img_w, kg):
    p = {}
    # STN
    p['stn_c1_w'] = _init(kg, (8, 3, 7, 7), 3 * 49)
    p['stn_c1_b'] = _init(kg, (8,), 3 * 49)
    p['stn_c2_w'] = _init(kg, (10, 8, 5, 5), 8 * 25)
    p['stn_c2_b'] = _init(kg, (10,), 8 * 25)
    stn_lin_in = 10 * (img_h // 4) * (img_w // 4)
    p['stn_l1_w'] = _init(kg, (32, stn_lin_in), stn_lin_in)
    p['stn_l1_b'] = _init(kg, (32,), stn_lin_in)
    p['stn_l2_w'] = jnp.zeros((6, 32), jnp.float32)              # weight.zero_()
    p['stn_l2_b'] = jnp.array([1, 0, 0, 0, 1, 0], jnp.float32)   # identity theta

    # ResNet-34 backbone (architecture itself is the static RESNET34_STAGES)
    backbone = {'conv1_w': _init(kg, (64, 3, 7, 7), 3 * 49), 'bn1': _bn(64),
                'layers': []}
    in_c = 64
    for out_c, nblocks, stride in RESNET34_STAGES:
        layer = []
        for b in range(nblocks):
            s = stride if b == 0 else 1
            blk = {'conv1_w': _init(kg, (out_c, in_c, 3, 3), in_c * 9),
                   'bn1': _bn(out_c),
                   'conv2_w': _init(kg, (out_c, out_c, 3, 3), out_c * 9),
                   'bn2': _bn(out_c)}
            if s != 1 or in_c != out_c:
                blk['down_w'] = _init(kg, (out_c, in_c, 1, 1), in_c)
                blk['down_bn'] = _bn(out_c)
            layer.append(blk)
            in_c = out_c
        backbone['layers'].append(layer)
    p['backbone'] = backbone

    # proj / SE
    p['proj_w'] = _init(kg, (512, 512, 1, 1), 512)
    p['proj_bn'] = _bn(512)
    p['se_c1_w'] = _init(kg, (32, 512, 1, 1), 512)
    p['se_c1_b'] = _init(kg, (32,), 512)
    p['se_c2_w'] = _init(kg, (512, 32, 1, 1), 32)
    p['se_c2_b'] = _init(kg, (512,), 32)

    # 3-layer bidirectional LSTM, hidden=512
    H = 512
    lstm = []
    for layer in range(3):
        in_size = 512 if layer == 0 else 2 * H
        lp = {}
        for d in ('fwd', 'bwd'):
            lp[d] = (_init(kg, (4 * H, in_size), H),
                     _init(kg, (4 * H, H), H),
                     _init(kg, (4 * H,), H),
                     _init(kg, (4 * H,), H))
        lstm.append(lp)
    p['lstm'] = lstm

    # classifier
    p['cls_w'] = _init(kg, (num_chars + 1, 2 * H), 2 * H)
    p['cls_b'] = _init(kg, (num_chars + 1,), 2 * H)
    return p


# ----------------------------------------------------------------------------
if __name__ == "__main__":
    NUM_CHARS, SEQ_LEN, IMG_H, IMG_W = 10, 8, 32, 64
    params = init_params(NUM_CHARS, SEQ_LEN, IMG_H, IMG_W, KeyGen(1234))
    params = fold_inference_params(params)      # BN fold + weight relayout, once
    x = jax.random.normal(jax.random.PRNGKey(0), (2, 3, IMG_H, IMG_W),
                          jnp.float32)
    fwd = jax.jit(functools.partial(crnn_ctc_forward, seq_len=SEQ_LEN))
    logits = jax.block_until_ready(fwd(x, params))
    assert logits.shape == (2, SEQ_LEN, NUM_CHARS + 1), logits.shape
    assert bool(jnp.all(jnp.isfinite(logits)))
    print("KERNEL_OK")
</pallas_src>

<mosaic_0001>
module attributes {stable_mosaic.version = 11 : i64} {
  func.func @_matmul_kernel_1k(%arg0: i32, %arg1: i32, %arg2: memref<256x256xbf16, #tpu.memory_space<vmem>>, %arg3: memref<256x128xbf16, #tpu.memory_space<vmem>>, %arg4: memref<1x128xf32, #tpu.memory_space<vmem>>, %arg5: memref<256x128xbf16, #tpu.memory_space<vmem>>) attributes {dimension_semantics = [#tpu.dimension_semantics<parallel>, #tpu.dimension_semantics<parallel>], iteration_bounds = array<i64: 4, 1>, scalar_prefetch = 0 : i64, scratch_operands = 0 : i64, tpu.core_type = #tpu.core_type<tc>, window_params = [{transform_indices = @transform_0, window_bounds = array<i64: 256, 256>}, {transform_indices = @transform_1, window_bounds = array<i64: 256, 128>}, {transform_indices = @transform_2, window_bounds = array<i64: 1, 128>}, {transform_indices = @transform_3, window_bounds = array<i64: 256, 128>}]} {
    %c0 = arith.constant 0 : index
    %c0_0 = arith.constant 0 : index
    %0 = vector.load %arg2[%c0, %c0_0] : memref<256x256xbf16, #tpu.memory_space<vmem>>, vector<256x256xbf16>
    %c0_1 = arith.constant 0 : index
    %c0_2 = arith.constant 0 : index
    %1 = vector.load %arg3[%c0_1, %c0_2] : memref<256x128xbf16, #tpu.memory_space<vmem>>, vector<256x128xbf16>
    %cst = arith.constant dense<0.000000e+00> : vector<256x128xf32>
    %2 = tpu.matmul %0, %1, %cst {dimension_numbers = #tpu.dot_dimension_numbers<[1], [0], [0], [1], [0, 0, 1, 1], [], []>} : vector<256x256xbf16>, vector<256x128xbf16>, vector<256x128xf32> -> vector<256x128xf32>
    %c0_3 = arith.constant 0 : index
    %c0_4 = arith.constant 0 : index
    %3 = vector.load %arg4[%c0_3, %c0_4] : memref<1x128xf32, #tpu.memory_space<vmem>>, vector<1x128xf32>
    %4 = vector.broadcast %3 : vector<1x128xf32> to vector<256x128xf32>
    %5 = arith.addf %2, %4 : vector<256x128xf32>
    %cst_5 = arith.constant 0.000000e+00 : f32
    %6 = vector.broadcast %cst_5 : f32 to vector<256x128xf32>
    %7 = arith.maximumf %5, %6 : vector<256x128xf32>
    %8 = arith.truncf %7 : vector<256x128xf32> to vector<256x128xbf16>
    %c0_6 = arith.constant 0 : index
    %c0_7 = arith.constant 0 : index
    %9 = vector.load %arg5[%c0_6, %c0_7] : memref<256x128xbf16, #tpu.memory_space<vmem>>, vector<256x128xbf16>
    tpu.vector_store %arg5[%c0_6, %c0_7], %8 {strides = array<i32>} : memref<256x128xbf16, #tpu.memory_space<vmem>>, vector<256x128xbf16>,
    return
  }
  func.func @transform_0(%arg0: i32, %arg1: i32) -> (i32, i32) {
    %c0_i32 = arith.constant 0 : i32
    %c0_i32_0 = arith.constant 0 : i32
    return %arg0, %c0_i32 : i32, i32
  }
  func.func @transform_1(%arg0: i32, %arg1: i32) -> (i32, i32) {
    %c0_i32 = arith.constant 0 : i32
    %c0_i32_0 = arith.constant 0 : i32
    return %c0_i32, %arg1 : i32, i32
  }
  func.func @transform_2(%arg0: i32, %arg1: i32) -> (i32, i32) {
    %c0_i32 = arith.constant 0 : i32
    %c0_i32_0 = arith.constant 0 : i32
    return %c0_i32, %arg1 : i32, i32
  }
  func.func @transform_3(%arg0: i32, %arg1: i32) -> (i32, i32) {
    %c0_i32 = arith.constant 0 : i32
    return %arg0, %arg1 : i32, i32
  }
}

module attributes {stable_mosaic.version = 11 : i64} {
  func.func @_matmul_kernel_1k(%arg0: i32, %arg1: i32, %arg2: memref<128x640xbf16, #tpu.memory_space<vmem>>, %arg3: memref<640x128xbf16, #tpu.memory_space<vmem>>, %arg4: memref<1x128xf32, #tpu.memory_space<vmem>>, %arg5: memref<128x128xbf16, #tpu.memory_space<vmem>>) attributes {dimension_semantics = [#tpu.dimension_semantics<parallel>, #tpu.dimension_semantics<parallel>], iteration_bounds = array<i64: 2, 1>, scalar_prefetch = 0 : i64, scratch_operands = 0 : i64, tpu.core_type = #tpu.core_type<tc>, window_params = [{transform_indices = @transform_0, window_bounds = array<i64: 128, 640>}, {transform_indices = @transform_1, window_bounds = array<i64: 640, 128>}, {transform_indices = @transform_2, window_bounds = array<i64: 1, 128>}, {transform_indices = @transform_3, window_bounds = array<i64: 128, 128>}]} {
    %c0 = arith.constant 0 : index
    %c0_0 = arith.constant 0 : index
    %0 = vector.load %arg2[%c0, %c0_0] : memref<128x640xbf16, #tpu.memory_space<vmem>>, vector<128x640xbf16>
    %c0_1 = arith.constant 0 : index
    %c0_2 = arith.constant 0 : index
    %1 = vector.load %arg3[%c0_1, %c0_2] : memref<640x128xbf16, #tpu.memory_space<vmem>>, vector<640x128xbf16>
    %cst = arith.constant dense<0.000000e+00> : vector<128x128xf32>
    %2 = tpu.matmul %0, %1, %cst {dimension_numbers = #tpu.dot_dimension_numbers<[1], [0], [0], [1], [0, 0, 1, 1], [], []>} : vector<128x640xbf16>, vector<640x128xbf16>, vector<128x128xf32> -> vector<128x128xf32>
    %c0_3 = arith.constant 0 : index
    %c0_4 = arith.constant 0 : index
    %3 = vector.load %arg4[%c0_3, %c0_4] : memref<1x128xf32, #tpu.memory_space<vmem>>, vector<1x128xf32>
    %4 = vector.broadcast %3 : vector<1x128xf32> to vector<128x128xf32>
    %5 = arith.addf %2, %4 : vector<128x128xf32>
    %cst_5 = arith.constant 0.000000e+00 : f32
    %6 = vector.broadcast %cst_5 : f32 to vector<128x128xf32>
    %7 = arith.maximumf %5, %6 : vector<128x128xf32>
    %8 = arith.truncf %7 : vector<128x128xf32> to vector<128x128xbf16>
    %c0_6 = arith.constant 0 : index
    %c0_7 = arith.constant 0 : index
    %9 = vector.load %arg5[%c0_6, %c0_7] : memref<128x128xbf16, #tpu.memory_space<vmem>>, vector<128x128xbf16>
    tpu.vector_store %arg5[%c0_6, %c0_7], %8 {strides = array<i32>} : memref<128x128xbf16, #tpu.memory_space<vmem>>, vector<128x128xbf16>,
    return
  }
  func.func @transform_0(%arg0: i32, %arg1: i32) -> (i32, i32) {
    %c0_i32 = arith.constant 0 : i32
    %c0_i32_0 = arith.constant 0 : i32
    return %arg0, %c0_i32 : i32, i32
  }
  func.func @transform_1(%arg0: i32, %arg1: i32) -> (i32, i32) {
    %c0_i32 = arith.constant 0 : i32
    %c0_i32_0 = arith.constant 0 : i32
    return %c0_i32, %arg1 : i32, i32
  }
  func.func @transform_2(%arg0: i32, %arg1: i32) -> (i32, i32) {
    %c0_i32 = arith.constant 0 : i32
    %c0_i32_0 = arith.constant 0 : i32
    return %c0_i32, %arg1 : i32, i32
  }
  func.func @transform_3(%arg0: i32, %arg1: i32) -> (i32, i32) {
    %c0_i32 = arith.constant 0 : i32
    return %arg0, %arg1 : i32, i32
  }
}

module attributes {stable_mosaic.version = 11 : i64} {
  func.func @_matmul_kernel_1k(%arg0: i32, %arg1: i32, %arg2: memref<128x640xbf16, #tpu.memory_space<vmem>>, %arg3: memref<640x128xbf16, #tpu.memory_space<vmem>>, %arg4: memref<1x128xf32, #tpu.memory_space<vmem>>, %arg5: memref<128x128xbf16, #tpu.memory_space<vmem>>) attributes {dimension_semantics = [#tpu.dimension_semantics<parallel>, #tpu.dimension_semantics<parallel>], iteration_bounds = array<i64: 2, 1>, scalar_prefetch = 0 : i64, scratch_operands = 0 : i64, tpu.core_type = #tpu.core_type<tc>, window_params = [{transform_indices = @transform_0, window_bounds = array<i64: 128, 640>}, {transform_indices = @transform_1, window_bounds = array<i64: 640, 128>}, {transform_indices = @transform_2, window_bounds = array<i64: 1, 128>}, {transform_indices = @transform_3, window_bounds = array<i64: 128, 128>}]} {
    %c0 = arith.constant 0 : index
    %c0_0 = arith.constant 0 : index
    %0 = vector.load %arg2[%c0, %c0_0] : memref<128x640xbf16, #tpu.memory_space<vmem>>, vector<128x640xbf16>
    %c0_1 = arith.constant 0 : index
    %c0_2 = arith.constant 0 : index
    %1 = vector.load %arg3[%c0_1, %c0_2] : memref<640x128xbf16, #tpu.memory_space<vmem>>, vector<640x128xbf16>
    %cst = arith.constant dense<0.000000e+00> : vector<128x128xf32>
    %2 = tpu.matmul %0, %1, %cst {dimension_numbers = #tpu.dot_dimension_numbers<[1], [0], [0], [1], [0, 0, 1, 1], [], []>} : vector<128x640xbf16>, vector<640x128xbf16>, vector<128x128xf32> -> vector<128x128xf32>
    %c0_3 = arith.constant 0 : index
    %c0_4 = arith.constant 0 : index
    %3 = vector.load %arg4[%c0_3, %c0_4] : memref<1x128xf32, #tpu.memory_space<vmem>>, vector<1x128xf32>
    %4 = vector.broadcast %3 : vector<1x128xf32> to vector<128x128xf32>
    %5 = arith.addf %2, %4 : vector<128x128xf32>
    %6 = arith.truncf %5 : vector<128x128xf32> to vector<128x128xbf16>
    %c0_5 = arith.constant 0 : index
    %c0_6 = arith.constant 0 : index
    %7 = vector.load %arg5[%c0_5, %c0_6] : memref<128x128xbf16, #tpu.memory_space<vmem>>, vector<128x128xbf16>
    tpu.vector_store %arg5[%c0_5, %c0_6], %6 {strides = array<i32>} : memref<128x128xbf16, #tpu.memory_space<vmem>>, vector<128x128xbf16>,
    return
  }
  func.func @transform_0(%arg0: i32, %arg1: i32) -> (i32, i32) {
    %c0_i32 = arith.constant 0 : i32
    %c0_i32_0 = arith.constant 0 : i32
    return %arg0, %c0_i32 : i32, i32
  }
  func.func @transform_1(%arg0: i32, %arg1: i32) -> (i32, i32) {
    %c0_i32 = arith.constant 0 : i32
    %c0_i32_0 = arith.constant 0 : i32
    return %c0_i32, %arg1 : i32, i32
  }
  func.func @transform_2(%arg0: i32, %arg1: i32) -> (i32, i32) {
    %c0_i32 = arith.constant 0 : i32
    %c0_i32_0 = arith.constant 0 : i32
    return %c0_i32, %arg1 : i32, i32
  }
  func.func @transform_3(%arg0: i32, %arg1: i32) -> (i32, i32) {
    %c0_i32 = arith.constant 0 : i32
    return %arg0, %arg1 : i32, i32
  }
}

module attributes {stable_mosaic.version = 11 : i64} {
  func.func @_matmul_kernel_1k(%arg0: i32, %arg1: i32, %arg2: memref<64x640xbf16, #tpu.memory_space<vmem>>, %arg3: memref<640x128xbf16, #tpu.memory_space<vmem>>, %arg4: memref<1x128xf32, #tpu.memory_space<vmem>>, %arg5: memref<64x128xbf16, #tpu.memory_space<vmem>>) attributes {dimension_semantics = [#tpu.dimension_semantics<parallel>, #tpu.dimension_semantics<parallel>], iteration_bounds = array<i64: 1, 1>, scalar_prefetch = 0 : i64, scratch_operands = 0 : i64, tpu.core_type = #tpu.core_type<tc>, window_params = [{transform_indices = @transform_0, window_bounds = array<i64: 64, 640>}, {transform_indices = @transform_1, window_bounds = array<i64: 640, 128>}, {transform_indices = @transform_2, window_bounds = array<i64: 1, 128>}, {transform_indices = @transform_3, window_bounds = array<i64: 64, 128>}]} {
    %c0 = arith.constant 0 : index
    %c0_0 = arith.constant 0 : index
    %0 = vector.load %arg2[%c0, %c0_0] : memref<64x640xbf16, #tpu.memory_space<vmem>>, vector<64x640xbf16>
    %c0_1 = arith.constant 0 : index
    %c0_2 = arith.constant 0 : index
    %1 = vector.load %arg3[%c0_1, %c0_2] : memref<640x128xbf16, #tpu.memory_space<vmem>>, vector<640x128xbf16>
    %cst = arith.constant dense<0.000000e+00> : vector<64x128xf32>
    %2 = tpu.matmul %0, %1, %cst {dimension_numbers = #tpu.dot_dimension_numbers<[1], [0], [0], [1], [0, 0, 1, 1], [], []>} : vector<64x640xbf16>, vector<640x128xbf16>, vector<64x128xf32> -> vector<64x128xf32>
    %c0_3 = arith.constant 0 : index
    %c0_4 = arith.constant 0 : index
    %3 = vector.load %arg4[%c0_3, %c0_4] : memref<1x128xf32, #tpu.memory_space<vmem>>, vector<1x128xf32>
    %4 = vector.broadcast %3 : vector<1x128xf32> to vector<64x128xf32>
    %5 = arith.addf %2, %4 : vector<64x128xf32>
    %cst_5 = arith.constant 0.000000e+00 : f32
    %6 = vector.broadcast %cst_5 : f32 to vector<64x128xf32>
    %7 = arith.maximumf %5, %6 : vector<64x128xf32>
    %8 = arith.truncf %7 : vector<64x128xf32> to vector<64x128xbf16>
    %c0_6 = arith.constant 0 : index
    %c0_7 = arith.constant 0 : index
    %9 = vector.load %arg5[%c0_6, %c0_7] : memref<64x128xbf16, #tpu.memory_space<vmem>>, vector<64x128xbf16>
    tpu.vector_store %arg5[%c0_6, %c0_7], %8 {strides = array<i32>} : memref<64x128xbf16, #tpu.memory_space<vmem>>, vector<64x128xbf16>,
    return
  }
  func.func @transform_0(%arg0: i32, %arg1: i32) -> (i32, i32) {
    %c0_i32 = arith.constant 0 : i32
    %c0_i32_0 = arith.constant 0 : i32
    return %arg0, %c0_i32 : i32, i32
  }
  func.func @transform_1(%arg0: i32, %arg1: i32) -> (i32, i32) {
    %c0_i32 = arith.constant 0 : i32
    %c0_i32_0 = arith.constant 0 : i32
    return %c0_i32, %arg1 : i32, i32
  }
  func.func @transform_2(%arg0: i32, %arg1: i32) -> (i32, i32) {
    %c0_i32 = arith.constant 0 : i32
    %c0_i32_0 = arith.constant 0 : i32
    return %c0_i32, %arg1 : i32, i32
  }
  func.func @transform_3(%arg0: i32, %arg1: i32) -> (i32, i32) {
    %c0_i32 = arith.constant 0 : i32
    return %arg0, %arg1 : i32, i32
  }
}

module attributes {stable_mosaic.version = 11 : i64} {
  func.func @_matmul_kernel_1k(%arg0: i32, %arg1: i32, %arg2: memref<64x1152xbf16, #tpu.memory_space<vmem>>, %arg3: memref<1152x128xbf16, #tpu.memory_space<vmem>>, %arg4: memref<1x128xf32, #tpu.memory_space<vmem>>, %arg5: memref<64x128xbf16, #tpu.memory_space<vmem>>) attributes {dimension_semantics = [#tpu.dimension_semantics<parallel>, #tpu.dimension_semantics<parallel>], iteration_bounds = array<i64: 1, 1>, scalar_prefetch = 0 : i64, scratch_operands = 0 : i64, tpu.core_type = #tpu.core_type<tc>, window_params = [{transform_indices = @transform_0, window_bounds = array<i64: 64, 1152>}, {transform_indices = @transform_1, window_bounds = array<i64: 1152, 128>}, {transform_indices = @transform_2, window_bounds = array<i64: 1, 128>}, {transform_indices = @transform_3, window_bounds = array<i64: 64, 128>}]} {
    %c0 = arith.constant 0 : index
    %c0_0 = arith.constant 0 : index
    %0 = vector.load %arg2[%c0, %c0_0] : memref<64x1152xbf16, #tpu.memory_space<vmem>>, vector<64x1152xbf16>
    %c0_1 = arith.constant 0 : index
    %c0_2 = arith.constant 0 : index
    %1 = vector.load %arg3[%c0_1, %c0_2] : memref<1152x128xbf16, #tpu.memory_space<vmem>>, vector<1152x128xbf16>
    %cst = arith.constant dense<0.000000e+00> : vector<64x128xf32>
    %2 = tpu.matmul %0, %1, %cst {dimension_numbers = #tpu.dot_dimension_numbers<[1], [0], [0], [1], [0, 0, 1, 1], [], []>} : vector<64x1152xbf16>, vector<1152x128xbf16>, vector<64x128xf32> -> vector<64x128xf32>
    %c0_3 = arith.constant 0 : index
    %c0_4 = arith.constant 0 : index
    %3 = vector.load %arg4[%c0_3, %c0_4] : memref<1x128xf32, #tpu.memory_space<vmem>>, vector<1x128xf32>
    %4 = vector.broadcast %3 : vector<1x128xf32> to vector<64x128xf32>
    %5 = arith.addf %2, %4 : vector<64x128xf32>
    %6 = arith.truncf %5 : vector<64x128xf32> to vector<64x128xbf16>
    %c0_5 = arith.constant 0 : index
    %c0_6 = arith.constant 0 : index
    %7 = vector.load %arg5[%c0_5, %c0_6] : memref<64x128xbf16, #tpu.memory_space<vmem>>, vector<64x128xbf16>
    tpu.vector_store %arg5[%c0_5, %c0_6], %6 {strides = array<i32>} : memref<64x128xbf16, #tpu.memory_space<vmem>>, vector<64x128xbf16>,
    return
  }
  func.func @transform_0(%arg0: i32, %arg1: i32) -> (i32, i32) {
    %c0_i32 = arith.constant 0 : i32
    %c0_i32_0 = arith.constant 0 : i32
    return %arg0, %c0_i32 : i32, i32
  }
  func.func @transform_1(%arg0: i32, %arg1: i32) -> (i32, i32) {
    %c0_i32 = arith.constant 0 : i32
    %c0_i32_0 = arith.constant 0 : i32
    return %c0_i32, %arg1 : i32, i32
  }
  func.func @transform_2(%arg0: i32, %arg1: i32) -> (i32, i32) {
    %c0_i32 = arith.constant 0 : i32
    %c0_i32_0 = arith.constant 0 : i32
    return %c0_i32, %arg1 : i32, i32
  }
  func.func @transform_3(%arg0: i32, %arg1: i32) -> (i32, i32) {
    %c0_i32 = arith.constant 0 : i32
    return %arg0, %arg1 : i32, i32
  }
}

module attributes {stable_mosaic.version = 11 : i64} {
  func.func @_matmul_kernel_1k(%arg0: i32, %arg1: i32, %arg2: memref<64x1152xbf16, #tpu.memory_space<vmem>>, %arg3: memref<1152x128xbf16, #tpu.memory_space<vmem>>, %arg4: memref<1x128xf32, #tpu.memory_space<vmem>>, %arg5: memref<64x128xbf16, #tpu.memory_space<vmem>>) attributes {dimension_semantics = [#tpu.dimension_semantics<parallel>, #tpu.dimension_semantics<parallel>], iteration_bounds = array<i64: 1, 1>, scalar_prefetch = 0 : i64, scratch_operands = 0 : i64, tpu.core_type = #tpu.core_type<tc>, window_params = [{transform_indices = @transform_0, window_bounds = array<i64: 64, 1152>}, {transform_indices = @transform_1, window_bounds = array<i64: 1152, 128>}, {transform_indices = @transform_2, window_bounds = array<i64: 1, 128>}, {transform_indices = @transform_3, window_bounds = array<i64: 64, 128>}]} {
    %c0 = arith.constant 0 : index
    %c0_0 = arith.constant 0 : index
    %0 = vector.load %arg2[%c0, %c0_0] : memref<64x1152xbf16, #tpu.memory_space<vmem>>, vector<64x1152xbf16>
    %c0_1 = arith.constant 0 : index
    %c0_2 = arith.constant 0 : index
    %1 = vector.load %arg3[%c0_1, %c0_2] : memref<1152x128xbf16, #tpu.memory_space<vmem>>, vector<1152x128xbf16>
    %cst = arith.constant dense<0.000000e+00> : vector<64x128xf32>
    %2 = tpu.matmul %0, %1, %cst {dimension_numbers = #tpu.dot_dimension_numbers<[1], [0], [0], [1], [0, 0, 1, 1], [], []>} : vector<64x1152xbf16>, vector<1152x128xbf16>, vector<64x128xf32> -> vector<64x128xf32>
    %c0_3 = arith.constant 0 : index
    %c0_4 = arith.constant 0 : index
    %3 = vector.load %arg4[%c0_3, %c0_4] : memref<1x128xf32, #tpu.memory_space<vmem>>, vector<1x128xf32>
    %4 = vector.broadcast %3 : vector<1x128xf32> to vector<64x128xf32>
    %5 = arith.addf %2, %4 : vector<64x128xf32>
    %cst_5 = arith.constant 0.000000e+00 : f32
    %6 = vector.broadcast %cst_5 : f32 to vector<64x128xf32>
    %7 = arith.maximumf %5, %6 : vector<64x128xf32>
    %8 = arith.truncf %7 : vector<64x128xf32> to vector<64x128xbf16>
    %c0_6 = arith.constant 0 : index
    %c0_7 = arith.constant 0 : index
    %9 = vector.load %arg5[%c0_6, %c0_7] : memref<64x128xbf16, #tpu.memory_space<vmem>>, vector<64x128xbf16>
    tpu.vector_store %arg5[%c0_6, %c0_7], %8 {strides = array<i32>} : memref<64x128xbf16, #tpu.memory_space<vmem>>, vector<64x128xbf16>,
    return
  }
  func.func @transform_0(%arg0: i32, %arg1: i32) -> (i32, i32) {
    %c0_i32 = arith.constant 0 : i32
    %c0_i32_0 = arith.constant 0 : i32
    return %arg0, %c0_i32 : i32, i32
  }
  func.func @transform_1(%arg0: i32, %arg1: i32) -> (i32, i32) {
    %c0_i32 = arith.constant 0 : i32
    %c0_i32_0 = arith.constant 0 : i32
    return %c0_i32, %arg1 : i32, i32
  }
  func.func @transform_2(%arg0: i32, %arg1: i32) -> (i32, i32) {
    %c0_i32 = arith.constant 0 : i32
    %c0_i32_0 = arith.constant 0 : i32
    return %c0_i32, %arg1 : i32, i32
  }
  func.func @transform_3(%arg0: i32, %arg1: i32) -> (i32, i32) {
    %c0_i32 = arith.constant 0 : i32
    return %arg0, %arg1 : i32, i32
  }
}

module attributes {stable_mosaic.version = 11 : i64} {
  func.func @_bilstm_kernel(%arg0: memref<8x2x2048xf32, #tpu.memory_space<vmem>>, %arg1: memref<8x2x2048xf32, #tpu.memory_space<vmem>>, %arg2: memref<512x2048xbf16, #tpu.memory_space<vmem>>, %arg3: memref<512x2048xbf16, #tpu.memory_space<vmem>>, %arg4: memref<8x2x512xf32, #tpu.memory_space<vmem>>, %arg5: memref<8x2x512xf32, #tpu.memory_space<vmem>>) attributes {dimension_semantics = [], scalar_prefetch = 0 : i64, scratch_operands = 0 : i64, tpu.core_type = #tpu.core_type<tc>} {
    %cst = arith.constant 0.000000e+00 : f32
    %0 = vector.broadcast %cst : f32 to vector<2x512xf32>
    %c0_i32 = arith.constant 0 : i32
    %c8_i32 = arith.constant 8 : i32
    %1 = arith.addi %c0_i32, %c8_i32 : i32
    %c1_i32 = arith.constant 1 : i32
    %2:4 = scf.for %arg6 = %c0_i32 to %1 step %c1_i32 iter_args(%arg7 = %0, %arg8 = %0, %arg9 = %0, %arg10 = %0) -> (vector<2x512xf32>, vector<2x512xf32>, vector<2x512xf32>, vector<2x512xf32>)  : i32 {
      %3 = arith.index_cast %arg6 : i32 to index
      %c0 = arith.constant 0 : index
      %c0_1 = arith.constant 0 : index
      %4 = vector.load %arg0[%3, %c0, %c0_1] : memref<8x2x2048xf32, #tpu.memory_space<vmem>>, vector<1x2x2048xf32>
      %5 = vector.shape_cast %4 : vector<1x2x2048xf32> to vector<2x2048xf32>
      %6 = arith.truncf %arg7 : vector<2x512xf32> to vector<2x512xbf16>
      %c0_2 = arith.constant 0 : index
      %c0_3 = arith.constant 0 : index
      %7 = vector.load %arg2[%c0_2, %c0_3] : memref<512x2048xbf16, #tpu.memory_space<vmem>>, vector<512x2048xbf16>
      %cst_4 = arith.constant dense<0.000000e+00> : vector<2x2048xf32>
      %8 = tpu.matmul %6, %7, %cst_4 {dimension_numbers = #tpu.dot_dimension_numbers<[1], [0], [0], [1], [0, 0, 1, 1], [], []>} : vector<2x512xbf16>, vector<512x2048xbf16>, vector<2x2048xf32> -> vector<2x2048xf32>
      %9 = arith.addf %5, %8 : vector<2x2048xf32>
      %10 = arith.index_cast %arg6 : i32 to index
      %c0_5 = arith.constant 0 : index
      %c0_6 = arith.constant 0 : index
      %11 = vector.load %arg1[%10, %c0_5, %c0_6] : memref<8x2x2048xf32, #tpu.memory_space<vmem>>, vector<1x2x2048xf32>
      %12 = vector.shape_cast %11 : vector<1x2x2048xf32> to vector<2x2048xf32>
      %13 = arith.truncf %arg9 : vector<2x512xf32> to vector<2x512xbf16>
      %c0_7 = arith.constant 0 : index
      %c0_8 = arith.constant 0 : index
      %14 = vector.load %arg3[%c0_7, %c0_8] : memref<512x2048xbf16, #tpu.memory_space<vmem>>, vector<512x2048xbf16>
      %cst_9 = arith.constant dense<0.000000e+00> : vector<2x2048xf32>
      %15 = tpu.matmul %13, %14, %cst_9 {dimension_numbers = #tpu.dot_dimension_numbers<[1], [0], [0], [1], [0, 0, 1, 1], [], []>} : vector<2x512xbf16>, vector<512x2048xbf16>, vector<2x2048xf32> -> vector<2x2048xf32>
      %16 = arith.addf %12, %15 : vector<2x2048xf32>
      %17 = vector.extract_strided_slice %9 {offsets = [0, 0], sizes = [2, 512], strides = [1, 1]} : vector<2x2048xf32> to vector<2x512xf32>
      %18 = arith.negf %17 : vector<2x512xf32>
      %19 = math.exp %18 : vector<2x512xf32>
      %cst_10 = arith.constant 1.000000e+00 : f32
      %20 = vector.broadcast %cst_10 : f32 to vector<2x512xf32>
      %21 = arith.addf %20, %19 : vector<2x512xf32>
      %22 = arith.divf %20, %21 : vector<2x512xf32>
      %23 = vector.extract_strided_slice %9 {offsets = [0, 512], sizes = [2, 512], strides = [1, 1]} : vector<2x2048xf32> to vector<2x512xf32>
      %24 = arith.negf %23 : vector<2x512xf32>
      %25 = math.exp %24 : vector<2x512xf32>
      %cst_11 = arith.constant 1.000000e+00 : f32
      %26 = vector.broadcast %cst_11 : f32 to vector<2x512xf32>
      %27 = arith.addf %26, %25 : vector<2x512xf32>
      %28 = arith.divf %26, %27 : vector<2x512xf32>
      %29 = vector.extract_strided_slice %9 {offsets = [0, 1024], sizes = [2, 512], strides = [1, 1]} : vector<2x2048xf32> to vector<2x512xf32>
      %30 = math.tanh %29 : vector<2x512xf32>
      %31 = vector.extract_strided_slice %9 {offsets = [0, 1536], sizes = [2, 512], strides = [1, 1]} : vector<2x2048xf32> to vector<2x512xf32>
      %32 = arith.negf %31 : vector<2x512xf32>
      %33 = math.exp %32 : vector<2x512xf32>
      %cst_12 = arith.constant 1.000000e+00 : f32
      %34 = vector.broadcast %cst_12 : f32 to vector<2x512xf32>
      %35 = arith.addf %34, %33 : vector<2x512xf32>
      %36 = arith.divf %34, %35 : vector<2x512xf32>
      %37 = arith.mulf %28, %arg8 : vector<2x512xf32>
      %38 = arith.mulf %22, %30 : vector<2x512xf32>
      %39 = arith.addf %37, %38 : vector<2x512xf32>
      %40 = math.tanh %39 : vector<2x512xf32>
      %41 = arith.mulf %36, %40 : vector<2x512xf32>
      %42 = vector.extract_strided_slice %16 {offsets = [0, 0], sizes = [2, 512], strides = [1, 1]} : vector<2x2048xf32> to vector<2x512xf32>
      %43 = arith.negf %42 : vector<2x512xf32>
      %44 = math.exp %43 : vector<2x512xf32>
      %cst_13 = arith.constant 1.000000e+00 : f32
      %45 = vector.broadcast %cst_13 : f32 to vector<2x512xf32>
      %46 = arith.addf %45, %44 : vector<2x512xf32>
      %47 = arith.divf %45, %46 : vector<2x512xf32>
      %48 = vector.extract_strided_slice %16 {offsets = [0, 512], sizes = [2, 512], strides = [1, 1]} : vector<2x2048xf32> to vector<2x512xf32>
      %49 = arith.negf %48 : vector<2x512xf32>
      %50 = math.exp %49 : vector<2x512xf32>
      %cst_14 = arith.constant 1.000000e+00 : f32
      %51 = vector.broadcast %cst_14 : f32 to vector<2x512xf32>
      %52 = arith.addf %51, %50 : vector<2x512xf32>
      %53 = arith.divf %51, %52 : vector<2x512xf32>
      %54 = vector.extract_strided_slice %16 {offsets = [0, 1024], sizes = [2, 512], strides = [1, 1]} : vector<2x2048xf32> to vector<2x512xf32>
      %55 = math.tanh %54 : vector<2x512xf32>
      %56 = vector.extract_strided_slice %16 {offsets = [0, 1536], sizes = [2, 512], strides = [1, 1]} : vector<2x2048xf32> to vector<2x512xf32>
      %57 = arith.negf %56 : vector<2x512xf32>
      %58 = math.exp %57 : vector<2x512xf32>
      %cst_15 = arith.constant 1.000000e+00 : f32
      %59 = vector.broadcast %cst_15 : f32 to vector<2x512xf32>
      %60 = arith.addf %59, %58 : vector<2x512xf32>
      %61 = arith.divf %59, %60 : vector<2x512xf32>
      %62 = arith.mulf %53, %arg10 : vector<2x512xf32>
      %63 = arith.mulf %47, %55 : vector<2x512xf32>
      %64 = arith.addf %62, %63 : vector<2x512xf32>
      %65 = math.tanh %64 : vector<2x512xf32>
      %66 = arith.mulf %61, %65 : vector<2x512xf32>
      %67 = arith.index_cast %arg6 : i32 to index
      %c0_16 = arith.constant 0 : index
      %c0_17 = arith.constant 0 : index
      %68 = vector.load %arg4[%67, %c0_16, %c0_17] : memref<8x2x512xf32, #tpu.memory_space<vmem>>, vector<1x2x512xf32>
      %69 = vector.shape_cast %68 : vector<1x2x512xf32> to vector<2x512xf32>
      %70 = vector.shape_cast %41 : vector<2x512xf32> to vector<1x2x512xf32>
      tpu.vector_store %arg4[%67, %c0_16, %c0_17], %70 {strides = array<i32>} : memref<8x2x512xf32, #tpu.memory_space<vmem>>, vector<1x2x512xf32>,
      %71 = arith.index_cast %arg6 : i32 to index
      %c0_18 = arith.constant 0 : index
      %c0_19 = arith.constant 0 : index
      %72 = vector.load %arg5[%71, %c0_18, %c0_19] : memref<8x2x512xf32, #tpu.memory_space<vmem>>, vector<1x2x512xf32>
      %73 = vector.shape_cast %72 : vector<1x2x512xf32> to vector<2x512xf32>
      %74 = vector.shape_cast %66 : vector<2x512xf32> to vector<1x2x512xf32>
      tpu.vector_store %arg5[%71, %c0_18, %c0_19], %74 {strides = array<i32>} : memref<8x2x512xf32, #tpu.memory_space<vmem>>, vector<1x2x512xf32>,
      scf.yield %41, %39, %66, %64 : vector<2x512xf32>, vector<2x512xf32>, vector<2x512xf32>, vector<2x512xf32>
    }
    %c8_i32_0 = arith.constant 8 : i32
    return
  }
}

</mosaic_0001>

<bundles_post_ra>
// kernel: crnn_ctc_forward.18
= control target key start
LH: loop header
LB: loop body
LE: loop exit
PB: predicated region body
PF: predicated region fallthrough
CT: control target
= control target key end

     0   :  { %s1494_s12 = smov 0   ;;  %s1496_s13 = smov 0   ;;  %s1668_s0 = inlined_call_operand.vmem [shape: bf16[1024,256], index: 0, kind: input, shape index: {}]   ;;  %s1669_s1 = inlined_call_operand.vmem [shape: bf16[256,128], index: 1, kind: input, shape index: {}]   ;;  %s1670_s2 = inlined_call_operand.vmem [shape: f32[1,128], index: 2, kind: input, shape index: {}]   ;;  %s1671_s3 = inlined_call_operand.vmem [shape: bf16[1024,128], index: 3, kind: output, shape index: {}]  }
   0x1   :  { %s1498_s14 = smov 0  }
   0x2 LB: > { %s25_s15 = sadd.s32 1, %s1468_s13  ;;  %p1017_p0 = scmp.ge.s32.totalorder %s1472_s14, 1  ;;  %s1472_s14 = sphi %s1498_s14, %s13_s14   ;;  %s1468_s13 = sphi %s1496_s13, %s1673_s13   ;;  %s1464_s12 = sphi %s1494_s12, %s1672_s12  }
   0x3   : > { %p27_p1 = scmp.ge.s32.totalorder %s25_s15, 4  ;;  %p170_p2 = scmp.lt.s32.totalorder %s1472_s14, 5 }
   0x5   : > { %s1675_s15 = smov (%p27_p1, %s25_s15), 0  ;;  %p171_p3 = pnand %p1017_p0, %p170_p2 }
   0x6   : > { %s1018_s18 = sshll.u32 (!%p171_p3), %s1464_s12, 5 }
   0x7   : > { %174 = sbr.rel (%p171_p3) target bundleno = 309 (0x135), region = 32  ;;  %p206_p4 = scmp.lt.s32.totalorder (!%p171_p3), %s1018_s18, 127 }
   0xc   : > { %v1386_v0 = vld [vmem:[%s1669_s1 + $0x78] sm:$0xff]   ;;  %v1388_v2 = vld [vmem:[%s1669_s1 + $0x70] sm:$0xff]   ;;  %v1390_v4 = vld [vmem:[%s1669_s1 + $0x68] sm:$0xff]   ;;  %s1677_s18 = smov (!%p206_p4, %s1018_s18), 127 }
   0xd   : > { %v1387_v1 = vld [vmem:[%s1669_s1 + $0x38] sm:$0xff]   ;;  %1234 = vmatprep.subr.bf16.mxu0 %v1386_v0  ;;  %1346 = vmatprep.subr.bf16.mxu1 %v1386_v0  ;;  %v1389_v3 = vld [vmem:[%s1669_s1 + $0x30] sm:$0xff]   ;;  %v1391_v5 = vld [vmem:[%s1669_s1 + $0x28] sm:$0xff]   ;;  %s1106_s6 = sshll.u32 %s1677_s18, 3  ;;  %s1022_s5 = sshll.u32 %s1677_s18, 2 }
   0xe   : > { %1235 = vmatpush3.bf16.msra.mxu0 %v1387_v1  ;;  %1354 = vmatpush3.bf16.msra.mxu1 %v1387_v1  ;;  %v1392_v6 = vld [vmem:[%s1669_s1 + $0x60] sm:$0xff]   ;;  %v1394_v8 = vld [vmem:[%s1669_s1 + $0x58] sm:$0xff]   ;;  %s1545_s11 = scalar_lea.vmem %s1668_s0, %s1106_s6  ;;  %v1396_v10 = vld [vmem:[%s1669_s1 + $0x50] sm:$0xff]   ;;  %s1613_s8 = scalar_lea.vmem %s1671_s3, %s1022_s5 }
   0xf   : > { %1236 = vmatprep.subr.bf16.mxu0 %v1388_v2  ;;  %1347 = vmatprep.subr.bf16.mxu1 %v1388_v2  ;;  %v1393_v7 = vld [vmem:[%s1669_s1 + $0x20] sm:$0xff]   ;;  %v1395_v9 = vld [vmem:[%s1669_s1 + $0x18] sm:$0xff]   ;;  %v1397_v13 = vld [vmem:[%s1669_s1 + $0x10] sm:$0xff]  }
  0x10   : > { %v1404_v11 = vld [vmem:[%s1545_s11 + $0x4] ss:$8 sps:$4 sm:$0xff]   ;;  %v1402_v18 = vld [vmem:[%s1545_s11] ss:$8 sps:$4 sm:$0xff]   ;;  %v1408_v20 = vld [vmem:[%s1545_s11 + $0x14] ss:$8 sps:$4 sm:$0xff]  }
  0x11   : > { %v1407_v12 = vld [vmem:[%s1545_s11 + $0x84] ss:$8 sps:$4 sm:$0xff]   ;;  %588 = vmatprep.mubr.bf16.mxu0 %v1404_v11  ;;  %v1405_v19 = vld [vmem:[%s1545_s11 + $0x80] ss:$8 sps:$4 sm:$0xff]   ;;  %v1410_v21 = vld [vmem:[%s1545_s11 + $0x94] ss:$8 sps:$4 sm:$0xff]  }
  0x12   : > { %1237 = vmatpush3.bf16.msra.mxu0 %v1389_v3  ;;  %1355 = vmatpush3.bf16.msra.mxu1 %v1389_v3  ;;  %v1398_v14 = vld [vmem:[%s1669_s1 + $0x48] sm:$0xff]   ;;  %v1400_v16 = vld [vmem:[%s1669_s1 + $0x40] sm:$0xff]   ;;  %v1412_v22 = vld [vmem:[%s1545_s11 + $0x10] ss:$8 sps:$4 sm:$0xff]  }
  0x13   : > { %1238 = vmatprep.subr.bf16.mxu0 %v1390_v4  ;;  %1348 = vmatprep.subr.bf16.mxu1 %v1390_v4  ;;  %v1399_v15 = vld [vmem:[%s1669_s1 + $0x8] sm:$0xff]   ;;  %v1401_v17 = vld [vmem:[%s1669_s1] sm:$0xff]   ;;  %v1413_v23 = vld [vmem:[%s1545_s11 + $0x90] ss:$8 sps:$4 sm:$0xff]  }
  0x14   : > { %652 = vmatprep.mubr.bf16.mxu1 %v1407_v12  ;;  %v1414_v24 = vld [vmem:[%s1545_s11 + $0x24] ss:$8 sps:$4 sm:$0xff]   ;;  %v1418_v26 = vld [vmem:[%s1545_s11 + $0x20] ss:$8 sps:$4 sm:$0xff]   ;;  %v1420_v28 = vld [vmem:[%s1545_s11 + $0x34] ss:$8 sps:$4 sm:$0xff]  }
  0x15   : > { %v1416_v25 = vld [vmem:[%s1545_s11 + $0xa4] ss:$8 sps:$4 sm:$0xff]   ;;  %v1419_v27 = vld [vmem:[%s1545_s11 + $0xa0] ss:$8 sps:$4 sm:$0xff]   ;;  %v1422_v29 = vld [vmem:[%s1545_s11 + $0xb4] ss:$8 sps:$4 sm:$0xff]  }
  0x16   : > { %1239 = vmatpush3.bf16.msra.mxu0 %v1391_v5  ;;  %1356 = vmatpush3.bf16.msra.mxu1 %v1391_v5  ;;  %v1424_v30 = vld [vmem:[%s1545_s11 + $0x30] ss:$8 sps:$4 sm:$0xff]   ;;  %v1426_v32 = vld [vmem:[%s1545_s11 + $0x44] ss:$8 sps:$4 sm:$0xff]   ;;  %v1430_v34 = vld [vmem:[%s1545_s11 + $0x40] ss:$8 sps:$4 sm:$0xff]  }
  0x17   : > { %1240 = vmatprep.subr.bf16.mxu0 %v1392_v6  ;;  %1349 = vmatprep.subr.bf16.mxu1 %v1392_v6  ;;  %v1425_v31 = vld [vmem:[%s1545_s11 + $0xb0] ss:$8 sps:$4 sm:$0xff]   ;;  %v1428_v33 = vld [vmem:[%s1545_s11 + $0xc4] ss:$8 sps:$4 sm:$0xff]   ;;  %v1431_v35 = vld [vmem:[%s1545_s11 + $0xc0] ss:$8 sps:$4 sm:$0xff]  }
  0x18   : > { %v1432_v36 = vld [vmem:[%s1545_s11 + $0x54] ss:$8 sps:$4 sm:$0xff]   ;;  %v1436_v38 = vld [vmem:[%s1545_s11 + $0x50] ss:$8 sps:$4 sm:$0xff]   ;;  %v1438_v40 = vld [vmem:[%s1545_s11 + $0x64] ss:$8 sps:$4 sm:$0xff]  }
  0x19   : > { %v1434_v37 = vld [vmem:[%s1545_s11 + $0xd4] ss:$8 sps:$4 sm:$0xff]   ;;  %v1437_v39 = vld [vmem:[%s1545_s11 + $0xd0] ss:$8 sps:$4 sm:$0xff]   ;;  %v1440_v41 = vld [vmem:[%s1545_s11 + $0xe4] ss:$8 sps:$4 sm:$0xff]  }
  0x1a   : > { %1241 = vmatpush3.bf16.msra.mxu0 %v1393_v7  ;;  %1357 = vmatpush3.bf16.msra.mxu1 %v1393_v7  ;;  %v1442_v42 = vld [vmem:[%s1545_s11 + $0x60] ss:$8 sps:$4 sm:$0xff]   ;;  %v1444_v44 = vld [vmem:[%s1545_s11 + $0x74] ss:$8 sps:$4 sm:$0xff]   ;;  %v1448_v46 = vld [vmem:[%s1545_s11 + $0x70] ss:$8 sps:$4 sm:$0xff]  }
  0x1b   : > { %1242 = vmatprep.subr.bf16.mxu0 %v1394_v8  ;;  %1350 = vmatprep.subr.bf16.mxu1 %v1394_v8  ;;  %v1443_v43 = vld [vmem:[%s1545_s11 + $0xe0] ss:$8 sps:$4 sm:$0xff]   ;;  %v1446_v45 = vld [vmem:[%s1545_s11 + $0xf4] ss:$8 sps:$4 sm:$0xff]   ;;  %v1449_v47 = vld [vmem:[%s1545_s11 + $0xf0] ss:$8 sps:$4 sm:$0xff]  }
  0x1c   : > { %v1603_v52 = vld [vmem:[%s1670_s2] ss:$0 sm:$0xff] }
  0x1e   : > { %1243 = vmatpush3.bf16.msra.mxu0 %v1395_v9  ;;  %1358 = vmatpush3.bf16.msra.mxu1 %v1395_v9 }
  0x1f   : > { %1244 = vmatprep.subr.bf16.mxu0 %v1396_v10  ;;  %1351 = vmatprep.subr.bf16.mxu1 %v1396_v10 }
  0x22   : > { %1245 = vmatpush3.bf16.msra.mxu0 %v1397_v13  ;;  %1359 = vmatpush3.bf16.msra.mxu1 %v1397_v13 }
  0x23   : > { %1246 = vmatprep.subr.bf16.mxu0 %v1398_v14  ;;  %1352 = vmatprep.subr.bf16.mxu1 %v1398_v14 }
  0x26   : > { %1247 = vmatpush3.bf16.msra.mxu0 %v1399_v15  ;;  %1360 = vmatpush3.bf16.msra.mxu1 %v1399_v15 }
  0x27   : > { %1248 = vmatprep.subr.bf16.mxu0 %v1400_v16  ;;  %1353 = vmatprep.subr.bf16.mxu1 %v1400_v16 }
  0x2a   : > { %1249 = vmatpush3.bf16.msra.mxu0 %v1401_v17  ;;  %1361 = vmatpush3.bf16.msra.mxu1 %v1401_v17 }
  0x2d   : > { %589 = vmatmul.mubr.bf16.vlgmr.msra.gmra.mxu0 %v1402_v18  ;;  %653 = vmatmul.mubr.bf16.vlgmr.msra.gmra.mxu1 %v1405_v19 }
  0x2e   : > { %596 = vmatprep.mubr.bf16.mxu0 %v1408_v20  ;;  %660 = vmatprep.mubr.bf16.mxu1 %v1410_v21 }
  0x35   : > { %597 = vmatmul.mubr.bf16.gmra.mxu0 %v1412_v22  ;;  %661 = vmatmul.mubr.bf16.gmra.mxu1 %v1413_v23 }
  0x36   : > { %604 = vmatprep.mubr.bf16.mxu0 %v1414_v24  ;;  %668 = vmatprep.mubr.bf16.mxu1 %v1416_v25 }
  0x3d   : > { %605 = vmatmul.mubr.bf16.gmra.mxu0 %v1418_v26  ;;  %669 = vmatmul.mubr.bf16.gmra.mxu1 %v1419_v27 }
  0x3e   : > { %612 = vmatprep.mubr.bf16.mxu0 %v1420_v28  ;;  %676 = vmatprep.mubr.bf16.mxu1 %v1422_v29 }
  0x45   : > { %613 = vmatmul.mubr.bf16.gmra.mxu0 %v1424_v30  ;;  %677 = vmatmul.mubr.bf16.gmra.mxu1 %v1425_v31 }
  0x46   : > { %620 = vmatprep.mubr.bf16.mxu0 %v1426_v32  ;;  %684 = vmatprep.mubr.bf16.mxu1 %v1428_v33 }
  0x4d   : > { %621 = vmatmul.mubr.bf16.gmra.mxu0 %v1430_v34  ;;  %685 = vmatmul.mubr.bf16.gmra.mxu1 %v1431_v35 }
  0x4e   : > { %628 = vmatprep.mubr.bf16.mxu0 %v1432_v36  ;;  %692 = vmatprep.mubr.bf16.mxu1 %v1434_v37 }
  0x55   : > { %629 = vmatmul.mubr.bf16.gmra.mxu0 %v1436_v38  ;;  %693 = vmatmul.mubr.bf16.gmra.mxu1 %v1437_v39 }
  0x56   : > { %636 = vmatprep.mubr.bf16.mxu0 %v1438_v40  ;;  %700 = vmatprep.mubr.bf16.mxu1 %v1440_v41 }
  0x5d   : > { %637 = vmatmul.mubr.bf16.gmra.mxu0 %v1442_v42  ;;  %701 = vmatmul.mubr.bf16.gmra.mxu1 %v1443_v43 }
  0x5e   : > { %644 = vmatprep.mubr.bf16.mxu0 %v1444_v44  ;;  %708 = vmatprep.mubr.bf16.mxu1 %v1446_v45 }
  0x65   : > { %645 = vmatmul.mubr.bf16.gmra.mxu0 %v1448_v46  ;;  %709 = vmatmul.mubr.bf16.gmra.mxu1 %v1449_v47 }
  0xed   : > { %v1250_v48 = vpop.f32.mrf.mxu0  ;;  %v1298_v49 = vpop.f32.mrf.mxu1 }
  0xef   : > { %v1251_v50 = vpop.f32.mrf.mxu0  ;;  %v1299_v51 = vpop.f32.mrf.mxu1 }
  0xf0   : > { %v1252_v53 = vadd.f32 %v1251_v50, %v1250_v48  ;;  %v1300_v54 = vadd.f32 %v1299_v51, %v1298_v49 }
  0xf1   : > { %v1253_v55 = vpop.f32.mrf.mxu0  ;;  %v1301_v56 = vpop.f32.mrf.mxu1 }
  0xf2   : > { %v591_v57 = vadd.f32 %v1252_v53, %v1603_v52  ;;  %v655_v58 = vadd.f32 %v1300_v54, %v1603_v52 }
  0xf3   : > { %v1254_v59 = vpop.f32.mrf.mxu0  ;;  %v1302_v60 = vpop.f32.mrf.mxu1 }
  0xf4   : > { %v1255_v61 = vadd.f32 %v1254_v59, %v1253_v55  ;;  %v1303_v62 = vadd.f32 %v1302_v60, %v1301_v56  ;;  %v717_v3 = vmax.f32 %v591_v57, 0.0  ;;  %v733_v4 = vmax.f32 %v655_v58, 0.0 }
  0xf5   : > { %v1256_v63 = vpop.f32.mrf.mxu0  ;;  %v1304_v0 = vpop.f32.mrf.mxu1 }
  0xf6   : > { %v594_v1 = vadd.f32 %v1255_v61, %v1603_v52  ;;  %v658_v2 = vadd.f32 %v1303_v62, %v1603_v52 }
  0xf7   : > { %v1257_v5 = vpop.f32.mrf.mxu0  ;;  %v1305_v6 = vpop.f32.mrf.mxu1 }
  0xf8   : > { %v718_v7 = vmax.f32 %v594_v1, 0.0  ;;  %v734_v8 = vmax.f32 %v658_v2, 0.0  ;;  %v1258_v9 = vadd.f32 %v1257_v5, %v1256_v63  ;;  %v1306_v10 = vadd.f32 %v1305_v6, %v1304_v0 }
  0xf9   : > { %v1259_v11 = vpop.f32.mrf.mxu0  ;;  %v1307_v12 = vpop.f32.mrf.mxu1 }
  0xfa   : > { %v1142_v13 = vpack.c.bf16 %v718_v7, %v717_v3  ;;  %v1182_v14 = vpack.c.bf16 %v734_v8, %v733_v4  ;;  %v599_v15 = vadd.f32 %v1258_v9, %v1603_v52  ;;  %v663_v16 = vadd.f32 %v1306_v10, %v1603_v52 }
  0xfb   : > { %v1260_v17 = vpop.f32.mrf.mxu0  ;;  %v1308_v18 = vpop.f32.mrf.mxu1 }
  0xfc   : > { %1143 = vst [vmem:[%s1613_s8] sm:$0xff] %v1142_v13   ;;  %1226 = vst [vmem:[%s1613_s8 + $0x40] sm:$0xff] %v1182_v14   ;;  %v1261_v19 = vadd.f32 %v1260_v17, %v1259_v11  ;;  %v1309_v20 = vadd.f32 %v1308_v18, %v1307_v12  ;;  %v719_v25 = vmax.f32 %v599_v15, 0.0  ;;  %v735_v26 = vmax.f32 %v663_v16, 0.0 }
  0xfd   : > { %v1262_v21 = vpop.f32.mrf.mxu0  ;;  %v1310_v22 = vpop.f32.mrf.mxu1 }
  0xfe   : > { %v602_v23 = vadd.f32 %v1261_v19, %v1603_v52  ;;  %v666_v24 = vadd.f32 %v1309_v20, %v1603_v52 }
  0xff   : > { %v1263_v27 = vpop.f32.mrf.mxu0  ;;  %v1311_v28 = vpop.f32.mrf.mxu1 }
 0x100   : > { %v720_v29 = vmax.f32 %v602_v23, 0.0  ;;  %v736_v30 = vmax.f32 %v666_v24, 0.0  ;;  %v1264_v31 = vadd.f32 %v1263_v27, %v1262_v21  ;;  %v1312_v32 = vadd.f32 %v1311_v28, %v1310_v22 }
 0x101   : > { %v1265_v33 = vpop.f32.mrf.mxu0  ;;  %v1313_v34 = vpop.f32.mrf.mxu1 }
 0x102   : > { %v1147_v35 = vpack.c.bf16 %v720_v29, %v719_v25  ;;  %v1187_v36 = vpack.c.bf16 %v736_v30, %v735_v26  ;;  %v607_v37 = vadd.f32 %v1264_v31, %v1603_v52  ;;  %v671_v38 = vadd.f32 %v1312_v32, %v1603_v52 }
 0x103   : > { %v1266_v39 = vpop.f32.mrf.mxu0  ;;  %v1314_v40 = vpop.f32.mrf.mxu1 }
 0x104   : > { %1219 = vst [vmem:[%s1613_s8 + $0x8] sm:$0xff] %v1147_v35   ;;  %1227 = vst [vmem:[%s1613_s8 + $0x48] sm:$0xff] %v1187_v36   ;;  %v1267_v41 = vadd.f32 %v1266_v39, %v1265_v33  ;;  %v1315_v42 = vadd.f32 %v1314_v40, %v1313_v34  ;;  %v721_v47 = vmax.f32 %v607_v37, 0.0  ;;  %v737_v48 = vmax.f32 %v671_v38, 0.0 }
 0x105   : > { %v1268_v43 = vpop.f32.mrf.mxu0  ;;  %v1316_v44 = vpop.f32.mrf.mxu1 }
 0x106   : > { %v610_v45 = vadd.f32 %v1267_v41, %v1603_v52  ;;  %v674_v46 = vadd.f32 %v1315_v42, %v1603_v52 }
 0x107   : > { %v1269_v49 = vpop.f32.mrf.mxu0  ;;  %v1317_v50 = vpop.f32.mrf.mxu1 }
 0x108   : > { %v722_v51 = vmax.f32 %v610_v45, 0.0  ;;  %v738_v53 = vmax.f32 %v674_v46, 0.0  ;;  %v1270_v54 = vadd.f32 %v1269_v49, %v1268_v43  ;;  %v1318_v55 = vadd.f32 %v1317_v50, %v1316_v44 }
 0x109   : > { %v1271_v56 = vpop.f32.mrf.mxu0  ;;  %v1319_v57 = vpop.f32.mrf.mxu1 }
 0x10a   : > { %v1152_v58 = vpack.c.bf16 %v722_v51, %v721_v47  ;;  %v1192_v59 = vpack.c.bf16 %v738_v53, %v737_v48  ;;  %v615_v60 = vadd.f32 %v1270_v54, %v1603_v52  ;;  %v679_v61 = vadd.f32 %v1318_v55, %v1603_v52 }
 0x10b   : > { %v1272_v62 = vpop.f32.mrf.mxu0  ;;  %v1320_v63 = vpop.f32.mrf.mxu1 }
 0x10c   : > { %1220 = vst [vmem:[%s1613_s8 + $0x10] sm:$0xff] %v1152_v58   ;;  %1228 = vst [vmem:[%s1613_s8 + $0x50] sm:$0xff] %v1192_v59   ;;  %v1273_v0 = vadd.f32 %v1272_v62, %v1271_v56  ;;  %v1321_v1 = vadd.f32 %v1320_v63, %v1319_v57  ;;  %v723_v6 = vmax.f32 %v615_v60, 0.0  ;;  %v739_v7 = vmax.f32 %v679_v61, 0.0 }
 0x10d   : > { %v1274_v2 = vpop.f32.mrf.mxu0  ;;  %v1322_v3 = vpop.f32.mrf.mxu1 }
 0x10e   : > { %v618_v4 = vadd.f32 %v1273_v0, %v1603_v52  ;;  %v682_v5 = vadd.f32 %v1321_v1, %v1603_v52 }
 0x10f   : > { %v1275_v8 = vpop.f32.mrf.mxu0  ;;  %v1323_v9 = vpop.f32.mrf.mxu1 }
 0x110   : > { %v724_v10 = vmax.f32 %v618_v4, 0.0  ;;  %v740_v11 = vmax.f32 %v682_v5, 0.0  ;;  %v1276_v12 = vadd.f32 %v1275_v8, %v1274_v2  ;;  %v1324_v13 = vadd.f32 %v1323_v9, %v1322_v3 }
 0x111   : > { %v1277_v14 = vpop.f32.mrf.mxu0  ;;  %v1325_v15 = vpop.f32.mrf.mxu1 }
 0x112   : > { %v1157_v16 = vpack.c.bf16 %v724_v10, %v723_v6  ;;  %v1197_v17 = vpack.c.bf16 %v740_v11, %v739_v7  ;;  %v623_v18 = vadd.f32 %v1276_v12, %v1603_v52  ;;  %v687_v19 = vadd.f32 %v1324_v13, %v1603_v52 }
 0x113   : > { %v1278_v20 = vpop.f32.mrf.mxu0  ;;  %v1326_v21 = vpop.f32.mrf.mxu1 }
 0x114   : > { %1221 = vst [vmem:[%s1613_s8 + $0x18] sm:$0xff] %v1157_v16   ;;  %1229 = vst [vmem:[%s1613_s8 + $0x58] sm:$0xff] %v1197_v17   ;;  %v1279_v22 = vadd.f32 %v1278_v20, %v1277_v14  ;;  %v1327_v23 = vadd.f32 %v1326_v21, %v1325_v15  ;;  %v725_v28 = vmax.f32 %v623_v18, 0.0  ;;  %v741_v29 = vmax.f32 %v687_v19, 0.0 }
 0x115   : > { %v1280_v24 = vpop.f32.mrf.mxu0  ;;  %v1328_v25 = vpop.f32.mrf.mxu1 }
 0x116   : > { %v626_v26 = vadd.f32 %v1279_v22, %v1603_v52  ;;  %v690_v27 = vadd.f32 %v1327_v23, %v1603_v52 }
 0x117   : > { %v1281_v30 = vpop.f32.mrf.mxu0  ;;  %v1329_v31 = vpop.f32.mrf.mxu1 }
 0x118   : > { %v726_v32 = vmax.f32 %v626_v26, 0.0  ;;  %v742_v33 = vmax.f32 %v690_v27, 0.0  ;;  %v1282_v34 = vadd.f32 %v1281_v30, %v1280_v24  ;;  %v1330_v35 = vadd.f32 %v1329_v31, %v1328_v25 }
 0x119   : > { %v1283_v36 = vpop.f32.mrf.mxu0  ;;  %v1331_v37 = vpop.f32.mrf.mxu1 }
 0x11a   : > { %v1162_v38 = vpack.c.bf16 %v726_v32, %v725_v28  ;;  %v1202_v39 = vpack.c.bf16 %v742_v33, %v741_v29  ;;  %v631_v40 = vadd.f32 %v1282_v34, %v1603_v52  ;;  %v695_v41 = vadd.f32 %v1330_v35, %v1603_v52 }
 0x11b   : > { %v1284_v42 = vpop.f32.mrf.mxu0  ;;  %v1332_v43 = vpop.f32.mrf.mxu1 }
 0x11c   : > { %1222 = vst [vmem:[%s1613_s8 + $0x20] sm:$0xff] %v1162_v38   ;;  %1230 = vst [vmem:[%s1613_s8 + $0x60] sm:$0xff] %v1202_v39   ;;  %v1285_v44 = vadd.f32 %v1284_v42, %v1283_v36  ;;  %v1333_v45 = vadd.f32 %v1332_v43, %v1331_v37  ;;  %v727_v50 = vmax.f32 %v631_v40, 0.0  ;;  %v743_v51 = vmax.f32 %v695_v41, 0.0 }
 0x11d   : > { %v1286_v46 = vpop.f32.mrf.mxu0  ;;  %v1334_v47 = vpop.f32.mrf.mxu1 }
 0x11e   : > { %v634_v48 = vadd.f32 %v1285_v44, %v1603_v52  ;;  %v698_v49 = vadd.f32 %v1333_v45, %v1603_v52 }
 0x11f   : > { %v1287_v53 = vpop.f32.mrf.mxu0  ;;  %v1335_v54 = vpop.f32.mrf.mxu1 }
 0x120   : > { %v728_v55 = vmax.f32 %v634_v48, 0.0  ;;  %v744_v56 = vmax.f32 %v698_v49, 0.0  ;;  %v1288_v57 = vadd.f32 %v1287_v53, %v1286_v46  ;;  %v1336_v58 = vadd.f32 %v1335_v54, %v1334_v47 }
 0x121   : > { %v1289_v59 = vpop.f32.mrf.mxu0  ;;  %v1337_v60 = vpop.f32.mrf.mxu1 }
 0x122   : > { %v1167_v61 = vpack.c.bf16 %v728_v55, %v727_v50  ;;  %v1207_v62 = vpack.c.bf16 %v744_v56, %v743_v51  ;;  %v639_v63 = vadd.f32 %v1288_v57, %v1603_v52  ;;  %v703_v0 = vadd.f32 %v1336_v58, %v1603_v52 }
 0x123   : > { %v1290_v1 = vpop.f32.mrf.mxu0  ;;  %v1338_v2 = vpop.f32.mrf.mxu1 }
 0x124   : > { %1223 = vst [vmem:[%s1613_s8 + $0x28] sm:$0xff] %v1167_v61   ;;  %1231 = vst [vmem:[%s1613_s8 + $0x68] sm:$0xff] %v1207_v62   ;;  %v1291_v3 = vadd.f32 %v1290_v1, %v1289_v59  ;;  %v1339_v4 = vadd.f32 %v1338_v2, %v1337_v60  ;;  %v729_v9 = vmax.f32 %v639_v63, 0.0  ;;  %v745_v10 = vmax.f32 %v703_v0, 0.0 }
 0x125   : > { %v1292_v5 = vpop.f32.mrf.mxu0  ;;  %v1340_v6 = vpop.f32.mrf.mxu1 }
 0x126   : > { %v642_v7 = vadd.f32 %v1291_v3, %v1603_v52  ;;  %v706_v8 = vadd.f32 %v1339_v4, %v1603_v52 }
 0x127   : > { %v1293_v11 = vpop.f32.mrf.mxu0  ;;  %v1341_v12 = vpop.f32.mrf.mxu1 }
 0x128   : > { %v730_v13 = vmax.f32 %v642_v7, 0.0  ;;  %v746_v14 = vmax.f32 %v706_v8, 0.0  ;;  %v1294_v15 = vadd.f32 %v1293_v11, %v1292_v5  ;;  %v1342_v16 = vadd.f32 %v1341_v12, %v1340_v6 }
 0x129   : > { %v1295_v17 = vpop.f32.mrf.mxu0  ;;  %v1343_v18 = vpop.f32.mrf.mxu1 }
 0x12a   : > { %v1172_v19 = vpack.c.bf16 %v730_v13, %v729_v9  ;;  %v1212_v20 = vpack.c.bf16 %v746_v14, %v745_v10  ;;  %v647_v23 = vadd.f32 %v1294_v15, %v1603_v52  ;;  %v711_v24 = vadd.f32 %v1342_v16, %v1603_v52 }
 0x12b   : > { %v1296_v21 = vpop.f32.mrf.mxu0  ;;  %v1344_v22 = vpop.f32.mrf.mxu1 }
 0x12c   : > { %1224 = vst [vmem:[%s1613_s8 + $0x30] sm:$0xff] %v1172_v19   ;;  %1232 = vst [vmem:[%s1613_s8 + $0x70] sm:$0xff] %v1212_v20   ;;  %v1297_v25 = vadd.f32 %v1296_v21, %v1295_v17  ;;  %v1345_v26 = vadd.f32 %v1344_v22, %v1343_v18  ;;  %v731_v29 = vmax.f32 %v647_v23, 0.0  ;;  %v747_v30 = vmax.f32 %v711_v24, 0.0 }
 0x12e   : > { %v650_v27 = vadd.f32 %v1297_v25, %v1603_v52  ;;  %v714_v28 = vadd.f32 %v1345_v26, %v1603_v52 }
 0x130   : > { %v732_v31 = vmax.f32 %v650_v27, 0.0  ;;  %v748_v32 = vmax.f32 %v714_v28, 0.0 }
 0x132   : > { %v1177_v33 = vpack.c.bf16 %v732_v31, %v731_v29  ;;  %v1217_v34 = vpack.c.bf16 %v748_v32, %v747_v30 }
 0x134   : > { %1225 = vst [vmem:[%s1613_s8 + $0x38] sm:$0xff] %v1177_v33   ;;  %1233 = vst [vmem:[%s1613_s8 + $0x78] sm:$0xff] %v1217_v34  }
 0x135 PF: > { %s13_s14 = sadd.s32 1, %s1472_s14   ;;  %s1672_s12 = smov %s1468_s13 }
 0x136   : > { %p10_p5 = scmp.ge.s32.totalorder %s13_s14, 6   ;;  %s1673_s13 = smov %s1675_s15 }
 0x138   :  { %12 = sbr.rel (!%p10_p5) target bundleno = 2 (0x2), region = 68 }

// kernel: crnn_ctc_forward.19
= control target key start
LH: loop header
LB: loop body
LE: loop exit
PB: predicated region body
PF: predicated region fallthrough
CT: control target
= control target key end

     0   :  { %s1831_s12 = smov 0   ;;  %s1833_s13 = smov 0   ;;  %s2118_s0 = inlined_call_operand.vmem [shape: bf16[256,640], index: 0, kind: input, shape index: {}]   ;;  %s2119_s1 = inlined_call_operand.vmem [shape: bf16[640,128], index: 1, kind: input, shape index: {}]   ;;  %s2120_s2 = inlined_call_operand.vmem [shape: f32[1,128], index: 2, kind: input, shape index: {}]   ;;  %s2121_s3 = inlined_call_operand.vmem [shape: bf16[256,128], index: 3, kind: output, shape index: {}]  }
   0x1   :  { %s1835_s14 = smov 0  }
   0x2 LB: > { %s25_s15 = sadd.s32 1, %s1805_s13  ;;  %p1307_p0 = scmp.ge.s32.totalorder %s1809_s14, 1  ;;  %s1809_s14 = sphi %s1835_s14, %s13_s14   ;;  %s1805_s13 = sphi %s1833_s13, %s2131_s13   ;;  %s1801_s12 = sphi %s1831_s12, %s2130_s12  }
   0x3   : > { %p27_p1 = scmp.ge.s32.totalorder %s25_s15, 2  ;;  %p170_p2 = scmp.lt.s32.totalorder %s1809_s14, 3 }
   0x5   : > { %s2133_s15 = smov (%p27_p1, %s25_s15), 0  ;;  %p171_p3 = pnand %p1307_p0, %p170_p2 }
   0x7   : > { %174 = sbr.rel (%p171_p3) target bundleno = 325 (0x145), region = 32 }
   0xc   : > { %v1691_v0 = vld [vmem:[%s2119_s1 + $0x78] sm:$0xff]   ;;  %v1695_v4 = vld [vmem:[%s2119_s1 + $0x70] sm:$0xff]   ;;  %v1699_v8 = vld [vmem:[%s2119_s1 + $0x68] sm:$0xff]   ;;  %s1308_s23 = sshll.u32 %s1801_s12, 4 }
   0xd   : > { %v1692_v1 = vld [vmem:[%s2119_s1 + $0xf8] sm:$0xff]   ;;  %1474 = vmatprep.subr.bf16.mxu0 %v1691_v0  ;;  %v1696_v5 = vld [vmem:[%s2119_s1 + $0xf0] sm:$0xff]   ;;  %v1700_v9 = vld [vmem:[%s2119_s1 + $0xe8] sm:$0xff]   ;;  %p206_p4 = scmp.lt.s32.totalorder %s1308_s23, 31 }
   0xe   : > { %v1693_v2 = vld [vmem:[%s2119_s1 + $0x38] sm:$0xff]   ;;  %1538 = vmatprep.subr.bf16.mxu1 %v1692_v1  ;;  %v1697_v6 = vld [vmem:[%s2119_s1 + $0x30] sm:$0xff]   ;;  %v1701_v10 = vld [vmem:[%s2119_s1 + $0x28] sm:$0xff]  }
   0xf   : > { %v1694_v3 = vld [vmem:[%s2119_s1 + $0xb8] sm:$0xff]   ;;  %1475 = vmatpush3.bf16.msra.mxu0 %v1693_v2  ;;  %v1698_v7 = vld [vmem:[%s2119_s1 + $0xb0] sm:$0xff]   ;;  %v1702_v11 = vld [vmem:[%s2119_s1 + $0xa8] sm:$0xff]   ;;  %s2135_s23 = smov (!%p206_p4, %s1308_s23), 31 }
  0x10   : > { %1539 = vmatpush3.bf16.msra.mxu1 %v1694_v3  ;;  %1476 = vmatprep.subr.bf16.mxu0 %v1695_v4  ;;  %v1703_v12 = vld [vmem:[%s2119_s1 + $0x60] sm:$0xff]   ;;  %v1707_v16 = vld [vmem:[%s2119_s1 + $0x58] sm:$0xff]   ;;  %v1711_v20 = vld [vmem:[%s2119_s1 + $0x50] sm:$0xff]   ;;  %s1666_s22 = smul.u32 20, %s2135_s23 }
  0x11   : > { %1540 = vmatprep.subr.bf16.mxu1 %v1696_v5  ;;  %v1704_v13 = vld [vmem:[%s2119_s1 + $0xe0] sm:$0xff]   ;;  %v1708_v17 = vld [vmem:[%s2119_s1 + $0xd8] sm:$0xff]   ;;  %v1712_v21 = vld [vmem:[%s2119_s1 + $0xd0] sm:$0xff]  }
  0x12   : > { %v1705_v14 = vld [vmem:[%s2119_s1 + $0x20] sm:$0xff]   ;;  %v1709_v18 = vld [vmem:[%s2119_s1 + $0x18] sm:$0xff]   ;;  %v1713_v22 = vld [vmem:[%s2119_s1 + $0x10] sm:$0xff]   ;;  %s1948_s6 = scalar_lea.vmem %s2118_s0, %s1666_s22 }
  0x13   : > { %1477 = vmatpush3.bf16.msra.mxu0 %v1697_v6  ;;  %v1706_v15 = vld [vmem:[%s2119_s1 + $0xa0] sm:$0xff]   ;;  %v1710_v19 = vld [vmem:[%s2119_s1 + $0x98] sm:$0xff]   ;;  %v1714_v23 = vld [vmem:[%s2119_s1 + $0x90] sm:$0xff]  }
  0x14   : > { %1541 = vmatpush3.bf16.msra.mxu1 %v1698_v7  ;;  %1478 = vmatprep.subr.bf16.mxu0 %v1699_v8  ;;  %v1715_v24 = vld [vmem:[%s2119_s1 + $0x48] sm:$0xff]   ;;  %v1719_v28 = vld [vmem:[%s2119_s1 + $0x40] sm:$0xff]   ;;  %v1729_v36 = vld [vmem:[%s2119_s1 + $0x138] sm:$0xff]  }
  0x15   : > { %1542 = vmatprep.subr.bf16.mxu1 %v1700_v9  ;;  %v1716_v25 = vld [vmem:[%s2119_s1 + $0xc8] sm:$0xff]   ;;  %v1720_v29 = vld [vmem:[%s2119_s1 + $0xc0] sm:$0xff]   ;;  %v1736_v39 = vld [vmem:[%s2119_s1 + $0x130] sm:$0xff]  }
  0x16   : > { %v1717_v26 = vld [vmem:[%s2119_s1 + $0x8] sm:$0xff]   ;;  %v1721_v30 = vld [vmem:[%s2119_s1] sm:$0xff]   ;;  %v1739_v43 = vld [vmem:[%s1948_s6 + $0x5c] ss:$20 sps:$4 sm:$0xff]  }
  0x17   : > { %1479 = vmatpush3.bf16.msra.mxu0 %v1701_v10  ;;  %v1718_v27 = vld [vmem:[%s2119_s1 + $0x88] sm:$0xff]   ;;  %v1722_v31 = vld [vmem:[%s2119_s1 + $0x80] sm:$0xff]   ;;  %v1744_v48 = vld [vmem:[%s1948_s6 + $0x7c] ss:$20 sps:$4 sm:$0xff]  }
  0x18   : > { %1543 = vmatpush3.bf16.msra.mxu1 %v1702_v11  ;;  %1480 = vmatprep.subr.bf16.mxu0 %v1703_v12  ;;  %v1723_v32 = vld [vmem:[%s1948_s6] ss:$20 sps:$4 sm:$0xff]   ;;  %v1725_v33 = vld [vmem:[%s1948_s6 + $0x4] ss:$20 sps:$4 sm:$0xff]   ;;  %v1726_v34 = vld [vmem:[%s1948_s6 + $0x8] ss:$20 sps:$4 sm:$0xff]  }
  0x19   : > { %1544 = vmatprep.subr.bf16.mxu1 %v1704_v13  ;;  %v1728_v35 = vld [vmem:[%s1948_s6 + $0xc] ss:$20 sps:$4 sm:$0xff]   ;;  %844 = vmatprep.mubr.bf16.mxu0 %v1725_v33  ;;  %v1732_v38 = vld [vmem:[%s1948_s6 + $0x34] ss:$20 sps:$4 sm:$0xff]   ;;  %v1735_v41 = vld [vmem:[%s1948_s6 + $0x30] ss:$20 sps:$4 sm:$0xff]  }
  0x1a   : > { %941 = vmatprep.mubr.bf16.mxu1 %v1728_v35  ;;  %v1730_v37 = vld [vmem:[%s1948_s6 + $0x2c] ss:$20 sps:$4 sm:$0xff]   ;;  %v1734_v40 = vld [vmem:[%s1948_s6 + $0x28] ss:$20 sps:$4 sm:$0xff]   ;;  %v1741_v46 = vld [vmem:[%s1948_s6 + $0x50] ss:$20 sps:$4 sm:$0xff]  }
  0x1b   : > { %1481 = vmatpush3.bf16.msra.mxu0 %v1705_v14  ;;  %v1737_v42 = vld [vmem:[%s1948_s6 + $0x54] ss:$20 sps:$4 sm:$0xff]   ;;  %v1750_v45 = vld [vmem:[%s2119_s1 + $0x120] sm:$0xff]   ;;  %v1742_v47 = vld [vmem:[%s1948_s6 + $0x58] ss:$20 sps:$4 sm:$0xff]  }
  0x1c   : > { %1545 = vmatpush3.bf16.msra.mxu1 %v1706_v15  ;;  %1482 = vmatprep.subr.bf16.mxu0 %v1707_v16  ;;  %v1743_v44 = vld [vmem:[%s2119_s1 + $0x128] sm:$0xff]   ;;  %v1746_v49 = vld [vmem:[%s1948_s6 + $0x84] ss:$20 sps:$4 sm:$0xff]   ;;  %v1764_v51 = vld [vmem:[%s2119_s1 + $0x110] sm:$0xff]  }
  0x1d   : > { %1546 = vmatprep.subr.bf16.mxu1 %v1708_v17  ;;  %v1757_v50 = vld [vmem:[%s2119_s1 + $0x118] sm:$0xff]   ;;  %v1749_v53 = vld [vmem:[%s1948_s6 + $0x80] ss:$20 sps:$4 sm:$0xff]   ;;  %v1771_v55 = vld [vmem:[%s2119_s1 + $0x108] sm:$0xff]  }
  0x1e   : > { %v1748_v52 = vld [vmem:[%s1948_s6 + $0x78] ss:$20 sps:$4 sm:$0xff]   ;;  %v1778_v57 = vld [vmem:[%s2119_s1 + $0x100] sm:$0xff]   ;;  %v1756_v59 = vld [vmem:[%s1948_s6 + $0xa8] ss:$20 sps:$4 sm:$0xff]  }
  0x1f   : > { %1483 = vmatpush3.bf16.msra.mxu0 %v1709_v18  ;;  %v1751_v54 = vld [vmem:[%s1948_s6 + $0xa4] ss:$20 sps:$4 sm:$0xff]   ;;  %v1753_v56 = vld [vmem:[%s1948_s6 + $0xac] ss:$20 sps:$4 sm:$0xff]   ;;  %v1760_v61 = vld [vmem:[%s1948_s6 + $0xd4] ss:$20 sps:$4 sm:$0xff]  }
  0x20   : > { %1547 = vmatpush3.bf16.msra.mxu1 %v1710_v19  ;;  %1484 = vmatprep.subr.bf16.mxu0 %v1711_v20  ;;  %v1755_v58 = vld [vmem:[%s1948_s6 + $0xa0] ss:$20 sps:$4 sm:$0xff]   ;;  %v1762_v62 = vld [vmem:[%s1948_s6 + $0xc8] ss:$20 sps:$4 sm:$0xff]   ;;  %v1763_v63 = vld [vmem:[%s1948_s6 + $0xd0] ss:$20 sps:$4 sm:$0xff]  }
  0x21   : > { %1548 = vmatprep.subr.bf16.mxu1 %v1712_v21  ;;  %v1758_v60 = vld [vmem:[%s1948_s6 + $0xcc] ss:$20 sps:$4 sm:$0xff]   ;;  %v1765_v0 = vld [vmem:[%s1948_s6 + $0xf4] ss:$20 sps:$4 sm:$0xff]   ;;  %v1767_v1 = vld [vmem:[%s1948_s6 + $0xfc] ss:$20 sps:$4 sm:$0xff]  }
  0x22   : > { %v1769_v2 = vld [vmem:[%s1948_s6 + $0xf0] ss:$20 sps:$4 sm:$0xff]   ;;  %v1770_v3 = vld [vmem:[%s1948_s6 + $0xf8] ss:$20 sps:$4 sm:$0xff]   ;;  %v1777_v7 = vld [vmem:[%s1948_s6 + $0x120] ss:$20 sps:$4 sm:$0xff]  }
  0x23   : > { %1485 = vmatpush3.bf16.msra.mxu0 %v1713_v22  ;;  %v1772_v4 = vld [vmem:[%s1948_s6 + $0x11c] ss:$20 sps:$4 sm:$0xff]   ;;  %v1774_v5 = vld [vmem:[%s1948_s6 + $0x124] ss:$20 sps:$4 sm:$0xff]   ;;  %v1783_v12 = vld [vmem:[%s1948_s6 + $0x60] ss:$20 sps:$4 sm:$0xff]  }
  0x24   : > { %1549 = vmatpush3.bf16.msra.mxu1 %v1714_v23  ;;  %1486 = vmatprep.subr.bf16.mxu0 %v1715_v24  ;;  %v1776_v6 = vld [vmem:[%s1948_s6 + $0x118] ss:$20 sps:$4 sm:$0xff]   ;;  %v1779_v8 = vld [vmem:[%s1948_s6 + $0x10] ss:$20 sps:$4 sm:$0xff]   ;;  %v1784_v13 = vld [vmem:[%s1948_s6 + $0x100] ss:$20 sps:$4 sm:$0xff]  }
  0x25   : > { %1550 = vmatprep.subr.bf16.mxu1 %v1716_v25  ;;  %v1780_v9 = vld [vmem:[%s1948_s6 + $0xb0] ss:$20 sps:$4 sm:$0xff]   ;;  %v1781_v10 = vld [vmem:[%s1948_s6 + $0x38] ss:$20 sps:$4 sm:$0xff]   ;;  %v1785_v14 = vld [vmem:[%s1948_s6 + $0x88] ss:$20 sps:$4 sm:$0xff]  }
  0x26   : > { %v1782_v11 = vld [vmem:[%s1948_s6 + $0xd8] ss:$20 sps:$4 sm:$0xff]   ;;  %v1786_v15 = vld [vmem:[%s1948_s6 + $0x128] ss:$20 sps:$4 sm:$0xff]   ;;  %v2023_v18 = vld [vmem:[%s2120_s2] ss:$0 sm:$0xff] }
  0x27   : > { %1487 = vmatpush3.bf16.msra.mxu0 %v1717_v26  ;;  %s1311_s6 = sshll.u32 %s2135_s23, 2 }
  0x28   : > { %1551 = vmatpush3.bf16.msra.mxu1 %v1718_v27  ;;  %1488 = vmatprep.subr.bf16.mxu0 %v1719_v28  ;;  %s2093_s8 = scalar_lea.vmem %s2121_s3, %s1311_s6 }
  0x29   : > { %1552 = vmatprep.subr.bf16.mxu1 %v1720_v29 }
  0x2b   : > { %1489 = vmatpush3.bf16.msra.mxu0 %v1721_v30 }
  0x2c   : > { %1553 = vmatpush3.bf16.msra.mxu1 %v1722_v31  ;;  %1618 = vmatprep.subr.bf16.mxu0 %v1729_v36 }
  0x2d   : > { %1650 = vmatprep.subr.bf16.mxu1 %v1729_v36 }
  0x2e   : > { %845 = vmatmul.mubr.bf16.vlgmr.msra.gmra.mxu0 %v1723_v32 }
  0x2f   : > { %942 = vmatmul.mubr.bf16.vlgmr.msra.gmra.mxu1 %v1726_v34  ;;  %1619 = vmatpush3.bf16.msra.mxu0 %v1729_v36 }
  0x30   : > { %1658 = vmatpush3.bf16.msra.mxu1 %v1729_v36  ;;  %852 = vmatprep.mubr.bf16.mxu0 %v1730_v37 }
  0x31   : > { %949 = vmatprep.mubr.bf16.mxu1 %v1732_v38  ;;  %1620 = vmatprep.subr.bf16.mxu0 %v1736_v39 }
  0x32   : > { %1651 = vmatprep.subr.bf16.mxu1 %v1736_v39 }
  0x33   : > { %1621 = vmatpush3.bf16.msra.mxu0 %v1736_v39 }
  0x34   : > { %1659 = vmatpush3.bf16.msra.mxu1 %v1736_v39  ;;  %1622 = vmatprep.subr.bf16.mxu0 %v1743_v44 }
  0x35   : > { %1652 = vmatprep.subr.bf16.mxu1 %v1743_v44 }
  0x36   : > { %853 = vmatmul.mubr.bf16.gmra.mxu0 %v1734_v40 }
  0x37   : > { %950 = vmatmul.mubr.bf16.gmra.mxu1 %v1735_v41  ;;  %860 = vmatprep.mubr.bf16.mxu0 %v1737_v42 }
  0x38   : > { %957 = vmatprep.mubr.bf16.mxu1 %v1739_v43  ;;  %1623 = vmatpush3.bf16.msra.mxu0 %v1743_v44 }
  0x39   : > { %1660 = vmatpush3.bf16.msra.mxu1 %v1743_v44  ;;  %1624 = vmatprep.subr.bf16.mxu0 %v1750_v45 }
  0x3a   : > { %1653 = vmatprep.subr.bf16.mxu1 %v1750_v45 }
  0x3c   : > { %1625 = vmatpush3.bf16.msra.mxu0 %v1750_v45 }
  0x3d   : > { %1661 = vmatpush3.bf16.msra.mxu1 %v1750_v45  ;;  %1626 = vmatprep.subr.bf16.mxu0 %v1757_v50 }
  0x3e   : > { %861 = vmatmul.mubr.bf16.gmra.mxu0 %v1741_v46  ;;  %1654 = vmatprep.subr.bf16.mxu1 %v1757_v50 }
  0x3f   : > { %958 = vmatmul.mubr.bf16.gmra.mxu1 %v1742_v47  ;;  %868 = vmatprep.mubr.bf16.mxu0 %v1744_v48 }
  0x40   : > { %965 = vmatprep.mubr.bf16.mxu1 %v1746_v49  ;;  %1627 = vmatpush3.bf16.msra.mxu0 %v1757_v50 }
  0x41   : > { %1662 = vmatpush3.bf16.msra.mxu1 %v1757_v50  ;;  %1628 = vmatprep.subr.bf16.mxu0 %v1764_v51 }
  0x42   : > { %1655 = vmatprep.subr.bf16.mxu1 %v1764_v51 }
  0x44   : > { %1629 = vmatpush3.bf16.msra.mxu0 %v1764_v51 }
  0x45   : > { %1663 = vmatpush3.bf16.msra.mxu1 %v1764_v51  ;;  %1630 = vmatprep.subr.bf16.mxu0 %v1771_v55 }
  0x46   : > { %869 = vmatmul.mubr.bf16.gmra.mxu0 %v1748_v52  ;;  %1656 = vmatprep.subr.bf16.mxu1 %v1771_v55 }
  0x47   : > { %966 = vmatmul.mubr.bf16.gmra.mxu1 %v1749_v53  ;;  %876 = vmatprep.mubr.bf16.mxu0 %v1751_v54 }
  0x48   : > { %973 = vmatprep.mubr.bf16.mxu1 %v1753_v56  ;;  %1631 = vmatpush3.bf16.msra.mxu0 %v1771_v55 }
  0x49   : > { %1664 = vmatpush3.bf16.msra.mxu1 %v1771_v55  ;;  %1632 = vmatprep.subr.bf16.mxu0 %v1778_v57 }
  0x4a   : > { %1657 = vmatprep.subr.bf16.mxu1 %v1778_v57 }
  0x4c   : > { %1633 = vmatpush3.bf16.msra.mxu0 %v1778_v57 }
  0x4d   : > { %1665 = vmatpush3.bf16.msra.mxu1 %v1778_v57 }
  0x4e   : > { %877 = vmatmul.mubr.bf16.gmra.mxu0 %v1755_v58 }
  0x4f   : > { %974 = vmatmul.mubr.bf16.gmra.mxu1 %v1756_v59  ;;  %884 = vmatprep.mubr.bf16.mxu0 %v1758_v60 }
  0x50   : > { %981 = vmatprep.mubr.bf16.mxu1 %v1760_v61 }
  0x56   : > { %885 = vmatmul.mubr.bf16.gmra.mxu0 %v1762_v62 }
  0x57   : > { %982 = vmatmul.mubr.bf16.gmra.mxu1 %v1763_v63  ;;  %892 = vmatprep.mubr.bf16.mxu0 %v1765_v0 }
  0x58   : > { %989 = vmatprep.mubr.bf16.mxu1 %v1767_v1 }
  0x5e   : > { %893 = vmatmul.mubr.bf16.gmra.mxu0 %v1769_v2 }
  0x5f   : > { %990 = vmatmul.mubr.bf16.gmra.mxu1 %v1770_v3  ;;  %900 = vmatprep.mubr.bf16.mxu0 %v1772_v4 }
  0x60   : > { %997 = vmatprep.mubr.bf16.mxu1 %v1774_v5 }
  0x66   : > { %901 = vmatmul.mubr.bf16.gmra.mxu0 %v1776_v6 }
  0x67   : > { %998 = vmatmul.mubr.bf16.gmra.mxu1 %v1777_v7  ;;  %1634 = vmatprep.mubr.bf16.mxu0 %v1779_v8 }
  0x68   : > { %1642 = vmatprep.mubr.bf16.mxu1 %v1780_v9 }
  0x6e   : > { %1635 = vmatmul.mubr.bf16.vlgmr.msra.gmra.mxu0 %v1781_v10 }
  0x6f   : > { %1643 = vmatmul.mubr.bf16.vlgmr.msra.gmra.mxu1 %v1782_v11  ;;  %1638 = vmatprep.mubr.bf16.mxu0 %v1783_v12 }
  0x70   : > { %1646 = vmatprep.mubr.bf16.mxu1 %v1784_v13 }
  0x76   : > { %1639 = vmatmul.mubr.bf16.gmra.mxu0 %v1785_v14 }
  0x77   : > { %1647 = vmatmul.mubr.bf16.gmra.mxu1 %v1786_v15 }
  0xee   : > { %v1490_v16 = vpop.f32.mrf.mxu0 }
  0xef   : > { %v1554_v17 = vpop.f32.mrf.mxu1 }
  0xf0   : > { %v1491_v19 = vpop.f32.mrf.mxu0 }
  0xf1   : > { %v1492_v20 = vadd.f32 %v1491_v19, %v1490_v16  ;;  %v1555_v21 = vpop.f32.mrf.mxu1 }
  0xf2   : > { %v1493_v22 = vpop.f32.mrf.mxu0  ;;  %v1556_v24 = vadd.f32 %v1555_v21, %v1554_v17 }
  0xf3   : > { %v847_v23 = vadd.f32 %v1492_v20, %v2023_v18  ;;  %v2026_v25 = vpop.f32.mrf.mxu1 }
  0xf4   : > { %v1494_v26 = vpop.f32.mrf.mxu0 }
  0xf5   : > { %v2028_v27 = vpop.f32.mrf.mxu1  ;;  %v2030_v28 = vadd.f32 %v1556_v24, %v847_v23  ;;  %v1495_v10 = vadd.f32 %v1494_v26, %v1493_v22 }
  0xf6   : > { %v1496_v29 = vpop.f32.mrf.mxu0 }
  0xf7   : > { %2122 = vst [vmem:[#allocation2_spill] sm:$0xff] %v2030_v28  ;;  %v1560_v30 = vpop.f32.mrf.mxu1  ;;  %v850_v19 = vadd.f32 %v1495_v10, %v2023_v18 }
  0xf8   : > { %v1497_v31 = vpop.f32.mrf.mxu0 }
  0xf9   : > { %v1561_v32 = vpop.f32.mrf.mxu1  ;;  %v1498_v12 = vadd.f32 %v1497_v31, %v1496_v29  ;;  %v1559_v29 = vadd.f32 %v2028_v27, %v2026_v25 }
  0xfa   : > { %v1499_v33 = vpop.f32.mrf.mxu0  ;;  %v1562_v31 = vadd.f32 %v1561_v32, %v1560_v30 }
  0xfb   : > { %v1563_v34 = vpop.f32.mrf.mxu1  ;;  %v855_v23 = vadd.f32 %v1498_v12, %v2023_v18 }
  0xfc   : > { %v1500_v35 = vpop.f32.mrf.mxu0 }
  0xfd   : > { %v1564_v36 = vpop.f32.mrf.mxu1  ;;  %v1501_v13 = vadd.f32 %v1500_v35, %v1499_v33 }
  0xfe   : > { %v1502_v37 = vpop.f32.mrf.mxu0  ;;  %v1565_v33 = vadd.f32 %v1564_v36, %v1563_v34 }
  0xff   : > { %v1566_v38 = vpop.f32.mrf.mxu1  ;;  %v858_v24 = vadd.f32 %v1501_v13, %v2023_v18  ;;  %v947_v13 = vadd.f32 %v1559_v29, %v850_v19 }
 0x100   : > { %v1503_v39 = vpop.f32.mrf.mxu0 }
 0x101   : > { %v1567_v40 = vpop.f32.mrf.mxu1  ;;  %v1504_v14 = vadd.f32 %v1503_v39, %v1502_v37  ;;  %v955_v28 = vadd.f32 %v1565_v33, %v858_v24 }
 0x102   : > { %v1505_v41 = vpop.f32.mrf.mxu0  ;;  %v1568_v39 = vadd.f32 %v1567_v40, %v1566_v38 }
 0x103   : > { %v2032_v42 = vpop.f32.mrf.mxu1  ;;  %v863_v22 = vadd.f32 %v1504_v14, %v2023_v18  ;;  %v952_v14 = vadd.f32 %v1562_v31, %v855_v23 }
 0x104   : > { %v1506_v43 = vpop.f32.mrf.mxu0 }
 0x105   : > { %v2034_v44 = vpop.f32.mrf.mxu1  ;;  %v1507_v10 = vadd.f32 %v1506_v43, %v1505_v41  ;;  %v2064_v25 = vadd.f32 %v1568_v39, %v863_v22 }
 0x106   : > { %v1508_v45 = vpop.f32.mrf.mxu0  ;;  %v2068_v27 = vadd.f32 %v2034_v44, %v2032_v42 }
 0x107   : > { %v2036_v46 = vpop.f32.mrf.mxu1  ;;  %v2073_v38 = vadd.f32 %v1507_v10, %v2023_v18 }
 0x108   : > { %v1509_v47 = vpop.f32.mrf.mxu0 }
 0x109   : > { %v1573_v48 = vpop.f32.mrf.mxu1  ;;  %v1510_v20 = vadd.f32 %v1509_v47, %v1508_v45 }
 0x10a   : > { %v1511_v49 = vpop.f32.mrf.mxu0  ;;  %v1574_v30 = vadd.f32 %v1573_v48, %v2036_v46 }
 0x10b   : > { %v2038_v50 = vpop.f32.mrf.mxu1  ;;  %v871_v12 = vadd.f32 %v1510_v20, %v2023_v18 }
 0x10c   : > { %v1512_v51 = vpop.f32.mrf.mxu0 }
 0x10d   : > { %v2040_v52 = vpop.f32.mrf.mxu1  ;;  %v1513_v32 = vadd.f32 %v1512_v51, %v1511_v49 }
 0x10e   : > { %v1514_v53 = vpop.f32.mrf.mxu0 }
 0x10f   : > { %v2042_v54 = vpop.f32.mrf.mxu1 }
 0x110   : > { %v1515_v55 = vpop.f32.mrf.mxu0 }
 0x111   : > { %v1579_v56 = vpop.f32.mrf.mxu1  ;;  %v1516_v35 = vadd.f32 %v1515_v55, %v1514_v53 }
 0x112   : > { %v1517_v57 = vpop.f32.mrf.mxu0  ;;  %v1580_v55 = vadd.f32 %v1579_v56, %v2042_v54 }
 0x113   : > { %v1581_v58 = vpop.f32.mrf.mxu1  ;;  %v879_v34 = vadd.f32 %v1516_v35, %v2023_v18 }
 0x114   : > { %v1518_v59 = vpop.f32.mrf.mxu0 }
 0x115   : > { %v1582_v60 = vpop.f32.mrf.mxu1  ;;  %v1519_v45 = vadd.f32 %v1518_v59, %v1517_v57  ;;  %v968_v59 = vadd.f32 %v1574_v30, %v871_v12  ;;  %v976_v19 = vadd.f32 %v1580_v55, %v879_v34 }
 0x116   : > { %v1520_v61 = vpop.f32.mrf.mxu0  ;;  %v1583_v57 = vadd.f32 %v1582_v60, %v1581_v58 }
 0x117   : > { %v1584_v62 = vpop.f32.mrf.mxu1  ;;  %v882_v40 = vadd.f32 %v1519_v45, %v2023_v18 }
 0x118   : > { %v1521_v63 = vpop.f32.mrf.mxu0 }
 0x119   : > { %v1585_v0 = vpop.f32.mrf.mxu1  ;;  %v1522_v26 = vadd.f32 %v1521_v63, %v1520_v61  ;;  %v979_v60 = vadd.f32 %v1583_v57, %v882_v40 }
 0x11a   : > { %v1523_v1 = vpop.f32.mrf.mxu0  ;;  %v1586_v41 = vadd.f32 %v1585_v0, %v1584_v62  ;;  %v1577_v62 = vadd.f32 %v2040_v52, %v2038_v50 }
 0x11b   : > { %v1587_v2 = vpop.f32.mrf.mxu1  ;;  %v887_v61 = vadd.f32 %v1522_v26, %v2023_v18 }
 0x11c   : > { %v1524_v3 = vpop.f32.mrf.mxu0 }
 0x11d   : > { %v1588_v4 = vpop.f32.mrf.mxu1  ;;  %v1525_v47 = vadd.f32 %v1524_v3, %v1523_v1  ;;  %v984_v51 = vadd.f32 %v1586_v41, %v887_v61  ;;  %v874_v3 = vadd.f32 %v1513_v32, %v2023_v18 }
 0x11e   : > { %v1526_v5 = vpop.f32.mrf.mxu0  ;;  %v1589_v46 = vadd.f32 %v1588_v4, %v1587_v2 }
 0x11f   : > { %v2044_v6 = vpop.f32.mrf.mxu1  ;;  %v890_v43 = vadd.f32 %v1525_v47, %v2023_v18  ;;  %v971_v41 = vadd.f32 %v1577_v62, %v874_v3 }
 0x120   : > { %v1527_v7 = vpop.f32.mrf.mxu0 }
 0x121   : > { %v2046_v8 = vpop.f32.mrf.mxu1  ;;  %v1528_v48 = vadd.f32 %v1527_v7, %v1526_v5  ;;  %v987_v58 = vadd.f32 %v1589_v46, %v890_v43  ;;  %v2126_v5 = vld [vmem:[#allocation2_spill] sm:$0xff] }
 0x122   : > { %v1529_v9 = vpop.f32.mrf.mxu0  ;;  %v1592_v2 = vadd.f32 %v2046_v8, %v2044_v6 }
 0x123   : > { %v2048_v11 = vpop.f32.mrf.mxu1  ;;  %v895_v50 = vadd.f32 %v1528_v48, %v2023_v18 }
 0x124   : > { %2123 = vst [vmem:[#allocation3_spill] sm:$0xff] %v2048_v11  ;;  %v1530_v15 = vpop.f32.mrf.mxu0 }
 0x125   : > { %v2050_v16 = vpop.f32.mrf.mxu1  ;;  %v1531_v49 = vadd.f32 %v1530_v15, %v1529_v9  ;;  %v992_v34 = vadd.f32 %v1592_v2, %v895_v50 }
 0x126   : > { %2124 = vst [vmem:[#allocation4_spill] sm:$0xff] %v2050_v16  ;;  %v1532_v17 = vpop.f32.mrf.mxu0 }
 0x127   : > { %v2053_v21 = vpop.f32.mrf.mxu1  ;;  %v898_v52 = vadd.f32 %v1531_v49, %v2023_v18  ;;  %v963_v49 = vadd.f32 %v2068_v27, %v2073_v38 }
 0x128   : > { %2125 = vst [vmem:[#allocation5_spill] sm:$0xff] %v2053_v21  ;;  %v1533_v11 = vpop.f32.mrf.mxu0 }
 0x129   : > { %v1597_v37 = vpop.f32.mrf.mxu1  ;;  %v1534_v42 = vadd.f32 %v1533_v11, %v1532_v17 }
 0x12a   : > { %v1535_v16 = vpop.f32.mrf.mxu0 }
 0x12b   : > { %v2061_v21 = vpop.f32.mrf.mxu1  ;;  %v903_v4 = vadd.f32 %v1534_v42, %v2023_v18  ;;  %v2128_v43 = vld [vmem:[#allocation3_spill] sm:$0xff] }
 0x12c   : > { %v1536_v63 = vpop.f32.mrf.mxu0 }
 0x12d   : > { %v1600_v36 = vpop.f32.mrf.mxu1  ;;  %v1537_v23 = vadd.f32 %v1536_v63, %v1535_v16 }
 0x12e   : > { %v1636_v53 = vpop.f32.mrf.mxu0 }
 0x12f   : > { %v1644_v44 = vpop.f32.mrf.mxu1  ;;  %v1049_v0 = vadd.f32 %v1636_v53, %v952_v14  ;;  %v2127_v24 = vld [vmem:[#allocation5_spill] sm:$0xff]  ;;  %v906_v8 = vadd.f32 %v1537_v23, %v2023_v18  ;;  %v2129_v53 = vld [vmem:[#allocation4_spill] sm:$0xff] }
 0x130   : > { %v1040_v1 = vpop.f32.mrf.mxu0  ;;  %v1081_v54 = vadd.f32 %v1644_v44, %v984_v51  ;;  %v1598_v22 = vadd.f32 %v1597_v37, %v2127_v24  ;;  %v1595_v55 = vadd.f32 %v2129_v53, %v2128_v43 }
 0x131   : > { %v1072_v20 = vpop.f32.mrf.mxu1  ;;  %v1041_v7 = vadd.f32 %v1040_v1, %v2126_v5  ;;  %v1105_v26 = vmax.f32 %v1049_v0, 0.0 }
 0x132   : > { %v1637_v56 = vpop.f32.mrf.mxu0  ;;  %v1073_v15 = vadd.f32 %v1072_v20, %v976_v19  ;;  %v1113_v33 = vmax.f32 %v1081_v54, 0.0  ;;  %v1000_v47 = vadd.f32 %v1598_v22, %v903_v4  ;;  %v995_v3 = vadd.f32 %v1595_v55, %v898_v52 }
 0x133   : > { %v1052_v9 = vadd.f32 %v1637_v56, %v955_v28  ;;  %v1645_v11 = vpop.f32.mrf.mxu1  ;;  %v1103_v10 = vmax.f32 %v1041_v7, 0.0 }
 0x134   : > { %v1084_v16 = vadd.f32 %v1645_v11, %v987_v58  ;;  %v1043_v17 = vpop.f32.mrf.mxu0  ;;  %v1111_v61 = vmax.f32 %v1073_v15, 0.0 }
 0x135   : > { %v1106_v29 = vmax.f32 %v1052_v9, 0.0  ;;  %v1044_v31 = vadd.f32 %v1043_v17, %v947_v13  ;;  %v1075_v6 = vpop.f32.mrf.mxu1  ;;  %v1601_v13 = vadd.f32 %v1600_v36, %v2061_v21 }
 0x136   : > { %v1114_v28 = vmax.f32 %v1084_v16, 0.0  ;;  %v1076_v35 = vadd.f32 %v1075_v6, %v979_v60  ;;  %v1640_v39 = vpop.f32.mrf.mxu0 }
 0x137   : > { %v1435_v45 = vpack.c.bf16 %v1106_v29, %v1105_v26  ;;  %v1104_v37 = vmax.f32 %v1044_v31, 0.0  ;;  %v1648_v12 = vpop.f32.mrf.mxu1  ;;  %v1065_v32 = vadd.f32 %v1640_v39, %v968_v59  ;;  %v1003_v21 = vadd.f32 %v1601_v13, %v906_v8 }
 0x138   : > { %v1455_v18 = vpack.c.bf16 %v1114_v28, %v1113_v33  ;;  %v1112_v63 = vmax.f32 %v1076_v35, 0.0  ;;  %v1056_v14 = vpop.f32.mrf.mxu0  ;;  %v1097_v42 = vadd.f32 %v1648_v12, %v1000_v47 }
 0x139   : > { %1467 = vst [vmem:[%s2093_s8 + $0x8] sm:$0xff] %v1435_v45   ;;  %v1430_v30 = vpack.c.bf16 %v1104_v37, %v1103_v10  ;;  %v1088_v40 = vpop.f32.mrf.mxu1  ;;  %v1057_v36 = vadd.f32 %v1056_v14, %v2064_v25  ;;  %v1109_v62 = vmax.f32 %v1065_v32, 0.0 }
 0x13a   : > { %1471 = vst [vmem:[%s2093_s8 + $0x28] sm:$0xff] %v1455_v18   ;;  %v1450_v57 = vpack.c.bf16 %v1112_v63, %v1111_v61  ;;  %v1641_v44 = vpop.f32.mrf.mxu0  ;;  %v1089_v59 = vadd.f32 %v1088_v40, %v992_v34  ;;  %v1117_v23 = vmax.f32 %v1097_v42, 0.0 }
 0x13b   : > { %1431 = vst [vmem:[%s2093_s8] sm:$0xff] %v1430_v30   ;;  %v1068_v46 = vadd.f32 %v1641_v44, %v971_v41  ;;  %v1649_v48 = vpop.f32.mrf.mxu1  ;;  %v1107_v56 = vmax.f32 %v1057_v36, 0.0 }
 0x13c   : > { %1470 = vst [vmem:[%s2093_s8 + $0x20] sm:$0xff] %v1450_v57   ;;  %v1100_v51 = vadd.f32 %v1649_v48, %v1003_v21  ;;  %v1059_v1 = vpop.f32.mrf.mxu0  ;;  %v1115_v27 = vmax.f32 %v1089_v59, 0.0 }
 0x13d   : > { %v1110_v0 = vmax.f32 %v1068_v46, 0.0  ;;  %v1060_v19 = vadd.f32 %v1059_v1, %v963_v49  ;;  %v1091_v20 = vpop.f32.mrf.mxu1 }
 0x13e   : > { %v1118_v25 = vmax.f32 %v1100_v51, 0.0  ;;  %v1092_v54 = vadd.f32 %v1091_v20, %v995_v3 }
 0x13f   : > { %v1445_v58 = vpack.c.bf16 %v1110_v0, %v1109_v62  ;;  %v1108_v60 = vmax.f32 %v1060_v19, 0.0 }
 0x140   : > { %v1465_v38 = vpack.c.bf16 %v1118_v25, %v1117_v23  ;;  %v1116_v2 = vmax.f32 %v1092_v54, 0.0 }
 0x141   : > { %1469 = vst [vmem:[%s2093_s8 + $0x18] sm:$0xff] %v1445_v58   ;;  %v1440_v4 = vpack.c.bf16 %v1108_v60, %v1107_v56 }
 0x142   : > { %1473 = vst [vmem:[%s2093_s8 + $0x38] sm:$0xff] %v1465_v38   ;;  %v1460_v5 = vpack.c.bf16 %v1116_v2, %v1115_v27 }
 0x143   : > { %1468 = vst [vmem:[%s2093_s8 + $0x10] sm:$0xff] %v1440_v4  }
 0x144   : > { %1472 = vst [vmem:[%s2093_s8 + $0x30] sm:$0xff] %v1460_v5  }
 0x145 PF: > { %s13_s14 = sadd.s32 1, %s1809_s14   ;;  %s2130_s12 = smov %s1805_s13 }
 0x146   : > { %p10_p5 = scmp.ge.s32.totalorder %s13_s14, 4   ;;  %s2131_s13 = smov %s2133_s15 }
 0x148   :  { %12 = sbr.rel (!%p10_p5) target bundleno = 2 (0x2), region = 68 }

// kernel: crnn_ctc_forward.20
= control target key start
LH: loop header
LB: loop body
LE: loop exit
PB: predicated region body
PF: predicated region fallthrough
CT: control target
= control target key end

     0   :  { %s1815_s12 = smov 0   ;;  %s1817_s13 = smov 0   ;;  %s2123_s0 = inlined_call_operand.vmem [shape: bf16[256,640], index: 0, kind: input, shape index: {}]   ;;  %s2124_s1 = inlined_call_operand.vmem [shape: bf16[640,128], index: 1, kind: input, shape index: {}]   ;;  %s2125_s2 = inlined_call_operand.vmem [shape: f32[1,128], index: 2, kind: input, shape index: {}]   ;;  %s2126_s3 = inlined_call_operand.vmem [shape: bf16[256,128], index: 3, kind: output, shape index: {}]  }
   0x1   :  { %s1819_s14 = smov 0  }
   0x2 LB: > { %s25_s15 = sadd.s32 1, %s1789_s13  ;;  %p1291_p0 = scmp.ge.s32.totalorder %s1793_s14, 1  ;;  %s1793_s14 = sphi %s1819_s14, %s13_s14   ;;  %s1789_s13 = sphi %s1817_s13, %s2138_s13   ;;  %s1785_s12 = sphi %s1815_s12, %s2137_s12  }
   0x3   : > { %p27_p1 = scmp.ge.s32.totalorder %s25_s15, 2  ;;  %p170_p2 = scmp.lt.s32.totalorder %s1793_s14, 3 }
   0x5   : > { %s2140_s15 = smov (%p27_p1, %s25_s15), 0  ;;  %p171_p3 = pnand %p1291_p0, %p170_p2 }
   0x7   : > { %174 = sbr.rel (%p171_p3) target bundleno = 323 (0x143), region = 32 }
   0xc   : > { %v1675_v0 = vld [vmem:[%s2124_s1 + $0x78] sm:$0xff]   ;;  %v1679_v4 = vld [vmem:[%s2124_s1 + $0x70] sm:$0xff]   ;;  %v1683_v8 = vld [vmem:[%s2124_s1 + $0x68] sm:$0xff]   ;;  %s1292_s23 = sshll.u32 %s1785_s12, 4 }
   0xd   : > { %v1676_v1 = vld [vmem:[%s2124_s1 + $0xf8] sm:$0xff]   ;;  %1458 = vmatprep.subr.bf16.mxu0 %v1675_v0  ;;  %v1680_v5 = vld [vmem:[%s2124_s1 + $0xf0] sm:$0xff]   ;;  %v1684_v9 = vld [vmem:[%s2124_s1 + $0xe8] sm:$0xff]   ;;  %p206_p4 = scmp.lt.s32.totalorder %s1292_s23, 31 }
   0xe   : > { %v1677_v2 = vld [vmem:[%s2124_s1 + $0x38] sm:$0xff]   ;;  %1522 = vmatprep.subr.bf16.mxu1 %v1676_v1  ;;  %v1681_v6 = vld [vmem:[%s2124_s1 + $0x30] sm:$0xff]   ;;  %v1685_v10 = vld [vmem:[%s2124_s1 + $0x28] sm:$0xff]  }
   0xf   : > { %v1678_v3 = vld [vmem:[%s2124_s1 + $0xb8] sm:$0xff]   ;;  %1459 = vmatpush3.bf16.msra.mxu0 %v1677_v2  ;;  %v1682_v7 = vld [vmem:[%s2124_s1 + $0xb0] sm:$0xff]   ;;  %v1686_v11 = vld [vmem:[%s2124_s1 + $0xa8] sm:$0xff]   ;;  %s2142_s23 = smov (!%p206_p4, %s1292_s23), 31 }
  0x10   : > { %1523 = vmatpush3.bf16.msra.mxu1 %v1678_v3  ;;  %1460 = vmatprep.subr.bf16.mxu0 %v1679_v4  ;;  %v1687_v12 = vld [vmem:[%s2124_s1 + $0x60] sm:$0xff]   ;;  %v1691_v16 = vld [vmem:[%s2124_s1 + $0x58] sm:$0xff]   ;;  %v1695_v20 = vld [vmem:[%s2124_s1 + $0x50] sm:$0xff]   ;;  %s1650_s22 = smul.u32 20, %s2142_s23 }
  0x11   : > { %1524 = vmatprep.subr.bf16.mxu1 %v1680_v5  ;;  %v1688_v13 = vld [vmem:[%s2124_s1 + $0xe0] sm:$0xff]   ;;  %v1692_v17 = vld [vmem:[%s2124_s1 + $0xd8] sm:$0xff]   ;;  %v1696_v21 = vld [vmem:[%s2124_s1 + $0xd0] sm:$0xff]  }
  0x12   : > { %v1689_v14 = vld [vmem:[%s2124_s1 + $0x20] sm:$0xff]   ;;  %v1693_v18 = vld [vmem:[%s2124_s1 + $0x18] sm:$0xff]   ;;  %v1697_v22 = vld [vmem:[%s2124_s1 + $0x10] sm:$0xff]   ;;  %s1932_s6 = scalar_lea.vmem %s2123_s0, %s1650_s22 }
  0x13   : > { %1461 = vmatpush3.bf16.msra.mxu0 %v1681_v6  ;;  %v1690_v15 = vld [vmem:[%s2124_s1 + $0xa0] sm:$0xff]   ;;  %v1694_v19 = vld [vmem:[%s2124_s1 + $0x98] sm:$0xff]   ;;  %v1698_v23 = vld [vmem:[%s2124_s1 + $0x90] sm:$0xff]  }
  0x14   : > { %1525 = vmatpush3.bf16.msra.mxu1 %v1682_v7  ;;  %1462 = vmatprep.subr.bf16.mxu0 %v1683_v8  ;;  %v1699_v24 = vld [vmem:[%s2124_s1 + $0x48] sm:$0xff]   ;;  %v1703_v28 = vld [vmem:[%s2124_s1 + $0x40] sm:$0xff]   ;;  %v1713_v36 = vld [vmem:[%s2124_s1 + $0x138] sm:$0xff]  }
  0x15   : > { %1526 = vmatprep.subr.bf16.mxu1 %v1684_v9  ;;  %v1700_v25 = vld [vmem:[%s2124_s1 + $0xc8] sm:$0xff]   ;;  %v1704_v29 = vld [vmem:[%s2124_s1 + $0xc0] sm:$0xff]   ;;  %v1720_v39 = vld [vmem:[%s2124_s1 + $0x130] sm:$0xff]  }
  0x16   : > { %v1701_v26 = vld [vmem:[%s2124_s1 + $0x8] sm:$0xff]   ;;  %v1705_v30 = vld [vmem:[%s2124_s1] sm:$0xff]   ;;  %v1723_v43 = vld [vmem:[%s1932_s6 + $0x5c] ss:$20 sps:$4 sm:$0xff]  }
  0x17   : > { %1463 = vmatpush3.bf16.msra.mxu0 %v1685_v10  ;;  %v1702_v27 = vld [vmem:[%s2124_s1 + $0x88] sm:$0xff]   ;;  %v1706_v31 = vld [vmem:[%s2124_s1 + $0x80] sm:$0xff]   ;;  %v1728_v48 = vld [vmem:[%s1932_s6 + $0x7c] ss:$20 sps:$4 sm:$0xff]  }
  0x18   : > { %1527 = vmatpush3.bf16.msra.mxu1 %v1686_v11  ;;  %1464 = vmatprep.subr.bf16.mxu0 %v1687_v12  ;;  %v1707_v32 = vld [vmem:[%s1932_s6] ss:$20 sps:$4 sm:$0xff]   ;;  %v1709_v33 = vld [vmem:[%s1932_s6 + $0x4] ss:$20 sps:$4 sm:$0xff]   ;;  %v1710_v34 = vld [vmem:[%s1932_s6 + $0x8] ss:$20 sps:$4 sm:$0xff]  }
  0x19   : > { %1528 = vmatprep.subr.bf16.mxu1 %v1688_v13  ;;  %v1712_v35 = vld [vmem:[%s1932_s6 + $0xc] ss:$20 sps:$4 sm:$0xff]   ;;  %844 = vmatprep.mubr.bf16.mxu0 %v1709_v33  ;;  %v1716_v38 = vld [vmem:[%s1932_s6 + $0x34] ss:$20 sps:$4 sm:$0xff]   ;;  %v1719_v41 = vld [vmem:[%s1932_s6 + $0x30] ss:$20 sps:$4 sm:$0xff]  }
  0x1a   : > { %941 = vmatprep.mubr.bf16.mxu1 %v1712_v35  ;;  %v1714_v37 = vld [vmem:[%s1932_s6 + $0x2c] ss:$20 sps:$4 sm:$0xff]   ;;  %v1718_v40 = vld [vmem:[%s1932_s6 + $0x28] ss:$20 sps:$4 sm:$0xff]   ;;  %v1725_v46 = vld [vmem:[%s1932_s6 + $0x50] ss:$20 sps:$4 sm:$0xff]  }
  0x1b   : > { %1465 = vmatpush3.bf16.msra.mxu0 %v1689_v14  ;;  %v1721_v42 = vld [vmem:[%s1932_s6 + $0x54] ss:$20 sps:$4 sm:$0xff]   ;;  %v1734_v45 = vld [vmem:[%s2124_s1 + $0x120] sm:$0xff]   ;;  %v1726_v47 = vld [vmem:[%s1932_s6 + $0x58] ss:$20 sps:$4 sm:$0xff]  }
  0x1c   : > { %1529 = vmatpush3.bf16.msra.mxu1 %v1690_v15  ;;  %1466 = vmatprep.subr.bf16.mxu0 %v1691_v16  ;;  %v1727_v44 = vld [vmem:[%s2124_s1 + $0x128] sm:$0xff]   ;;  %v1730_v49 = vld [vmem:[%s1932_s6 + $0x84] ss:$20 sps:$4 sm:$0xff]   ;;  %v1748_v51 = vld [vmem:[%s2124_s1 + $0x110] sm:$0xff]  }
  0x1d   : > { %1530 = vmatprep.subr.bf16.mxu1 %v1692_v17  ;;  %v1741_v50 = vld [vmem:[%s2124_s1 + $0x118] sm:$0xff]   ;;  %v1733_v53 = vld [vmem:[%s1932_s6 + $0x80] ss:$20 sps:$4 sm:$0xff]   ;;  %v1755_v55 = vld [vmem:[%s2124_s1 + $0x108] sm:$0xff]  }
  0x1e   : > { %v1732_v52 = vld [vmem:[%s1932_s6 + $0x78] ss:$20 sps:$4 sm:$0xff]   ;;  %v1762_v57 = vld [vmem:[%s2124_s1 + $0x100] sm:$0xff]   ;;  %v1740_v59 = vld [vmem:[%s1932_s6 + $0xa8] ss:$20 sps:$4 sm:$0xff]  }
  0x1f   : > { %1467 = vmatpush3.bf16.msra.mxu0 %v1693_v18  ;;  %v1735_v54 = vld [vmem:[%s1932_s6 + $0xa4] ss:$20 sps:$4 sm:$0xff]   ;;  %v1737_v56 = vld [vmem:[%s1932_s6 + $0xac] ss:$20 sps:$4 sm:$0xff]   ;;  %v1744_v61 = vld [vmem:[%s1932_s6 + $0xd4] ss:$20 sps:$4 sm:$0xff]  }
  0x20   : > { %1531 = vmatpush3.bf16.msra.mxu1 %v1694_v19  ;;  %1468 = vmatprep.subr.bf16.mxu0 %v1695_v20  ;;  %v1739_v58 = vld [vmem:[%s1932_s6 + $0xa0] ss:$20 sps:$4 sm:$0xff]   ;;  %v1746_v62 = vld [vmem:[%s1932_s6 + $0xc8] ss:$20 sps:$4 sm:$0xff]   ;;  %v1747_v63 = vld [vmem:[%s1932_s6 + $0xd0] ss:$20 sps:$4 sm:$0xff]  }
  0x21   : > { %1532 = vmatprep.subr.bf16.mxu1 %v1696_v21  ;;  %v1742_v60 = vld [vmem:[%s1932_s6 + $0xcc] ss:$20 sps:$4 sm:$0xff]   ;;  %v1749_v0 = vld [vmem:[%s1932_s6 + $0xf4] ss:$20 sps:$4 sm:$0xff]   ;;  %v1751_v1 = vld [vmem:[%s1932_s6 + $0xfc] ss:$20 sps:$4 sm:$0xff]  }
  0x22   : > { %v1753_v2 = vld [vmem:[%s1932_s6 + $0xf0] ss:$20 sps:$4 sm:$0xff]   ;;  %v1754_v3 = vld [vmem:[%s1932_s6 + $0xf8] ss:$20 sps:$4 sm:$0xff]   ;;  %v1761_v7 = vld [vmem:[%s1932_s6 + $0x120] ss:$20 sps:$4 sm:$0xff]  }
  0x23   : > { %1469 = vmatpush3.bf16.msra.mxu0 %v1697_v22  ;;  %v1756_v4 = vld [vmem:[%s1932_s6 + $0x11c] ss:$20 sps:$4 sm:$0xff]   ;;  %v1758_v5 = vld [vmem:[%s1932_s6 + $0x124] ss:$20 sps:$4 sm:$0xff]   ;;  %v1767_v12 = vld [vmem:[%s1932_s6 + $0x60] ss:$20 sps:$4 sm:$0xff]  }
  0x24   : > { %1533 = vmatpush3.bf16.msra.mxu1 %v1698_v23  ;;  %1470 = vmatprep.subr.bf16.mxu0 %v1699_v24  ;;  %v1760_v6 = vld [vmem:[%s1932_s6 + $0x118] ss:$20 sps:$4 sm:$0xff]   ;;  %v1763_v8 = vld [vmem:[%s1932_s6 + $0x10] ss:$20 sps:$4 sm:$0xff]   ;;  %v1768_v13 = vld [vmem:[%s1932_s6 + $0x100] ss:$20 sps:$4 sm:$0xff]  }
  0x25   : > { %1534 = vmatprep.subr.bf16.mxu1 %v1700_v25  ;;  %v1764_v9 = vld [vmem:[%s1932_s6 + $0xb0] ss:$20 sps:$4 sm:$0xff]   ;;  %v1765_v10 = vld [vmem:[%s1932_s6 + $0x38] ss:$20 sps:$4 sm:$0xff]   ;;  %v1769_v14 = vld [vmem:[%s1932_s6 + $0x88] ss:$20 sps:$4 sm:$0xff]  }
  0x26   : > { %v1766_v11 = vld [vmem:[%s1932_s6 + $0xd8] ss:$20 sps:$4 sm:$0xff]   ;;  %v1770_v15 = vld [vmem:[%s1932_s6 + $0x128] ss:$20 sps:$4 sm:$0xff]   ;;  %v2007_v18 = vld [vmem:[%s2125_s2] ss:$0 sm:$0xff] }
  0x27   : > { %1471 = vmatpush3.bf16.msra.mxu0 %v1701_v26  ;;  %s1295_s6 = sshll.u32 %s2142_s23, 2 }
  0x28   : > { %1535 = vmatpush3.bf16.msra.mxu1 %v1702_v27  ;;  %1472 = vmatprep.subr.bf16.mxu0 %v1703_v28  ;;  %s2082_s9 = scalar_lea.vmem %s2126_s3, %s1295_s6 }
  0x29   : > { %1536 = vmatprep.subr.bf16.mxu1 %v1704_v29 }
  0x2b   : > { %1473 = vmatpush3.bf16.msra.mxu0 %v1705_v30 }
  0x2c   : > { %1537 = vmatpush3.bf16.msra.mxu1 %v1706_v31  ;;  %1602 = vmatprep.subr.bf16.mxu0 %v1713_v36 }
  0x2d   : > { %1634 = vmatprep.subr.bf16.mxu1 %v1713_v36 }
  0x2e   : > { %845 = vmatmul.mubr.bf16.vlgmr.msra.gmra.mxu0 %v1707_v32 }
  0x2f   : > { %942 = vmatmul.mubr.bf16.vlgmr.msra.gmra.mxu1 %v1710_v34  ;;  %1603 = vmatpush3.bf16.msra.mxu0 %v1713_v36 }
  0x30   : > { %1642 = vmatpush3.bf16.msra.mxu1 %v1713_v36  ;;  %852 = vmatprep.mubr.bf16.mxu0 %v1714_v37 }
  0x31   : > { %949 = vmatprep.mubr.bf16.mxu1 %v1716_v38  ;;  %1604 = vmatprep.subr.bf16.mxu0 %v1720_v39 }
  0x32   : > { %1635 = vmatprep.subr.bf16.mxu1 %v1720_v39 }
  0x33   : > { %1605 = vmatpush3.bf16.msra.mxu0 %v1720_v39 }
  0x34   : > { %1643 = vmatpush3.bf16.msra.mxu1 %v1720_v39  ;;  %1606 = vmatprep.subr.bf16.mxu0 %v1727_v44 }
  0x35   : > { %1636 = vmatprep.subr.bf16.mxu1 %v1727_v44 }
  0x36   : > { %853 = vmatmul.mubr.bf16.gmra.mxu0 %v1718_v40 }
  0x37   : > { %950 = vmatmul.mubr.bf16.gmra.mxu1 %v1719_v41  ;;  %860 = vmatprep.mubr.bf16.mxu0 %v1721_v42 }
  0x38   : > { %957 = vmatprep.mubr.bf16.mxu1 %v1723_v43  ;;  %1607 = vmatpush3.bf16.msra.mxu0 %v1727_v44 }
  0x39   : > { %1644 = vmatpush3.bf16.msra.mxu1 %v1727_v44  ;;  %1608 = vmatprep.subr.bf16.mxu0 %v1734_v45 }
  0x3a   : > { %1637 = vmatprep.subr.bf16.mxu1 %v1734_v45 }
  0x3c   : > { %1609 = vmatpush3.bf16.msra.mxu0 %v1734_v45 }
  0x3d   : > { %1645 = vmatpush3.bf16.msra.mxu1 %v1734_v45  ;;  %1610 = vmatprep.subr.bf16.mxu0 %v1741_v50 }
  0x3e   : > { %861 = vmatmul.mubr.bf16.gmra.mxu0 %v1725_v46  ;;  %1638 = vmatprep.subr.bf16.mxu1 %v1741_v50 }
  0x3f   : > { %958 = vmatmul.mubr.bf16.gmra.mxu1 %v1726_v47  ;;  %868 = vmatprep.mubr.bf16.mxu0 %v1728_v48 }
  0x40   : > { %965 = vmatprep.mubr.bf16.mxu1 %v1730_v49  ;;  %1611 = vmatpush3.bf16.msra.mxu0 %v1741_v50 }
  0x41   : > { %1646 = vmatpush3.bf16.msra.mxu1 %v1741_v50  ;;  %1612 = vmatprep.subr.bf16.mxu0 %v1748_v51 }
  0x42   : > { %1639 = vmatprep.subr.bf16.mxu1 %v1748_v51 }
  0x44   : > { %1613 = vmatpush3.bf16.msra.mxu0 %v1748_v51 }
  0x45   : > { %1647 = vmatpush3.bf16.msra.mxu1 %v1748_v51  ;;  %1614 = vmatprep.subr.bf16.mxu0 %v1755_v55 }
  0x46   : > { %869 = vmatmul.mubr.bf16.gmra.mxu0 %v1732_v52  ;;  %1640 = vmatprep.subr.bf16.mxu1 %v1755_v55 }
  0x47   : > { %966 = vmatmul.mubr.bf16.gmra.mxu1 %v1733_v53  ;;  %876 = vmatprep.mubr.bf16.mxu0 %v1735_v54 }
  0x48   : > { %973 = vmatprep.mubr.bf16.mxu1 %v1737_v56  ;;  %1615 = vmatpush3.bf16.msra.mxu0 %v1755_v55 }
  0x49   : > { %1648 = vmatpush3.bf16.msra.mxu1 %v1755_v55  ;;  %1616 = vmatprep.subr.bf16.mxu0 %v1762_v57 }
  0x4a   : > { %1641 = vmatprep.subr.bf16.mxu1 %v1762_v57 }
  0x4c   : > { %1617 = vmatpush3.bf16.msra.mxu0 %v1762_v57 }
  0x4d   : > { %1649 = vmatpush3.bf16.msra.mxu1 %v1762_v57 }
  0x4e   : > { %877 = vmatmul.mubr.bf16.gmra.mxu0 %v1739_v58 }
  0x4f   : > { %974 = vmatmul.mubr.bf16.gmra.mxu1 %v1740_v59  ;;  %884 = vmatprep.mubr.bf16.mxu0 %v1742_v60 }
  0x50   : > { %981 = vmatprep.mubr.bf16.mxu1 %v1744_v61 }
  0x56   : > { %885 = vmatmul.mubr.bf16.gmra.mxu0 %v1746_v62 }
  0x57   : > { %982 = vmatmul.mubr.bf16.gmra.mxu1 %v1747_v63  ;;  %892 = vmatprep.mubr.bf16.mxu0 %v1749_v0 }
  0x58   : > { %989 = vmatprep.mubr.bf16.mxu1 %v1751_v1 }
  0x5e   : > { %893 = vmatmul.mubr.bf16.gmra.mxu0 %v1753_v2 }
  0x5f   : > { %990 = vmatmul.mubr.bf16.gmra.mxu1 %v1754_v3  ;;  %900 = vmatprep.mubr.bf16.mxu0 %v1756_v4 }
  0x60   : > { %997 = vmatprep.mubr.bf16.mxu1 %v1758_v5 }
  0x66   : > { %901 = vmatmul.mubr.bf16.gmra.mxu0 %v1760_v6 }
  0x67   : > { %998 = vmatmul.mubr.bf16.gmra.mxu1 %v1761_v7  ;;  %1618 = vmatprep.mubr.bf16.mxu0 %v1763_v8 }
  0x68   : > { %1626 = vmatprep.mubr.bf16.mxu1 %v1764_v9 }
  0x6e   : > { %1619 = vmatmul.mubr.bf16.vlgmr.msra.gmra.mxu0 %v1765_v10 }
  0x6f   : > { %1627 = vmatmul.mubr.bf16.vlgmr.msra.gmra.mxu1 %v1766_v11  ;;  %1622 = vmatprep.mubr.bf16.mxu0 %v1767_v12 }
  0x70   : > { %1630 = vmatprep.mubr.bf16.mxu1 %v1768_v13 }
  0x76   : > { %1623 = vmatmul.mubr.bf16.gmra.mxu0 %v1769_v14 }
  0x77   : > { %1631 = vmatmul.mubr.bf16.gmra.mxu1 %v1770_v15 }
  0xee   : > { %v1474_v16 = vpop.f32.mrf.mxu0 }
  0xef   : > { %v1538_v17 = vpop.f32.mrf.mxu1 }
  0xf0   : > { %v1475_v19 = vpop.f32.mrf.mxu0 }
  0xf1   : > { %v1476_v20 = vadd.f32 %v1475_v19, %v1474_v16  ;;  %v1539_v21 = vpop.f32.mrf.mxu1 }
  0xf2   : > { %v1477_v22 = vpop.f32.mrf.mxu0  ;;  %v1540_v24 = vadd.f32 %v1539_v21, %v1538_v17 }
  0xf3   : > { %v847_v23 = vadd.f32 %v1476_v20, %v2007_v18  ;;  %v2010_v25 = vpop.f32.mrf.mxu1 }
  0xf4   : > { %v1478_v26 = vpop.f32.mrf.mxu0 }
  0xf5   : > { %v2012_v27 = vpop.f32.mrf.mxu1  ;;  %v2014_v28 = vadd.f32 %v1540_v24, %v847_v23  ;;  %v1479_v13 = vadd.f32 %v1478_v26, %v1477_v22 }
  0xf6   : > { %v1480_v29 = vpop.f32.mrf.mxu0  ;;  %v1543_v26 = vadd.f32 %v2012_v27, %v2010_v25 }
  0xf7   : > { %v2016_v30 = vpop.f32.mrf.mxu1  ;;  %v850_v21 = vadd.f32 %v1479_v13, %v2007_v18 }
  0xf8   : > { %v1481_v31 = vpop.f32.mrf.mxu0 }
  0xf9   : > { %v2018_v32 = vpop.f32.mrf.mxu1  ;;  %v1482_v15 = vadd.f32 %v1481_v31, %v1480_v29 }
  0xfa   : > { %v1483_v33 = vpop.f32.mrf.mxu0 }
  0xfb   : > { %v2020_v34 = vpop.f32.mrf.mxu1 }
  0xfc   : > { %v1484_v35 = vpop.f32.mrf.mxu0 }
  0xfd   : > { %v1548_v36 = vpop.f32.mrf.mxu1  ;;  %v1485_v16 = vadd.f32 %v1484_v35, %v1483_v33  ;;  %v1546_v35 = vadd.f32 %v2018_v32, %v2016_v30 }
  0xfe   : > { %v1486_v37 = vpop.f32.mrf.mxu0 }
  0xff   : > { %v2022_v38 = vpop.f32.mrf.mxu1 }
 0x100   : > { %v1487_v39 = vpop.f32.mrf.mxu0 }
 0x101   : > { %v2024_v40 = vpop.f32.mrf.mxu1 }
 0x102   : > { %v1489_v41 = vpop.f32.mrf.mxu0 }
 0x103   : > { %v2026_v42 = vpop.f32.mrf.mxu1 }
 0x104   : > { %v1490_v43 = vpop.f32.mrf.mxu0 }
 0x105   : > { %v2028_v44 = vpop.f32.mrf.mxu1  ;;  %v1491_v29 = vadd.f32 %v1490_v43, %v1489_v41 }
 0x106   : > { %2127 = vst [vmem:[#allocation2_spill] sm:$0xff] %v2028_v44  ;;  %v1492_v45 = vpop.f32.mrf.mxu0  ;;  %v1488_v44 = vadd.f32 %v1487_v39, %v1486_v37 }
 0x107   : > { %v2030_v46 = vpop.f32.mrf.mxu1  ;;  %v2071_v32 = vadd.f32 %v1491_v29, %v2007_v18 }
 0x108   : > { %v1493_v47 = vpop.f32.mrf.mxu0  ;;  %v2067_v25 = vadd.f32 %v1488_v44, %v2007_v18 }
 0x109   : > { %v2032_v48 = vpop.f32.mrf.mxu1 }
 0x10a   : > { %v1495_v49 = vpop.f32.mrf.mxu0  ;;  %v1558_v29 = vadd.f32 %v2032_v48, %v2030_v46  ;;  %v1552_v46 = vadd.f32 %v2024_v40, %v2022_v38 }
 0x10b   : > { %v2034_v50 = vpop.f32.mrf.mxu1 }
 0x10c   : > { %v1496_v51 = vpop.f32.mrf.mxu0  ;;  %v960_v38 = vadd.f32 %v1552_v46, %v2067_v25 }
 0x10d   : > { %v2036_v52 = vpop.f32.mrf.mxu1  ;;  %v2132_v48 = vld [vmem:[#allocation2_spill] sm:$0xff] }
 0x10e   : > { %v1498_v53 = vpop.f32.mrf.mxu0 }
 0x10f   : > { %v2038_v54 = vpop.f32.mrf.mxu1 }
 0x110   : > { %v1499_v55 = vpop.f32.mrf.mxu0 }
 0x111   : > { %v1563_v56 = vpop.f32.mrf.mxu1 }
 0x112   : > { %v1501_v57 = vpop.f32.mrf.mxu0  ;;  %v1564_v44 = vadd.f32 %v1563_v56, %v2038_v54 }
 0x113   : > { %v2040_v58 = vpop.f32.mrf.mxu1 }
 0x114   : > { %v1502_v59 = vpop.f32.mrf.mxu0 }
 0x115   : > { %v1566_v60 = vpop.f32.mrf.mxu1  ;;  %v1503_v31 = vadd.f32 %v1502_v59, %v1501_v57 }
 0x116   : > { %v1504_v61 = vpop.f32.mrf.mxu0  ;;  %v1567_v59 = vadd.f32 %v1566_v60, %v2040_v58 }
 0x117   : > { %v1568_v62 = vpop.f32.mrf.mxu1 }
 0x118   : > { %v1505_v63 = vpop.f32.mrf.mxu0 }
 0x119   : > { %v1569_v0 = vpop.f32.mrf.mxu1  ;;  %v1506_v23 = vadd.f32 %v1505_v63, %v1504_v61  ;;  %v1549_v61 = vadd.f32 %v1548_v36, %v2020_v34  ;;  %v1494_v63 = vadd.f32 %v1493_v47, %v1492_v45  ;;  %v882_v34 = vadd.f32 %v1503_v31, %v2007_v18 }
 0x11a   : > { %v1507_v1 = vpop.f32.mrf.mxu0  ;;  %v1570_v36 = vadd.f32 %v1569_v0, %v1568_v62  ;;  %v1561_v31 = vadd.f32 %v2036_v52, %v2034_v50  ;;  %v1555_v50 = vadd.f32 %v2132_v48, %v2026_v42 }
 0x11b   : > { %v1571_v2 = vpop.f32.mrf.mxu1  ;;  %v887_v13 = vadd.f32 %v1506_v23, %v2007_v18  ;;  %v979_v58 = vadd.f32 %v1567_v59, %v882_v34 }
 0x11c   : > { %v1508_v3 = vpop.f32.mrf.mxu0 }
 0x11d   : > { %v1572_v4 = vpop.f32.mrf.mxu1  ;;  %v1509_v24 = vadd.f32 %v1508_v3, %v1507_v1  ;;  %v1497_v1 = vadd.f32 %v1496_v51, %v1495_v49  ;;  %v871_v49 = vadd.f32 %v1494_v63, %v2007_v18 }
 0x11e   : > { %v1510_v5 = vpop.f32.mrf.mxu0  ;;  %v1573_v45 = vadd.f32 %v1572_v4, %v1571_v2 }
 0x11f   : > { %v2042_v6 = vpop.f32.mrf.mxu1  ;;  %v890_v37 = vadd.f32 %v1509_v24, %v2007_v18  ;;  %v874_v51 = vadd.f32 %v1497_v1, %v2007_v18  ;;  %v968_v52 = vadd.f32 %v1558_v29, %v871_v49 }
 0x120   : > { %2128 = vst [vmem:[#allocation3_spill] sm:$0xff] %v2042_v6  ;;  %v1511_v7 = vpop.f32.mrf.mxu0  ;;  %v855_v6 = vadd.f32 %v1482_v15, %v2007_v18 }
 0x121   : > { %v2044_v8 = vpop.f32.mrf.mxu1  ;;  %v987_v15 = vadd.f32 %v1573_v45, %v890_v37 }
 0x122   : > { %2129 = vst [vmem:[#allocation4_spill] sm:$0xff] %v2044_v8  ;;  %v1513_v9 = vpop.f32.mrf.mxu0  ;;  %v952_v41 = vadd.f32 %v1546_v35, %v855_v6 }
 0x123   : > { %v2046_v10 = vpop.f32.mrf.mxu1 }
 0x124   : > { %2130 = vst [vmem:[#allocation5_spill] sm:$0xff] %v2046_v10  ;;  %v1514_v11 = vpop.f32.mrf.mxu0  ;;  %v858_v10 = vadd.f32 %v1485_v16, %v2007_v18  ;;  %v1512_v16 = vadd.f32 %v1511_v7, %v1510_v5 }
 0x125   : > { %v2048_v12 = vpop.f32.mrf.mxu1  ;;  %v1515_v4 = vadd.f32 %v1514_v11, %v1513_v9 }
 0x126   : > { %2131 = vst [vmem:[#allocation6_spill] sm:$0xff] %v2048_v12  ;;  %v1516_v14 = vpop.f32.mrf.mxu0  ;;  %v1500_v12 = vadd.f32 %v1499_v55, %v1498_v53  ;;  %v947_v53 = vadd.f32 %v1543_v26, %v850_v21  ;;  %v955_v30 = vadd.f32 %v1549_v61, %v858_v10  ;;  %v984_v10 = vadd.f32 %v1570_v36, %v887_v13 }
 0x127   : > { %v2050_v17 = vpop.f32.mrf.mxu1  ;;  %v898_v61 = vadd.f32 %v1515_v4, %v2007_v18  ;;  %v963_v36 = vadd.f32 %v1555_v50, %v2071_v32 }
 0x128   : > { %v1517_v19 = vpop.f32.mrf.mxu0  ;;  %v879_v27 = vadd.f32 %v1500_v12, %v2007_v18 }
 0x129   : > { %v2052_v20 = vpop.f32.mrf.mxu1  ;;  %v1518_v55 = vadd.f32 %v1517_v19, %v1516_v14 }
 0x12a   : > { %v1519_v8 = vpop.f32.mrf.mxu0  ;;  %v976_v62 = vadd.f32 %v1564_v44, %v879_v27  ;;  %v1582_v63 = vadd.f32 %v2052_v20, %v2050_v17  ;;  %v2133_v27 = vld [vmem:[#allocation3_spill] sm:$0xff] }
 0x12b   : > { %v2057_v22 = vpop.f32.mrf.mxu1  ;;  %v903_v60 = vadd.f32 %v1518_v55, %v2007_v18 }
 0x12c   : > { %v1520_v33 = vpop.f32.mrf.mxu0 }
 0x12d   : > { %v1584_v3 = vpop.f32.mrf.mxu1  ;;  %v1521_v6 = vadd.f32 %v1520_v33, %v1519_v8  ;;  %v895_v33 = vadd.f32 %v1512_v16, %v2007_v18  ;;  %v2136_v17 = vld [vmem:[#allocation6_spill] sm:$0xff] }
 0x12e   : > { %v1620_v39 = vpop.f32.mrf.mxu0  ;;  %v1585_v1 = vadd.f32 %v1584_v3, %v2057_v22  ;;  %v1000_v22 = vadd.f32 %v1582_v63, %v903_v60 }
 0x12f   : > { %v1628_v43 = vpop.f32.mrf.mxu1  ;;  %v1049_v21 = vadd.f32 %v1620_v39, %v952_v41  ;;  %v906_v9 = vadd.f32 %v1521_v6, %v2007_v18  ;;  %v2134_v18 = vld [vmem:[#allocation4_spill] sm:$0xff] }
 0x130   : > { %v1040_v47 = vpop.f32.mrf.mxu0  ;;  %v1081_v23 = vadd.f32 %v1628_v43, %v984_v10  ;;  %v1576_v41 = vadd.f32 %v2134_v18, %v2133_v27  ;;  %v2135_v43 = vld [vmem:[#allocation5_spill] sm:$0xff] }
 0x131   : > { %v1072_v57 = vpop.f32.mrf.mxu1  ;;  %v1041_v8 = vadd.f32 %v1040_v47, %v2014_v28  ;;  %v1579_v20 = vadd.f32 %v2136_v17, %v2135_v43 }
 0x132   : > { %v1621_v12 = vpop.f32.mrf.mxu0  ;;  %v1073_v11 = vadd.f32 %v1072_v57, %v976_v62  ;;  %v992_v47 = vadd.f32 %v1576_v41, %v895_v33 }
 0x133   : > { %v1052_v0 = vadd.f32 %v1621_v12, %v955_v30  ;;  %v1629_v2 = vpop.f32.mrf.mxu1  ;;  %v1003_v30 = vadd.f32 %v1585_v1, %v906_v9  ;;  %v995_v44 = vadd.f32 %v1579_v20, %v898_v61 }
 0x134   : > { %v1084_v54 = vadd.f32 %v1629_v2, %v987_v15  ;;  %v1043_v56 = vpop.f32.mrf.mxu0 }
 0x135   : > { %v1419_v5 = vpack.c.bf16 %v1052_v0, %v1049_v21  ;;  %v1044_v7 = vadd.f32 %v1043_v56, %v947_v53  ;;  %v1075_v14 = vpop.f32.mrf.mxu1  ;;  %v971_v53 = vadd.f32 %v1561_v31, %v874_v51 }
 0x136   : > { %v1439_v19 = vpack.c.bf16 %v1084_v54, %v1081_v23  ;;  %v1076_v24 = vadd.f32 %v1075_v14, %v979_v58  ;;  %v1624_v26 = vpop.f32.mrf.mxu0 }
 0x137   : > { %1451 = vst [vmem:[%s2082_s9 + $0x8] sm:$0xff] %v1419_v5   ;;  %v1414_v28 = vpack.c.bf16 %v1044_v7, %v1041_v8  ;;  %v1632_v35 = vpop.f32.mrf.mxu1  ;;  %v1065_v34 = vadd.f32 %v1624_v26, %v968_v52 }
 0x138   : > { %1455 = vst [vmem:[%s2082_s9 + $0x28] sm:$0xff] %v1439_v19   ;;  %v1434_v13 = vpack.c.bf16 %v1076_v24, %v1073_v11  ;;  %v1056_v37 = vpop.f32.mrf.mxu0  ;;  %v1097_v45 = vadd.f32 %v1632_v35, %v1000_v22 }
 0x139   : > { %1415 = vst [vmem:[%s2082_s9] sm:$0xff] %v1414_v28   ;;  %v1088_v39 = vpop.f32.mrf.mxu1  ;;  %v1057_v55 = vadd.f32 %v1056_v37, %v960_v38 }
 0x13a   : > { %1454 = vst [vmem:[%s2082_s9 + $0x20] sm:$0xff] %v1434_v13   ;;  %v1625_v3 = vpop.f32.mrf.mxu0  ;;  %v1089_v10 = vadd.f32 %v1088_v39, %v992_v47 }
 0x13b   : > { %v1068_v40 = vadd.f32 %v1625_v3, %v971_v53  ;;  %v1633_v42 = vpop.f32.mrf.mxu1 }
 0x13c   : > { %v1100_v49 = vadd.f32 %v1633_v42, %v1003_v30  ;;  %v1059_v51 = vpop.f32.mrf.mxu0 }
 0x13d   : > { %v1429_v57 = vpack.c.bf16 %v1068_v40, %v1065_v34  ;;  %v1060_v59 = vadd.f32 %v1059_v51, %v963_v36  ;;  %v1091_v6 = vpop.f32.mrf.mxu1 }
 0x13e   : > { %v1449_v12 = vpack.c.bf16 %v1100_v49, %v1097_v45  ;;  %v1092_v25 = vadd.f32 %v1091_v6, %v995_v44 }
 0x13f   : > { %1453 = vst [vmem:[%s2082_s9 + $0x18] sm:$0xff] %v1429_v57   ;;  %v1424_v15 = vpack.c.bf16 %v1060_v59, %v1057_v55 }
 0x140   : > { %1457 = vst [vmem:[%s2082_s9 + $0x38] sm:$0xff] %v1449_v12   ;;  %v1444_v16 = vpack.c.bf16 %v1092_v25, %v1089_v10 }
 0x141   : > { %1452 = vst [vmem:[%s2082_s9 + $0x10] sm:$0xff] %v1424_v15  }
 0x142   : > { %1456 = vst [vmem:[%s2082_s9 + $0x30] sm:$0xff] %v1444_v16  }
 0x143 PF: > { %s13_s14 = sadd.s32 1, %s1793_s14   ;;  %s2137_s12 = smov %s1789_s13 }
 0x144   : > { %p10_p5 = scmp.ge.s32.totalorder %s13_s14, 4   ;;  %s2138_s13 = smov %s2140_s15 }
 0x146   :  { %12 = sbr.rel (!%p10_p5) target bundleno = 2 (0x2), region = 68 }

// kernel: crnn_ctc_forward.25
= control target key start
LH: loop header
LB: loop body
LE: loop exit
PB: predicated region body
PF: predicated region fallthrough
CT: control target
= control target key end

     0   :  { %s1232_s1 = inlined_call_operand.vmem [shape: bf16[640,128], index: 1, kind: input, shape index: {}]   ;;  %s1233_s0 = inlined_call_operand.vmem [shape: bf16[64,640], index: 0, kind: input, shape index: {}]   ;;  %s1234_s2 = inlined_call_operand.vmem [shape: f32[1,128], index: 2, kind: input, shape index: {}]   ;;  %s1235_s3 = inlined_call_operand.vmem [shape: bf16[64,128], index: 3, kind: output, shape index: {}]  }
   0x1   :  { %v949_v0 = vld [vmem:[%s1232_s1 + $0x78] sm:$0xff]   ;;  %v953_v4 = vld [vmem:[%s1232_s1 + $0x70] sm:$0xff]   ;;  %v957_v8 = vld [vmem:[%s1232_s1 + $0x68] sm:$0xff]  }
   0x2   :  { %v950_v1 = vld [vmem:[%s1232_s1 + $0xf8] sm:$0xff]   ;;  %817 = vmatprep.subr.bf16.mxu0 %v949_v0  ;;  %v954_v5 = vld [vmem:[%s1232_s1 + $0xf0] sm:$0xff]   ;;  %v958_v9 = vld [vmem:[%s1232_s1 + $0xe8] sm:$0xff]  }
   0x3   :  { %v951_v2 = vld [vmem:[%s1232_s1 + $0x38] sm:$0xff]   ;;  %857 = vmatprep.subr.bf16.mxu1 %v950_v1  ;;  %v955_v6 = vld [vmem:[%s1232_s1 + $0x30] sm:$0xff]   ;;  %v959_v10 = vld [vmem:[%s1232_s1 + $0x28] sm:$0xff]  }
   0x4   :  { %v952_v3 = vld [vmem:[%s1232_s1 + $0xb8] sm:$0xff]   ;;  %818 = vmatpush3.bf16.msra.mxu0 %v951_v2  ;;  %v956_v7 = vld [vmem:[%s1232_s1 + $0xb0] sm:$0xff]   ;;  %v960_v11 = vld [vmem:[%s1232_s1 + $0xa8] sm:$0xff]  }
   0x5   :  { %858 = vmatpush3.bf16.msra.mxu1 %v952_v3  ;;  %819 = vmatprep.subr.bf16.mxu0 %v953_v4  ;;  %v961_v12 = vld [vmem:[%s1232_s1 + $0x60] sm:$0xff]   ;;  %v965_v16 = vld [vmem:[%s1232_s1 + $0x58] sm:$0xff]   ;;  %v969_v20 = vld [vmem:[%s1232_s1 + $0x50] sm:$0xff]  }
   0x6   :  { %859 = vmatprep.subr.bf16.mxu1 %v954_v5  ;;  %v962_v13 = vld [vmem:[%s1232_s1 + $0xe0] sm:$0xff]   ;;  %v966_v17 = vld [vmem:[%s1232_s1 + $0xd8] sm:$0xff]   ;;  %v970_v21 = vld [vmem:[%s1232_s1 + $0xd0] sm:$0xff]  }
   0x7   :  { %v963_v14 = vld [vmem:[%s1232_s1 + $0x20] sm:$0xff]   ;;  %v967_v18 = vld [vmem:[%s1232_s1 + $0x18] sm:$0xff]   ;;  %v971_v22 = vld [vmem:[%s1232_s1 + $0x10] sm:$0xff]  }
   0x8   :  { %820 = vmatpush3.bf16.msra.mxu0 %v955_v6  ;;  %v964_v15 = vld [vmem:[%s1232_s1 + $0xa0] sm:$0xff]   ;;  %v968_v19 = vld [vmem:[%s1232_s1 + $0x98] sm:$0xff]   ;;  %v972_v23 = vld [vmem:[%s1232_s1 + $0x90] sm:$0xff]  }
   0x9   :  { %860 = vmatpush3.bf16.msra.mxu1 %v956_v7  ;;  %821 = vmatprep.subr.bf16.mxu0 %v957_v8  ;;  %v973_v24 = vld [vmem:[%s1232_s1 + $0x48] sm:$0xff]   ;;  %v977_v28 = vld [vmem:[%s1232_s1 + $0x40] sm:$0xff]   ;;  %v987_v36 = vld [vmem:[%s1232_s1 + $0x138] sm:$0xff]  }
   0xa   :  { %861 = vmatprep.subr.bf16.mxu1 %v958_v9  ;;  %v974_v25 = vld [vmem:[%s1232_s1 + $0xc8] sm:$0xff]   ;;  %v978_v29 = vld [vmem:[%s1232_s1 + $0xc0] sm:$0xff]   ;;  %v988_v37 = vld [vmem:[%s1232_s1 + $0x130] sm:$0xff]  }
   0xb   :  { %v975_v26 = vld [vmem:[%s1232_s1 + $0x8] sm:$0xff]   ;;  %v979_v30 = vld [vmem:[%s1232_s1] sm:$0xff]   ;;  %v999_v45 = vld [vmem:[%s1233_s0 + $0x5c] ss:$20 sps:$4 sm:$0xff]  }
   0xc   :  { %822 = vmatpush3.bf16.msra.mxu0 %v959_v10  ;;  %v976_v27 = vld [vmem:[%s1232_s1 + $0x88] sm:$0xff]   ;;  %v980_v31 = vld [vmem:[%s1232_s1 + $0x80] sm:$0xff]   ;;  %v1003_v46 = vld [vmem:[%s1232_s1 + $0x118] sm:$0xff]  }
   0xd   :  { %862 = vmatpush3.bf16.msra.mxu1 %v960_v11  ;;  %823 = vmatprep.subr.bf16.mxu0 %v961_v12  ;;  %v981_v32 = vld [vmem:[%s1233_s0] ss:$20 sps:$4 sm:$0xff]   ;;  %v983_v33 = vld [vmem:[%s1233_s0 + $0x4] ss:$20 sps:$4 sm:$0xff]   ;;  %v984_v34 = vld [vmem:[%s1233_s0 + $0x8] ss:$20 sps:$4 sm:$0xff]  }
   0xe   :  { %863 = vmatprep.subr.bf16.mxu1 %v962_v13  ;;  %v986_v35 = vld [vmem:[%s1233_s0 + $0xc] ss:$20 sps:$4 sm:$0xff]   ;;  %502 = vmatprep.mubr.bf16.mxu0 %v983_v33  ;;  %v991_v39 = vld [vmem:[%s1233_s0 + $0x34] ss:$20 sps:$4 sm:$0xff]   ;;  %v994_v42 = vld [vmem:[%s1233_s0 + $0x30] ss:$20 sps:$4 sm:$0xff]  }
   0xf   :  { %567 = vmatprep.mubr.bf16.mxu1 %v986_v35  ;;  %v989_v38 = vld [vmem:[%s1233_s0 + $0x2c] ss:$20 sps:$4 sm:$0xff]   ;;  %v993_v40 = vld [vmem:[%s1233_s0 + $0x28] ss:$20 sps:$4 sm:$0xff]   ;;  %v1001_v47 = vld [vmem:[%s1233_s0 + $0x50] ss:$20 sps:$4 sm:$0xff]  }
  0x10   :  { %824 = vmatpush3.bf16.msra.mxu0 %v963_v14  ;;  %v995_v41 = vld [vmem:[%s1232_s1 + $0x128] sm:$0xff]   ;;  %v996_v44 = vld [vmem:[%s1232_s1 + $0x120] sm:$0xff]   ;;  %v1005_v49 = vld [vmem:[%s1233_s0 + $0x7c] ss:$20 sps:$4 sm:$0xff]  }
  0x11   :  { %864 = vmatpush3.bf16.msra.mxu1 %v964_v15  ;;  %825 = vmatprep.subr.bf16.mxu0 %v965_v16  ;;  %v997_v43 = vld [vmem:[%s1233_s0 + $0x54] ss:$20 sps:$4 sm:$0xff]   ;;  %v1002_v48 = vld [vmem:[%s1233_s0 + $0x58] ss:$20 sps:$4 sm:$0xff]   ;;  %v1013_v55 = vld [vmem:[%s1233_s0 + $0x10] ss:$20 sps:$4 sm:$0xff]  }
  0x12   :  { %865 = vmatprep.subr.bf16.mxu1 %v966_v17  ;;  %v1007_v50 = vld [vmem:[%s1233_s0 + $0x84] ss:$20 sps:$4 sm:$0xff]   ;;  %v1004_v51 = vld [vmem:[%s1232_s1 + $0x110] sm:$0xff]   ;;  %v1011_v52 = vld [vmem:[%s1232_s1 + $0x108] sm:$0xff]  }
  0x13   :  { %v1009_v53 = vld [vmem:[%s1233_s0 + $0x78] ss:$20 sps:$4 sm:$0xff]   ;;  %v1010_v54 = vld [vmem:[%s1233_s0 + $0x80] ss:$20 sps:$4 sm:$0xff]   ;;  %v1016_v59 = vld [vmem:[%s1233_s0 + $0x88] ss:$20 sps:$4 sm:$0xff]  }
  0x14   :  { %826 = vmatpush3.bf16.msra.mxu0 %v967_v18  ;;  %v1014_v56 = vld [vmem:[%s1233_s0 + $0x60] ss:$20 sps:$4 sm:$0xff]   ;;  %v1015_v58 = vld [vmem:[%s1233_s0 + $0x38] ss:$20 sps:$4 sm:$0xff]  }
  0x15   :  { %866 = vmatpush3.bf16.msra.mxu1 %v968_v19  ;;  %827 = vmatprep.subr.bf16.mxu0 %v969_v20  ;;  %v1012_v57 = vld [vmem:[%s1232_s1 + $0x100] sm:$0xff]  }
  0x16   :  { %867 = vmatprep.subr.bf16.mxu1 %v970_v21 }
  0x18   :  { %828 = vmatpush3.bf16.msra.mxu0 %v971_v22 }
  0x19   :  { %868 = vmatpush3.bf16.msra.mxu1 %v972_v23  ;;  %829 = vmatprep.subr.bf16.mxu0 %v973_v24 }
  0x1a   :  { %869 = vmatprep.subr.bf16.mxu1 %v974_v25 }
  0x1c   :  { %830 = vmatpush3.bf16.msra.mxu0 %v975_v26  ;;  %v717_v26 = vld [vmem:[%s1234_s2] ss:$0 sm:$0xff] }
  0x1d   :  { %870 = vmatpush3.bf16.msra.mxu1 %v976_v27  ;;  %831 = vmatprep.subr.bf16.mxu0 %v977_v28 }
  0x1e   :  { %871 = vmatprep.subr.bf16.mxu1 %v978_v29 }
  0x20   :  { %832 = vmatpush3.bf16.msra.mxu0 %v979_v30 }
  0x21   :  { %872 = vmatpush3.bf16.msra.mxu1 %v980_v31  ;;  %909 = vmatprep.subr.bf16.mxu0 %v987_v36 }
  0x22   :  { %933 = vmatprep.subr.bf16.mxu1 %v987_v36 }
  0x23   :  { %503 = vmatmul.mubr.bf16.vlgmr.msra.gmra.mxu0 %v981_v32 }
  0x24   :  { %568 = vmatmul.mubr.bf16.vlgmr.msra.gmra.mxu1 %v984_v34  ;;  %910 = vmatpush3.bf16.msra.mxu0 %v987_v36 }
  0x25   :  { %941 = vmatpush3.bf16.msra.mxu1 %v987_v36  ;;  %911 = vmatprep.subr.bf16.mxu0 %v988_v37 }
  0x26   :  { %934 = vmatprep.subr.bf16.mxu1 %v988_v37  ;;  %510 = vmatprep.mubr.bf16.mxu0 %v989_v38 }
  0x27   :  { %575 = vmatprep.mubr.bf16.mxu1 %v991_v39 }
  0x28   :  { %912 = vmatpush3.bf16.msra.mxu0 %v988_v37 }
  0x29   :  { %942 = vmatpush3.bf16.msra.mxu1 %v988_v37  ;;  %913 = vmatprep.subr.bf16.mxu0 %v995_v41 }
  0x2a   :  { %935 = vmatprep.subr.bf16.mxu1 %v995_v41 }
  0x2b   :  { %511 = vmatmul.mubr.bf16.gmra.mxu0 %v993_v40 }
  0x2c   :  { %576 = vmatmul.mubr.bf16.gmra.mxu1 %v994_v42  ;;  %518 = vmatprep.mubr.bf16.mxu0 %v997_v43 }
  0x2d   :  { %914 = vmatpush3.bf16.msra.mxu0 %v995_v41  ;;  %583 = vmatprep.mubr.bf16.mxu1 %v999_v45 }
  0x2e   :  { %943 = vmatpush3.bf16.msra.mxu1 %v995_v41  ;;  %915 = vmatprep.subr.bf16.mxu0 %v996_v44 }
  0x2f   :  { %936 = vmatprep.subr.bf16.mxu1 %v996_v44 }
  0x31   :  { %916 = vmatpush3.bf16.msra.mxu0 %v996_v44 }
  0x32   :  { %944 = vmatpush3.bf16.msra.mxu1 %v996_v44  ;;  %917 = vmatprep.subr.bf16.mxu0 %v1003_v46 }
  0x33   :  { %519 = vmatmul.mubr.bf16.gmra.mxu0 %v1001_v47  ;;  %937 = vmatprep.subr.bf16.mxu1 %v1003_v46 }
  0x34   :  { %584 = vmatmul.mubr.bf16.gmra.mxu1 %v1002_v48  ;;  %526 = vmatprep.mubr.bf16.mxu0 %v1005_v49 }
  0x35   :  { %918 = vmatpush3.bf16.msra.mxu0 %v1003_v46  ;;  %591 = vmatprep.mubr.bf16.mxu1 %v1007_v50 }
  0x36   :  { %945 = vmatpush3.bf16.msra.mxu1 %v1003_v46  ;;  %919 = vmatprep.subr.bf16.mxu0 %v1004_v51 }
  0x37   :  { %938 = vmatprep.subr.bf16.mxu1 %v1004_v51 }
  0x39   :  { %920 = vmatpush3.bf16.msra.mxu0 %v1004_v51 }
  0x3a   :  { %946 = vmatpush3.bf16.msra.mxu1 %v1004_v51  ;;  %921 = vmatprep.subr.bf16.mxu0 %v1011_v52 }
  0x3b   :  { %527 = vmatmul.mubr.bf16.gmra.mxu0 %v1009_v53  ;;  %939 = vmatprep.subr.bf16.mxu1 %v1011_v52 }
  0x3c   :  { %592 = vmatmul.mubr.bf16.gmra.mxu1 %v1010_v54  ;;  %925 = vmatprep.mubr.bf16.mxu0 %v1013_v55 }
  0x3d   :  { %922 = vmatpush3.bf16.msra.mxu0 %v1011_v52  ;;  %929 = vmatprep.mubr.bf16.mxu1 %v1014_v56 }
  0x3e   :  { %947 = vmatpush3.bf16.msra.mxu1 %v1011_v52  ;;  %923 = vmatprep.subr.bf16.mxu0 %v1012_v57 }
  0x3f   :  { %940 = vmatprep.subr.bf16.mxu1 %v1012_v57 }
  0x41   :  { %924 = vmatpush3.bf16.msra.mxu0 %v1012_v57 }
  0x42   :  { %948 = vmatpush3.bf16.msra.mxu1 %v1012_v57 }
  0x44   :  { %926 = vmatmul.mubr.bf16.vlgmr.msra.gmra.mxu0 %v1015_v58 }
  0x45   :  { %930 = vmatmul.mubr.bf16.vlgmr.msra.gmra.mxu1 %v1016_v59 }
  0xe3   :  { %v833_v60 = vpop.f32.mrf.mxu0 }
  0xe4   :  { %v873_v61 = vpop.f32.mrf.mxu1 }
  0xe5   :  { %v834_v62 = vpop.f32.mrf.mxu0 }
  0xe6   :  { %v874_v63 = vpop.f32.mrf.mxu1  ;;  %v835_v27 = vadd.f32 %v834_v62, %v833_v60 }
  0xe7   :  { %v836_v0 = vpop.f32.mrf.mxu0  ;;  %v875_v48 = vadd.f32 %v874_v63, %v873_v61 }
  0xe8   :  { %v876_v1 = vpop.f32.mrf.mxu1  ;;  %v505_v40 = vadd.f32 %v835_v27, %v717_v26 }
  0xe9   :  { %v837_v2 = vpop.f32.mrf.mxu0 }
  0xea   :  { %v877_v3 = vpop.f32.mrf.mxu1  ;;  %v838_v33 = vadd.f32 %v837_v2, %v836_v0  ;;  %v570_v59 = vadd.f32 %v875_v48, %v505_v40 }
  0xeb   :  { %v839_v4 = vpop.f32.mrf.mxu0  ;;  %v878_v57 = vadd.f32 %v877_v3, %v876_v1 }
  0xec   :  { %v879_v5 = vpop.f32.mrf.mxu1  ;;  %v508_v49 = vadd.f32 %v838_v33, %v717_v26 }
  0xed   :  { %v840_v6 = vpop.f32.mrf.mxu0 }
  0xee   :  { %v880_v7 = vpop.f32.mrf.mxu1  ;;  %v841_v22 = vadd.f32 %v840_v6, %v839_v4  ;;  %v573_v63 = vadd.f32 %v878_v57, %v508_v49 }
  0xef   :  { %v842_v8 = vpop.f32.mrf.mxu0  ;;  %v881_v41 = vadd.f32 %v880_v7, %v879_v5 }
  0xf0   :  { %v882_v9 = vpop.f32.mrf.mxu1  ;;  %v513_v34 = vadd.f32 %v841_v22, %v717_v26 }
  0xf1   :  { %v843_v10 = vpop.f32.mrf.mxu0 }
  0xf2   :  { %v883_v11 = vpop.f32.mrf.mxu1  ;;  %v844_v28 = vadd.f32 %v843_v10, %v842_v8  ;;  %v578_v51 = vadd.f32 %v881_v41, %v513_v34 }
  0xf3   :  { %v845_v12 = vpop.f32.mrf.mxu0  ;;  %v884_v50 = vadd.f32 %v883_v11, %v882_v9 }
  0xf4   :  { %v885_v13 = vpop.f32.mrf.mxu1  ;;  %v516_v42 = vadd.f32 %v844_v28, %v717_v26 }
  0xf5   :  { %v846_v14 = vpop.f32.mrf.mxu0 }
  0xf6   :  { %v886_v15 = vpop.f32.mrf.mxu1  ;;  %v847_v30 = vadd.f32 %v846_v14, %v845_v12  ;;  %v581_v62 = vadd.f32 %v884_v50, %v516_v42 }
  0xf7   :  { %v848_v16 = vpop.f32.mrf.mxu0  ;;  %v887_v53 = vadd.f32 %v886_v15, %v885_v13 }
  0xf8   :  { %v888_v17 = vpop.f32.mrf.mxu1  ;;  %v521_v43 = vadd.f32 %v847_v30, %v717_v26 }
  0xf9   :  { %v849_v18 = vpop.f32.mrf.mxu0 }
  0xfa   :  { %v889_v19 = vpop.f32.mrf.mxu1  ;;  %v850_v36 = vadd.f32 %v849_v18, %v848_v16  ;;  %v586_v4 = vadd.f32 %v887_v53, %v521_v43 }
  0xfb   :  { %v851_v20 = vpop.f32.mrf.mxu0  ;;  %v890_v0 = vadd.f32 %v889_v19, %v888_v17 }
  0xfc   :  { %v891_v21 = vpop.f32.mrf.mxu1  ;;  %v524_v54 = vadd.f32 %v850_v36, %v717_v26 }
  0xfd   :  { %v852_v23 = vpop.f32.mrf.mxu0 }
  0xfe   :  { %v853_v24 = vadd.f32 %v852_v23, %v851_v20  ;;  %v892_v25 = vpop.f32.mrf.mxu1  ;;  %v589_v11 = vadd.f32 %v890_v0, %v524_v54 }
  0xff   :  { %v854_v29 = vpop.f32.mrf.mxu0  ;;  %v893_v37 = vadd.f32 %v892_v25, %v891_v21 }
 0x100   :  { %v529_v31 = vadd.f32 %v853_v24, %v717_v26  ;;  %v894_v32 = vpop.f32.mrf.mxu1 }
 0x101   :  { %v855_v35 = vpop.f32.mrf.mxu0 }
 0x102   :  { %v856_v38 = vadd.f32 %v855_v35, %v854_v29  ;;  %v895_v39 = vpop.f32.mrf.mxu1  ;;  %v594_v47 = vadd.f32 %v893_v37, %v529_v31 }
 0x103   :  { %v896_v45 = vadd.f32 %v895_v39, %v894_v32 }
 0x104   :  { %v532_v44 = vadd.f32 %v856_v38, %v717_v26  ;;  %v927_v46 = vpop.f32.mrf.mxu0 }
 0x105   :  { %v931_v52 = vpop.f32.mrf.mxu1  ;;  %v643_v58 = vadd.f32 %v927_v46, %v578_v51 }
 0x106   :  { %v634_v55 = vpop.f32.mrf.mxu0  ;;  %v597_v56 = vadd.f32 %v896_v45, %v532_v44  ;;  %v659_v2 = vadd.f32 %v931_v52, %v594_v47 }
 0x107   :  { %v650_v60 = vpop.f32.mrf.mxu1  ;;  %v635_v6 = vadd.f32 %v634_v55, %v570_v59  ;;  %v667_v12 = vmax.f32 %v643_v58, 0.0 }
 0x108   :  { %v928_v5 = vpop.f32.mrf.mxu0  ;;  %v651_v8 = vadd.f32 %v650_v60, %v586_v4  ;;  %v671_v3 = vmax.f32 %v659_v2, 0.0 }
 0x109   :  { %v646_v7 = vadd.f32 %v928_v5, %v581_v62  ;;  %v932_v61 = vpop.f32.mrf.mxu1  ;;  %v665_v18 = vmax.f32 %v635_v6, 0.0 }
 0x10a   :  { %v662_v9 = vadd.f32 %v932_v61, %v597_v56  ;;  %v637_v10 = vpop.f32.mrf.mxu0  ;;  %v669_v20 = vmax.f32 %v651_v8, 0.0 }
 0x10b   :  { %v668_v13 = vmax.f32 %v646_v7, 0.0  ;;  %v638_v14 = vadd.f32 %v637_v10, %v573_v63  ;;  %v653_v1 = vpop.f32.mrf.mxu1 }
 0x10c   :  { %v672_v15 = vmax.f32 %v662_v9, 0.0  ;;  %v654_v16 = vadd.f32 %v653_v1, %v589_v11 }
 0x10d   :  { %v802_v17 = vpack.c.bf16 %v668_v13, %v667_v12  ;;  %v666_v19 = vmax.f32 %v638_v14, 0.0 }
 0x10e   :  { %v812_v21 = vpack.c.bf16 %v672_v15, %v671_v3  ;;  %v670_v22 = vmax.f32 %v654_v16, 0.0 }
 0x10f   :  { %814 = vst [vmem:[%s1235_s3 + $0x8] sm:$0xff] %v802_v17   ;;  %v797_v23 = vpack.c.bf16 %v666_v19, %v665_v18 }
 0x110   :  { %816 = vst [vmem:[%s1235_s3 + $0x18] sm:$0xff] %v812_v21   ;;  %v807_v24 = vpack.c.bf16 %v670_v22, %v669_v20 }
 0x111   :  { %798 = vst [vmem:[%s1235_s3] sm:$0xff] %v797_v23  }
 0x112   :  { %815 = vst [vmem:[%s1235_s3 + $0x10] sm:$0xff] %v807_v24  }

// kernel: crnn_ctc_forward.26
= control target key start
LH: loop header
LB: loop body
LE: loop exit
PB: predicated region body
PF: predicated region fallthrough
CT: control target
= control target key end

     0   :  { %s2100_s1 = inlined_call_operand.vmem [shape: bf16[1152,128], index: 1, kind: input, shape index: {}]   ;;  %s2101_s0 = inlined_call_operand.vmem [shape: bf16[64,1152], index: 0, kind: input, shape index: {}]   ;;  %s2102_s2 = inlined_call_operand.vmem [shape: f32[1,128], index: 2, kind: input, shape index: {}]   ;;  %s2103_s3 = inlined_call_operand.vmem [shape: bf16[64,128], index: 3, kind: output, shape index: {}]  }
   0x1   :  { %v1551_v0 = vld [vmem:[%s2100_s1 + $0x78] sm:$0xff]   ;;  %v1555_v4 = vld [vmem:[%s2100_s1 + $0x70] sm:$0xff]   ;;  %v1559_v8 = vld [vmem:[%s2100_s1 + $0x68] sm:$0xff]  }
   0x2   :  { %v1552_v1 = vld [vmem:[%s2100_s1 + $0xf8] sm:$0xff]   ;;  %1339 = vmatprep.subr.bf16.mxu0 %v1551_v0  ;;  %v1556_v5 = vld [vmem:[%s2100_s1 + $0xf0] sm:$0xff]   ;;  %v1560_v9 = vld [vmem:[%s2100_s1 + $0xe8] sm:$0xff]  }
   0x3   :  { %v1553_v2 = vld [vmem:[%s2100_s1 + $0x38] sm:$0xff]   ;;  %1379 = vmatprep.subr.bf16.mxu1 %v1552_v1  ;;  %v1557_v6 = vld [vmem:[%s2100_s1 + $0x30] sm:$0xff]   ;;  %v1561_v10 = vld [vmem:[%s2100_s1 + $0x28] sm:$0xff]  }
   0x4   :  { %v1554_v3 = vld [vmem:[%s2100_s1 + $0xb8] sm:$0xff]   ;;  %1340 = vmatpush3.bf16.msra.mxu0 %v1553_v2  ;;  %v1558_v7 = vld [vmem:[%s2100_s1 + $0xb0] sm:$0xff]   ;;  %v1562_v11 = vld [vmem:[%s2100_s1 + $0xa8] sm:$0xff]  }
   0x5   :  { %1380 = vmatpush3.bf16.msra.mxu1 %v1554_v3  ;;  %1341 = vmatprep.subr.bf16.mxu0 %v1555_v4  ;;  %v1563_v12 = vld [vmem:[%s2100_s1 + $0x60] sm:$0xff]   ;;  %v1567_v16 = vld [vmem:[%s2100_s1 + $0x58] sm:$0xff]   ;;  %v1571_v20 = vld [vmem:[%s2100_s1 + $0x50] sm:$0xff]  }
   0x6   :  { %1381 = vmatprep.subr.bf16.mxu1 %v1556_v5  ;;  %v1564_v13 = vld [vmem:[%s2100_s1 + $0xe0] sm:$0xff]   ;;  %v1568_v17 = vld [vmem:[%s2100_s1 + $0xd8] sm:$0xff]   ;;  %v1572_v21 = vld [vmem:[%s2100_s1 + $0xd0] sm:$0xff]  }
   0x7   :  { %v1565_v14 = vld [vmem:[%s2100_s1 + $0x20] sm:$0xff]   ;;  %v1569_v18 = vld [vmem:[%s2100_s1 + $0x18] sm:$0xff]   ;;  %v1573_v22 = vld [vmem:[%s2100_s1 + $0x10] sm:$0xff]  }
   0x8   :  { %1342 = vmatpush3.bf16.msra.mxu0 %v1557_v6  ;;  %v1566_v15 = vld [vmem:[%s2100_s1 + $0xa0] sm:$0xff]   ;;  %v1570_v19 = vld [vmem:[%s2100_s1 + $0x98] sm:$0xff]   ;;  %v1574_v23 = vld [vmem:[%s2100_s1 + $0x90] sm:$0xff]  }
   0x9   :  { %1382 = vmatpush3.bf16.msra.mxu1 %v1558_v7  ;;  %1343 = vmatprep.subr.bf16.mxu0 %v1559_v8  ;;  %v1575_v24 = vld [vmem:[%s2100_s1 + $0x48] sm:$0xff]   ;;  %v1579_v28 = vld [vmem:[%s2100_s1 + $0x40] sm:$0xff]   ;;  %v1589_v36 = vld [vmem:[%s2100_s1 + $0x178] sm:$0xff]  }
   0xa   :  { %1383 = vmatprep.subr.bf16.mxu1 %v1560_v9  ;;  %v1576_v25 = vld [vmem:[%s2100_s1 + $0xc8] sm:$0xff]   ;;  %v1580_v29 = vld [vmem:[%s2100_s1 + $0xc0] sm:$0xff]   ;;  %v1590_v37 = vld [vmem:[%s2100_s1 + $0x1f8] sm:$0xff]  }
   0xb   :  { %v1577_v26 = vld [vmem:[%s2100_s1 + $0x8] sm:$0xff]   ;;  %v1581_v30 = vld [vmem:[%s2100_s1] sm:$0xff]   ;;  %v1591_v38 = vld [vmem:[%s2100_s1 + $0x138] sm:$0xff]  }
   0xc   :  { %1344 = vmatpush3.bf16.msra.mxu0 %v1561_v10  ;;  %v1578_v27 = vld [vmem:[%s2100_s1 + $0x88] sm:$0xff]   ;;  %v1582_v31 = vld [vmem:[%s2100_s1 + $0x80] sm:$0xff]   ;;  %v1592_v39 = vld [vmem:[%s2100_s1 + $0x1b8] sm:$0xff]  }
   0xd   :  { %1384 = vmatpush3.bf16.msra.mxu1 %v1562_v11  ;;  %1345 = vmatprep.subr.bf16.mxu0 %v1563_v12  ;;  %v1583_v32 = vld [vmem:[%s2101_s0] ss:$36 sps:$4 sm:$0xff]   ;;  %v1586_v34 = vld [vmem:[%s2101_s0 + $0x8] ss:$36 sps:$4 sm:$0xff]   ;;  %v1593_v40 = vld [vmem:[%s2100_s1 + $0x170] sm:$0xff]  }
   0xe   :  { %1385 = vmatprep.subr.bf16.mxu1 %v1564_v13  ;;  %v1585_v33 = vld [vmem:[%s2101_s0 + $0x4] ss:$36 sps:$4 sm:$0xff]   ;;  %v1588_v35 = vld [vmem:[%s2101_s0 + $0xc] ss:$36 sps:$4 sm:$0xff]   ;;  %v1599_v45 = vld [vmem:[%s2101_s0 + $0x54] ss:$36 sps:$4 sm:$0xff]  }
   0xf   :  { %854 = vmatprep.mubr.bf16.mxu0 %v1585_v33  ;;  %919 = vmatprep.mubr.bf16.mxu1 %v1588_v35  ;;  %v1594_v41 = vld [vmem:[%s2100_s1 + $0x1f0] sm:$0xff]   ;;  %v1601_v46 = vld [vmem:[%s2101_s0 + $0x48] ss:$36 sps:$4 sm:$0xff]   ;;  %v1607_v52 = vld [vmem:[%s2100_s1 + $0x160] sm:$0xff]  }
  0x10   :  { %1346 = vmatpush3.bf16.msra.mxu0 %v1565_v14  ;;  %v1595_v42 = vld [vmem:[%s2100_s1 + $0x130] sm:$0xff]   ;;  %v1603_v48 = vld [vmem:[%s2100_s1 + $0x168] sm:$0xff]   ;;  %v1608_v53 = vld [vmem:[%s2100_s1 + $0x1e0] sm:$0xff]  }
  0x11   :  { %1386 = vmatpush3.bf16.msra.mxu1 %v1566_v15  ;;  %1347 = vmatprep.subr.bf16.mxu0 %v1567_v16  ;;  %v1596_v43 = vld [vmem:[%s2100_s1 + $0x1b0] sm:$0xff]   ;;  %v1604_v49 = vld [vmem:[%s2100_s1 + $0x1e8] sm:$0xff]   ;;  %v1609_v54 = vld [vmem:[%s2100_s1 + $0x120] sm:$0xff]  }
  0x12   :  { %1387 = vmatprep.subr.bf16.mxu1 %v1568_v17  ;;  %v1597_v44 = vld [vmem:[%s2101_s0 + $0x4c] ss:$36 sps:$4 sm:$0xff]   ;;  %v1610_v55 = vld [vmem:[%s2100_s1 + $0x1a0] sm:$0xff]   ;;  %v1611_v56 = vld [vmem:[%s2101_s0 + $0x94] ss:$36 sps:$4 sm:$0xff]  }
  0x13   :  { %v1602_v47 = vld [vmem:[%s2101_s0 + $0x50] ss:$36 sps:$4 sm:$0xff]   ;;  %v1605_v50 = vld [vmem:[%s2100_s1 + $0x128] sm:$0xff]   ;;  %v1613_v57 = vld [vmem:[%s2101_s0 + $0x9c] ss:$36 sps:$4 sm:$0xff]  }
  0x14   :  { %1348 = vmatpush3.bf16.msra.mxu0 %v1569_v18  ;;  %v1606_v51 = vld [vmem:[%s2100_s1 + $0x1a8] sm:$0xff]   ;;  %v1615_v58 = vld [vmem:[%s2101_s0 + $0x90] ss:$36 sps:$4 sm:$0xff]   ;;  %v1616_v59 = vld [vmem:[%s2101_s0 + $0x98] ss:$36 sps:$4 sm:$0xff]  }
  0x15   :  { %1388 = vmatpush3.bf16.msra.mxu1 %v1570_v19  ;;  %1349 = vmatprep.subr.bf16.mxu0 %v1571_v20  ;;  %v1617_v60 = vld [vmem:[%s2100_s1 + $0x158] sm:$0xff]   ;;  %v1621_v0 = vld [vmem:[%s2100_s1 + $0x150] sm:$0xff]   ;;  %v1627_v5 = vld [vmem:[%s2101_s0 + $0xe4] ss:$36 sps:$4 sm:$0xff]  }
  0x16   :  { %1389 = vmatprep.subr.bf16.mxu1 %v1572_v21  ;;  %v1618_v61 = vld [vmem:[%s2100_s1 + $0x1d8] sm:$0xff]   ;;  %v1622_v1 = vld [vmem:[%s2100_s1 + $0x1d0] sm:$0xff]   ;;  %v1630_v7 = vld [vmem:[%s2101_s0 + $0xe0] ss:$36 sps:$4 sm:$0xff]  }
  0x17   :  { %v1619_v62 = vld [vmem:[%s2100_s1 + $0x118] sm:$0xff]   ;;  %v1623_v2 = vld [vmem:[%s2100_s1 + $0x110] sm:$0xff]   ;;  %v1631_v8 = vld [vmem:[%s2100_s1 + $0x148] sm:$0xff]  }
  0x18   :  { %1350 = vmatpush3.bf16.msra.mxu0 %v1573_v22  ;;  %v1620_v63 = vld [vmem:[%s2100_s1 + $0x198] sm:$0xff]   ;;  %v1624_v3 = vld [vmem:[%s2100_s1 + $0x190] sm:$0xff]   ;;  %v1632_v9 = vld [vmem:[%s2100_s1 + $0x1c8] sm:$0xff]  }
  0x19   :  { %1390 = vmatpush3.bf16.msra.mxu1 %v1574_v23  ;;  %1351 = vmatprep.subr.bf16.mxu0 %v1575_v24  ;;  %v1625_v4 = vld [vmem:[%s2101_s0 + $0xdc] ss:$36 sps:$4 sm:$0xff]   ;;  %v1633_v10 = vld [vmem:[%s2100_s1 + $0x108] sm:$0xff]   ;;  %v1639_v16 = vld [vmem:[%s2101_s0 + $0x10] ss:$36 sps:$4 sm:$0xff]  }
  0x1a   :  { %1391 = vmatprep.subr.bf16.mxu1 %v1576_v25  ;;  %v1629_v6 = vld [vmem:[%s2101_s0 + $0xd8] ss:$36 sps:$4 sm:$0xff]   ;;  %v1634_v11 = vld [vmem:[%s2100_s1 + $0x188] sm:$0xff]   ;;  %v1635_v12 = vld [vmem:[%s2100_s1 + $0x140] sm:$0xff]  }
  0x1b   :  { %v1636_v13 = vld [vmem:[%s2100_s1 + $0x1c0] sm:$0xff]   ;;  %v1641_v17 = vld [vmem:[%s2101_s0 + $0x14] ss:$36 sps:$4 sm:$0xff]   ;;  %v1663_v33 = vld [vmem:[%s2101_s0 + $0xec] ss:$36 sps:$4 sm:$0xff]  }
  0x1c   :  { %1352 = vmatpush3.bf16.msra.mxu0 %v1577_v26  ;;  %v1637_v14 = vld [vmem:[%s2100_s1 + $0x100] sm:$0xff]   ;;  %v1642_v18 = vld [vmem:[%s2101_s0 + $0x18] ss:$36 sps:$4 sm:$0xff]   ;;  %v1646_v21 = vld [vmem:[%s2100_s1 + $0x230] sm:$0xff]  }
  0x1d   :  { %1392 = vmatpush3.bf16.msra.mxu1 %v1578_v27  ;;  %1353 = vmatprep.subr.bf16.mxu0 %v1579_v28  ;;  %v1638_v15 = vld [vmem:[%s2100_s1 + $0x180] sm:$0xff]   ;;  %v1645_v20 = vld [vmem:[%s2100_s1 + $0x238] sm:$0xff]   ;;  %v1653_v26 = vld [vmem:[%s2100_s1 + $0x228] sm:$0xff]  }
  0x1e   :  { %1393 = vmatprep.subr.bf16.mxu1 %v1580_v29  ;;  %v1644_v19 = vld [vmem:[%s2101_s0 + $0x1c] ss:$36 sps:$4 sm:$0xff]   ;;  %v1649_v23 = vld [vmem:[%s2101_s0 + $0x64] ss:$36 sps:$4 sm:$0xff]   ;;  %v1657_v28 = vld [vmem:[%s2101_s0 + $0xac] ss:$36 sps:$4 sm:$0xff]  }
  0x1f   :  { %v1647_v22 = vld [vmem:[%s2101_s0 + $0x5c] ss:$36 sps:$4 sm:$0xff]   ;;  %v1655_v27 = vld [vmem:[%s2101_s0 + $0xa4] ss:$36 sps:$4 sm:$0xff]   ;;  %v1662_v35 = vld [vmem:[%s2100_s1 + $0x210] sm:$0xff]  }
  0x20   :  { %1354 = vmatpush3.bf16.msra.mxu0 %v1581_v30  ;;  %v1651_v24 = vld [vmem:[%s2101_s0 + $0x58] ss:$36 sps:$4 sm:$0xff]   ;;  %v1652_v25 = vld [vmem:[%s2101_s0 + $0x60] ss:$36 sps:$4 sm:$0xff]  }
  0x21   :  { %1394 = vmatpush3.bf16.msra.mxu1 %v1582_v31  ;;  %1419 = vmatprep.subr.bf16.mxu0 %v1589_v36  ;;  %v1654_v29 = vld [vmem:[%s2100_s1 + $0x220] sm:$0xff]   ;;  %v1660_v31 = vld [vmem:[%s2101_s0 + $0xa8] ss:$36 sps:$4 sm:$0xff]  }
  0x22   :  { %1459 = vmatprep.subr.bf16.mxu1 %v1590_v37  ;;  %v1659_v30 = vld [vmem:[%s2101_s0 + $0xa0] ss:$36 sps:$4 sm:$0xff]   ;;  %v1667_v36 = vld [vmem:[%s2101_s0 + $0xe8] ss:$36 sps:$4 sm:$0xff]  }
  0x23   :  { %855 = vmatmul.mubr.bf16.vlgmr.msra.gmra.mxu0 %v1583_v32  ;;  %v1661_v32 = vld [vmem:[%s2100_s1 + $0x218] sm:$0xff]   ;;  %v1669_v37 = vld [vmem:[%s2100_s1 + $0x208] sm:$0xff]  }
  0x24   :  { %920 = vmatmul.mubr.bf16.vlgmr.msra.gmra.mxu1 %v1586_v34  ;;  %1420 = vmatpush3.bf16.msra.mxu0 %v1591_v38  ;;  %v1665_v34 = vld [vmem:[%s2101_s0 + $0xf4] ss:$36 sps:$4 sm:$0xff]  }
  0x25   :  { %1460 = vmatpush3.bf16.msra.mxu1 %v1592_v39  ;;  %1421 = vmatprep.subr.bf16.mxu0 %v1593_v40  ;;  %v1668_v38 = vld [vmem:[%s2101_s0 + $0xf0] ss:$36 sps:$4 sm:$0xff]   ;;  %v1671_v39 = vld [vmem:[%s2101_s0 + $0x20] ss:$36 sps:$4 sm:$0xff]  }
  0x26   :  { %1461 = vmatprep.subr.bf16.mxu1 %v1594_v41  ;;  %862 = vmatprep.mubr.bf16.mxu0 %v1597_v44  ;;  %v1672_v40 = vld [vmem:[%s2101_s0 + $0xb0] ss:$36 sps:$4 sm:$0xff]   ;;  %v1670_v41 = vld [vmem:[%s2100_s1 + $0x200] sm:$0xff]  }
  0x27   :  { %927 = vmatprep.mubr.bf16.mxu1 %v1599_v45 }
  0x28   :  { %1422 = vmatpush3.bf16.msra.mxu0 %v1595_v42  ;;  %v1673_v42 = vld [vmem:[%s2101_s0 + $0x68] ss:$36 sps:$4 sm:$0xff]  }
  0x29   :  { %1462 = vmatpush3.bf16.msra.mxu1 %v1596_v43  ;;  %1423 = vmatprep.subr.bf16.mxu0 %v1603_v48  ;;  %v1674_v43 = vld [vmem:[%s2101_s0 + $0xf8] ss:$36 sps:$4 sm:$0xff]  }
  0x2a   :  { %1463 = vmatprep.subr.bf16.mxu1 %v1604_v49 }
  0x2b   :  { %863 = vmatmul.mubr.bf16.gmra.mxu0 %v1601_v46 }
  0x2c   :  { %928 = vmatmul.mubr.bf16.gmra.mxu1 %v1602_v47  ;;  %1424 = vmatpush3.bf16.msra.mxu0 %v1605_v50 }
  0x2d   :  { %1464 = vmatpush3.bf16.msra.mxu1 %v1606_v51  ;;  %1425 = vmatprep.subr.bf16.mxu0 %v1607_v52 }
  0x2e   :  { %1465 = vmatprep.subr.bf16.mxu1 %v1608_v53  ;;  %870 = vmatprep.mubr.bf16.mxu0 %v1611_v56 }
  0x2f   :  { %935 = vmatprep.mubr.bf16.mxu1 %v1613_v57 }
  0x30   :  { %1426 = vmatpush3.bf16.msra.mxu0 %v1609_v54 }
  0x31   :  { %1466 = vmatpush3.bf16.msra.mxu1 %v1610_v55  ;;  %1427 = vmatprep.subr.bf16.mxu0 %v1617_v60 }
  0x32   :  { %1467 = vmatprep.subr.bf16.mxu1 %v1618_v61 }
  0x33   :  { %871 = vmatmul.mubr.bf16.gmra.mxu0 %v1615_v58 }
  0x34   :  { %936 = vmatmul.mubr.bf16.gmra.mxu1 %v1616_v59  ;;  %1428 = vmatpush3.bf16.msra.mxu0 %v1619_v62 }
  0x35   :  { %1468 = vmatpush3.bf16.msra.mxu1 %v1620_v63  ;;  %1429 = vmatprep.subr.bf16.mxu0 %v1621_v0 }
  0x36   :  { %1469 = vmatprep.subr.bf16.mxu1 %v1622_v1  ;;  %878 = vmatprep.mubr.bf16.mxu0 %v1625_v4 }
  0x37   :  { %943 = vmatprep.mubr.bf16.mxu1 %v1627_v5 }
  0x38   :  { %1430 = vmatpush3.bf16.msra.mxu0 %v1623_v2 }
  0x39   :  { %1470 = vmatpush3.bf16.msra.mxu1 %v1624_v3  ;;  %1431 = vmatprep.subr.bf16.mxu0 %v1631_v8 }
  0x3a   :  { %1471 = vmatprep.subr.bf16.mxu1 %v1632_v9 }
  0x3b   :  { %879 = vmatmul.mubr.bf16.gmra.mxu0 %v1629_v6 }
  0x3c   :  { %944 = vmatmul.mubr.bf16.gmra.mxu1 %v1630_v7  ;;  %1432 = vmatpush3.bf16.msra.mxu0 %v1633_v10 }
  0x3d   :  { %1472 = vmatpush3.bf16.msra.mxu1 %v1634_v11  ;;  %1433 = vmatprep.subr.bf16.mxu0 %v1635_v12 }
  0x3e   :  { %1473 = vmatprep.subr.bf16.mxu1 %v1636_v13  ;;  %984 = vmatprep.mubr.bf16.mxu0 %v1641_v17 }
  0x3f   :  { %1049 = vmatprep.mubr.bf16.mxu1 %v1644_v19 }
  0x40   :  { %1434 = vmatpush3.bf16.msra.mxu0 %v1637_v14 }
  0x41   :  { %1474 = vmatpush3.bf16.msra.mxu1 %v1638_v15  ;;  %1511 = vmatprep.subr.bf16.mxu0 %v1645_v20 }
  0x42   :  { %1535 = vmatprep.subr.bf16.mxu1 %v1645_v20 }
  0x43   :  { %985 = vmatmul.mubr.bf16.vlgmr.msra.gmra.mxu0 %v1639_v16 }
  0x44   :  { %1050 = vmatmul.mubr.bf16.vlgmr.msra.gmra.mxu1 %v1642_v18  ;;  %1512 = vmatpush3.bf16.msra.mxu0 %v1645_v20 }
  0x45   :  { %1543 = vmatpush3.bf16.msra.mxu1 %v1645_v20  ;;  %1513 = vmatprep.subr.bf16.mxu0 %v1646_v21 }
  0x46   :  { %1536 = vmatprep.subr.bf16.mxu1 %v1646_v21  ;;  %992 = vmatprep.mubr.bf16.mxu0 %v1647_v22 }
  0x47   :  { %1057 = vmatprep.mubr.bf16.mxu1 %v1649_v23 }
  0x48   :  { %1514 = vmatpush3.bf16.msra.mxu0 %v1646_v21 }
  0x49   :  { %1544 = vmatpush3.bf16.msra.mxu1 %v1646_v21  ;;  %1515 = vmatprep.subr.bf16.mxu0 %v1653_v26 }
  0x4a   :  { %1537 = vmatprep.subr.bf16.mxu1 %v1653_v26 }
  0x4b   :  { %993 = vmatmul.mubr.bf16.gmra.mxu0 %v1651_v24 }
  0x4c   :  { %1058 = vmatmul.mubr.bf16.gmra.mxu1 %v1652_v25  ;;  %1000 = vmatprep.mubr.bf16.mxu0 %v1655_v27 }
  0x4d   :  { %1516 = vmatpush3.bf16.msra.mxu0 %v1653_v26  ;;  %1065 = vmatprep.mubr.bf16.mxu1 %v1657_v28 }
  0x4e   :  { %1545 = vmatpush3.bf16.msra.mxu1 %v1653_v26  ;;  %1517 = vmatprep.subr.bf16.mxu0 %v1654_v29 }
  0x4f   :  { %1538 = vmatprep.subr.bf16.mxu1 %v1654_v29 }
  0x51   :  { %1518 = vmatpush3.bf16.msra.mxu0 %v1654_v29 }
  0x52   :  { %1546 = vmatpush3.bf16.msra.mxu1 %v1654_v29  ;;  %1519 = vmatprep.subr.bf16.mxu0 %v1661_v32 }
  0x53   :  { %1001 = vmatmul.mubr.bf16.gmra.mxu0 %v1659_v30  ;;  %1539 = vmatprep.subr.bf16.mxu1 %v1661_v32 }
  0x54   :  { %1066 = vmatmul.mubr.bf16.gmra.mxu1 %v1660_v31  ;;  %1008 = vmatprep.mubr.bf16.mxu0 %v1663_v33 }
  0x55   :  { %1520 = vmatpush3.bf16.msra.mxu0 %v1661_v32  ;;  %1073 = vmatprep.mubr.bf16.mxu1 %v1665_v34 }
  0x56   :  { %1547 = vmatpush3.bf16.msra.mxu1 %v1661_v32  ;;  %1521 = vmatprep.subr.bf16.mxu0 %v1662_v35  ;;  %v1191_v32 = vld [vmem:[%s2102_s2] ss:$0 sm:$0xff] }
  0x57   :  { %1540 = vmatprep.subr.bf16.mxu1 %v1662_v35 }
  0x59   :  { %1522 = vmatpush3.bf16.msra.mxu0 %v1662_v35 }
  0x5a   :  { %1548 = vmatpush3.bf16.msra.mxu1 %v1662_v35  ;;  %1523 = vmatprep.subr.bf16.mxu0 %v1669_v37 }
  0x5b   :  { %1009 = vmatmul.mubr.bf16.gmra.mxu0 %v1667_v36  ;;  %1541 = vmatprep.subr.bf16.mxu1 %v1669_v37 }
  0x5c   :  { %1074 = vmatmul.mubr.bf16.gmra.mxu1 %v1668_v38  ;;  %1527 = vmatprep.mubr.bf16.mxu0 %v1671_v39 }
  0x5d   :  { %1524 = vmatpush3.bf16.msra.mxu0 %v1669_v37  ;;  %1531 = vmatprep.mubr.bf16.mxu1 %v1672_v40 }
  0x5e   :  { %1549 = vmatpush3.bf16.msra.mxu1 %v1669_v37  ;;  %1525 = vmatprep.subr.bf16.mxu0 %v1670_v41 }
  0x5f   :  { %1542 = vmatprep.subr.bf16.mxu1 %v1670_v41 }
  0x61   :  { %1526 = vmatpush3.bf16.msra.mxu0 %v1670_v41 }
  0x62   :  { %1550 = vmatpush3.bf16.msra.mxu1 %v1670_v41 }
  0x64   :  { %1528 = vmatmul.mubr.bf16.vlgmr.msra.gmra.mxu0 %v1673_v42 }
  0x65   :  { %1532 = vmatmul.mubr.bf16.vlgmr.msra.gmra.mxu1 %v1674_v43 }
  0xe3   :  { %v1355_v44 = vpop.f32.mrf.mxu0 }
  0xe4   :  { %v2019_v45 = vpop.f32.mrf.mxu1 }
  0xe5   :  { %v1356_v46 = vpop.f32.mrf.mxu0 }
  0xe6   :  { %v2021_v47 = vpop.f32.mrf.mxu1  ;;  %v1357_v31 = vadd.f32 %v1356_v46, %v1355_v44 }
  0xe7   :  { %v1358_v48 = vpop.f32.mrf.mxu0  ;;  %v1397_v46 = vadd.f32 %v2021_v47, %v2019_v45 }
  0xe8   :  { %v2023_v49 = vpop.f32.mrf.mxu1  ;;  %v857_v40 = vadd.f32 %v1357_v31, %v1191_v32 }
  0xe9   :  { %v1359_v50 = vpop.f32.mrf.mxu0 }
  0xea   :  { %v2025_v51 = vpop.f32.mrf.mxu1  ;;  %v1360_v42 = vadd.f32 %v1359_v50, %v1358_v48 }
  0xeb   :  { %v1361_v52 = vpop.f32.mrf.mxu0 }
  0xec   :  { %v1401_v53 = vpop.f32.mrf.mxu1 }
  0xed   :  { %v1362_v54 = vpop.f32.mrf.mxu0 }
  0xee   :  { %v1402_v55 = vpop.f32.mrf.mxu1  ;;  %v1363_v33 = vadd.f32 %v1362_v54, %v1361_v52 }
  0xef   :  { %v1364_v56 = vpop.f32.mrf.mxu0  ;;  %v1403_v52 = vadd.f32 %v1402_v55, %v1401_v53 }
  0xf0   :  { %v2027_v57 = vpop.f32.mrf.mxu1  ;;  %v865_v43 = vadd.f32 %v1363_v33, %v1191_v32 }
  0xf1   :  { %v1365_v58 = vpop.f32.mrf.mxu0 }
  0xf2   :  { %v1405_v59 = vpop.f32.mrf.mxu1  ;;  %v1366_v36 = vadd.f32 %v1365_v58, %v1364_v56 }
  0xf3   :  { %v1367_v60 = vpop.f32.mrf.mxu0  ;;  %v1406_v48 = vadd.f32 %v1405_v59, %v2027_v57 }
  0xf4   :  { %v2029_v61 = vpop.f32.mrf.mxu1 }
  0xf5   :  { %v1368_v62 = vpop.f32.mrf.mxu0 }
  0xf6   :  { %v2031_v63 = vpop.f32.mrf.mxu1  ;;  %v1369_v54 = vadd.f32 %v1368_v62, %v1367_v60 }
  0xf7   :  { %v1370_v0 = vpop.f32.mrf.mxu0 }
  0xf8   :  { %v2033_v1 = vpop.f32.mrf.mxu1  ;;  %v873_v62 = vadd.f32 %v1369_v54, %v1191_v32 }
  0xf9   :  { %v1371_v2 = vpop.f32.mrf.mxu0 }
  0xfa   :  { %v2035_v3 = vpop.f32.mrf.mxu1 }
  0xfb   :  { %v1373_v4 = vpop.f32.mrf.mxu0 }
  0xfc   :  { %v1413_v5 = vpop.f32.mrf.mxu1 }
  0xfd   :  { %v1374_v6 = vpop.f32.mrf.mxu0 }
  0xfe   :  { %v1414_v7 = vpop.f32.mrf.mxu1  ;;  %v1375_v37 = vadd.f32 %v1374_v6, %v1373_v4  ;;  %v922_v4 = vadd.f32 %v1397_v46, %v857_v40  ;;  %v1400_v6 = vadd.f32 %v2025_v51, %v2023_v49 }
  0xff   :  { %v1376_v8 = vpop.f32.mrf.mxu0  ;;  %v1415_v31 = vadd.f32 %v1414_v7, %v1413_v5  ;;  %v1412_v7 = vadd.f32 %v2035_v3, %v2033_v1 }
 0x100   :  { %v1416_v9 = vpop.f32.mrf.mxu1 }
 0x101   :  { %v1377_v10 = vpop.f32.mrf.mxu0 }
 0x102   :  { %v1417_v11 = vpop.f32.mrf.mxu1  ;;  %v1378_v41 = vadd.f32 %v1377_v10, %v1376_v8  ;;  %v860_v8 = vadd.f32 %v1360_v42, %v1191_v32  ;;  %v930_v10 = vadd.f32 %v1403_v52, %v865_v43 }
 0x103   :  { %v2037_v12 = vpop.f32.mrf.mxu0  ;;  %v1418_v53 = vadd.f32 %v1417_v11, %v1416_v9 }
 0x104   :  { %v2039_v13 = vpop.f32.mrf.mxu1  ;;  %v884_v50 = vadd.f32 %v1378_v41, %v1191_v32 }
 0x105   :  { %v1436_v14 = vpop.f32.mrf.mxu0 }
 0x106   :  { %v2041_v15 = vpop.f32.mrf.mxu1  ;;  %v949_v57 = vadd.f32 %v1418_v53, %v884_v50  ;;  %v1437_v59 = vadd.f32 %v1436_v14, %v2037_v12 }
 0x107   :  { %v1438_v16 = vpop.f32.mrf.mxu0 }
 0x108   :  { %v2043_v17 = vpop.f32.mrf.mxu1  ;;  %v987_v41 = vadd.f32 %v1437_v59, %v922_v4 }
 0x109   :  { %2104 = vst [vmem:[#allocation2_spill] sm:$0xff] %v2043_v17  ;;  %v1439_v18 = vpop.f32.mrf.mxu0  ;;  %v881_v17 = vadd.f32 %v1375_v37, %v1191_v32 }
 0x10a   :  { %v2045_v19 = vpop.f32.mrf.mxu1  ;;  %v1440_v37 = vadd.f32 %v1439_v18, %v1438_v16 }
 0x10b   :  { %2105 = vst [vmem:[#allocation3_spill] sm:$0xff] %v2045_v19  ;;  %v1441_v20 = vpop.f32.mrf.mxu0  ;;  %v868_v19 = vadd.f32 %v1366_v36, %v1191_v32  ;;  %v946_v36 = vadd.f32 %v1415_v31, %v881_v17 }
 0x10c   :  { %v2047_v21 = vpop.f32.mrf.mxu1 }
 0x10d   :  { %v1442_v22 = vpop.f32.mrf.mxu0  ;;  %v933_v47 = vadd.f32 %v1406_v48, %v868_v19 }
 0x10e   :  { %v2049_v23 = vpop.f32.mrf.mxu1  ;;  %v1443_v55 = vadd.f32 %v1442_v22, %v1441_v20  ;;  %v925_v22 = vadd.f32 %v1400_v6, %v860_v8 }
 0x10f   :  { %v1444_v24 = vpop.f32.mrf.mxu0  ;;  %v1483_v14 = vadd.f32 %v2049_v23, %v2047_v21 }
 0x110   :  { %v2051_v25 = vpop.f32.mrf.mxu1  ;;  %v990_v12 = vadd.f32 %v1440_v37, %v925_v22 }
 0x111   :  { %v1445_v26 = vpop.f32.mrf.mxu0 }
 0x112   :  { %v2053_v27 = vpop.f32.mrf.mxu1  ;;  %v1446_v60 = vadd.f32 %v1445_v26, %v1444_v24  ;;  %v995_v24 = vadd.f32 %v1443_v55, %v930_v10  ;;  %v2110_v42 = vld [vmem:[#allocation3_spill] sm:$0xff] }
 0x113   :  { %v1447_v28 = vpop.f32.mrf.mxu0  ;;  %v1486_v1 = vadd.f32 %v2053_v27, %v2051_v25 }
 0x114   :  { %v2055_v29 = vpop.f32.mrf.mxu1  ;;  %v998_v26 = vadd.f32 %v1446_v60, %v933_v47 }
 0x115   :  { %2106 = vst [vmem:[#allocation4_spill] sm:$0xff] %v2055_v29  ;;  %v1448_v30 = vpop.f32.mrf.mxu0 }
 0x116   :  { %v2060_v34 = vpop.f32.mrf.mxu1  ;;  %v1449_v19 = vadd.f32 %v1448_v30, %v1447_v28  ;;  %v1063_v52 = vadd.f32 %v1486_v1, %v998_v26 }
 0x117   :  { %2107 = vst [vmem:[#allocation5_spill] sm:$0xff] %v2060_v34  ;;  %v1450_v35 = vpop.f32.mrf.mxu0  ;;  %v1372_v34 = vadd.f32 %v1371_v2, %v1370_v0  ;;  %v1409_v0 = vadd.f32 %v2031_v63, %v2029_v61 }
 0x118   :  { %v2062_v38 = vpop.f32.mrf.mxu1 }
 0x119   :  { %v1451_v39 = vpop.f32.mrf.mxu0  ;;  %v876_v2 = vadd.f32 %v1372_v34, %v1191_v32  ;;  %v938_v63 = vadd.f32 %v1409_v0, %v873_v62 }
 0x11a   :  { %v2064_v29 = vpop.f32.mrf.mxu1  ;;  %v1452_v9 = vadd.f32 %v1451_v39, %v1450_v35  ;;  %v1477_v39 = vadd.f32 %v2041_v15, %v2039_v13 }
 0x11b   :  { %2108 = vst [vmem:[#allocation6_spill] sm:$0xff] %v2064_v29  ;;  %v1453_v44 = vpop.f32.mrf.mxu0  ;;  %v941_v17 = vadd.f32 %v1412_v7, %v876_v2  ;;  %v1003_v16 = vadd.f32 %v1449_v19, %v938_v63 }
 0x11c   :  { %v1493_v56 = vpop.f32.mrf.mxu1  ;;  %v2111_v54 = vld [vmem:[#allocation4_spill] sm:$0xff]  ;;  %v1052_v4 = vadd.f32 %v1477_v39, %v987_v41 }
 0x11d   :  { %v1454_v58 = vpop.f32.mrf.mxu0  ;;  %v1006_v18 = vadd.f32 %v1452_v9, %v941_v17 }
 0x11e   :  { %v1455_v33 = vadd.f32 %v1454_v58, %v1453_v44  ;;  %v1494_v29 = vpop.f32.mrf.mxu1  ;;  %v1060_v44 = vadd.f32 %v1483_v14, %v995_v24  ;;  %v2112_v21 = vld [vmem:[#allocation5_spill] sm:$0xff] }
 0x11f   :  { %v1456_v45 = vpop.f32.mrf.mxu0  ;;  %v1495_v32 = vadd.f32 %v1494_v29, %v1493_v56  ;;  %v2109_v29 = vld [vmem:[#allocation2_spill] sm:$0xff]  ;;  %v1489_v23 = vadd.f32 %v2112_v21, %v2111_v54 }
 0x120   :  { %v1496_v49 = vpop.f32.mrf.mxu1  ;;  %v1011_v11 = vadd.f32 %v1455_v33, %v946_v36  ;;  %v1480_v43 = vadd.f32 %v2110_v42, %v2109_v29 }
 0x121   :  { %v1457_v51 = vpop.f32.mrf.mxu0  ;;  %v1068_v13 = vadd.f32 %v1489_v23, %v1003_v16 }
 0x122   :  { %v1458_v5 = vadd.f32 %v1457_v51, %v1456_v45  ;;  %v1497_v20 = vpop.f32.mrf.mxu1  ;;  %v1076_v28 = vadd.f32 %v1495_v32, %v1011_v11  ;;  %v2113_v25 = vld [vmem:[#allocation6_spill] sm:$0xff]  ;;  %v1055_v50 = vadd.f32 %v1480_v43, %v990_v12 }
 0x123   :  { %v1498_v34 = vadd.f32 %v1497_v20, %v1496_v49  ;;  %v1492_v27 = vadd.f32 %v2113_v25, %v2062_v38 }
 0x124   :  { %v1014_v61 = vadd.f32 %v1458_v5, %v949_v57  ;;  %v1529_v40 = vpop.f32.mrf.mxu0 }
 0x125   :  { %v1533_v3 = vpop.f32.mrf.mxu1  ;;  %v1125_v58 = vadd.f32 %v1529_v40, %v1060_v44  ;;  %v1071_v31 = vadd.f32 %v1492_v27, %v1006_v18 }
 0x126   :  { %v1116_v30 = vpop.f32.mrf.mxu0  ;;  %v1079_v35 = vadd.f32 %v1498_v34, %v1014_v61  ;;  %v1141_v8 = vadd.f32 %v1533_v3, %v1076_v28 }
 0x127   :  { %v1132_v46 = vpop.f32.mrf.mxu1  ;;  %v1117_v33 = vadd.f32 %v1116_v30, %v1052_v4 }
 0x128   :  { %v1530_v56 = vpop.f32.mrf.mxu0  ;;  %v1133_v55 = vadd.f32 %v1132_v46, %v1068_v13 }
 0x129   :  { %v1128_v6 = vadd.f32 %v1530_v56, %v1063_v52  ;;  %v1534_v48 = vpop.f32.mrf.mxu1 }
 0x12a   :  { %v1144_v15 = vadd.f32 %v1534_v48, %v1079_v35  ;;  %v1119_v10 = vpop.f32.mrf.mxu0 }
 0x12b   :  { %v1324_v45 = vpack.c.bf16 %v1128_v6, %v1125_v58  ;;  %v1120_v47 = vadd.f32 %v1119_v10, %v1055_v50  ;;  %v1135_v53 = vpop.f32.mrf.mxu1 }
 0x12c   :  { %v1334_v60 = vpack.c.bf16 %v1144_v15, %v1141_v8  ;;  %v1136_v62 = vadd.f32 %v1135_v53, %v1071_v31 }
 0x12d   :  { %1336 = vst [vmem:[%s2103_s3 + $0x8] sm:$0xff] %v1324_v45   ;;  %v1319_v38 = vpack.c.bf16 %v1120_v47, %v1117_v33 }
 0x12e   :  { %1338 = vst [vmem:[%s2103_s3 + $0x18] sm:$0xff] %v1334_v60   ;;  %v1329_v0 = vpack.c.bf16 %v1136_v62, %v1133_v55 }
 0x12f   :  { %1320 = vst [vmem:[%s2103_s3] sm:$0xff] %v1319_v38  }
 0x130   :  { %1337 = vst [vmem:[%s2103_s3 + $0x10] sm:$0xff] %v1329_v0  }

// kernel: crnn_ctc_forward.27
= control target key start
LH: loop header
LB: loop body
LE: loop exit
PB: predicated region body
PF: predicated region fallthrough
CT: control target
= control target key end

     0   :  { %s2108_s1 = inlined_call_operand.vmem [shape: bf16[1152,128], index: 1, kind: input, shape index: {}]   ;;  %s2109_s0 = inlined_call_operand.vmem [shape: bf16[64,1152], index: 0, kind: input, shape index: {}]   ;;  %s2110_s2 = inlined_call_operand.vmem [shape: f32[1,128], index: 2, kind: input, shape index: {}]   ;;  %s2111_s3 = inlined_call_operand.vmem [shape: bf16[64,128], index: 3, kind: output, shape index: {}]  }
   0x1   :  { %v1559_v0 = vld [vmem:[%s2108_s1 + $0x78] sm:$0xff]   ;;  %v1563_v4 = vld [vmem:[%s2108_s1 + $0x70] sm:$0xff]   ;;  %v1567_v8 = vld [vmem:[%s2108_s1 + $0x68] sm:$0xff]  }
   0x2   :  { %v1560_v1 = vld [vmem:[%s2108_s1 + $0xf8] sm:$0xff]   ;;  %1347 = vmatprep.subr.bf16.mxu0 %v1559_v0  ;;  %v1564_v5 = vld [vmem:[%s2108_s1 + $0xf0] sm:$0xff]   ;;  %v1568_v9 = vld [vmem:[%s2108_s1 + $0xe8] sm:$0xff]  }
   0x3   :  { %v1561_v2 = vld [vmem:[%s2108_s1 + $0x38] sm:$0xff]   ;;  %1387 = vmatprep.subr.bf16.mxu1 %v1560_v1  ;;  %v1565_v6 = vld [vmem:[%s2108_s1 + $0x30] sm:$0xff]   ;;  %v1569_v10 = vld [vmem:[%s2108_s1 + $0x28] sm:$0xff]  }
   0x4   :  { %v1562_v3 = vld [vmem:[%s2108_s1 + $0xb8] sm:$0xff]   ;;  %1348 = vmatpush3.bf16.msra.mxu0 %v1561_v2  ;;  %v1566_v7 = vld [vmem:[%s2108_s1 + $0xb0] sm:$0xff]   ;;  %v1570_v11 = vld [vmem:[%s2108_s1 + $0xa8] sm:$0xff]  }
   0x5   :  { %1388 = vmatpush3.bf16.msra.mxu1 %v1562_v3  ;;  %1349 = vmatprep.subr.bf16.mxu0 %v1563_v4  ;;  %v1571_v12 = vld [vmem:[%s2108_s1 + $0x60] sm:$0xff]   ;;  %v1575_v16 = vld [vmem:[%s2108_s1 + $0x58] sm:$0xff]   ;;  %v1579_v20 = vld [vmem:[%s2108_s1 + $0x50] sm:$0xff]  }
   0x6   :  { %1389 = vmatprep.subr.bf16.mxu1 %v1564_v5  ;;  %v1572_v13 = vld [vmem:[%s2108_s1 + $0xe0] sm:$0xff]   ;;  %v1576_v17 = vld [vmem:[%s2108_s1 + $0xd8] sm:$0xff]   ;;  %v1580_v21 = vld [vmem:[%s2108_s1 + $0xd0] sm:$0xff]  }
   0x7   :  { %v1573_v14 = vld [vmem:[%s2108_s1 + $0x20] sm:$0xff]   ;;  %v1577_v18 = vld [vmem:[%s2108_s1 + $0x18] sm:$0xff]   ;;  %v1581_v22 = vld [vmem:[%s2108_s1 + $0x10] sm:$0xff]  }
   0x8   :  { %1350 = vmatpush3.bf16.msra.mxu0 %v1565_v6  ;;  %v1574_v15 = vld [vmem:[%s2108_s1 + $0xa0] sm:$0xff]   ;;  %v1578_v19 = vld [vmem:[%s2108_s1 + $0x98] sm:$0xff]   ;;  %v1582_v23 = vld [vmem:[%s2108_s1 + $0x90] sm:$0xff]  }
   0x9   :  { %1390 = vmatpush3.bf16.msra.mxu1 %v1566_v7  ;;  %1351 = vmatprep.subr.bf16.mxu0 %v1567_v8  ;;  %v1583_v24 = vld [vmem:[%s2108_s1 + $0x48] sm:$0xff]   ;;  %v1587_v28 = vld [vmem:[%s2108_s1 + $0x40] sm:$0xff]   ;;  %v1597_v36 = vld [vmem:[%s2108_s1 + $0x178] sm:$0xff]  }
   0xa   :  { %1391 = vmatprep.subr.bf16.mxu1 %v1568_v9  ;;  %v1584_v25 = vld [vmem:[%s2108_s1 + $0xc8] sm:$0xff]   ;;  %v1588_v29 = vld [vmem:[%s2108_s1 + $0xc0] sm:$0xff]   ;;  %v1598_v37 = vld [vmem:[%s2108_s1 + $0x1f8] sm:$0xff]  }
   0xb   :  { %v1585_v26 = vld [vmem:[%s2108_s1 + $0x8] sm:$0xff]   ;;  %v1589_v30 = vld [vmem:[%s2108_s1] sm:$0xff]   ;;  %v1599_v38 = vld [vmem:[%s2108_s1 + $0x138] sm:$0xff]  }
   0xc   :  { %1352 = vmatpush3.bf16.msra.mxu0 %v1569_v10  ;;  %v1586_v27 = vld [vmem:[%s2108_s1 + $0x88] sm:$0xff]   ;;  %v1590_v31 = vld [vmem:[%s2108_s1 + $0x80] sm:$0xff]   ;;  %v1600_v39 = vld [vmem:[%s2108_s1 + $0x1b8] sm:$0xff]  }
   0xd   :  { %1392 = vmatpush3.bf16.msra.mxu1 %v1570_v11  ;;  %1353 = vmatprep.subr.bf16.mxu0 %v1571_v12  ;;  %v1591_v32 = vld [vmem:[%s2109_s0] ss:$36 sps:$4 sm:$0xff]   ;;  %v1594_v34 = vld [vmem:[%s2109_s0 + $0x8] ss:$36 sps:$4 sm:$0xff]   ;;  %v1601_v40 = vld [vmem:[%s2108_s1 + $0x170] sm:$0xff]  }
   0xe   :  { %1393 = vmatprep.subr.bf16.mxu1 %v1572_v13  ;;  %v1593_v33 = vld [vmem:[%s2109_s0 + $0x4] ss:$36 sps:$4 sm:$0xff]   ;;  %v1596_v35 = vld [vmem:[%s2109_s0 + $0xc] ss:$36 sps:$4 sm:$0xff]   ;;  %v1607_v45 = vld [vmem:[%s2109_s0 + $0x54] ss:$36 sps:$4 sm:$0xff]  }
   0xf   :  { %854 = vmatprep.mubr.bf16.mxu0 %v1593_v33  ;;  %919 = vmatprep.mubr.bf16.mxu1 %v1596_v35  ;;  %v1602_v41 = vld [vmem:[%s2108_s1 + $0x1f0] sm:$0xff]   ;;  %v1609_v46 = vld [vmem:[%s2109_s0 + $0x48] ss:$36 sps:$4 sm:$0xff]   ;;  %v1615_v52 = vld [vmem:[%s2108_s1 + $0x160] sm:$0xff]  }
  0x10   :  { %1354 = vmatpush3.bf16.msra.mxu0 %v1573_v14  ;;  %v1603_v42 = vld [vmem:[%s2108_s1 + $0x130] sm:$0xff]   ;;  %v1611_v48 = vld [vmem:[%s2108_s1 + $0x168] sm:$0xff]   ;;  %v1616_v53 = vld [vmem:[%s2108_s1 + $0x1e0] sm:$0xff]  }
  0x11   :  { %1394 = vmatpush3.bf16.msra.mxu1 %v1574_v15  ;;  %1355 = vmatprep.subr.bf16.mxu0 %v1575_v16  ;;  %v1604_v43 = vld [vmem:[%s2108_s1 + $0x1b0] sm:$0xff]   ;;  %v1612_v49 = vld [vmem:[%s2108_s1 + $0x1e8] sm:$0xff]   ;;  %v1617_v54 = vld [vmem:[%s2108_s1 + $0x120] sm:$0xff]  }
  0x12   :  { %1395 = vmatprep.subr.bf16.mxu1 %v1576_v17  ;;  %v1605_v44 = vld [vmem:[%s2109_s0 + $0x4c] ss:$36 sps:$4 sm:$0xff]   ;;  %v1618_v55 = vld [vmem:[%s2108_s1 + $0x1a0] sm:$0xff]   ;;  %v1619_v56 = vld [vmem:[%s2109_s0 + $0x94] ss:$36 sps:$4 sm:$0xff]  }
  0x13   :  { %v1610_v47 = vld [vmem:[%s2109_s0 + $0x50] ss:$36 sps:$4 sm:$0xff]   ;;  %v1613_v50 = vld [vmem:[%s2108_s1 + $0x128] sm:$0xff]   ;;  %v1621_v57 = vld [vmem:[%s2109_s0 + $0x9c] ss:$36 sps:$4 sm:$0xff]  }
  0x14   :  { %1356 = vmatpush3.bf16.msra.mxu0 %v1577_v18  ;;  %v1614_v51 = vld [vmem:[%s2108_s1 + $0x1a8] sm:$0xff]   ;;  %v1623_v58 = vld [vmem:[%s2109_s0 + $0x90] ss:$36 sps:$4 sm:$0xff]   ;;  %v1624_v59 = vld [vmem:[%s2109_s0 + $0x98] ss:$36 sps:$4 sm:$0xff]  }
  0x15   :  { %1396 = vmatpush3.bf16.msra.mxu1 %v1578_v19  ;;  %1357 = vmatprep.subr.bf16.mxu0 %v1579_v20  ;;  %v1625_v60 = vld [vmem:[%s2108_s1 + $0x158] sm:$0xff]   ;;  %v1629_v0 = vld [vmem:[%s2108_s1 + $0x150] sm:$0xff]   ;;  %v1635_v5 = vld [vmem:[%s2109_s0 + $0xe4] ss:$36 sps:$4 sm:$0xff]  }
  0x16   :  { %1397 = vmatprep.subr.bf16.mxu1 %v1580_v21  ;;  %v1626_v61 = vld [vmem:[%s2108_s1 + $0x1d8] sm:$0xff]   ;;  %v1630_v1 = vld [vmem:[%s2108_s1 + $0x1d0] sm:$0xff]   ;;  %v1638_v7 = vld [vmem:[%s2109_s0 + $0xe0] ss:$36 sps:$4 sm:$0xff]  }
  0x17   :  { %v1627_v62 = vld [vmem:[%s2108_s1 + $0x118] sm:$0xff]   ;;  %v1631_v2 = vld [vmem:[%s2108_s1 + $0x110] sm:$0xff]   ;;  %v1639_v8 = vld [vmem:[%s2108_s1 + $0x148] sm:$0xff]  }
  0x18   :  { %1358 = vmatpush3.bf16.msra.mxu0 %v1581_v22  ;;  %v1628_v63 = vld [vmem:[%s2108_s1 + $0x198] sm:$0xff]   ;;  %v1632_v3 = vld [vmem:[%s2108_s1 + $0x190] sm:$0xff]   ;;  %v1640_v9 = vld [vmem:[%s2108_s1 + $0x1c8] sm:$0xff]  }
  0x19   :  { %1398 = vmatpush3.bf16.msra.mxu1 %v1582_v23  ;;  %1359 = vmatprep.subr.bf16.mxu0 %v1583_v24  ;;  %v1633_v4 = vld [vmem:[%s2109_s0 + $0xdc] ss:$36 sps:$4 sm:$0xff]   ;;  %v1641_v10 = vld [vmem:[%s2108_s1 + $0x108] sm:$0xff]   ;;  %v1647_v16 = vld [vmem:[%s2109_s0 + $0x10] ss:$36 sps:$4 sm:$0xff]  }
  0x1a   :  { %1399 = vmatprep.subr.bf16.mxu1 %v1584_v25  ;;  %v1637_v6 = vld [vmem:[%s2109_s0 + $0xd8] ss:$36 sps:$4 sm:$0xff]   ;;  %v1642_v11 = vld [vmem:[%s2108_s1 + $0x188] sm:$0xff]   ;;  %v1643_v12 = vld [vmem:[%s2108_s1 + $0x140] sm:$0xff]  }
  0x1b   :  { %v1644_v13 = vld [vmem:[%s2108_s1 + $0x1c0] sm:$0xff]   ;;  %v1649_v17 = vld [vmem:[%s2109_s0 + $0x14] ss:$36 sps:$4 sm:$0xff]   ;;  %v1671_v33 = vld [vmem:[%s2109_s0 + $0xec] ss:$36 sps:$4 sm:$0xff]  }
  0x1c   :  { %1360 = vmatpush3.bf16.msra.mxu0 %v1585_v26  ;;  %v1645_v14 = vld [vmem:[%s2108_s1 + $0x100] sm:$0xff]   ;;  %v1650_v18 = vld [vmem:[%s2109_s0 + $0x18] ss:$36 sps:$4 sm:$0xff]   ;;  %v1654_v21 = vld [vmem:[%s2108_s1 + $0x230] sm:$0xff]  }
  0x1d   :  { %1400 = vmatpush3.bf16.msra.mxu1 %v1586_v27  ;;  %1361 = vmatprep.subr.bf16.mxu0 %v1587_v28  ;;  %v1646_v15 = vld [vmem:[%s2108_s1 + $0x180] sm:$0xff]   ;;  %v1653_v20 = vld [vmem:[%s2108_s1 + $0x238] sm:$0xff]   ;;  %v1661_v26 = vld [vmem:[%s2108_s1 + $0x228] sm:$0xff]  }
  0x1e   :  { %1401 = vmatprep.subr.bf16.mxu1 %v1588_v29  ;;  %v1652_v19 = vld [vmem:[%s2109_s0 + $0x1c] ss:$36 sps:$4 sm:$0xff]   ;;  %v1657_v23 = vld [vmem:[%s2109_s0 + $0x64] ss:$36 sps:$4 sm:$0xff]   ;;  %v1665_v28 = vld [vmem:[%s2109_s0 + $0xac] ss:$36 sps:$4 sm:$0xff]  }
  0x1f   :  { %v1655_v22 = vld [vmem:[%s2109_s0 + $0x5c] ss:$36 sps:$4 sm:$0xff]   ;;  %v1663_v27 = vld [vmem:[%s2109_s0 + $0xa4] ss:$36 sps:$4 sm:$0xff]   ;;  %v1670_v35 = vld [vmem:[%s2108_s1 + $0x210] sm:$0xff]  }
  0x20   :  { %1362 = vmatpush3.bf16.msra.mxu0 %v1589_v30  ;;  %v1659_v24 = vld [vmem:[%s2109_s0 + $0x58] ss:$36 sps:$4 sm:$0xff]   ;;  %v1660_v25 = vld [vmem:[%s2109_s0 + $0x60] ss:$36 sps:$4 sm:$0xff]  }
  0x21   :  { %1402 = vmatpush3.bf16.msra.mxu1 %v1590_v31  ;;  %1427 = vmatprep.subr.bf16.mxu0 %v1597_v36  ;;  %v1662_v29 = vld [vmem:[%s2108_s1 + $0x220] sm:$0xff]   ;;  %v1668_v31 = vld [vmem:[%s2109_s0 + $0xa8] ss:$36 sps:$4 sm:$0xff]  }
  0x22   :  { %1467 = vmatprep.subr.bf16.mxu1 %v1598_v37  ;;  %v1667_v30 = vld [vmem:[%s2109_s0 + $0xa0] ss:$36 sps:$4 sm:$0xff]   ;;  %v1675_v36 = vld [vmem:[%s2109_s0 + $0xe8] ss:$36 sps:$4 sm:$0xff]  }
  0x23   :  { %855 = vmatmul.mubr.bf16.vlgmr.msra.gmra.mxu0 %v1591_v32  ;;  %v1669_v32 = vld [vmem:[%s2108_s1 + $0x218] sm:$0xff]   ;;  %v1677_v37 = vld [vmem:[%s2108_s1 + $0x208] sm:$0xff]  }
  0x24   :  { %920 = vmatmul.mubr.bf16.vlgmr.msra.gmra.mxu1 %v1594_v34  ;;  %1428 = vmatpush3.bf16.msra.mxu0 %v1599_v38  ;;  %v1673_v34 = vld [vmem:[%s2109_s0 + $0xf4] ss:$36 sps:$4 sm:$0xff]  }
  0x25   :  { %1468 = vmatpush3.bf16.msra.mxu1 %v1600_v39  ;;  %1429 = vmatprep.subr.bf16.mxu0 %v1601_v40  ;;  %v1676_v38 = vld [vmem:[%s2109_s0 + $0xf0] ss:$36 sps:$4 sm:$0xff]   ;;  %v1679_v39 = vld [vmem:[%s2109_s0 + $0x20] ss:$36 sps:$4 sm:$0xff]  }
  0x26   :  { %1469 = vmatprep.subr.bf16.mxu1 %v1602_v41  ;;  %862 = vmatprep.mubr.bf16.mxu0 %v1605_v44  ;;  %v1680_v40 = vld [vmem:[%s2109_s0 + $0xb0] ss:$36 sps:$4 sm:$0xff]   ;;  %v1678_v41 = vld [vmem:[%s2108_s1 + $0x200] sm:$0xff]  }
  0x27   :  { %927 = vmatprep.mubr.bf16.mxu1 %v1607_v45 }
  0x28   :  { %1430 = vmatpush3.bf16.msra.mxu0 %v1603_v42  ;;  %v1681_v42 = vld [vmem:[%s2109_s0 + $0x68] ss:$36 sps:$4 sm:$0xff]  }
  0x29   :  { %1470 = vmatpush3.bf16.msra.mxu1 %v1604_v43  ;;  %1431 = vmatprep.subr.bf16.mxu0 %v1611_v48  ;;  %v1682_v43 = vld [vmem:[%s2109_s0 + $0xf8] ss:$36 sps:$4 sm:$0xff]  }
  0x2a   :  { %1471 = vmatprep.subr.bf16.mxu1 %v1612_v49 }
  0x2b   :  { %863 = vmatmul.mubr.bf16.gmra.mxu0 %v1609_v46 }
  0x2c   :  { %928 = vmatmul.mubr.bf16.gmra.mxu1 %v1610_v47  ;;  %1432 = vmatpush3.bf16.msra.mxu0 %v1613_v50 }
  0x2d   :  { %1472 = vmatpush3.bf16.msra.mxu1 %v1614_v51  ;;  %1433 = vmatprep.subr.bf16.mxu0 %v1615_v52 }
  0x2e   :  { %1473 = vmatprep.subr.bf16.mxu1 %v1616_v53  ;;  %870 = vmatprep.mubr.bf16.mxu0 %v1619_v56 }
  0x2f   :  { %935 = vmatprep.mubr.bf16.mxu1 %v1621_v57 }
  0x30   :  { %1434 = vmatpush3.bf16.msra.mxu0 %v1617_v54 }
  0x31   :  { %1474 = vmatpush3.bf16.msra.mxu1 %v1618_v55  ;;  %1435 = vmatprep.subr.bf16.mxu0 %v1625_v60 }
  0x32   :  { %1475 = vmatprep.subr.bf16.mxu1 %v1626_v61 }
  0x33   :  { %871 = vmatmul.mubr.bf16.gmra.mxu0 %v1623_v58 }
  0x34   :  { %936 = vmatmul.mubr.bf16.gmra.mxu1 %v1624_v59  ;;  %1436 = vmatpush3.bf16.msra.mxu0 %v1627_v62 }
  0x35   :  { %1476 = vmatpush3.bf16.msra.mxu1 %v1628_v63  ;;  %1437 = vmatprep.subr.bf16.mxu0 %v1629_v0 }
  0x36   :  { %1477 = vmatprep.subr.bf16.mxu1 %v1630_v1  ;;  %878 = vmatprep.mubr.bf16.mxu0 %v1633_v4 }
  0x37   :  { %943 = vmatprep.mubr.bf16.mxu1 %v1635_v5 }
  0x38   :  { %1438 = vmatpush3.bf16.msra.mxu0 %v1631_v2 }
  0x39   :  { %1478 = vmatpush3.bf16.msra.mxu1 %v1632_v3  ;;  %1439 = vmatprep.subr.bf16.mxu0 %v1639_v8 }
  0x3a   :  { %1479 = vmatprep.subr.bf16.mxu1 %v1640_v9 }
  0x3b   :  { %879 = vmatmul.mubr.bf16.gmra.mxu0 %v1637_v6 }
  0x3c   :  { %944 = vmatmul.mubr.bf16.gmra.mxu1 %v1638_v7  ;;  %1440 = vmatpush3.bf16.msra.mxu0 %v1641_v10 }
  0x3d   :  { %1480 = vmatpush3.bf16.msra.mxu1 %v1642_v11  ;;  %1441 = vmatprep.subr.bf16.mxu0 %v1643_v12 }
  0x3e   :  { %1481 = vmatprep.subr.bf16.mxu1 %v1644_v13  ;;  %984 = vmatprep.mubr.bf16.mxu0 %v1649_v17 }
  0x3f   :  { %1049 = vmatprep.mubr.bf16.mxu1 %v1652_v19 }
  0x40   :  { %1442 = vmatpush3.bf16.msra.mxu0 %v1645_v14 }
  0x41   :  { %1482 = vmatpush3.bf16.msra.mxu1 %v1646_v15  ;;  %1519 = vmatprep.subr.bf16.mxu0 %v1653_v20 }
  0x42   :  { %1543 = vmatprep.subr.bf16.mxu1 %v1653_v20 }
  0x43   :  { %985 = vmatmul.mubr.bf16.vlgmr.msra.gmra.mxu0 %v1647_v16 }
  0x44   :  { %1050 = vmatmul.mubr.bf16.vlgmr.msra.gmra.mxu1 %v1650_v18  ;;  %1520 = vmatpush3.bf16.msra.mxu0 %v1653_v20 }
  0x45   :  { %1551 = vmatpush3.bf16.msra.mxu1 %v1653_v20  ;;  %1521 = vmatprep.subr.bf16.mxu0 %v1654_v21 }
  0x46   :  { %1544 = vmatprep.subr.bf16.mxu1 %v1654_v21  ;;  %992 = vmatprep.mubr.bf16.mxu0 %v1655_v22 }
  0x47   :  { %1057 = vmatprep.mubr.bf16.mxu1 %v1657_v23 }
  0x48   :  { %1522 = vmatpush3.bf16.msra.mxu0 %v1654_v21 }
  0x49   :  { %1552 = vmatpush3.bf16.msra.mxu1 %v1654_v21  ;;  %1523 = vmatprep.subr.bf16.mxu0 %v1661_v26 }
  0x4a   :  { %1545 = vmatprep.subr.bf16.mxu1 %v1661_v26 }
  0x4b   :  { %993 = vmatmul.mubr.bf16.gmra.mxu0 %v1659_v24 }
  0x4c   :  { %1058 = vmatmul.mubr.bf16.gmra.mxu1 %v1660_v25  ;;  %1000 = vmatprep.mubr.bf16.mxu0 %v1663_v27 }
  0x4d   :  { %1524 = vmatpush3.bf16.msra.mxu0 %v1661_v26  ;;  %1065 = vmatprep.mubr.bf16.mxu1 %v1665_v28 }
  0x4e   :  { %1553 = vmatpush3.bf16.msra.mxu1 %v1661_v26  ;;  %1525 = vmatprep.subr.bf16.mxu0 %v1662_v29 }
  0x4f   :  { %1546 = vmatprep.subr.bf16.mxu1 %v1662_v29 }
  0x51   :  { %1526 = vmatpush3.bf16.msra.mxu0 %v1662_v29 }
  0x52   :  { %1554 = vmatpush3.bf16.msra.mxu1 %v1662_v29  ;;  %1527 = vmatprep.subr.bf16.mxu0 %v1669_v32 }
  0x53   :  { %1001 = vmatmul.mubr.bf16.gmra.mxu0 %v1667_v30  ;;  %1547 = vmatprep.subr.bf16.mxu1 %v1669_v32  ;;  %v1199_v30 = vld [vmem:[%s2110_s2] ss:$0 sm:$0xff] }
  0x54   :  { %1066 = vmatmul.mubr.bf16.gmra.mxu1 %v1668_v31  ;;  %1008 = vmatprep.mubr.bf16.mxu0 %v1671_v33 }
  0x55   :  { %1528 = vmatpush3.bf16.msra.mxu0 %v1669_v32  ;;  %1073 = vmatprep.mubr.bf16.mxu1 %v1673_v34 }
  0x56   :  { %1555 = vmatpush3.bf16.msra.mxu1 %v1669_v32  ;;  %1529 = vmatprep.subr.bf16.mxu0 %v1670_v35 }
  0x57   :  { %1548 = vmatprep.subr.bf16.mxu1 %v1670_v35 }
  0x59   :  { %1530 = vmatpush3.bf16.msra.mxu0 %v1670_v35 }
  0x5a   :  { %1556 = vmatpush3.bf16.msra.mxu1 %v1670_v35  ;;  %1531 = vmatprep.subr.bf16.mxu0 %v1677_v37 }
  0x5b   :  { %1009 = vmatmul.mubr.bf16.gmra.mxu0 %v1675_v36  ;;  %1549 = vmatprep.subr.bf16.mxu1 %v1677_v37 }
  0x5c   :  { %1074 = vmatmul.mubr.bf16.gmra.mxu1 %v1676_v38  ;;  %1535 = vmatprep.mubr.bf16.mxu0 %v1679_v39 }
  0x5d   :  { %1532 = vmatpush3.bf16.msra.mxu0 %v1677_v37  ;;  %1539 = vmatprep.mubr.bf16.mxu1 %v1680_v40 }
  0x5e   :  { %1557 = vmatpush3.bf16.msra.mxu1 %v1677_v37  ;;  %1533 = vmatprep.subr.bf16.mxu0 %v1678_v41 }
  0x5f   :  { %1550 = vmatprep.subr.bf16.mxu1 %v1678_v41 }
  0x61   :  { %1534 = vmatpush3.bf16.msra.mxu0 %v1678_v41 }
  0x62   :  { %1558 = vmatpush3.bf16.msra.mxu1 %v1678_v41 }
  0x64   :  { %1536 = vmatmul.mubr.bf16.vlgmr.msra.gmra.mxu0 %v1681_v42 }
  0x65   :  { %1540 = vmatmul.mubr.bf16.vlgmr.msra.gmra.mxu1 %v1682_v43 }
  0xe3   :  { %v1363_v44 = vpop.f32.mrf.mxu0 }
  0xe4   :  { %v1403_v45 = vpop.f32.mrf.mxu1 }
  0xe5   :  { %v1364_v46 = vpop.f32.mrf.mxu0 }
  0xe6   :  { %v1404_v47 = vpop.f32.mrf.mxu1  ;;  %v1365_v29 = vadd.f32 %v1364_v46, %v1363_v44 }
  0xe7   :  { %v1366_v48 = vpop.f32.mrf.mxu0  ;;  %v1405_v42 = vadd.f32 %v1404_v47, %v1403_v45 }
  0xe8   :  { %v2027_v49 = vpop.f32.mrf.mxu1  ;;  %v857_v38 = vadd.f32 %v1365_v29, %v1199_v30 }
  0xe9   :  { %v1367_v50 = vpop.f32.mrf.mxu0 }
  0xea   :  { %v2029_v51 = vpop.f32.mrf.mxu1  ;;  %v1368_v33 = vadd.f32 %v1367_v50, %v1366_v48 }
  0xeb   :  { %v1369_v52 = vpop.f32.mrf.mxu0  ;;  %v1408_v50 = vadd.f32 %v2029_v51, %v2027_v49 }
  0xec   :  { %v2031_v53 = vpop.f32.mrf.mxu1  ;;  %v860_v44 = vadd.f32 %v1368_v33, %v1199_v30 }
  0xed   :  { %v1370_v54 = vpop.f32.mrf.mxu0 }
  0xee   :  { %v2033_v55 = vpop.f32.mrf.mxu1  ;;  %v1371_v34 = vadd.f32 %v1370_v54, %v1369_v52 }
  0xef   :  { %v1372_v56 = vpop.f32.mrf.mxu0  ;;  %v1411_v52 = vadd.f32 %v2033_v55, %v2031_v53 }
  0xf0   :  { %v2035_v57 = vpop.f32.mrf.mxu1  ;;  %v865_v46 = vadd.f32 %v1371_v34, %v1199_v30 }
  0xf1   :  { %v1373_v58 = vpop.f32.mrf.mxu0 }
  0xf2   :  { %v2037_v59 = vpop.f32.mrf.mxu1  ;;  %v1374_v39 = vadd.f32 %v1373_v58, %v1372_v56 }
  0xf3   :  { %v1375_v60 = vpop.f32.mrf.mxu0  ;;  %v1414_v45 = vadd.f32 %v2037_v59, %v2035_v57 }
  0xf4   :  { %v2039_v61 = vpop.f32.mrf.mxu1  ;;  %v868_v48 = vadd.f32 %v1374_v39, %v1199_v30 }
  0xf5   :  { %v1376_v62 = vpop.f32.mrf.mxu0 }
  0xf6   :  { %v2041_v63 = vpop.f32.mrf.mxu1  ;;  %v933_v49 = vadd.f32 %v1414_v45, %v868_v48 }
  0xf7   :  { %v1378_v0 = vpop.f32.mrf.mxu0  ;;  %v1417_v55 = vadd.f32 %v2041_v63, %v2039_v61 }
  0xf8   :  { %v2043_v1 = vpop.f32.mrf.mxu1 }
  0xf9   :  { %v1379_v2 = vpop.f32.mrf.mxu0 }
  0xfa   :  { %v2045_v3 = vpop.f32.mrf.mxu1  ;;  %v1380_v54 = vadd.f32 %v1379_v2, %v1378_v0 }
  0xfb   :  { %v1381_v4 = vpop.f32.mrf.mxu0 }
  0xfc   :  { %v1421_v5 = vpop.f32.mrf.mxu1  ;;  %v876_v0 = vadd.f32 %v1380_v54, %v1199_v30 }
  0xfd   :  { %v1382_v6 = vpop.f32.mrf.mxu0 }
  0xfe   :  { %v1422_v7 = vpop.f32.mrf.mxu1  ;;  %v1383_v35 = vadd.f32 %v1382_v6, %v1381_v4  ;;  %v925_v6 = vadd.f32 %v1408_v50, %v860_v44 }
  0xff   :  { %v1384_v8 = vpop.f32.mrf.mxu0  ;;  %v1423_v56 = vadd.f32 %v1422_v7, %v1421_v5 }
 0x100   :  { %v1424_v9 = vpop.f32.mrf.mxu1 }
 0x101   :  { %v1385_v10 = vpop.f32.mrf.mxu0 }
 0x102   :  { %v1425_v11 = vpop.f32.mrf.mxu1  ;;  %v1386_v43 = vadd.f32 %v1385_v10, %v1384_v8  ;;  %v930_v8 = vadd.f32 %v1411_v52, %v865_v46 }
 0x103   :  { %v1443_v12 = vpop.f32.mrf.mxu0  ;;  %v1426_v51 = vadd.f32 %v1425_v11, %v1424_v9 }
 0x104   :  { %v2047_v13 = vpop.f32.mrf.mxu1  ;;  %v884_v47 = vadd.f32 %v1386_v43, %v1199_v30 }
 0x105   :  { %v1444_v14 = vpop.f32.mrf.mxu0 }
 0x106   :  { %v2049_v15 = vpop.f32.mrf.mxu1  ;;  %v949_v7 = vadd.f32 %v1426_v51, %v884_v47 }
 0x107   :  { %v2051_v16 = vpop.f32.mrf.mxu0 }
 0x108   :  { %v2053_v17 = vpop.f32.mrf.mxu1 }
 0x109   :  { %2112 = vst [vmem:[#allocation2_spill] sm:$0xff] %v2053_v17  ;;  %v1447_v18 = vpop.f32.mrf.mxu0  ;;  %v881_v17 = vadd.f32 %v1383_v35, %v1199_v30  ;;  %v1445_v35 = vadd.f32 %v1444_v14, %v1443_v12 }
 0x10a   :  { %v2055_v19 = vpop.f32.mrf.mxu1 }
 0x10b   :  { %2113 = vst [vmem:[#allocation3_spill] sm:$0xff] %v2055_v19  ;;  %v1449_v20 = vpop.f32.mrf.mxu0  ;;  %v1377_v19 = vadd.f32 %v1376_v62, %v1375_v60  ;;  %v946_v29 = vadd.f32 %v1423_v56, %v881_v17 }
 0x10c   :  { %v2057_v21 = vpop.f32.mrf.mxu1 }
 0x10d   :  { %v1450_v22 = vpop.f32.mrf.mxu0  ;;  %v873_v10 = vadd.f32 %v1377_v19, %v1199_v30 }
 0x10e   :  { %v2059_v23 = vpop.f32.mrf.mxu1  ;;  %v1451_v60 = vadd.f32 %v1450_v22, %v1449_v20  ;;  %v1448_v20 = vadd.f32 %v1447_v18, %v2051_v16  ;;  %v1485_v18 = vadd.f32 %v2049_v15, %v2047_v13 }
 0x10f   :  { %v1452_v24 = vpop.f32.mrf.mxu0  ;;  %v938_v17 = vadd.f32 %v1417_v55, %v873_v10  ;;  %v1491_v61 = vadd.f32 %v2059_v23, %v2057_v21 }
 0x110   :  { %v2061_v25 = vpop.f32.mrf.mxu1  ;;  %v995_v22 = vadd.f32 %v1451_v60, %v930_v8  ;;  %v2120_v44 = vld [vmem:[#allocation2_spill] sm:$0xff] }
 0x111   :  { %2114 = vst [vmem:[#allocation4_spill] sm:$0xff] %v2061_v25  ;;  %v1453_v26 = vpop.f32.mrf.mxu0  ;;  %v922_v25 = vadd.f32 %v1405_v42, %v857_v38  ;;  %v990_v38 = vadd.f32 %v1448_v20, %v925_v6 }
 0x112   :  { %v2063_v27 = vpop.f32.mrf.mxu1  ;;  %v1454_v53 = vadd.f32 %v1453_v26, %v1452_v24  ;;  %v2121_v46 = vld [vmem:[#allocation3_spill] sm:$0xff] }
 0x113   :  { %2115 = vst [vmem:[#allocation5_spill] sm:$0xff] %v2063_v27  ;;  %v1455_v28 = vpop.f32.mrf.mxu0  ;;  %v987_v14 = vadd.f32 %v1445_v35, %v922_v25  ;;  %v1488_v48 = vadd.f32 %v2121_v46, %v2120_v44 }
 0x114   :  { %v2068_v31 = vpop.f32.mrf.mxu1  ;;  %v998_v63 = vadd.f32 %v1454_v53, %v933_v49 }
 0x115   :  { %2116 = vst [vmem:[#allocation6_spill] sm:$0xff] %v2068_v31  ;;  %v1456_v32 = vpop.f32.mrf.mxu0  ;;  %v1052_v52 = vadd.f32 %v1485_v18, %v987_v14 }
 0x116   :  { %v2070_v36 = vpop.f32.mrf.mxu1  ;;  %v1457_v2 = vadd.f32 %v1456_v32, %v1455_v28 }
 0x117   :  { %v1458_v37 = vpop.f32.mrf.mxu0 }
 0x118   :  { %v2072_v40 = vpop.f32.mrf.mxu1  ;;  %v1003_v28 = vadd.f32 %v1457_v2, %v938_v17  ;;  %v2117_v39 = vld [vmem:[#allocation4_spill] sm:$0xff] }
 0x119   :  { %v1459_v41 = vpop.f32.mrf.mxu0 }
 0x11a   :  { %v1499_v27 = vpop.f32.mrf.mxu1  ;;  %v1460_v9 = vadd.f32 %v1459_v41, %v1458_v37  ;;  %v1060_v37 = vadd.f32 %v1491_v61, %v995_v22 }
 0x11b   :  { %v1461_v31 = vpop.f32.mrf.mxu0  ;;  %v1500_v13 = vadd.f32 %v1499_v27, %v2072_v40 }
 0x11c   :  { %v1501_v58 = vpop.f32.mrf.mxu1  ;;  %v2119_v25 = vld [vmem:[#allocation6_spill] sm:$0xff] }
 0x11d   :  { %v1462_v4 = vpop.f32.mrf.mxu0  ;;  %v1497_v42 = vadd.f32 %v2070_v36, %v2119_v25 }
 0x11e   :  { %v1463_v62 = vadd.f32 %v1462_v4, %v1461_v31  ;;  %v1502_v33 = vpop.f32.mrf.mxu1  ;;  %v1420_v31 = vadd.f32 %v2045_v3, %v2043_v1  ;;  %v2118_v1 = vld [vmem:[#allocation5_spill] sm:$0xff] }
 0x11f   :  { %v1464_v34 = vpop.f32.mrf.mxu0  ;;  %v1503_v11 = vadd.f32 %v1502_v33, %v1501_v58  ;;  %v1494_v3 = vadd.f32 %v2118_v1, %v2117_v39  ;;  %v1068_v58 = vadd.f32 %v1497_v42, %v1003_v28 }
 0x120   :  { %v1011_v5 = vadd.f32 %v1463_v62, %v946_v29  ;;  %v1504_v57 = vpop.f32.mrf.mxu1  ;;  %v941_v26 = vadd.f32 %v1420_v31, %v876_v0  ;;  %v1055_v62 = vadd.f32 %v1488_v48, %v990_v38 }
 0x121   :  { %v1465_v59 = vpop.f32.mrf.mxu0  ;;  %v1063_v56 = vadd.f32 %v1494_v3, %v998_v63 }
 0x122   :  { %v1466_v19 = vadd.f32 %v1465_v59, %v1464_v34  ;;  %v1505_v12 = vpop.f32.mrf.mxu1  ;;  %v1076_v16 = vadd.f32 %v1503_v11, %v1011_v5  ;;  %v1006_v21 = vadd.f32 %v1460_v9, %v941_v26 }
 0x123   :  { %v1506_v30 = vadd.f32 %v1505_v12, %v1504_v57 }
 0x124   :  { %v1014_v24 = vadd.f32 %v1466_v19, %v949_v7  ;;  %v1537_v32 = vpop.f32.mrf.mxu0  ;;  %v1071_v10 = vadd.f32 %v1500_v13, %v1006_v21 }
 0x125   :  { %v1541_v41 = vpop.f32.mrf.mxu1  ;;  %v1125_v50 = vadd.f32 %v1537_v32, %v1060_v37 }
 0x126   :  { %v1116_v23 = vpop.f32.mrf.mxu0  ;;  %v1079_v43 = vadd.f32 %v1506_v30, %v1014_v24  ;;  %v1141_v15 = vadd.f32 %v1541_v41, %v1076_v16 }
 0x127   :  { %v1132_v54 = vpop.f32.mrf.mxu1  ;;  %v1117_v45 = vadd.f32 %v1116_v23, %v1052_v52  ;;  %v1149_v29 = vmax.f32 %v1125_v50, 0.0 }
 0x128   :  { %v1538_v4 = vpop.f32.mrf.mxu0  ;;  %v1133_v36 = vadd.f32 %v1132_v54, %v1068_v58  ;;  %v1153_v51 = vmax.f32 %v1141_v15, 0.0 }
 0x129   :  { %v1128_v47 = vadd.f32 %v1538_v4, %v1063_v56  ;;  %v1542_v60 = vpop.f32.mrf.mxu1  ;;  %v1147_v55 = vmax.f32 %v1117_v45, 0.0 }
 0x12a   :  { %v1144_v6 = vadd.f32 %v1542_v60, %v1079_v43  ;;  %v1119_v8 = vpop.f32.mrf.mxu0  ;;  %v1151_v0 = vmax.f32 %v1133_v36, 0.0 }
 0x12b   :  { %v1150_v33 = vmax.f32 %v1128_v47, 0.0  ;;  %v1120_v34 = vadd.f32 %v1119_v8, %v1055_v62  ;;  %v1135_v49 = vpop.f32.mrf.mxu1 }
 0x12c   :  { %v1154_v35 = vmax.f32 %v1144_v6, 0.0  ;;  %v1136_v53 = vadd.f32 %v1135_v49, %v1071_v10 }
 0x12d   :  { %v1332_v27 = vpack.c.bf16 %v1150_v33, %v1149_v29  ;;  %v1148_v40 = vmax.f32 %v1120_v34, 0.0 }
 0x12e   :  { %v1342_v2 = vpack.c.bf16 %v1154_v35, %v1153_v51  ;;  %v1152_v5 = vmax.f32 %v1136_v53, 0.0 }
 0x12f   :  { %1344 = vst [vmem:[%s2111_s3 + $0x8] sm:$0xff] %v1332_v27   ;;  %v1327_v57 = vpack.c.bf16 %v1148_v40, %v1147_v55 }
 0x130   :  { %1346 = vst [vmem:[%s2111_s3 + $0x18] sm:$0xff] %v1342_v2   ;;  %v1337_v59 = vpack.c.bf16 %v1152_v5, %v1151_v0 }
 0x131   :  { %1328 = vst [vmem:[%s2111_s3] sm:$0xff] %v1327_v57  }
 0x132   :  { %1345 = vst [vmem:[%s2111_s3 + $0x10] sm:$0xff] %v1337_v59  }

// kernel: crnn_ctc_forward.33
= control target key start
LH: loop header
LB: loop body
LE: loop exit
PB: predicated region body
PF: predicated region fallthrough
CT: control target
= control target key end

     0   :  { %v9006_v0 = vmov 0.0   ;;  %v9008_v1 = vmov 0.0   ;;  %v9010_v2 = vmov 0.0   ;;  %v9012_v3 = vmov 0.0   ;;  %s9014_s18 = smov 0   ;;  %s12375_s0 = inlined_call_operand.vmem [shape: f32[8,2,2048], index: 0, kind: input, shape index: {}]   ;;  %s12376_s1 = inlined_call_operand.vmem [shape: f32[8,2,2048], index: 1, kind: input, shape index: {}]   ;;  %s12377_s2 = inlined_call_operand.vmem [shape: bf16[512,2048], index: 2, kind: input, shape index: {}]   ;;  %s12378_s3 = inlined_call_operand.vmem [shape: bf16[512,2048], index: 3, kind: input, shape index: {}]   ;;  %s12379_s4 = inlined_call_operand.vmem [shape: f32[8,2,512], index: 4, kind: output, shape index: {0}]   ;;  %s12380_s5 = inlined_call_operand.vmem [shape: f32[8,2,512], index: 5, kind: output, shape index: {1}]  }
   0x1 LB: > { %v174_v4 = vld [vmem:[%s12377_s2 + $0x380] sm:$0xff]  ;;  %v41_v7 = vlaneseq  ;;  %v8975_v13 = vmov 1983009808   ;;  %v37_v36 = vcombine.high %v8969_v3, %v8969_v3  ;;  %s8858_s14 = sshll.u32 %s8973_s18, 5  ;;  %s8860_s30 = sshll.u32 %s8973_s18, 3  ;;  %s8973_s18 = sphi %s9014_s18, %s24_s18   ;;  %v8969_v3 = vphi %v9012_v3, %v12381_v3   ;;  %v8965_v2 = vphi %v9010_v2, %v11027_v2   ;;  %v8961_v1 = vphi %v9008_v1, %v7781_v1   ;;  %v8957_v0 = vphi %v9006_v0, %v7779_v0  }
   0x2   : > { %v182_v5 = vld [vmem:[%s12377_s2 + $0x3c0] sm:$0xff]  ;;  %v39_v14 = vunpack.c.l.s4 %v8975_v13  ;;  %s10842_s22 = scalar_lea.vmem %s12375_s0, %s8858_s14  ;;  %s7784_s16 = scalar_lea.vmem %s12379_s4, %s8860_s30 }
   0x3   : > { %v430_v6 = vld [vmem:[%s12377_s2 + $0xb80] sm:$0xff]  ;;  %v7937_v8 = vcombine.high %v174_v4, %v182_v5  ;;  %v7936_v10 = vcombine.low %v174_v4, %v182_v5  ;;  %v42_v26 = vshrl.u32 %v41_v7, 7  ;;  %s12340_s20 = scalar_lea.vmem %s12376_s1, %s8858_s14  ;;  %s7787_s23 = scalar_lea.vmem %s12380_s5, %s8860_s30 }
   0x4   : > { %v438_v9 = vld [vmem:[%s12377_s2 + $0xbc0] sm:$0xff]  ;;  %v40_v25 = vunpack.c.0.s8 %v39_v14  ;;  %s24_s18 = sadd.s32 1, %s8973_s18  }
   0x5   : > { %v158_v11 = vld [vmem:[%s12377_s2 + $0x300] sm:$0xff]  ;;  %v8193_v15 = vcombine.high %v430_v6, %v438_v9  ;;  %v8192_v16 = vcombine.low %v430_v6, %v438_v9  ;;  %3134 = vmatprep.subr.bf16.mxu0 %v7937_v8  ;;  %p21_p0 = scmp.ge.s32.totalorder %s24_s18, 8  }
   0x6   : > { %v166_v12 = vld [vmem:[%s12377_s2 + $0x340] sm:$0xff]  ;;  %3135 = vmatpush1.bf16.msra.mxu0 %v7936_v10  ;;  %v9077_v35 = vsub.s32 %v40_v25, %v42_v26 }
   0x7   : > { %v7921_v17 = vcombine.high %v158_v11, %v166_v12  ;;  %v414_v18 = vld [vmem:[%s12377_s2 + $0xb00] sm:$0xff]  ;;  %3175 = vmatprep.subr.bf16.mxu1 %v8193_v15  ;;  %v7920_v27 = vcombine.low %v158_v11, %v166_v12 }
   0x8   : > { %v422_v19 = vld [vmem:[%s12377_s2 + $0xb40] sm:$0xff]  ;;  %3176 = vmatpush1.bf16.msra.mxu1 %v8192_v16  ;;  %v9080_v40 = vrot.slane %v8969_v3, %v9077_v35  ;;  %v9097_v47 = vrot.slane %v37_v36, %v9077_v35 }
   0x9   : > { %v142_v20 = vld [vmem:[%s12377_s2 + $0x280] sm:$0xff]  ;;  %v8177_v21 = vcombine.high %v414_v18, %v422_v19  ;;  %3136 = vmatprep.subr.bf16.mxu0 %v7921_v17  ;;  %v8176_v28 = vcombine.low %v414_v18, %v422_v19 }
   0xa   : > { %v150_v22 = vld [vmem:[%s12377_s2 + $0x2c0] sm:$0xff]  ;;  %3137 = vmatpush1.bf16.msra.mxu0 %v7920_v27  ;;  %v52_v46 = vcombine.high %v9080_v40, %v9080_v40  ;;  %v53_v57 = vcombine.high %v9097_v47, %v9097_v47 }
   0xb   : > { %v398_v23 = vld [vmem:[%s12377_s2 + $0xa80] sm:$0xff]  ;;  %v7905_v29 = vcombine.high %v142_v20, %v150_v22  ;;  %3177 = vmatprep.subr.bf16.mxu1 %v8177_v21  ;;  %v7904_v37 = vcombine.low %v142_v20, %v150_v22 }
   0xc   : > { %v406_v24 = vld [vmem:[%s12377_s2 + $0xac0] sm:$0xff]  ;;  %3178 = vmatpush1.bf16.msra.mxu1 %v8176_v28  ;;  %v9099_v51 = vpack.c.bf16 %v52_v46, %v52_v46  ;;  %v9116_v61 = vpack.c.bf16 %v53_v57, %v53_v57 }
   0xd   : > { %v8161_v30 = vcombine.high %v398_v23, %v406_v24  ;;  %v126_v31 = vld [vmem:[%s12377_s2 + $0x200] sm:$0xff]  ;;  %3138 = vmatprep.subr.bf16.mxu0 %v7905_v29  ;;  %v8160_v38 = vcombine.low %v398_v23, %v406_v24 }
   0xe   : > { %v134_v32 = vld [vmem:[%s12377_s2 + $0x240] sm:$0xff]  ;;  %3139 = vmatpush1.bf16.msra.mxu0 %v7904_v37  ;;  %3166 = vmatprep.mubr.bf16.mxu0 %v9099_v51 }
   0xf   : > { %v382_v33 = vld [vmem:[%s12377_s2 + $0xa00] sm:$0xff]  ;;  %v7889_v39 = vcombine.high %v126_v31, %v134_v32  ;;  %3179 = vmatprep.subr.bf16.mxu1 %v8161_v30  ;;  %v7888_v48 = vcombine.low %v126_v31, %v134_v32  ;;  %3207 = vmatprep.mubr.bf16.mxu1 %v9116_v61 }
  0x10   : > { %v390_v34 = vld [vmem:[%s12377_s2 + $0xa40] sm:$0xff]  ;;  %3180 = vmatpush1.bf16.msra.mxu1 %v8160_v38 }
  0x11   : > { %v8145_v41 = vcombine.high %v382_v33, %v390_v34  ;;  %v110_v42 = vld [vmem:[%s12377_s2 + $0x180] sm:$0xff]  ;;  %3140 = vmatprep.subr.bf16.mxu0 %v7889_v39  ;;  %v8144_v49 = vcombine.low %v382_v33, %v390_v34 }
  0x12   : > { %v118_v43 = vld [vmem:[%s12377_s2 + $0x1c0] sm:$0xff]  ;;  %3141 = vmatpush1.bf16.msra.mxu0 %v7888_v48 }
  0x13   : > { %v366_v44 = vld [vmem:[%s12377_s2 + $0x980] sm:$0xff]  ;;  %v7873_v50 = vcombine.high %v110_v42, %v118_v43  ;;  %3181 = vmatprep.subr.bf16.mxu1 %v8145_v41  ;;  %v7872_v58 = vcombine.low %v110_v42, %v118_v43 }
  0x14   : > { %v374_v45 = vld [vmem:[%s12377_s2 + $0x9c0] sm:$0xff]  ;;  %3182 = vmatpush1.bf16.msra.mxu1 %v8144_v49 }
  0x15   : > { %v8129_v52 = vcombine.high %v366_v44, %v374_v45  ;;  %v94_v53 = vld [vmem:[%s12377_s2 + $0x100] sm:$0xff]  ;;  %3142 = vmatprep.subr.bf16.mxu0 %v7873_v50  ;;  %v8128_v59 = vcombine.low %v366_v44, %v374_v45 }
  0x16   : > { %v102_v54 = vld [vmem:[%s12377_s2 + $0x140] sm:$0xff]  ;;  %3143 = vmatpush1.bf16.msra.mxu0 %v7872_v58 }
  0x17   : > { %v350_v55 = vld [vmem:[%s12377_s2 + $0x900] sm:$0xff]  ;;  %v7857_v60 = vcombine.high %v94_v53, %v102_v54  ;;  %3183 = vmatprep.subr.bf16.mxu1 %v8129_v52  ;;  %v7856_v6 = vcombine.low %v94_v53, %v102_v54 }
  0x18   : > { %v358_v56 = vld [vmem:[%s12377_s2 + $0x940] sm:$0xff]  ;;  %3184 = vmatpush1.bf16.msra.mxu1 %v8128_v59 }
  0x19   : > { %v8113_v62 = vcombine.high %v350_v55, %v358_v56  ;;  %v78_v63 = vld [vmem:[%s12377_s2 + $0x80] sm:$0xff]  ;;  %3144 = vmatprep.subr.bf16.mxu0 %v7857_v60  ;;  %v8112_v7 = vcombine.low %v350_v55, %v358_v56 }
  0x1a   : > { %v86_v3 = vld [vmem:[%s12377_s2 + $0xc0] sm:$0xff]  ;;  %3145 = vmatpush1.bf16.msra.mxu0 %v7856_v6 }
  0x1b   : > { %v334_v4 = vld [vmem:[%s12377_s2 + $0x880] sm:$0xff]  ;;  %v7841_v8 = vcombine.high %v78_v63, %v86_v3  ;;  %3185 = vmatprep.subr.bf16.mxu1 %v8113_v62  ;;  %v7840_v14 = vcombine.low %v78_v63, %v86_v3 }
  0x1c   : > { %v342_v5 = vld [vmem:[%s12377_s2 + $0x8c0] sm:$0xff]  ;;  %3186 = vmatpush1.bf16.msra.mxu1 %v8112_v7 }
  0x1d   : > { %v8097_v9 = vcombine.high %v334_v4, %v342_v5  ;;  %v62_v10 = vld [vmem:[%s12377_s2] sm:$0xff]  ;;  %3146 = vmatprep.subr.bf16.mxu0 %v7841_v8  ;;  %v8096_v15 = vcombine.low %v334_v4, %v342_v5 }
  0x1e   : > { %v70_v11 = vld [vmem:[%s12377_s2 + $0x40] sm:$0xff]  ;;  %3147 = vmatpush1.bf16.msra.mxu0 %v7840_v14 }
  0x1f   : > { %v318_v12 = vld [vmem:[%s12377_s2 + $0x800] sm:$0xff]  ;;  %v7825_v16 = vcombine.high %v62_v10, %v70_v11  ;;  %3187 = vmatprep.subr.bf16.mxu1 %v8097_v9  ;;  %v7824_v22 = vcombine.low %v62_v10, %v70_v11 }
  0x20   : > { %v326_v13 = vld [vmem:[%s12377_s2 + $0x840] sm:$0xff]  ;;  %3188 = vmatpush1.bf16.msra.mxu1 %v8096_v15 }
  0x21   : > { %v8081_v17 = vcombine.high %v318_v12, %v326_v13  ;;  %v302_v18 = vld [vmem:[%s12377_s2 + $0x780] sm:$0xff]  ;;  %3148 = vmatprep.subr.bf16.mxu0 %v7825_v16  ;;  %v8080_v23 = vcombine.low %v318_v12, %v326_v13 }
  0x22   : > { %v310_v19 = vld [vmem:[%s12377_s2 + $0x7c0] sm:$0xff]  ;;  %3149 = vmatpush1.bf16.msra.mxu0 %v7824_v22 }
  0x23   : > { %v558_v20 = vld [vmem:[%s12377_s2 + $0xf80] sm:$0xff]  ;;  %v8065_v24 = vcombine.high %v302_v18, %v310_v19  ;;  %3189 = vmatprep.subr.bf16.mxu1 %v8081_v17  ;;  %v8064_v30 = vcombine.low %v302_v18, %v310_v19 }
  0x24   : > { %v566_v21 = vld [vmem:[%s12377_s2 + $0xfc0] sm:$0xff]  ;;  %3190 = vmatpush1.bf16.msra.mxu1 %v8080_v23 }
  0x25   : > { %v8321_v25 = vcombine.high %v558_v20, %v566_v21  ;;  %v286_v26 = vld [vmem:[%s12377_s2 + $0x700] sm:$0xff]  ;;  %3150 = vmatprep.subr.bf16.mxu0 %v8065_v24  ;;  %v8320_v31 = vcombine.low %v558_v20, %v566_v21 }
  0x26   : > { %v294_v27 = vld [vmem:[%s12377_s2 + $0x740] sm:$0xff]  ;;  %3151 = vmatpush2.bf16.msra.mxu0 %v8064_v30 }
  0x27   : > { %v542_v28 = vld [vmem:[%s12377_s2 + $0xf00] sm:$0xff]  ;;  %v8049_v32 = vcombine.high %v286_v26, %v294_v27  ;;  %3191 = vmatprep.subr.bf16.mxu1 %v8321_v25  ;;  %v8048_v39 = vcombine.low %v286_v26, %v294_v27  ;;  %v175_v26 = vld [vmem:[%s12377_s2 + $0x388] sm:$0xff] }
  0x28   : > { %v550_v29 = vld [vmem:[%s12377_s2 + $0xf40] sm:$0xff]  ;;  %3192 = vmatpush2.bf16.msra.mxu1 %v8320_v31  ;;  %v183_v27 = vld [vmem:[%s12377_s2 + $0x3c8] sm:$0xff] }
  0x29   : > { %v8305_v33 = vcombine.high %v542_v28, %v550_v29  ;;  %v270_v34 = vld [vmem:[%s12377_s2 + $0x680] sm:$0xff]  ;;  %3152 = vmatprep.subr.bf16.mxu0 %v8049_v32  ;;  %v8304_v41 = vcombine.low %v542_v28, %v550_v29  ;;  %v431_v28 = vld [vmem:[%s12377_s2 + $0xb88] sm:$0xff]  ;;  %v7939_v32 = vcombine.high %v175_v26, %v183_v27 }
  0x2a   : > { %v278_v36 = vld [vmem:[%s12377_s2 + $0x6c0] sm:$0xff]  ;;  %3153 = vmatpush2.bf16.msra.mxu0 %v8048_v39  ;;  %v439_v29 = vld [vmem:[%s12377_s2 + $0xbc8] sm:$0xff] }
  0x2b   : > { %v526_v37 = vld [vmem:[%s12377_s2 + $0xe80] sm:$0xff]  ;;  %v8033_v42 = vcombine.high %v270_v34, %v278_v36  ;;  %3193 = vmatprep.subr.bf16.mxu1 %v8305_v33  ;;  %v8032_v49 = vcombine.low %v270_v34, %v278_v36  ;;  %v8195_v33 = vcombine.high %v431_v28, %v439_v29  ;;  %v159_v34 = vld [vmem:[%s12377_s2 + $0x308] sm:$0xff] }
  0x2c   : > { %v534_v38 = vld [vmem:[%s12377_s2 + $0xec0] sm:$0xff]  ;;  %3194 = vmatpush2.bf16.msra.mxu1 %v8304_v41  ;;  %v167_v36 = vld [vmem:[%s12377_s2 + $0x348] sm:$0xff]  ;;  %v9269_v41 = vpack.c.bf16 %v9097_v47, %v9097_v47 }
  0x2d   : > { %v8289_v43 = vcombine.high %v526_v37, %v534_v38  ;;  %v254_v44 = vld [vmem:[%s12377_s2 + $0x600] sm:$0xff]  ;;  %3154 = vmatprep.subr.bf16.mxu0 %v8033_v42  ;;  %v8288_v50 = vcombine.low %v526_v37, %v534_v38  ;;  %v9259_v37 = vpack.c.bf16 %v9080_v40, %v9080_v40  ;;  %v415_v38 = vld [vmem:[%s12377_s2 + $0xb08] sm:$0xff]  ;;  %v7938_v42 = vcombine.low %v175_v26, %v183_v27 }
  0x2e   : > { %v262_v45 = vld [vmem:[%s12377_s2 + $0x640] sm:$0xff]  ;;  %3155 = vmatpush2.bf16.msra.mxu0 %v8032_v49  ;;  %v423_v39 = vld [vmem:[%s12377_s2 + $0xb48] sm:$0xff]  ;;  %v7922_v49 = vcombine.low %v159_v34, %v167_v36 }
  0x2f   : > { %v510_v46 = vld [vmem:[%s12377_s2 + $0xe00] sm:$0xff]  ;;  %v8017_v52 = vcombine.high %v254_v44, %v262_v45  ;;  %3195 = vmatprep.subr.bf16.mxu1 %v8289_v43  ;;  %v8016_v58 = vcombine.low %v254_v44, %v262_v45  ;;  %v8194_v43 = vcombine.low %v431_v28, %v439_v29  ;;  %v7923_v44 = vcombine.high %v159_v34, %v167_v36  ;;  %v143_v45 = vld [vmem:[%s12377_s2 + $0x288] sm:$0xff] }
  0x30   : > { %v518_v48 = vld [vmem:[%s12377_s2 + $0xe40] sm:$0xff]  ;;  %3196 = vmatpush2.bf16.msra.mxu1 %v8288_v50  ;;  %v8179_v40 = vcombine.high %v415_v38, %v423_v39  ;;  %v399_v47 = vld [vmem:[%s12377_s2 + $0xa88] sm:$0xff]  ;;  %v8178_v50 = vcombine.low %v415_v38, %v423_v39 }
  0x31   : > { %v8273_v53 = vcombine.high %v510_v46, %v518_v48  ;;  %v238_v54 = vld [vmem:[%s12377_s2 + $0x580] sm:$0xff]  ;;  %3156 = vmatprep.subr.bf16.mxu0 %v8017_v52  ;;  %v8272_v59 = vcombine.low %v510_v46, %v518_v48  ;;  %v151_v46 = vld [vmem:[%s12377_s2 + $0x2c8] sm:$0xff] }
  0x32   : > { %v246_v55 = vld [vmem:[%s12377_s2 + $0x5c0] sm:$0xff]  ;;  %3157 = vmatpush2.bf16.msra.mxu0 %v8016_v58  ;;  %v407_v48 = vld [vmem:[%s12377_s2 + $0xac8] sm:$0xff]  ;;  %v7907_v52 = vcombine.high %v143_v45, %v151_v46  ;;  %v7906_v58 = vcombine.low %v143_v45, %v151_v46 }
  0x33   : > { %v494_v56 = vld [vmem:[%s12377_s2 + $0xd80] sm:$0xff]  ;;  %v8001_v60 = vcombine.high %v238_v54, %v246_v55  ;;  %3197 = vmatprep.subr.bf16.mxu1 %v8273_v53  ;;  %v8000_v6 = vcombine.low %v238_v54, %v246_v55  ;;  %v8163_v53 = vcombine.high %v399_v47, %v407_v48  ;;  %v127_v54 = vld [vmem:[%s12377_s2 + $0x208] sm:$0xff] }
  0x34   : > { %v502_v57 = vld [vmem:[%s12377_s2 + $0xdc0] sm:$0xff]  ;;  %3198 = vmatpush2.bf16.msra.mxu1 %v8272_v59  ;;  %v135_v55 = vld [vmem:[%s12377_s2 + $0x248] sm:$0xff]  ;;  %v8162_v59 = vcombine.low %v399_v47, %v407_v48 }
  0x35   : > { %v8257_v62 = vcombine.high %v494_v56, %v502_v57  ;;  %v222_v63 = vld [vmem:[%s12377_s2 + $0x500] sm:$0xff]  ;;  %3158 = vmatprep.subr.bf16.mxu0 %v8001_v60  ;;  %v8256_v7 = vcombine.low %v494_v56, %v502_v57  ;;  %v383_v56 = vld [vmem:[%s12377_s2 + $0xa08] sm:$0xff]  ;;  %v7891_v60 = vcombine.high %v127_v54, %v135_v55 }
  0x36   : > { %v230_v3 = vld [vmem:[%s12377_s2 + $0x540] sm:$0xff]  ;;  %3159 = vmatpush2.bf16.msra.mxu0 %v8000_v6  ;;  %v391_v57 = vld [vmem:[%s12377_s2 + $0xa48] sm:$0xff]  ;;  %v7890_v6 = vcombine.low %v127_v54, %v135_v55 }
  0x37   : > { %v478_v4 = vld [vmem:[%s12377_s2 + $0xd00] sm:$0xff]  ;;  %v7985_v8 = vcombine.high %v222_v63, %v230_v3  ;;  %3199 = vmatprep.subr.bf16.mxu1 %v8257_v62  ;;  %v7984_v14 = vcombine.low %v222_v63, %v230_v3  ;;  %v8147_v62 = vcombine.high %v383_v56, %v391_v57  ;;  %v111_v63 = vld [vmem:[%s12377_s2 + $0x188] sm:$0xff] }
  0x38   : > { %v486_v5 = vld [vmem:[%s12377_s2 + $0xd40] sm:$0xff]  ;;  %3200 = vmatpush2.bf16.msra.mxu1 %v8256_v7  ;;  %v119_v3 = vld [vmem:[%s12377_s2 + $0x1c8] sm:$0xff]  ;;  %v8146_v7 = vcombine.low %v383_v56, %v391_v57 }
  0x39   : > { %v8241_v9 = vcombine.high %v478_v4, %v486_v5  ;;  %v206_v10 = vld [vmem:[%s12377_s2 + $0x480] sm:$0xff]  ;;  %3160 = vmatprep.subr.bf16.mxu0 %v7985_v8  ;;  %v8240_v15 = vcombine.low %v478_v4, %v486_v5  ;;  %v367_v4 = vld [vmem:[%s12377_s2 + $0x988] sm:$0xff]  ;;  %v7875_v8 = vcombine.high %v111_v63, %v119_v3 }
  0x3a   : > { %v214_v11 = vld [vmem:[%s12377_s2 + $0x4c0] sm:$0xff]  ;;  %3161 = vmatpush2.bf16.msra.mxu0 %v7984_v14  ;;  %v375_v5 = vld [vmem:[%s12377_s2 + $0x9c8] sm:$0xff]  ;;  %v7874_v14 = vcombine.low %v111_v63, %v119_v3 }
  0x3b   : > { %v462_v12 = vld [vmem:[%s12377_s2 + $0xc80] sm:$0xff]  ;;  %v7969_v16 = vcombine.high %v206_v10, %v214_v11  ;;  %3201 = vmatprep.subr.bf16.mxu1 %v8241_v9  ;;  %v7968_v22 = vcombine.low %v206_v10, %v214_v11  ;;  %v8131_v9 = vcombine.high %v367_v4, %v375_v5  ;;  %v95_v10 = vld [vmem:[%s12377_s2 + $0x108] sm:$0xff] }
  0x3c   : > { %v470_v13 = vld [vmem:[%s12377_s2 + $0xcc0] sm:$0xff]  ;;  %3202 = vmatpush2.bf16.msra.mxu1 %v8240_v15  ;;  %v103_v11 = vld [vmem:[%s12377_s2 + $0x148] sm:$0xff]  ;;  %v8130_v15 = vcombine.low %v367_v4, %v375_v5 }
  0x3d   : > { %v8225_v17 = vcombine.high %v462_v12, %v470_v13  ;;  %v190_v18 = vld [vmem:[%s12377_s2 + $0x400] sm:$0xff]  ;;  %3162 = vmatprep.subr.bf16.mxu0 %v7969_v16  ;;  %v8224_v23 = vcombine.low %v462_v12, %v470_v13  ;;  %v351_v12 = vld [vmem:[%s12377_s2 + $0x908] sm:$0xff]  ;;  %v7859_v16 = vcombine.high %v95_v10, %v103_v11 }
  0x3e   : > { %v198_v19 = vld [vmem:[%s12377_s2 + $0x440] sm:$0xff]  ;;  %3163 = vmatpush2.bf16.msra.mxu0 %v7968_v22  ;;  %v359_v13 = vld [vmem:[%s12377_s2 + $0x948] sm:$0xff]  ;;  %v7858_v22 = vcombine.low %v95_v10, %v103_v11 }
  0x3f   : > { %v446_v20 = vld [vmem:[%s12377_s2 + $0xc00] sm:$0xff]  ;;  %v7953_v24 = vcombine.high %v190_v18, %v198_v19  ;;  %3203 = vmatprep.subr.bf16.mxu1 %v8225_v17  ;;  %v7952_v30 = vcombine.low %v190_v18, %v198_v19  ;;  %v8115_v17 = vcombine.high %v351_v12, %v359_v13  ;;  %v79_v18 = vld [vmem:[%s12377_s2 + $0x88] sm:$0xff] }
  0x40   : > { %v454_v21 = vld [vmem:[%s12377_s2 + $0xc40] sm:$0xff]  ;;  %3204 = vmatpush2.bf16.msra.mxu1 %v8224_v23  ;;  %v87_v19 = vld [vmem:[%s12377_s2 + $0xc8] sm:$0xff]  ;;  %v8114_v23 = vcombine.low %v351_v12, %v359_v13 }
  0x41   : > { %v8209_v25 = vcombine.high %v446_v20, %v454_v21  ;;  %3164 = vmatprep.subr.bf16.mxu0 %v7953_v24  ;;  %v8208_v31 = vcombine.low %v446_v20, %v454_v21  ;;  %v335_v20 = vld [vmem:[%s12377_s2 + $0x888] sm:$0xff]  ;;  %v7843_v24 = vcombine.high %v79_v18, %v87_v19 }
  0x42   : > { %3165 = vmatpush2.bf16.msra.mxu0 %v7952_v30  ;;  %v343_v21 = vld [vmem:[%s12377_s2 + $0x8c8] sm:$0xff]  ;;  %v7842_v30 = vcombine.low %v79_v18, %v87_v19 }
  0x43   : > { %3205 = vmatprep.subr.bf16.mxu1 %v8209_v25  ;;  %3216 = vmatprep.subr.bf16.mxu0 %v7939_v32  ;;  %v8099_v25 = vcombine.high %v335_v20, %v343_v21  ;;  %v63_v26 = vld [vmem:[%s12377_s2 + $0x8] sm:$0xff] }
  0x44   : > { %3206 = vmatpush2.bf16.msra.mxu1 %v8208_v31  ;;  %v71_v27 = vld [vmem:[%s12377_s2 + $0x48] sm:$0xff]  ;;  %v8098_v31 = vcombine.low %v335_v20, %v343_v21 }
  0x45   : > { %3257 = vmatprep.subr.bf16.mxu1 %v8195_v33  ;;  %3167 = vmatmul.mubr.bf16.vlgmr.msra.gmra.mxu0 %v9259_v37  ;;  %v319_v28 = vld [vmem:[%s12377_s2 + $0x808] sm:$0xff]  ;;  %v7827_v32 = vcombine.high %v63_v26, %v71_v27 }
  0x46   : > { %3217 = vmatpush1.bf16.msra.mxu0 %v7938_v42  ;;  %3248 = vmatprep.mubr.bf16.mxu0 %v9099_v51  ;;  %v327_v29 = vld [vmem:[%s12377_s2 + $0x848] sm:$0xff]  ;;  %v7826_v42 = vcombine.low %v63_v26, %v71_v27 }
  0x47   : > { %3208 = vmatmul.mubr.bf16.vlgmr.msra.gmra.mxu1 %v9269_v41  ;;  %3218 = vmatprep.subr.bf16.mxu0 %v7923_v44  ;;  %v8083_v33 = vcombine.high %v319_v28, %v327_v29  ;;  %v303_v34 = vld [vmem:[%s12377_s2 + $0x788] sm:$0xff] }
  0x48   : > { %3258 = vmatpush1.bf16.msra.mxu1 %v8194_v43  ;;  %3289 = vmatprep.mubr.bf16.mxu1 %v9116_v61  ;;  %v311_v36 = vld [vmem:[%s12377_s2 + $0x7c8] sm:$0xff]  ;;  %v8082_v43 = vcombine.low %v319_v28, %v327_v29 }
  0x49   : > { %3259 = vmatprep.subr.bf16.mxu1 %v8179_v40  ;;  %v559_v38 = vld [vmem:[%s12377_s2 + $0xf88] sm:$0xff]  ;;  %v8067_v44 = vcombine.high %v303_v34, %v311_v36 }
  0x4a   : > { %3219 = vmatpush1.bf16.msra.mxu0 %v7922_v49  ;;  %v567_v39 = vld [vmem:[%s12377_s2 + $0xfc8] sm:$0xff]  ;;  %v8066_v49 = vcombine.low %v303_v34, %v311_v36 }
  0x4b   : > { %3220 = vmatprep.subr.bf16.mxu0 %v7907_v52  ;;  %v8323_v40 = vcombine.high %v559_v38, %v567_v39  ;;  %v287_v45 = vld [vmem:[%s12377_s2 + $0x708] sm:$0xff] }
  0x4c   : > { %3260 = vmatpush1.bf16.msra.mxu1 %v8178_v50  ;;  %v295_v46 = vld [vmem:[%s12377_s2 + $0x748] sm:$0xff]  ;;  %v8322_v50 = vcombine.low %v559_v38, %v567_v39 }
  0x4d   : > { %3261 = vmatprep.subr.bf16.mxu1 %v8163_v53  ;;  %v543_v47 = vld [vmem:[%s12377_s2 + $0xf08] sm:$0xff]  ;;  %v8051_v52 = vcombine.high %v287_v45, %v295_v46 }
  0x4e   : > { %3221 = vmatpush1.bf16.msra.mxu0 %v7906_v58  ;;  %v551_v48 = vld [vmem:[%s12377_s2 + $0xf48] sm:$0xff]  ;;  %v8050_v58 = vcombine.low %v287_v45, %v295_v46  ;;  %v176_v45 = vld [vmem:[%s12377_s2 + $0x390] sm:$0xff] }
  0x4f   : > { %3222 = vmatprep.subr.bf16.mxu0 %v7891_v60  ;;  %v8307_v53 = vcombine.high %v543_v47, %v551_v48  ;;  %v271_v54 = vld [vmem:[%s12377_s2 + $0x688] sm:$0xff]  ;;  %v184_v46 = vld [vmem:[%s12377_s2 + $0x3d0] sm:$0xff] }
  0x50   : > { %3262 = vmatpush1.bf16.msra.mxu1 %v8162_v59  ;;  %v279_v55 = vld [vmem:[%s12377_s2 + $0x6c8] sm:$0xff]  ;;  %v8306_v59 = vcombine.low %v543_v47, %v551_v48  ;;  %v432_v47 = vld [vmem:[%s12377_s2 + $0xb90] sm:$0xff] }
  0x51   : > { %3263 = vmatprep.subr.bf16.mxu1 %v8147_v62  ;;  %v527_v56 = vld [vmem:[%s12377_s2 + $0xe88] sm:$0xff]  ;;  %v8035_v60 = vcombine.high %v271_v54, %v279_v55  ;;  %v440_v48 = vld [vmem:[%s12377_s2 + $0xbd0] sm:$0xff] }
  0x52   : > { %3223 = vmatpush1.bf16.msra.mxu0 %v7890_v6  ;;  %v535_v57 = vld [vmem:[%s12377_s2 + $0xec8] sm:$0xff]  ;;  %v8034_v6 = vcombine.low %v271_v54, %v279_v55  ;;  %v160_v54 = vld [vmem:[%s12377_s2 + $0x310] sm:$0xff] }
  0x53   : > { %3224 = vmatprep.subr.bf16.mxu0 %v7875_v8  ;;  %v8291_v62 = vcombine.high %v527_v56, %v535_v57  ;;  %v255_v63 = vld [vmem:[%s12377_s2 + $0x608] sm:$0xff]  ;;  %v168_v55 = vld [vmem:[%s12377_s2 + $0x350] sm:$0xff] }
  0x54   : > { %3264 = vmatpush1.bf16.msra.mxu1 %v8146_v7  ;;  %v263_v3 = vld [vmem:[%s12377_s2 + $0x648] sm:$0xff]  ;;  %v8290_v7 = vcombine.low %v527_v56, %v535_v57  ;;  %v416_v56 = vld [vmem:[%s12377_s2 + $0xb10] sm:$0xff] }
  0x55   : > { %3265 = vmatprep.subr.bf16.mxu1 %v8131_v9  ;;  %v511_v4 = vld [vmem:[%s12377_s2 + $0xe08] sm:$0xff]  ;;  %v8019_v8 = vcombine.high %v255_v63, %v263_v3  ;;  %v424_v57 = vld [vmem:[%s12377_s2 + $0xb50] sm:$0xff] }
  0x56   : > { %3225 = vmatpush1.bf16.msra.mxu0 %v7874_v14  ;;  %v519_v5 = vld [vmem:[%s12377_s2 + $0xe48] sm:$0xff]  ;;  %v8018_v14 = vcombine.low %v255_v63, %v263_v3  ;;  %v144_v63 = vld [vmem:[%s12377_s2 + $0x290] sm:$0xff] }
  0x57   : > { %3226 = vmatprep.subr.bf16.mxu0 %v7859_v16  ;;  %v8275_v9 = vcombine.high %v511_v4, %v519_v5  ;;  %v239_v10 = vld [vmem:[%s12377_s2 + $0x588] sm:$0xff]  ;;  %v152_v3 = vld [vmem:[%s12377_s2 + $0x2d0] sm:$0xff] }
  0x58   : > { %3266 = vmatpush1.bf16.msra.mxu1 %v8130_v15  ;;  %v247_v11 = vld [vmem:[%s12377_s2 + $0x5c8] sm:$0xff]  ;;  %v8274_v15 = vcombine.low %v511_v4, %v519_v5  ;;  %v400_v4 = vld [vmem:[%s12377_s2 + $0xa90] sm:$0xff] }
  0x59   : > { %3267 = vmatprep.subr.bf16.mxu1 %v8115_v17  ;;  %v495_v12 = vld [vmem:[%s12377_s2 + $0xd88] sm:$0xff]  ;;  %v8003_v16 = vcombine.high %v239_v10, %v247_v11  ;;  %v408_v5 = vld [vmem:[%s12377_s2 + $0xad0] sm:$0xff] }
  0x5a   : > { %3227 = vmatpush1.bf16.msra.mxu0 %v7858_v22  ;;  %v503_v13 = vld [vmem:[%s12377_s2 + $0xdc8] sm:$0xff]  ;;  %v8002_v22 = vcombine.low %v239_v10, %v247_v11  ;;  %v128_v10 = vld [vmem:[%s12377_s2 + $0x210] sm:$0xff] }
  0x5b   : > { %3228 = vmatprep.subr.bf16.mxu0 %v7843_v24  ;;  %v8259_v17 = vcombine.high %v495_v12, %v503_v13  ;;  %v223_v18 = vld [vmem:[%s12377_s2 + $0x508] sm:$0xff]  ;;  %v136_v11 = vld [vmem:[%s12377_s2 + $0x250] sm:$0xff] }
  0x5c   : > { %3268 = vmatpush1.bf16.msra.mxu1 %v8114_v23  ;;  %v231_v19 = vld [vmem:[%s12377_s2 + $0x548] sm:$0xff]  ;;  %v8258_v23 = vcombine.low %v495_v12, %v503_v13  ;;  %v384_v12 = vld [vmem:[%s12377_s2 + $0xa10] sm:$0xff] }
  0x5d   : > { %3269 = vmatprep.subr.bf16.mxu1 %v8099_v25  ;;  %v479_v20 = vld [vmem:[%s12377_s2 + $0xd08] sm:$0xff]  ;;  %v7987_v24 = vcombine.high %v223_v18, %v231_v19  ;;  %v392_v13 = vld [vmem:[%s12377_s2 + $0xa50] sm:$0xff] }
  0x5e   : > { %3229 = vmatpush1.bf16.msra.mxu0 %v7842_v30  ;;  %v487_v21 = vld [vmem:[%s12377_s2 + $0xd48] sm:$0xff]  ;;  %v7986_v30 = vcombine.low %v223_v18, %v231_v19  ;;  %v112_v18 = vld [vmem:[%s12377_s2 + $0x190] sm:$0xff] }
  0x5f   : > { %3230 = vmatprep.subr.bf16.mxu0 %v7827_v32  ;;  %v8243_v25 = vcombine.high %v479_v20, %v487_v21  ;;  %v207_v26 = vld [vmem:[%s12377_s2 + $0x488] sm:$0xff]  ;;  %v120_v19 = vld [vmem:[%s12377_s2 + $0x1d0] sm:$0xff] }
  0x60   : > { %3270 = vmatpush1.bf16.msra.mxu1 %v8098_v31  ;;  %v215_v27 = vld [vmem:[%s12377_s2 + $0x4c8] sm:$0xff]  ;;  %v8242_v31 = vcombine.low %v479_v20, %v487_v21  ;;  %v368_v20 = vld [vmem:[%s12377_s2 + $0x990] sm:$0xff] }
  0x61   : > { %3271 = vmatprep.subr.bf16.mxu1 %v8083_v33  ;;  %v463_v28 = vld [vmem:[%s12377_s2 + $0xc88] sm:$0xff]  ;;  %v7971_v32 = vcombine.high %v207_v26, %v215_v27  ;;  %v376_v21 = vld [vmem:[%s12377_s2 + $0x9d0] sm:$0xff] }
  0x62   : > { %3231 = vmatpush1.bf16.msra.mxu0 %v7826_v42  ;;  %v471_v29 = vld [vmem:[%s12377_s2 + $0xcc8] sm:$0xff]  ;;  %v7970_v42 = vcombine.low %v207_v26, %v215_v27  ;;  %v96_v26 = vld [vmem:[%s12377_s2 + $0x110] sm:$0xff] }
  0x63   : > { %3232 = vmatprep.subr.bf16.mxu0 %v8067_v44  ;;  %v8227_v33 = vcombine.high %v463_v28, %v471_v29  ;;  %v191_v34 = vld [vmem:[%s12377_s2 + $0x408] sm:$0xff]  ;;  %v104_v27 = vld [vmem:[%s12377_s2 + $0x150] sm:$0xff] }
  0x64   : > { %3272 = vmatpush1.bf16.msra.mxu1 %v8082_v43  ;;  %v199_v36 = vld [vmem:[%s12377_s2 + $0x448] sm:$0xff]  ;;  %v8226_v43 = vcombine.low %v463_v28, %v471_v29  ;;  %v352_v28 = vld [vmem:[%s12377_s2 + $0x910] sm:$0xff] }
  0x65   : > { %3273 = vmatprep.subr.bf16.mxu1 %v8323_v40  ;;  %v447_v38 = vld [vmem:[%s12377_s2 + $0xc08] sm:$0xff]  ;;  %v7955_v44 = vcombine.high %v191_v34, %v199_v36  ;;  %v360_v29 = vld [vmem:[%s12377_s2 + $0x950] sm:$0xff] }
  0x66   : > { %3233 = vmatpush2.bf16.msra.mxu0 %v8066_v49  ;;  %v455_v39 = vld [vmem:[%s12377_s2 + $0xc48] sm:$0xff]  ;;  %v7954_v49 = vcombine.low %v191_v34, %v199_v36  ;;  %v80_v34 = vld [vmem:[%s12377_s2 + $0x90] sm:$0xff] }
  0x67   : > { %3234 = vmatprep.subr.bf16.mxu0 %v8051_v52  ;;  %v8211_v40 = vcombine.high %v447_v38, %v455_v39  ;;  %v7941_v52 = vcombine.high %v176_v45, %v184_v46  ;;  %v88_v36 = vld [vmem:[%s12377_s2 + $0xd0] sm:$0xff] }
  0x68   : > { %3274 = vmatpush2.bf16.msra.mxu1 %v8322_v50  ;;  %v8210_v50 = vcombine.low %v447_v38, %v455_v39  ;;  %v336_v38 = vld [vmem:[%s12377_s2 + $0x890] sm:$0xff] }
  0x69   : > { %3275 = vmatprep.subr.bf16.mxu1 %v8307_v53  ;;  %v8197_v53 = vcombine.high %v432_v47, %v440_v48  ;;  %v344_v39 = vld [vmem:[%s12377_s2 + $0x8d0] sm:$0xff] }
  0x6a   : > { %3235 = vmatpush2.bf16.msra.mxu0 %v8050_v58  ;;  %v7940_v58 = vcombine.low %v176_v45, %v184_v46  ;;  %v64_v45 = vld [vmem:[%s12377_s2 + $0x10] sm:$0xff] }
  0x6b   : > { %3236 = vmatprep.subr.bf16.mxu0 %v8035_v60  ;;  %v7925_v60 = vcombine.high %v160_v54, %v168_v55  ;;  %v72_v46 = vld [vmem:[%s12377_s2 + $0x50] sm:$0xff] }
  0x6c   : > { %3276 = vmatpush2.bf16.msra.mxu1 %v8306_v59  ;;  %v8196_v59 = vcombine.low %v432_v47, %v440_v48  ;;  %v320_v47 = vld [vmem:[%s12377_s2 + $0x810] sm:$0xff] }
  0x6d   : > { %3277 = vmatprep.subr.bf16.mxu1 %v8291_v62  ;;  %v8181_v62 = vcombine.high %v416_v56, %v424_v57  ;;  %v328_v48 = vld [vmem:[%s12377_s2 + $0x850] sm:$0xff] }
  0x6e   : > { %3237 = vmatpush2.bf16.msra.mxu0 %v8034_v6  ;;  %v7924_v6 = vcombine.low %v160_v54, %v168_v55  ;;  %v304_v54 = vld [vmem:[%s12377_s2 + $0x790] sm:$0xff] }
  0x6f   : > { %3238 = vmatprep.subr.bf16.mxu0 %v8019_v8  ;;  %v7909_v8 = vcombine.high %v144_v63, %v152_v3  ;;  %v312_v55 = vld [vmem:[%s12377_s2 + $0x7d0] sm:$0xff] }
  0x70   : > { %3278 = vmatpush2.bf16.msra.mxu1 %v8290_v7  ;;  %v8180_v7 = vcombine.low %v416_v56, %v424_v57  ;;  %v560_v56 = vld [vmem:[%s12377_s2 + $0xf90] sm:$0xff] }
  0x71   : > { %3279 = vmatprep.subr.bf16.mxu1 %v8275_v9  ;;  %v8165_v9 = vcombine.high %v400_v4, %v408_v5  ;;  %v568_v57 = vld [vmem:[%s12377_s2 + $0xfd0] sm:$0xff] }
  0x72   : > { %3239 = vmatpush2.bf16.msra.mxu0 %v8018_v14  ;;  %v7908_v14 = vcombine.low %v144_v63, %v152_v3  ;;  %v288_v63 = vld [vmem:[%s12377_s2 + $0x710] sm:$0xff] }
  0x73   : > { %3240 = vmatprep.subr.bf16.mxu0 %v8003_v16  ;;  %v7893_v16 = vcombine.high %v128_v10, %v136_v11  ;;  %v296_v3 = vld [vmem:[%s12377_s2 + $0x750] sm:$0xff] }
  0x74   : > { %3280 = vmatpush2.bf16.msra.mxu1 %v8274_v15  ;;  %v8164_v15 = vcombine.low %v400_v4, %v408_v5  ;;  %v544_v4 = vld [vmem:[%s12377_s2 + $0xf10] sm:$0xff] }
  0x75   : > { %3281 = vmatprep.subr.bf16.mxu1 %v8259_v17  ;;  %v8149_v17 = vcombine.high %v384_v12, %v392_v13  ;;  %v552_v5 = vld [vmem:[%s12377_s2 + $0xf50] sm:$0xff] }
  0x76   : > { %3241 = vmatpush2.bf16.msra.mxu0 %v8002_v22  ;;  %v7892_v22 = vcombine.low %v128_v10, %v136_v11  ;;  %v272_v10 = vld [vmem:[%s12377_s2 + $0x690] sm:$0xff] }
  0x77   : > { %3242 = vmatprep.subr.bf16.mxu0 %v7987_v24  ;;  %v7877_v24 = vcombine.high %v112_v18, %v120_v19  ;;  %v280_v11 = vld [vmem:[%s12377_s2 + $0x6d0] sm:$0xff] }
  0x78   : > { %3282 = vmatpush2.bf16.msra.mxu1 %v8258_v23  ;;  %v8148_v23 = vcombine.low %v384_v12, %v392_v13  ;;  %v528_v12 = vld [vmem:[%s12377_s2 + $0xe90] sm:$0xff] }
  0x79   : > { %3283 = vmatprep.subr.bf16.mxu1 %v8243_v25  ;;  %v8133_v25 = vcombine.high %v368_v20, %v376_v21  ;;  %v536_v13 = vld [vmem:[%s12377_s2 + $0xed0] sm:$0xff] }
  0x7a   : > { %3243 = vmatpush2.bf16.msra.mxu0 %v7986_v30  ;;  %v7876_v30 = vcombine.low %v112_v18, %v120_v19  ;;  %v256_v18 = vld [vmem:[%s12377_s2 + $0x610] sm:$0xff] }
  0x7b   : > { %3244 = vmatprep.subr.bf16.mxu0 %v7971_v32  ;;  %v7861_v32 = vcombine.high %v96_v26, %v104_v27  ;;  %v264_v19 = vld [vmem:[%s12377_s2 + $0x650] sm:$0xff] }
  0x7c   : > { %3284 = vmatpush2.bf16.msra.mxu1 %v8242_v31  ;;  %v8132_v31 = vcombine.low %v368_v20, %v376_v21  ;;  %v512_v20 = vld [vmem:[%s12377_s2 + $0xe10] sm:$0xff] }
  0x7d   : > { %3285 = vmatprep.subr.bf16.mxu1 %v8227_v33  ;;  %v8117_v33 = vcombine.high %v352_v28, %v360_v29  ;;  %v520_v21 = vld [vmem:[%s12377_s2 + $0xe50] sm:$0xff] }
  0x7e   : > { %3245 = vmatpush2.bf16.msra.mxu0 %v7970_v42  ;;  %v7860_v42 = vcombine.low %v96_v26, %v104_v27  ;;  %v240_v26 = vld [vmem:[%s12377_s2 + $0x590] sm:$0xff] }
  0x7f   : > { %3246 = vmatprep.subr.bf16.mxu0 %v7955_v44  ;;  %v7845_v44 = vcombine.high %v80_v34, %v88_v36  ;;  %v248_v27 = vld [vmem:[%s12377_s2 + $0x5d0] sm:$0xff] }
  0x80   : > { %3286 = vmatpush2.bf16.msra.mxu1 %v8226_v43  ;;  %v8116_v43 = vcombine.low %v352_v28, %v360_v29  ;;  %v496_v28 = vld [vmem:[%s12377_s2 + $0xd90] sm:$0xff] }
  0x81   : > { %3287 = vmatprep.subr.bf16.mxu1 %v8211_v40  ;;  %v8101_v40 = vcombine.high %v336_v38, %v344_v39  ;;  %v504_v29 = vld [vmem:[%s12377_s2 + $0xdd0] sm:$0xff] }
  0x82   : > { %3247 = vmatpush2.bf16.msra.mxu0 %v7954_v49  ;;  %v7844_v49 = vcombine.low %v80_v34, %v88_v36  ;;  %v224_v34 = vld [vmem:[%s12377_s2 + $0x510] sm:$0xff] }
  0x83   : > { %3298 = vmatprep.subr.bf16.mxu0 %v7941_v52  ;;  %v7829_v52 = vcombine.high %v64_v45, %v72_v46  ;;  %v232_v36 = vld [vmem:[%s12377_s2 + $0x550] sm:$0xff] }
  0x84   : > { %3288 = vmatpush2.bf16.msra.mxu1 %v8210_v50  ;;  %v8100_v50 = vcombine.low %v336_v38, %v344_v39  ;;  %v480_v38 = vld [vmem:[%s12377_s2 + $0xd10] sm:$0xff] }
  0x85   : > { %3339 = vmatprep.subr.bf16.mxu1 %v8197_v53  ;;  %3249 = vmatmul.mubr.bf16.vlgmr.msra.gmra.mxu0 %v9259_v37  ;;  %v8085_v53 = vcombine.high %v320_v47, %v328_v48  ;;  %v488_v39 = vld [vmem:[%s12377_s2 + $0xd50] sm:$0xff] }
  0x86   : > { %3299 = vmatpush1.bf16.msra.mxu0 %v7940_v58  ;;  %3330 = vmatprep.mubr.bf16.mxu0 %v9099_v51  ;;  %v7828_v58 = vcombine.low %v64_v45, %v72_v46  ;;  %v208_v45 = vld [vmem:[%s12377_s2 + $0x490] sm:$0xff] }
  0x87   : > { %3290 = vmatmul.mubr.bf16.vlgmr.msra.gmra.mxu1 %v9269_v41  ;;  %3300 = vmatprep.subr.bf16.mxu0 %v7925_v60  ;;  %v8069_v60 = vcombine.high %v304_v54, %v312_v55  ;;  %v216_v46 = vld [vmem:[%s12377_s2 + $0x4d0] sm:$0xff] }
  0x88   : > { %3340 = vmatpush1.bf16.msra.mxu1 %v8196_v59  ;;  %3371 = vmatprep.mubr.bf16.mxu1 %v9116_v61  ;;  %v8084_v59 = vcombine.low %v320_v47, %v328_v48  ;;  %v464_v47 = vld [vmem:[%s12377_s2 + $0xc90] sm:$0xff] }
  0x89   : > { %3341 = vmatprep.subr.bf16.mxu1 %v8181_v62  ;;  %v8325_v62 = vcombine.high %v560_v56, %v568_v57  ;;  %v472_v48 = vld [vmem:[%s12377_s2 + $0xcd0] sm:$0xff] }
  0x8a   : > { %3301 = vmatpush1.bf16.msra.mxu0 %v7924_v6  ;;  %v8068_v6 = vcombine.low %v304_v54, %v312_v55  ;;  %v192_v54 = vld [vmem:[%s12377_s2 + $0x410] sm:$0xff] }
  0x8b   : > { %3302 = vmatprep.subr.bf16.mxu0 %v7909_v8  ;;  %v8053_v8 = vcombine.high %v288_v63, %v296_v3  ;;  %v200_v55 = vld [vmem:[%s12377_s2 + $0x450] sm:$0xff] }
  0x8c   : > { %3342 = vmatpush1.bf16.msra.mxu1 %v8180_v7  ;;  %v8324_v7 = vcombine.low %v560_v56, %v568_v57  ;;  %v448_v56 = vld [vmem:[%s12377_s2 + $0xc10] sm:$0xff] }
  0x8d   : > { %3343 = vmatprep.subr.bf16.mxu1 %v8165_v9  ;;  %v8309_v9 = vcombine.high %v544_v4, %v552_v5  ;;  %v456_v57 = vld [vmem:[%s12377_s2 + $0xc50] sm:$0xff] }
  0x8e   : > { %3303 = vmatpush1.bf16.msra.mxu0 %v7908_v14  ;;  %v8052_v14 = vcombine.low %v288_v63, %v296_v3  ;;  %v177_v63 = vld [vmem:[%s12377_s2 + $0x398] sm:$0xff] }
  0x8f   : > { %3304 = vmatprep.subr.bf16.mxu0 %v7893_v16  ;;  %v8037_v16 = vcombine.high %v272_v10, %v280_v11  ;;  %v185_v3 = vld [vmem:[%s12377_s2 + $0x3d8] sm:$0xff] }
  0x90   : > { %3344 = vmatpush1.bf16.msra.mxu1 %v8164_v15  ;;  %v8308_v15 = vcombine.low %v544_v4, %v552_v5  ;;  %v433_v4 = vld [vmem:[%s12377_s2 + $0xb98] sm:$0xff] }
  0x91   : > { %3345 = vmatprep.subr.bf16.mxu1 %v8149_v17  ;;  %v8293_v17 = vcombine.high %v528_v12, %v536_v13  ;;  %v441_v5 = vld [vmem:[%s12377_s2 + $0xbd8] sm:$0xff] }
  0x92   : > { %3305 = vmatpush1.bf16.msra.mxu0 %v7892_v22  ;;  %v8036_v22 = vcombine.low %v272_v10, %v280_v11  ;;  %v161_v10 = vld [vmem:[%s12377_s2 + $0x318] sm:$0xff] }
  0x93   : > { %3306 = vmatprep.subr.bf16.mxu0 %v7877_v24  ;;  %v8021_v24 = vcombine.high %v256_v18, %v264_v19  ;;  %v169_v11 = vld [vmem:[%s12377_s2 + $0x358] sm:$0xff] }
  0x94   : > { %3346 = vmatpush1.bf16.msra.mxu1 %v8148_v23  ;;  %v8292_v23 = vcombine.low %v528_v12, %v536_v13  ;;  %v417_v12 = vld [vmem:[%s12377_s2 + $0xb18] sm:$0xff] }
  0x95   : > { %3347 = vmatprep.subr.bf16.mxu1 %v8133_v25  ;;  %v8277_v25 = vcombine.high %v512_v20, %v520_v21  ;;  %v425_v13 = vld [vmem:[%s12377_s2 + $0xb58] sm:$0xff] }
  0x96   : > { %3307 = vmatpush1.bf16.msra.mxu0 %v7876_v30  ;;  %v8020_v30 = vcombine.low %v256_v18, %v264_v19  ;;  %v145_v18 = vld [vmem:[%s12377_s2 + $0x298] sm:$0xff] }
  0x97   : > { %3308 = vmatprep.subr.bf16.mxu0 %v7861_v32  ;;  %v8005_v32 = vcombine.high %v240_v26, %v248_v27  ;;  %v153_v19 = vld [vmem:[%s12377_s2 + $0x2d8] sm:$0xff] }
  0x98   : > { %3348 = vmatpush1.bf16.msra.mxu1 %v8132_v31  ;;  %v8276_v31 = vcombine.low %v512_v20, %v520_v21  ;;  %v401_v20 = vld [vmem:[%s12377_s2 + $0xa98] sm:$0xff] }
  0x99   : > { %3349 = vmatprep.subr.bf16.mxu1 %v8117_v33  ;;  %v8261_v33 = vcombine.high %v496_v28, %v504_v29  ;;  %v409_v21 = vld [vmem:[%s12377_s2 + $0xad8] sm:$0xff] }
  0x9a   : > { %3309 = vmatpush1.bf16.msra.mxu0 %v7860_v42  ;;  %v8004_v42 = vcombine.low %v240_v26, %v248_v27  ;;  %v129_v26 = vld [vmem:[%s12377_s2 + $0x218] sm:$0xff] }
  0x9b   : > { %3310 = vmatprep.subr.bf16.mxu0 %v7845_v44  ;;  %v7989_v44 = vcombine.high %v224_v34, %v232_v36  ;;  %v137_v27 = vld [vmem:[%s12377_s2 + $0x258] sm:$0xff] }
  0x9c   : > { %3350 = vmatpush1.bf16.msra.mxu1 %v8116_v43  ;;  %v8260_v43 = vcombine.low %v496_v28, %v504_v29  ;;  %v385_v28 = vld [vmem:[%s12377_s2 + $0xa18] sm:$0xff] }
  0x9d   : > { %3351 = vmatprep.subr.bf16.mxu1 %v8101_v40  ;;  %v8245_v40 = vcombine.high %v480_v38, %v488_v39  ;;  %v393_v29 = vld [vmem:[%s12377_s2 + $0xa58] sm:$0xff] }
  0x9e   : > { %3311 = vmatpush1.bf16.msra.mxu0 %v7844_v49  ;;  %v7988_v49 = vcombine.low %v224_v34, %v232_v36  ;;  %v113_v34 = vld [vmem:[%s12377_s2 + $0x198] sm:$0xff] }
  0x9f   : > { %3312 = vmatprep.subr.bf16.mxu0 %v7829_v52  ;;  %v7973_v52 = vcombine.high %v208_v45, %v216_v46  ;;  %v121_v36 = vld [vmem:[%s12377_s2 + $0x1d8] sm:$0xff] }
  0xa0   : > { %3352 = vmatpush1.bf16.msra.mxu1 %v8100_v50  ;;  %v8244_v50 = vcombine.low %v480_v38, %v488_v39  ;;  %v369_v38 = vld [vmem:[%s12377_s2 + $0x998] sm:$0xff] }
  0xa1   : > { %3353 = vmatprep.subr.bf16.mxu1 %v8085_v53  ;;  %v8229_v53 = vcombine.high %v464_v47, %v472_v48  ;;  %v377_v39 = vld [vmem:[%s12377_s2 + $0x9d8] sm:$0xff] }
  0xa2   : > { %3313 = vmatpush1.bf16.msra.mxu0 %v7828_v58  ;;  %v7972_v58 = vcombine.low %v208_v45, %v216_v46  ;;  %v97_v45 = vld [vmem:[%s12377_s2 + $0x118] sm:$0xff] }
  0xa3   : > { %3314 = vmatprep.subr.bf16.mxu0 %v8069_v60  ;;  %v7957_v60 = vcombine.high %v192_v54, %v200_v55  ;;  %v105_v46 = vld [vmem:[%s12377_s2 + $0x158] sm:$0xff] }
  0xa4   : > { %3354 = vmatpush1.bf16.msra.mxu1 %v8084_v59  ;;  %v8228_v59 = vcombine.low %v464_v47, %v472_v48  ;;  %v353_v47 = vld [vmem:[%s12377_s2 + $0x918] sm:$0xff] }
  0xa5   : > { %3355 = vmatprep.subr.bf16.mxu1 %v8325_v62  ;;  %v8213_v62 = vcombine.high %v448_v56, %v456_v57  ;;  %v361_v48 = vld [vmem:[%s12377_s2 + $0x958] sm:$0xff] }
  0xa6   : > { %3315 = vmatpush2.bf16.msra.mxu0 %v8068_v6  ;;  %v7956_v6 = vcombine.low %v192_v54, %v200_v55  ;;  %v81_v54 = vld [vmem:[%s12377_s2 + $0x98] sm:$0xff] }
  0xa7   : > { %3316 = vmatprep.subr.bf16.mxu0 %v8053_v8  ;;  %v7943_v8 = vcombine.high %v177_v63, %v185_v3  ;;  %v89_v55 = vld [vmem:[%s12377_s2 + $0xd8] sm:$0xff] }
  0xa8   : > { %3356 = vmatpush2.bf16.msra.mxu1 %v8324_v7  ;;  %v8212_v7 = vcombine.low %v448_v56, %v456_v57  ;;  %v337_v56 = vld [vmem:[%s12377_s2 + $0x898] sm:$0xff] }
  0xa9   : > { %3357 = vmatprep.subr.bf16.mxu1 %v8309_v9  ;;  %v8199_v9 = vcombine.high %v433_v4, %v441_v5  ;;  %v345_v57 = vld [vmem:[%s12377_s2 + $0x8d8] sm:$0xff] }
  0xaa   : > { %3317 = vmatpush2.bf16.msra.mxu0 %v8052_v14  ;;  %v7942_v14 = vcombine.low %v177_v63, %v185_v3  ;;  %v65_v63 = vld [vmem:[%s12377_s2 + $0x18] sm:$0xff] }
  0xab   : > { %3318 = vmatprep.subr.bf16.mxu0 %v8037_v16  ;;  %v7927_v16 = vcombine.high %v161_v10, %v169_v11  ;;  %v73_v3 = vld [vmem:[%s12377_s2 + $0x58] sm:$0xff] }
  0xac   : > { %3358 = vmatpush2.bf16.msra.mxu1 %v8308_v15  ;;  %v8198_v15 = vcombine.low %v433_v4, %v441_v5  ;;  %v321_v4 = vld [vmem:[%s12377_s2 + $0x818] sm:$0xff] }
  0xad   : > { %3359 = vmatprep.subr.bf16.mxu1 %v8293_v17  ;;  %v8183_v17 = vcombine.high %v417_v12, %v425_v13  ;;  %v329_v5 = vld [vmem:[%s12377_s2 + $0x858] sm:$0xff] }
  0xae   : > { %3319 = vmatpush2.bf16.msra.mxu0 %v8036_v22  ;;  %v7926_v22 = vcombine.low %v161_v10, %v169_v11  ;;  %v305_v10 = vld [vmem:[%s12377_s2 + $0x798] sm:$0xff] }
  0xaf   : > { %3320 = vmatprep.subr.bf16.mxu0 %v8021_v24  ;;  %v7911_v24 = vcombine.high %v145_v18, %v153_v19  ;;  %v313_v11 = vld [vmem:[%s12377_s2 + $0x7d8] sm:$0xff] }
  0xb0   : > { %3360 = vmatpush2.bf16.msra.mxu1 %v8292_v23  ;;  %v8182_v23 = vcombine.low %v417_v12, %v425_v13  ;;  %v561_v12 = vld [vmem:[%s12377_s2 + $0xf98] sm:$0xff] }
  0xb1   : > { %3361 = vmatprep.subr.bf16.mxu1 %v8277_v25  ;;  %v8167_v25 = vcombine.high %v401_v20, %v409_v21  ;;  %v569_v13 = vld [vmem:[%s12377_s2 + $0xfd8] sm:$0xff] }
  0xb2   : > { %3321 = vmatpush2.bf16.msra.mxu0 %v8020_v30  ;;  %v7910_v30 = vcombine.low %v145_v18, %v153_v19  ;;  %v289_v18 = vld [vmem:[%s12377_s2 + $0x718] sm:$0xff] }
  0xb3   : > { %3322 = vmatprep.subr.bf16.mxu0 %v8005_v32  ;;  %v7895_v32 = vcombine.high %v129_v26, %v137_v27  ;;  %v297_v19 = vld [vmem:[%s12377_s2 + $0x758] sm:$0xff] }
  0xb4   : > { %3362 = vmatpush2.bf16.msra.mxu1 %v8276_v31  ;;  %v8166_v31 = vcombine.low %v401_v20, %v409_v21  ;;  %v545_v20 = vld [vmem:[%s12377_s2 + $0xf18] sm:$0xff] }
  0xb5   : > { %3363 = vmatprep.subr.bf16.mxu1 %v8261_v33  ;;  %v8151_v33 = vcombine.high %v385_v28, %v393_v29  ;;  %v553_v21 = vld [vmem:[%s12377_s2 + $0xf58] sm:$0xff] }
  0xb6   : > { %3323 = vmatpush2.bf16.msra.mxu0 %v8004_v42  ;;  %v7894_v42 = vcombine.low %v129_v26, %v137_v27  ;;  %v273_v26 = vld [vmem:[%s12377_s2 + $0x698] sm:$0xff] }
  0xb7   : > { %3324 = vmatprep.subr.bf16.mxu0 %v7989_v44  ;;  %v7879_v44 = vcombine.high %v113_v34, %v121_v36  ;;  %v281_v27 = vld [vmem:[%s12377_s2 + $0x6d8] sm:$0xff] }
  0xb8   : > { %3364 = vmatpush2.bf16.msra.mxu1 %v8260_v43  ;;  %v8150_v43 = vcombine.low %v385_v28, %v393_v29  ;;  %v529_v28 = vld [vmem:[%s12377_s2 + $0xe98] sm:$0xff] }
  0xb9   : > { %3365 = vmatprep.subr.bf16.mxu1 %v8245_v40  ;;  %v8135_v40 = vcombine.high %v369_v38, %v377_v39  ;;  %v537_v29 = vld [vmem:[%s12377_s2 + $0xed8] sm:$0xff] }
  0xba   : > { %3325 = vmatpush2.bf16.msra.mxu0 %v7988_v49  ;;  %v7878_v49 = vcombine.low %v113_v34, %v121_v36  ;;  %v257_v34 = vld [vmem:[%s12377_s2 + $0x618] sm:$0xff] }
  0xbb   : > { %3326 = vmatprep.subr.bf16.mxu0 %v7973_v52  ;;  %v7863_v52 = vcombine.high %v97_v45, %v105_v46  ;;  %v265_v36 = vld [vmem:[%s12377_s2 + $0x658] sm:$0xff] }
  0xbc   : > { %3366 = vmatpush2.bf16.msra.mxu1 %v8244_v50  ;;  %v8134_v50 = vcombine.low %v369_v38, %v377_v39  ;;  %v513_v38 = vld [vmem:[%s12377_s2 + $0xe18] sm:$0xff] }
  0xbd   : > { %3367 = vmatprep.subr.bf16.mxu1 %v8229_v53  ;;  %v8119_v53 = vcombine.high %v353_v47, %v361_v48  ;;  %v521_v39 = vld [vmem:[%s12377_s2 + $0xe58] sm:$0xff] }
  0xbe   : > { %3327 = vmatpush2.bf16.msra.mxu0 %v7972_v58  ;;  %v7862_v58 = vcombine.low %v97_v45, %v105_v46  ;;  %v241_v45 = vld [vmem:[%s12377_s2 + $0x598] sm:$0xff] }
  0xbf   : > { %3328 = vmatprep.subr.bf16.mxu0 %v7957_v60  ;;  %v7847_v60 = vcombine.high %v81_v54, %v89_v55  ;;  %v249_v46 = vld [vmem:[%s12377_s2 + $0x5d8] sm:$0xff] }
  0xc0   : > { %3368 = vmatpush2.bf16.msra.mxu1 %v8228_v59  ;;  %v8118_v59 = vcombine.low %v353_v47, %v361_v48  ;;  %v497_v47 = vld [vmem:[%s12377_s2 + $0xd98] sm:$0xff] }
  0xc1   : > { %3369 = vmatprep.subr.bf16.mxu1 %v8213_v62  ;;  %v8103_v62 = vcombine.high %v337_v56, %v345_v57  ;;  %v505_v48 = vld [vmem:[%s12377_s2 + $0xdd8] sm:$0xff] }
  0xc2   : > { %3329 = vmatpush2.bf16.msra.mxu0 %v7956_v6  ;;  %v7846_v6 = vcombine.low %v81_v54, %v89_v55  ;;  %v225_v54 = vld [vmem:[%s12377_s2 + $0x518] sm:$0xff] }
  0xc3   : > { %3380 = vmatprep.subr.bf16.mxu0 %v7943_v8  ;;  %v7831_v8 = vcombine.high %v65_v63, %v73_v3  ;;  %v233_v55 = vld [vmem:[%s12377_s2 + $0x558] sm:$0xff] }
  0xc4   : > { %3370 = vmatpush2.bf16.msra.mxu1 %v8212_v7  ;;  %v8102_v7 = vcombine.low %v337_v56, %v345_v57  ;;  %v481_v56 = vld [vmem:[%s12377_s2 + $0xd18] sm:$0xff] }
  0xc5   : > { %3421 = vmatprep.subr.bf16.mxu1 %v8199_v9  ;;  %3331 = vmatmul.mubr.bf16.vlgmr.msra.gmra.mxu0 %v9259_v37  ;;  %v8087_v9 = vcombine.high %v321_v4, %v329_v5  ;;  %v489_v57 = vld [vmem:[%s12377_s2 + $0xd58] sm:$0xff] }
  0xc6   : > { %3381 = vmatpush1.bf16.msra.mxu0 %v7942_v14  ;;  %3412 = vmatprep.mubr.bf16.mxu0 %v9099_v51  ;;  %v7830_v14 = vcombine.low %v65_v63, %v73_v3  ;;  %v209_v63 = vld [vmem:[%s12377_s2 + $0x498] sm:$0xff] }
  0xc7   : > { %3372 = vmatmul.mubr.bf16.vlgmr.msra.gmra.mxu1 %v9269_v41  ;;  %3382 = vmatprep.subr.bf16.mxu0 %v7927_v16  ;;  %v8071_v16 = vcombine.high %v305_v10, %v313_v11  ;;  %v217_v3 = vld [vmem:[%s12377_s2 + $0x4d8] sm:$0xff] }
  0xc8   : > { %3422 = vmatpush1.bf16.msra.mxu1 %v8198_v15  ;;  %3453 = vmatprep.mubr.bf16.mxu1 %v9116_v61  ;;  %v8086_v15 = vcombine.low %v321_v4, %v329_v5  ;;  %v465_v4 = vld [vmem:[%s12377_s2 + $0xc98] sm:$0xff] }
  0xc9   : > { %3423 = vmatprep.subr.bf16.mxu1 %v8183_v17  ;;  %v8327_v17 = vcombine.high %v561_v12, %v569_v13  ;;  %v473_v5 = vld [vmem:[%s12377_s2 + $0xcd8] sm:$0xff] }
  0xca   : > { %3383 = vmatpush1.bf16.msra.mxu0 %v7926_v22  ;;  %v8070_v22 = vcombine.low %v305_v10, %v313_v11  ;;  %v193_v10 = vld [vmem:[%s12377_s2 + $0x418] sm:$0xff] }
  0xcb   : > { %3384 = vmatprep.subr.bf16.mxu0 %v7911_v24  ;;  %v8055_v24 = vcombine.high %v289_v18, %v297_v19  ;;  %v201_v11 = vld [vmem:[%s12377_s2 + $0x458] sm:$0xff] }
  0xcc   : > { %3424 = vmatpush1.bf16.msra.mxu1 %v8182_v23  ;;  %v8326_v23 = vcombine.low %v561_v12, %v569_v13  ;;  %v449_v12 = vld [vmem:[%s12377_s2 + $0xc18] sm:$0xff] }
  0xcd   : > { %3425 = vmatprep.subr.bf16.mxu1 %v8167_v25  ;;  %v8311_v25 = vcombine.high %v545_v20, %v553_v21  ;;  %v457_v13 = vld [vmem:[%s12377_s2 + $0xc58] sm:$0xff] }
  0xce   : > { %3385 = vmatpush1.bf16.msra.mxu0 %v7910_v30  ;;  %v8054_v30 = vcombine.low %v289_v18, %v297_v19  ;;  %v178_v18 = vld [vmem:[%s12377_s2 + $0x3a0] sm:$0xff] }
  0xcf   : > { %3386 = vmatprep.subr.bf16.mxu0 %v7895_v32  ;;  %v8039_v32 = vcombine.high %v273_v26, %v281_v27  ;;  %v186_v19 = vld [vmem:[%s12377_s2 + $0x3e0] sm:$0xff] }
  0xd0   : > { %3426 = vmatpush1.bf16.msra.mxu1 %v8166_v31  ;;  %v8310_v31 = vcombine.low %v545_v20, %v553_v21  ;;  %v434_v20 = vld [vmem:[%s12377_s2 + $0xba0] sm:$0xff] }
  0xd1   : > { %3427 = vmatprep.subr.bf16.mxu1 %v8151_v33  ;;  %v8295_v33 = vcombine.high %v529_v28, %v537_v29  ;;  %v442_v21 = vld [vmem:[%s12377_s2 + $0xbe0] sm:$0xff] }
  0xd2   : > { %3387 = vmatpush1.bf16.msra.mxu0 %v7894_v42  ;;  %v8038_v42 = vcombine.low %v273_v26, %v281_v27  ;;  %v162_v26 = vld [vmem:[%s12377_s2 + $0x320] sm:$0xff] }
  0xd3   : > { %3388 = vmatprep.subr.bf16.mxu0 %v7879_v44  ;;  %v8023_v44 = vcombine.high %v257_v34, %v265_v36  ;;  %v170_v27 = vld [vmem:[%s12377_s2 + $0x360] sm:$0xff] }
  0xd4   : > { %3428 = vmatpush1.bf16.msra.mxu1 %v8150_v43  ;;  %v8294_v43 = vcombine.low %v529_v28, %v537_v29  ;;  %v418_v28 = vld [vmem:[%s12377_s2 + $0xb20] sm:$0xff] }
  0xd5   : > { %3429 = vmatprep.subr.bf16.mxu1 %v8135_v40  ;;  %v8279_v40 = vcombine.high %v513_v38, %v521_v39  ;;  %v426_v29 = vld [vmem:[%s12377_s2 + $0xb60] sm:$0xff] }
  0xd6   : > { %3389 = vmatpush1.bf16.msra.mxu0 %v7878_v49  ;;  %v8022_v49 = vcombine.low %v257_v34, %v265_v36  ;;  %v146_v34 = vld [vmem:[%s12377_s2 + $0x2a0] sm:$0xff] }
  0xd7   : > { %3390 = vmatprep.subr.bf16.mxu0 %v7863_v52  ;;  %v8007_v52 = vcombine.high %v241_v45, %v249_v46  ;;  %v154_v36 = vld [vmem:[%s12377_s2 + $0x2e0] sm:$0xff] }
  0xd8   : > { %3430 = vmatpush1.bf16.msra.mxu1 %v8134_v50  ;;  %v8278_v50 = vcombine.low %v513_v38, %v521_v39  ;;  %v402_v39 = vld [vmem:[%s12377_s2 + $0xaa0] sm:$0xff] }
  0xd9   : > { %3431 = vmatprep.subr.bf16.mxu1 %v8119_v53  ;;  %v8263_v53 = vcombine.high %v497_v47, %v505_v48 }
  0xda   : > { %3391 = vmatpush1.bf16.msra.mxu0 %v7862_v58  ;;  %v8006_v58 = vcombine.low %v241_v45, %v249_v46  ;;  %v8184_v46 = vcombine.low %v418_v28, %v426_v29 }
  0xdb   : > { %3392 = vmatprep.subr.bf16.mxu0 %v7847_v60  ;;  %v7991_v60 = vcombine.high %v225_v54, %v233_v55 }
  0xdc   : > { %3432 = vmatpush1.bf16.msra.mxu1 %v8118_v59  ;;  %v8262_v59 = vcombine.low %v497_v47, %v505_v48  ;;  %v7913_v47 = vcombine.high %v146_v34, %v154_v36 }
  0xdd   : > { %3433 = vmatprep.subr.bf16.mxu1 %v8103_v62  ;;  %v8247_v62 = vcombine.high %v481_v56, %v489_v57 }
  0xde   : > { %3393 = vmatpush1.bf16.msra.mxu0 %v7846_v6  ;;  %v7990_v6 = vcombine.low %v225_v54, %v233_v55  ;;  %v386_v55 = vld [vmem:[%s12377_s2 + $0xa20] sm:$0xff] }
  0xdf   : > { %3394 = vmatprep.subr.bf16.mxu0 %v7831_v8  ;;  %v7975_v8 = vcombine.high %v209_v63, %v217_v3 }
  0xe0   : > { %3434 = vmatpush1.bf16.msra.mxu1 %v8102_v7  ;;  %v8246_v7 = vcombine.low %v481_v56, %v489_v57  ;;  %v394_v56 = vld [vmem:[%s12377_s2 + $0xa60] sm:$0xff] }
  0xe1   : > { %3435 = vmatprep.subr.bf16.mxu1 %v8087_v9  ;;  %v8231_v9 = vcombine.high %v465_v4, %v473_v5 }
  0xe2   : > { %3395 = vmatpush1.bf16.msra.mxu0 %v7830_v14  ;;  %v7974_v14 = vcombine.low %v209_v63, %v217_v3 }
  0xe3   : > { %3396 = vmatprep.subr.bf16.mxu0 %v8071_v16  ;;  %v7959_v16 = vcombine.high %v193_v10, %v201_v11 }
  0xe4   : > { %3436 = vmatpush1.bf16.msra.mxu1 %v8086_v15  ;;  %v8230_v15 = vcombine.low %v465_v4, %v473_v5  ;;  %v8153_v4 = vcombine.high %v386_v55, %v394_v56  ;;  %v114_v5 = vld [vmem:[%s12377_s2 + $0x1a0] sm:$0xff] }
  0xe5   : > { %3437 = vmatprep.subr.bf16.mxu1 %v8327_v17  ;;  %v8215_v17 = vcombine.high %v449_v12, %v457_v13 }
  0xe6   : > { %3397 = vmatpush2.bf16.msra.mxu0 %v8070_v22  ;;  %v7958_v22 = vcombine.low %v193_v10, %v201_v11  ;;  %v8152_v10 = vcombine.low %v386_v55, %v394_v56 }
  0xe7   : > { %3398 = vmatprep.subr.bf16.mxu0 %v8055_v24  ;;  %v7945_v24 = vcombine.high %v178_v18, %v186_v19 }
  0xe8   : > { %3438 = vmatpush2.bf16.msra.mxu1 %v8326_v23  ;;  %v8214_v23 = vcombine.low %v449_v12, %v457_v13  ;;  %v98_v13 = vld [vmem:[%s12377_s2 + $0x120] sm:$0xff] }
  0xe9   : > { %3439 = vmatprep.subr.bf16.mxu1 %v8311_v25  ;;  %v8201_v25 = vcombine.high %v434_v20, %v442_v21 }
  0xea   : > { %3399 = vmatpush2.bf16.msra.mxu0 %v8054_v30  ;;  %v7944_v30 = vcombine.low %v178_v18, %v186_v19 }
  0xeb   : > { %3400 = vmatprep.subr.bf16.mxu0 %v8039_v32  ;;  %v7929_v32 = vcombine.high %v162_v26, %v170_v27 }
  0xec   : > { %3440 = vmatpush2.bf16.msra.mxu1 %v8310_v31  ;;  %v8200_v31 = vcombine.low %v434_v20, %v442_v21  ;;  %v82_v21 = vld [vmem:[%s12377_s2 + $0xa0] sm:$0xff] }
  0xed   : > { %3441 = vmatprep.subr.bf16.mxu1 %v8295_v33  ;;  %v8185_v33 = vcombine.high %v418_v28, %v426_v29  ;;  %v66_v29 = vld [vmem:[%s12377_s2 + $0x20] sm:$0xff] }
  0xee   : > { %3401 = vmatpush2.bf16.msra.mxu0 %v8038_v42  ;;  %v410_v42 = vld [vmem:[%s12377_s2 + $0xae0] sm:$0xff] }
  0xef   : > { %3402 = vmatprep.subr.bf16.mxu0 %v8023_v44  ;;  %v7928_v44 = vcombine.low %v162_v26, %v170_v27 }
  0xf0   : > { %3442 = vmatpush2.bf16.msra.mxu1 %v8294_v43 }
  0xf1   : > { %3443 = vmatprep.subr.bf16.mxu1 %v8279_v40 }
  0xf2   : > { %3403 = vmatpush2.bf16.msra.mxu0 %v8022_v49  ;;  %v8169_v49 = vcombine.high %v402_v39, %v410_v42 }
  0xf3   : > { %3404 = vmatprep.subr.bf16.mxu0 %v8007_v52  ;;  %v138_v52 = vld [vmem:[%s12377_s2 + $0x260] sm:$0xff] }
  0xf4   : > { %3444 = vmatpush2.bf16.msra.mxu1 %v8278_v50  ;;  %v130_v50 = vld [vmem:[%s12377_s2 + $0x220] sm:$0xff] }
  0xf5   : > { %3445 = vmatprep.subr.bf16.mxu1 %v8263_v53  ;;  %v7897_v63 = vcombine.high %v130_v50, %v138_v52 }
  0xf6   : > { %3405 = vmatpush2.bf16.msra.mxu0 %v8006_v58  ;;  %v7912_v58 = vcombine.low %v146_v34, %v154_v36 }
  0xf7   : > { %3406 = vmatprep.subr.bf16.mxu0 %v7991_v60 }
  0xf8   : > { %3446 = vmatpush2.bf16.msra.mxu1 %v8262_v59 }
  0xf9   : > { %3447 = vmatprep.subr.bf16.mxu1 %v8247_v62  ;;  %v8168_v62 = vcombine.low %v402_v39, %v410_v42  ;;  %v306_v39 = vld [vmem:[%s12377_s2 + $0x7a0] sm:$0xff] }
  0xfa   : > { %3407 = vmatpush2.bf16.msra.mxu0 %v7990_v6  ;;  %v122_v6 = vld [vmem:[%s12377_s2 + $0x1e0] sm:$0xff] }
  0xfb   : > { %3408 = vmatprep.subr.bf16.mxu0 %v7975_v8  ;;  %v378_v8 = vld [vmem:[%s12377_s2 + $0x9e0] sm:$0xff]  ;;  %v7881_v11 = vcombine.high %v114_v5, %v122_v6 }
  0xfc   : > { %3448 = vmatpush2.bf16.msra.mxu1 %v8246_v7  ;;  %v370_v7 = vld [vmem:[%s12377_s2 + $0x9a0] sm:$0xff] }
  0xfd   : > { %3449 = vmatprep.subr.bf16.mxu1 %v8231_v9  ;;  %v7896_v9 = vcombine.low %v130_v50, %v138_v52  ;;  %v8137_v12 = vcombine.high %v370_v7, %v378_v8  ;;  %v8136_v18 = vcombine.low %v370_v7, %v378_v8  ;;  %v314_v42 = vld [vmem:[%s12377_s2 + $0x7e0] sm:$0xff] }
  0xfe   : > { %3409 = vmatpush2.bf16.msra.mxu0 %v7974_v14  ;;  %v106_v14 = vld [vmem:[%s12377_s2 + $0x160] sm:$0xff]  ;;  %v8072_v55 = vcombine.low %v306_v39, %v314_v42 }
  0xff   : > { %3410 = vmatprep.subr.bf16.mxu0 %v7959_v16  ;;  %v362_v16 = vld [vmem:[%s12377_s2 + $0x960] sm:$0xff]  ;;  %v7865_v19 = vcombine.high %v98_v13, %v106_v14 }
 0x100   : > { %3450 = vmatpush2.bf16.msra.mxu1 %v8230_v15  ;;  %v354_v15 = vld [vmem:[%s12377_s2 + $0x920] sm:$0xff] }
 0x101   : > { %3451 = vmatprep.subr.bf16.mxu1 %v8215_v17  ;;  %v7880_v17 = vcombine.low %v114_v5, %v122_v6  ;;  %v8121_v20 = vcombine.high %v354_v15, %v362_v16  ;;  %v8120_v26 = vcombine.low %v354_v15, %v362_v16  ;;  %v298_v50 = vld [vmem:[%s12377_s2 + $0x760] sm:$0xff] }
 0x102   : > { %3411 = vmatpush2.bf16.msra.mxu0 %v7958_v22  ;;  %v90_v22 = vld [vmem:[%s12377_s2 + $0xe0] sm:$0xff] }
 0x103   : > { %3462 = vmatprep.subr.bf16.mxu0 %v7945_v24  ;;  %v346_v24 = vld [vmem:[%s12377_s2 + $0x8e0] sm:$0xff]  ;;  %v7849_v27 = vcombine.high %v82_v21, %v90_v22 }
 0x104   : > { %3452 = vmatpush2.bf16.msra.mxu1 %v8214_v23  ;;  %v338_v23 = vld [vmem:[%s12377_s2 + $0x8a0] sm:$0xff] }
 0x105   : > { %3503 = vmatprep.subr.bf16.mxu1 %v8201_v25  ;;  %v3168_v38 = vpop.f32.mrf.mxu0  ;;  %3413 = vmatmul.mubr.bf16.vlgmr.msra.gmra.mxu0 %v9259_v37  ;;  %v7864_v25 = vcombine.low %v98_v13, %v106_v14  ;;  %v8105_v28 = vcombine.high %v338_v23, %v346_v24  ;;  %v8104_v34 = vcombine.low %v338_v23, %v346_v24  ;;  %v546_v52 = vld [vmem:[%s12377_s2 + $0xf20] sm:$0xff] }
 0x106   : > { %3463 = vmatpush1.bf16.msra.mxu0 %v7944_v30  ;;  %3494 = vmatprep.mubr.bf16.mxu0 %v9099_v51  ;;  %v74_v30 = vld [vmem:[%s12377_s2 + $0x60] sm:$0xff] }
 0x107   : > { %v3209_v43 = vpop.f32.mrf.mxu1  ;;  %3454 = vmatmul.mubr.bf16.vlgmr.msra.gmra.mxu1 %v9269_v41  ;;  %v3170_v45 = vpop.f32.mrf.mxu0  ;;  %3464 = vmatprep.subr.bf16.mxu0 %v7929_v32  ;;  %v330_v32 = vld [vmem:[%s12377_s2 + $0x860] sm:$0xff]  ;;  %v7833_v36 = vcombine.high %v66_v29, %v74_v30 }
 0x108   : > { %v9873_v40 = vadd.f32 %v3209_v43, %v3168_v38  ;;  %3504 = vmatpush1.bf16.msra.mxu1 %v8200_v31  ;;  %3535 = vmatprep.mubr.bf16.mxu1 %v9116_v61  ;;  %v322_v31 = vld [vmem:[%s12377_s2 + $0x820] sm:$0xff] }
 0x109   : > { %v3211_v48 = vpop.f32.mrf.mxu1  ;;  %3505 = vmatprep.subr.bf16.mxu1 %v8185_v33  ;;  %v3172_v54 = vpop.f32.mrf.mxu0  ;;  %v7848_v33 = vcombine.low %v82_v21, %v90_v22  ;;  %v8089_v38 = vcombine.high %v322_v31, %v330_v32  ;;  %v562_v43 = vld [vmem:[%s12377_s2 + $0xfa0] sm:$0xff] }
 0x10a   : > { %v9882_v53 = vadd.f32 %v3211_v48, %v3170_v45  ;;  %3465 = vmatpush1.bf16.msra.mxu0 %v7928_v44  ;;  %v570_v44 = vld [vmem:[%s12377_s2 + $0xfe0] sm:$0xff]  ;;  %v7832_v45 = vcombine.low %v66_v29, %v74_v30 }
 0x10b   : > { %v3213_v57 = vpop.f32.mrf.mxu1  ;;  %v3173_v60 = vpop.f32.mrf.mxu0  ;;  %3466 = vmatprep.subr.bf16.mxu0 %v7913_v47  ;;  %v8073_v47 = vcombine.high %v306_v39, %v314_v42  ;;  %v8329_v48 = vcombine.high %v562_v43, %v570_v44  ;;  %v554_v54 = vld [vmem:[%s12377_s2 + $0xf60] sm:$0xff]  ;;  %v8328_v56 = vcombine.low %v562_v43, %v570_v44 }
 0x10c   : > { %v3806_v59 = vcombine.low %v9873_v40, %v9882_v53  ;;  %3506 = vmatpush1.bf16.msra.mxu1 %v8184_v46  ;;  %v8088_v46 = vcombine.low %v322_v31, %v330_v32  ;;  %v274_v60 = vld [vmem:[%s12377_s2 + $0x6a0] sm:$0xff]  ;;  %v8312_v5 = vcombine.low %v546_v52, %v554_v54 }
 0x10d   : > { %v3214_v3 = vpop.f32.mrf.mxu1  ;;  %3507 = vmatprep.subr.bf16.mxu1 %v8169_v49  ;;  %v290_v49 = vld [vmem:[%s12377_s2 + $0x720] sm:$0xff] }
 0x10e   : > { %3467 = vmatpush1.bf16.msra.mxu0 %v7912_v58  ;;  %v8057_v57 = vcombine.high %v290_v49, %v298_v50  ;;  %v8313_v58 = vcombine.high %v546_v52, %v554_v54  ;;  %v538_v3 = vld [vmem:[%s12377_s2 + $0xee0] sm:$0xff]  ;;  %v179_v54 = vld [vmem:[%s12377_s2 + $0x3a8] sm:$0xff] }
 0x10f   : > { %3468 = vmatprep.subr.bf16.mxu0 %v7897_v63  ;;  %v530_v63 = vld [vmem:[%s12377_s2 + $0xea0] sm:$0xff] }
 0x110   : > { %3508 = vmatpush1.bf16.msra.mxu1 %v8168_v62  ;;  %v282_v62 = vld [vmem:[%s12377_s2 + $0x6e0] sm:$0xff]  ;;  %v8297_v7 = vcombine.high %v530_v63, %v538_v3  ;;  %v8296_v13 = vcombine.low %v530_v63, %v538_v3  ;;  %v163_v3 = vld [vmem:[%s12377_s2 + $0x328] sm:$0xff] }
 0x111   : > { %3509 = vmatprep.subr.bf16.mxu1 %v8153_v4  ;;  %v8056_v4 = vcombine.low %v290_v49, %v298_v50  ;;  %v8041_v6 = vcombine.high %v274_v60, %v282_v62  ;;  %v258_v8 = vld [vmem:[%s12377_s2 + $0x620] sm:$0xff] }
 0x112   : > { %3469 = vmatpush1.bf16.msra.mxu0 %v7896_v9  ;;  %v266_v9 = vld [vmem:[%s12377_s2 + $0x660] sm:$0xff] }
 0x113   : > { %3470 = vmatprep.subr.bf16.mxu0 %v7881_v11  ;;  %v522_v11 = vld [vmem:[%s12377_s2 + $0xe60] sm:$0xff]  ;;  %v8025_v14 = vcombine.high %v258_v8, %v266_v9 }
 0x114   : > { %3510 = vmatpush1.bf16.msra.mxu1 %v8152_v10  ;;  %v514_v10 = vld [vmem:[%s12377_s2 + $0xe20] sm:$0xff] }
 0x115   : > { %3511 = vmatprep.subr.bf16.mxu1 %v8137_v12  ;;  %v8040_v12 = vcombine.low %v274_v60, %v282_v62  ;;  %v8281_v15 = vcombine.high %v514_v10, %v522_v11  ;;  %v242_v16 = vld [vmem:[%s12377_s2 + $0x5a0] sm:$0xff]  ;;  %v8280_v21 = vcombine.low %v514_v10, %v522_v11  ;;  %v147_v11 = vld [vmem:[%s12377_s2 + $0x2a8] sm:$0xff] }
 0x116   : > { %3471 = vmatpush1.bf16.msra.mxu0 %v7880_v17  ;;  %v250_v17 = vld [vmem:[%s12377_s2 + $0x5e0] sm:$0xff] }
 0x117   : > { %3472 = vmatprep.subr.bf16.mxu0 %v7865_v19  ;;  %v506_v19 = vld [vmem:[%s12377_s2 + $0xde0] sm:$0xff]  ;;  %v8009_v22 = vcombine.high %v242_v16, %v250_v17 }
 0x118   : > { %3512 = vmatpush1.bf16.msra.mxu1 %v8136_v18  ;;  %v498_v18 = vld [vmem:[%s12377_s2 + $0xda0] sm:$0xff] }
 0x119   : > { %3513 = vmatprep.subr.bf16.mxu1 %v8121_v20  ;;  %v8024_v20 = vcombine.low %v258_v8, %v266_v9  ;;  %v8265_v23 = vcombine.high %v498_v18, %v506_v19  ;;  %v226_v24 = vld [vmem:[%s12377_s2 + $0x520] sm:$0xff]  ;;  %v8264_v29 = vcombine.low %v498_v18, %v506_v19 }
 0x11a   : > { %3473 = vmatpush1.bf16.msra.mxu0 %v7864_v25  ;;  %v234_v25 = vld [vmem:[%s12377_s2 + $0x560] sm:$0xff] }
 0x11b   : > { %3474 = vmatprep.subr.bf16.mxu0 %v7849_v27  ;;  %v490_v27 = vld [vmem:[%s12377_s2 + $0xd60] sm:$0xff]  ;;  %v7993_v30 = vcombine.high %v226_v24, %v234_v25 }
 0x11c   : > { %3514 = vmatpush1.bf16.msra.mxu1 %v8120_v26  ;;  %v482_v26 = vld [vmem:[%s12377_s2 + $0xd20] sm:$0xff] }
 0x11d   : > { %3515 = vmatprep.subr.bf16.mxu1 %v8105_v28  ;;  %v8008_v28 = vcombine.low %v242_v16, %v250_v17  ;;  %v8249_v31 = vcombine.high %v482_v26, %v490_v27  ;;  %v210_v32 = vld [vmem:[%s12377_s2 + $0x4a0] sm:$0xff]  ;;  %v8248_v39 = vcombine.low %v482_v26, %v490_v27 }
 0x11e   : > { %3475 = vmatpush1.bf16.msra.mxu0 %v7848_v33  ;;  %v218_v33 = vld [vmem:[%s12377_s2 + $0x4e0] sm:$0xff] }
 0x11f   : > { %3476 = vmatprep.subr.bf16.mxu0 %v7833_v36  ;;  %v474_v36 = vld [vmem:[%s12377_s2 + $0xce0] sm:$0xff]  ;;  %v7977_v42 = vcombine.high %v210_v32, %v218_v33 }
 0x120   : > { %3516 = vmatpush1.bf16.msra.mxu1 %v8104_v34  ;;  %v466_v34 = vld [vmem:[%s12377_s2 + $0xca0] sm:$0xff] }
 0x121   : > { %3517 = vmatprep.subr.bf16.mxu1 %v8089_v38  ;;  %v7992_v38 = vcombine.low %v226_v24, %v234_v25  ;;  %v8233_v43 = vcombine.high %v466_v34, %v474_v36  ;;  %v194_v44 = vld [vmem:[%s12377_s2 + $0x420] sm:$0xff]  ;;  %v8232_v49 = vcombine.low %v466_v34, %v474_v36  ;;  %v131_v24 = vld [vmem:[%s12377_s2 + $0x228] sm:$0xff] }
 0x122   : > { %3477 = vmatpush1.bf16.msra.mxu0 %v7832_v45  ;;  %v202_v45 = vld [vmem:[%s12377_s2 + $0x460] sm:$0xff]  ;;  %v139_v25 = vld [vmem:[%s12377_s2 + $0x268] sm:$0xff] }
 0x123   : > { %3478 = vmatprep.subr.bf16.mxu0 %v8073_v47  ;;  %v458_v47 = vld [vmem:[%s12377_s2 + $0xc60] sm:$0xff]  ;;  %v7961_v50 = vcombine.high %v194_v44, %v202_v45  ;;  %v7899_v36 = vcombine.high %v131_v24, %v139_v25 }
 0x124   : > { %3518 = vmatpush1.bf16.msra.mxu1 %v8088_v46  ;;  %v450_v46 = vld [vmem:[%s12377_s2 + $0xc20] sm:$0xff] }
 0x125   : > { %3519 = vmatprep.subr.bf16.mxu1 %v8329_v48  ;;  %v7976_v48 = vcombine.low %v210_v32, %v218_v33  ;;  %v8217_v52 = vcombine.high %v450_v46, %v458_v47  ;;  %v8216_v60 = vcombine.low %v450_v46, %v458_v47  ;;  %v371_v46 = vld [vmem:[%s12377_s2 + $0x9a8] sm:$0xff] }
 0x126   : > { %3479 = vmatpush2.bf16.msra.mxu0 %v8072_v55  ;;  %v187_v55 = vld [vmem:[%s12377_s2 + $0x3e8] sm:$0xff] }
 0x127   : > { %3480 = vmatprep.subr.bf16.mxu0 %v8057_v57  ;;  %v443_v57 = vld [vmem:[%s12377_s2 + $0xbe8] sm:$0xff]  ;;  %v7947_v62 = vcombine.high %v179_v54, %v187_v55 }
 0x128   : > { %3520 = vmatpush2.bf16.msra.mxu1 %v8328_v56  ;;  %v435_v56 = vld [vmem:[%s12377_s2 + $0xba8] sm:$0xff] }
 0x129   : > { %3521 = vmatprep.subr.bf16.mxu1 %v8313_v58  ;;  %v7960_v58 = vcombine.low %v194_v44, %v202_v45  ;;  %v8203_v63 = vcombine.high %v435_v56, %v443_v57  ;;  %v8202_v8 = vcombine.low %v435_v56, %v443_v57  ;;  %v10099_v44 = vrot.slane %v3806_v59, %v9077_v35  ;;  %v379_v47 = vld [vmem:[%s12377_s2 + $0x9e8] sm:$0xff] }
 0x12a   : > { %3481 = vmatpush2.bf16.msra.mxu0 %v8056_v4  ;;  %v171_v4 = vld [vmem:[%s12377_s2 + $0x368] sm:$0xff]  ;;  %v8139_v59 = vcombine.high %v371_v46, %v379_v47  ;;  %v8138_v57 = vcombine.low %v371_v46, %v379_v47 }
 0x12b   : > { %3482 = vmatprep.subr.bf16.mxu0 %v8041_v6  ;;  %v427_v6 = vld [vmem:[%s12377_s2 + $0xb68] sm:$0xff]  ;;  %v7931_v9 = vcombine.high %v163_v3, %v171_v4  ;;  %v7930_v17 = vcombine.low %v163_v3, %v171_v4 }
 0x12c   : > { %3522 = vmatpush2.bf16.msra.mxu1 %v8312_v5  ;;  %v419_v5 = vld [vmem:[%s12377_s2 + $0xb28] sm:$0xff] }
 0x12d   : > { %3523 = vmatprep.subr.bf16.mxu1 %v8297_v7  ;;  %v7946_v7 = vcombine.low %v179_v54, %v187_v55  ;;  %v8187_v10 = vcombine.high %v419_v5, %v427_v6  ;;  %v355_v54 = vld [vmem:[%s12377_s2 + $0x928] sm:$0xff] }
 0x12e   : > { %3483 = vmatpush2.bf16.msra.mxu0 %v8040_v12  ;;  %v155_v12 = vld [vmem:[%s12377_s2 + $0x2e8] sm:$0xff] }
 0x12f   : > { %3484 = vmatprep.subr.bf16.mxu0 %v8025_v14  ;;  %v403_v14 = vld [vmem:[%s12377_s2 + $0xaa8] sm:$0xff] }
 0x130   : > { %3524 = vmatpush2.bf16.msra.mxu1 %v8296_v13  ;;  %v363_v55 = vld [vmem:[%s12377_s2 + $0x968] sm:$0xff] }
 0x131   : > { %3525 = vmatprep.subr.bf16.mxu1 %v8281_v15  ;;  %v411_v15 = vld [vmem:[%s12377_s2 + $0xae8] sm:$0xff] }
 0x132   : > { %3485 = vmatpush2.bf16.msra.mxu0 %v8024_v20  ;;  %v8186_v20 = vcombine.low %v419_v5, %v427_v6  ;;  %v8170_v34 = vcombine.low %v403_v14, %v411_v15  ;;  %v339_v3 = vld [vmem:[%s12377_s2 + $0x8a8] sm:$0xff]  ;;  %v8122_v6 = vcombine.low %v355_v54, %v363_v55 }
 0x133   : > { %3486 = vmatprep.subr.bf16.mxu0 %v8009_v22  ;;  %v347_v4 = vld [vmem:[%s12377_s2 + $0x8e8] sm:$0xff] }
 0x134   : > { %3526 = vmatpush2.bf16.msra.mxu1 %v8280_v21  ;;  %v7915_v21 = vcombine.high %v147_v11, %v155_v12  ;;  %v259_v47 = vld [vmem:[%s12377_s2 + $0x628] sm:$0xff] }
 0x135   : > { %3527 = vmatprep.subr.bf16.mxu1 %v8265_v23  ;;  %v8171_v23 = vcombine.high %v403_v14, %v411_v15  ;;  %v8106_v14 = vcombine.low %v339_v3, %v347_v4 }
 0x136   : > { %3487 = vmatpush2.bf16.msra.mxu0 %v8008_v28  ;;  %v387_v28 = vld [vmem:[%s12377_s2 + $0xa28] sm:$0xff] }
 0x137   : > { %3488 = vmatprep.subr.bf16.mxu0 %v7993_v30 }
 0x138   : > { %3528 = vmatpush2.bf16.msra.mxu1 %v8264_v29  ;;  %v395_v29 = vld [vmem:[%s12377_s2 + $0xa68] sm:$0xff] }
 0x139   : > { %3529 = vmatprep.subr.bf16.mxu1 %v8249_v31  ;;  %v7914_v31 = vcombine.low %v147_v11, %v155_v12  ;;  %v8154_v40 = vcombine.low %v387_v28, %v395_v29  ;;  %v323_v11 = vld [vmem:[%s12377_s2 + $0x828] sm:$0xff] }
 0x13a   : > { %3489 = vmatpush2.bf16.msra.mxu0 %v7992_v38  ;;  %v331_v12 = vld [vmem:[%s12377_s2 + $0x868] sm:$0xff] }
 0x13b   : > { %3490 = vmatprep.subr.bf16.mxu0 %v7977_v42  ;;  %v115_v42 = vld [vmem:[%s12377_s2 + $0x1a8] sm:$0xff] }
 0x13c   : > { %3530 = vmatpush2.bf16.msra.mxu1 %v8248_v39  ;;  %v8155_v39 = vcombine.high %v387_v28, %v395_v29  ;;  %v555_v28 = vld [vmem:[%s12377_s2 + $0xf68] sm:$0xff] }
 0x13d   : > { %3531 = vmatprep.subr.bf16.mxu1 %v8233_v43  ;;  %v123_v43 = vld [vmem:[%s12377_s2 + $0x1e8] sm:$0xff] }
 0x13e   : > { %3491 = vmatpush2.bf16.msra.mxu0 %v7976_v48  ;;  %v7898_v48 = vcombine.low %v131_v24, %v139_v25  ;;  %v7883_v53 = vcombine.high %v115_v42, %v123_v43  ;;  %v7882_v56 = vcombine.low %v115_v42, %v123_v43  ;;  %v291_v25 = vld [vmem:[%s12377_s2 + $0x728] sm:$0xff] }
 0x13f   : > { %3492 = vmatprep.subr.bf16.mxu0 %v7961_v50  ;;  %v99_v50 = vld [vmem:[%s12377_s2 + $0x128] sm:$0xff] }
 0x140   : > { %3532 = vmatpush2.bf16.msra.mxu1 %v8232_v49 }
 0x141   : > { %3533 = vmatprep.subr.bf16.mxu1 %v8217_v52  ;;  %v107_v52 = vld [vmem:[%s12377_s2 + $0x168] sm:$0xff] }
 0x142   : > { %3493 = vmatpush2.bf16.msra.mxu0 %v7960_v58  ;;  %v7867_v58 = vcombine.high %v99_v50, %v107_v52  ;;  %v7866_v5 = vcombine.low %v99_v50, %v107_v52 }
 0x143   : > { %3544 = vmatprep.subr.bf16.mxu0 %v7947_v62  ;;  %v83_v62 = vld [vmem:[%s12377_s2 + $0xa8] sm:$0xff] }
 0x144   : > { %3534 = vmatpush2.bf16.msra.mxu1 %v8216_v60  ;;  %v8123_v60 = vcombine.high %v355_v54, %v363_v55  ;;  %v243_v55 = vld [vmem:[%s12377_s2 + $0x5a8] sm:$0xff] }
 0x145   : > { %3585 = vmatprep.subr.bf16.mxu1 %v8203_v63  ;;  %v3250_v13 = vpop.f32.mrf.mxu0  ;;  %3495 = vmatmul.mubr.bf16.vlgmr.msra.gmra.mxu0 %v9259_v37  ;;  %v91_v63 = vld [vmem:[%s12377_s2 + $0xe8] sm:$0xff] }
 0x146   : > { %3545 = vmatpush1.bf16.msra.mxu0 %v7946_v7  ;;  %3576 = vmatprep.mubr.bf16.mxu0 %v9099_v51  ;;  %v7851_v7 = vcombine.high %v83_v62, %v91_v63 }
 0x147   : > { %v3291_v16 = vpop.f32.mrf.mxu1  ;;  %3536 = vmatmul.mubr.bf16.vlgmr.msra.gmra.mxu1 %v9269_v41  ;;  %v3252_v19 = vpop.f32.mrf.mxu0  ;;  %3546 = vmatprep.subr.bf16.mxu0 %v7931_v9  ;;  %v67_v9 = vld [vmem:[%s12377_s2 + $0x28] sm:$0xff] }
 0x148   : > { %v3292_v18 = vadd.f32 %v3291_v16, %v3250_v13  ;;  %3586 = vmatpush1.bf16.msra.mxu1 %v8202_v8  ;;  %3617 = vmatprep.mubr.bf16.mxu1 %v9116_v61  ;;  %v8107_v8 = vcombine.high %v339_v3, %v347_v4  ;;  %v7850_v13 = vcombine.low %v83_v62, %v91_v63  ;;  %v227_v4 = vld [vmem:[%s12377_s2 + $0x528] sm:$0xff] }
 0x149   : > { %v3293_v22 = vpop.f32.mrf.mxu1  ;;  %3587 = vmatprep.subr.bf16.mxu1 %v8187_v10  ;;  %v3254_v27 = vpop.f32.mrf.mxu0  ;;  %v75_v10 = vld [vmem:[%s12377_s2 + $0x68] sm:$0xff]  ;;  %v8091_v16 = vcombine.high %v323_v11, %v331_v12 }
 0x14a   : > { %v3294_v26 = vadd.f32 %v3293_v22, %v3252_v19  ;;  %3547 = vmatpush1.bf16.msra.mxu0 %v7930_v17  ;;  %v7835_v15 = vcombine.high %v67_v9, %v75_v10  ;;  %v307_v17 = vld [vmem:[%s12377_s2 + $0x7a8] sm:$0xff]  ;;  %v8090_v22 = vcombine.low %v323_v11, %v331_v12 }
 0x14b   : > { %v3295_v30 = vpop.f32.mrf.mxu1  ;;  %v3255_v33 = vpop.f32.mrf.mxu0  ;;  %3548 = vmatprep.subr.bf16.mxu0 %v7915_v21  ;;  %v563_v19 = vld [vmem:[%s12377_s2 + $0xfa8] sm:$0xff]  ;;  %v7834_v21 = vcombine.low %v67_v9, %v75_v10 }
 0x14c   : > { %v3807_v32 = vcombine.low %v3292_v18, %v3294_v26  ;;  %3588 = vmatpush1.bf16.msra.mxu1 %v8186_v20  ;;  %v315_v18 = vld [vmem:[%s12377_s2 + $0x7e8] sm:$0xff] }
 0x14d   : > { %v3296_v38 = vpop.f32.mrf.mxu1  ;;  %3589 = vmatprep.subr.bf16.mxu1 %v8171_v23  ;;  %v571_v20 = vld [vmem:[%s12377_s2 + $0xfe8] sm:$0xff]  ;;  %v8075_v23 = vcombine.high %v307_v17, %v315_v18  ;;  %v8074_v29 = vcombine.low %v307_v17, %v315_v18 }
 0x14e   : > { %v10102_v45 = vrot.slane %v3807_v32, %v9077_v35  ;;  %3549 = vmatpush1.bf16.msra.mxu0 %v7914_v31  ;;  %v8331_v24 = vcombine.high %v563_v19, %v571_v20  ;;  %v299_v26 = vld [vmem:[%s12377_s2 + $0x768] sm:$0xff]  ;;  %v8330_v30 = vcombine.low %v563_v19, %v571_v20 }
 0x14f   : > { %3550 = vmatprep.subr.bf16.mxu0 %v7899_v36  ;;  %v547_v27 = vld [vmem:[%s12377_s2 + $0xf28] sm:$0xff]  ;;  %v8059_v31 = vcombine.high %v291_v25, %v299_v26 }
 0x150   : > { %v3822_v49 = vcombine.low %v10099_v44, %v10102_v45  ;;  %3590 = vmatpush1.bf16.msra.mxu1 %v8170_v34  ;;  %v8315_v32 = vcombine.high %v547_v27, %v555_v28  ;;  %v275_v33 = vld [vmem:[%s12377_s2 + $0x6a8] sm:$0xff]  ;;  %v8314_v42 = vcombine.low %v547_v27, %v555_v28  ;;  %v180_v28 = vld [vmem:[%s12377_s2 + $0x3b0] sm:$0xff]  ;;  %v4298_v44 = vld [vmem:[%s12378_s3 + $0xc00] sm:$0xff] }
 0x151   : > { %3591 = vmatprep.subr.bf16.mxu1 %v8155_v39  ;;  %v283_v34 = vld [vmem:[%s12377_s2 + $0x6e8] sm:$0xff]  ;;  %v8058_v39 = vcombine.low %v291_v25, %v299_v26  ;;  %v4306_v45 = vld [vmem:[%s12378_s3 + $0xc40] sm:$0xff] }
 0x152   : > { %3551 = vmatpush1.bf16.msra.mxu0 %v7898_v48  ;;  %v531_v36 = vld [vmem:[%s12377_s2 + $0xea8] sm:$0xff]  ;;  %v8043_v43 = vcombine.high %v275_v33, %v283_v34 }
 0x153   : > { %3552 = vmatprep.subr.bf16.mxu0 %v7883_v53  ;;  %v539_v38 = vld [vmem:[%s12377_s2 + $0xee8] sm:$0xff] }
 0x154   : > { %3592 = vmatpush1.bf16.msra.mxu1 %v8154_v40  ;;  %v8299_v46 = vcombine.high %v531_v36, %v539_v38  ;;  %v267_v48 = vld [vmem:[%s12377_s2 + $0x668] sm:$0xff]  ;;  %v8298_v50 = vcombine.low %v531_v36, %v539_v38  ;;  %v164_v38 = vld [vmem:[%s12377_s2 + $0x330] sm:$0xff] }
 0x155   : > { %3593 = vmatprep.subr.bf16.mxu1 %v8139_v59  ;;  %v515_v40 = vld [vmem:[%s12377_s2 + $0xe28] sm:$0xff]  ;;  %v8042_v59 = vcombine.low %v275_v33, %v283_v34  ;;  %v8027_v52 = vcombine.high %v259_v47, %v267_v48 }
 0x156   : > { %3553 = vmatpush1.bf16.msra.mxu0 %v7882_v56  ;;  %v523_v53 = vld [vmem:[%s12377_s2 + $0xe68] sm:$0xff] }
 0x157   : > { %3554 = vmatprep.subr.bf16.mxu0 %v7867_v58  ;;  %v8283_v54 = vcombine.high %v515_v40, %v523_v53  ;;  %v251_v56 = vld [vmem:[%s12377_s2 + $0x5e8] sm:$0xff]  ;;  %v8282_v62 = vcombine.low %v515_v40, %v523_v53  ;;  %v148_v53 = vld [vmem:[%s12377_s2 + $0x2b0] sm:$0xff] }
 0x158   : > { %3594 = vmatpush1.bf16.msra.mxu1 %v8138_v57  ;;  %v499_v57 = vld [vmem:[%s12377_s2 + $0xda8] sm:$0xff]  ;;  %v8011_v63 = vcombine.high %v243_v55, %v251_v56 }
 0x159   : > { %3595 = vmatprep.subr.bf16.mxu1 %v8123_v60  ;;  %v507_v58 = vld [vmem:[%s12377_s2 + $0xde8] sm:$0xff]  ;;  %v8026_v60 = vcombine.low %v259_v47, %v267_v48 }
 0x15a   : > { %3555 = vmatpush1.bf16.msra.mxu0 %v7866_v5  ;;  %v8267_v3 = vcombine.high %v499_v57, %v507_v58  ;;  %v235_v5 = vld [vmem:[%s12377_s2 + $0x568] sm:$0xff]  ;;  %v8266_v9 = vcombine.low %v499_v57, %v507_v58 }
 0x15b   : > { %3556 = vmatprep.subr.bf16.mxu0 %v7851_v7  ;;  %v491_v7 = vld [vmem:[%s12377_s2 + $0xd68] sm:$0xff]  ;;  %v7995_v10 = vcombine.high %v227_v4, %v235_v5 }
 0x15c   : > { %3596 = vmatpush1.bf16.msra.mxu1 %v8122_v6  ;;  %v483_v6 = vld [vmem:[%s12377_s2 + $0xd28] sm:$0xff] }
 0x15d   : > { %3597 = vmatprep.subr.bf16.mxu1 %v8107_v8  ;;  %v8010_v8 = vcombine.low %v243_v55, %v251_v56  ;;  %v8251_v11 = vcombine.high %v483_v6, %v491_v7  ;;  %v211_v12 = vld [vmem:[%s12377_s2 + $0x4a8] sm:$0xff]  ;;  %v8250_v17 = vcombine.low %v483_v6, %v491_v7 }
 0x15e   : > { %3557 = vmatpush1.bf16.msra.mxu0 %v7850_v13  ;;  %v219_v13 = vld [vmem:[%s12377_s2 + $0x4e8] sm:$0xff] }
 0x15f   : > { %3558 = vmatprep.subr.bf16.mxu0 %v7835_v15  ;;  %v475_v15 = vld [vmem:[%s12377_s2 + $0xce8] sm:$0xff]  ;;  %v7979_v18 = vcombine.high %v211_v12, %v219_v13 }
 0x160   : > { %3598 = vmatpush1.bf16.msra.mxu1 %v8106_v14  ;;  %v467_v14 = vld [vmem:[%s12377_s2 + $0xca8] sm:$0xff] }
 0x161   : > { %3599 = vmatprep.subr.bf16.mxu1 %v8091_v16  ;;  %v7994_v16 = vcombine.low %v227_v4, %v235_v5  ;;  %v8235_v19 = vcombine.high %v467_v14, %v475_v15  ;;  %v195_v20 = vld [vmem:[%s12377_s2 + $0x428] sm:$0xff]  ;;  %v8234_v25 = vcombine.low %v467_v14, %v475_v15  ;;  %v132_v4 = vld [vmem:[%s12377_s2 + $0x230] sm:$0xff] }
 0x162   : > { %3559 = vmatpush1.bf16.msra.mxu0 %v7834_v21  ;;  %v203_v21 = vld [vmem:[%s12377_s2 + $0x468] sm:$0xff]  ;;  %v140_v5 = vld [vmem:[%s12377_s2 + $0x270] sm:$0xff] }
 0x163   : > { %3560 = vmatprep.subr.bf16.mxu0 %v8075_v23  ;;  %v459_v23 = vld [vmem:[%s12377_s2 + $0xc68] sm:$0xff]  ;;  %v7963_v26 = vcombine.high %v195_v20, %v203_v21  ;;  %v7901_v15 = vcombine.high %v132_v4, %v140_v5 }
 0x164   : > { %3600 = vmatpush1.bf16.msra.mxu1 %v8090_v22  ;;  %v451_v22 = vld [vmem:[%s12377_s2 + $0xc28] sm:$0xff] }
 0x165   : > { %3601 = vmatprep.subr.bf16.mxu1 %v8331_v24  ;;  %v7978_v24 = vcombine.low %v211_v12, %v219_v13  ;;  %v8219_v27 = vcombine.high %v451_v22, %v459_v23  ;;  %v8218_v33 = vcombine.low %v451_v22, %v459_v23  ;;  %v7900_v22 = vcombine.low %v132_v4, %v140_v5 }
 0x166   : > { %3561 = vmatpush2.bf16.msra.mxu0 %v8074_v29  ;;  %v188_v29 = vld [vmem:[%s12377_s2 + $0x3f0] sm:$0xff] }
 0x167   : > { %3562 = vmatprep.subr.bf16.mxu0 %v8059_v31  ;;  %v444_v31 = vld [vmem:[%s12377_s2 + $0xbf0] sm:$0xff]  ;;  %v7949_v34 = vcombine.high %v180_v28, %v188_v29 }
 0x168   : > { %3602 = vmatpush2.bf16.msra.mxu1 %v8330_v30  ;;  %v436_v30 = vld [vmem:[%s12377_s2 + $0xbb0] sm:$0xff] }
 0x169   : > { %3603 = vmatprep.subr.bf16.mxu1 %v8315_v32  ;;  %v7962_v32 = vcombine.low %v195_v20, %v203_v21  ;;  %v8205_v36 = vcombine.high %v436_v30, %v444_v31  ;;  %v8204_v47 = vcombine.low %v436_v30, %v444_v31  ;;  %v372_v20 = vld [vmem:[%s12377_s2 + $0x9b0] sm:$0xff] }
 0x16a   : > { %3563 = vmatpush2.bf16.msra.mxu0 %v8058_v39  ;;  %v172_v39 = vld [vmem:[%s12377_s2 + $0x370] sm:$0xff] }
 0x16b   : > { %3564 = vmatprep.subr.bf16.mxu0 %v8043_v43  ;;  %v428_v43 = vld [vmem:[%s12377_s2 + $0xb70] sm:$0xff]  ;;  %v7933_v48 = vcombine.high %v164_v38, %v172_v39  ;;  %v7932_v56 = vcombine.low %v164_v38, %v172_v39 }
 0x16c   : > { %3604 = vmatpush2.bf16.msra.mxu1 %v8314_v42  ;;  %v420_v42 = vld [vmem:[%s12377_s2 + $0xb30] sm:$0xff] }
 0x16d   : > { %3605 = vmatprep.subr.bf16.mxu1 %v8299_v46  ;;  %v7948_v46 = vcombine.low %v180_v28, %v188_v29  ;;  %v8189_v40 = vcombine.high %v420_v42, %v428_v43  ;;  %v380_v21 = vld [vmem:[%s12377_s2 + $0x9f0] sm:$0xff] }
 0x16e   : > { %3565 = vmatpush2.bf16.msra.mxu0 %v8042_v59  ;;  %v156_v59 = vld [vmem:[%s12377_s2 + $0x2f0] sm:$0xff]  ;;  %v8140_v31 = vcombine.low %v372_v20, %v380_v21 }
 0x16f   : > { %3566 = vmatprep.subr.bf16.mxu0 %v8027_v52  ;;  %v404_v52 = vld [vmem:[%s12377_s2 + $0xab0] sm:$0xff] }
 0x170   : > { %3606 = vmatpush2.bf16.msra.mxu1 %v8298_v50  ;;  %v356_v28 = vld [vmem:[%s12377_s2 + $0x930] sm:$0xff] }
 0x171   : > { %3607 = vmatprep.subr.bf16.mxu1 %v8283_v54  ;;  %v412_v54 = vld [vmem:[%s12377_s2 + $0xaf0] sm:$0xff] }
 0x172   : > { %3567 = vmatpush2.bf16.msra.mxu0 %v8026_v60  ;;  %v8188_v60 = vcombine.low %v420_v42, %v428_v43  ;;  %v8172_v14 = vcombine.low %v404_v52, %v412_v54  ;;  %v364_v29 = vld [vmem:[%s12377_s2 + $0x970] sm:$0xff] }
 0x173   : > { %3568 = vmatprep.subr.bf16.mxu0 %v8011_v63  ;;  %v340_v38 = vld [vmem:[%s12377_s2 + $0x8b0] sm:$0xff]  ;;  %v8124_v43 = vcombine.low %v356_v28, %v364_v29 }
 0x174   : > { %3608 = vmatpush2.bf16.msra.mxu1 %v8282_v62  ;;  %v7917_v62 = vcombine.high %v148_v53, %v156_v59  ;;  %v348_v39 = vld [vmem:[%s12377_s2 + $0x8f0] sm:$0xff] }
 0x175   : > { %3609 = vmatprep.subr.bf16.mxu1 %v8267_v3  ;;  %v8173_v3 = vcombine.high %v404_v52, %v412_v54  ;;  %v8108_v52 = vcombine.low %v340_v38, %v348_v39 }
 0x176   : > { %3569 = vmatpush2.bf16.msra.mxu0 %v8010_v8  ;;  %v388_v8 = vld [vmem:[%s12377_s2 + $0xa30] sm:$0xff] }
 0x177   : > { %3570 = vmatprep.subr.bf16.mxu0 %v7995_v10 }
 0x178   : > { %3610 = vmatpush2.bf16.msra.mxu1 %v8266_v9  ;;  %v396_v9 = vld [vmem:[%s12377_s2 + $0xa70] sm:$0xff] }
 0x179   : > { %3611 = vmatprep.subr.bf16.mxu1 %v8251_v11  ;;  %v7916_v11 = vcombine.low %v148_v53, %v156_v59  ;;  %v8156_v23 = vcombine.low %v388_v8, %v396_v9  ;;  %v324_v53 = vld [vmem:[%s12377_s2 + $0x830] sm:$0xff] }
 0x17a   : > { %3571 = vmatpush2.bf16.msra.mxu0 %v7994_v16  ;;  %v332_v59 = vld [vmem:[%s12377_s2 + $0x870] sm:$0xff] }
 0x17b   : > { %3572 = vmatprep.subr.bf16.mxu0 %v7979_v18  ;;  %v116_v18 = vld [vmem:[%s12377_s2 + $0x1b0] sm:$0xff] }
 0x17c   : > { %3612 = vmatpush2.bf16.msra.mxu1 %v8250_v17  ;;  %v8157_v17 = vcombine.high %v388_v8, %v396_v9  ;;  %v300_v8 = vld [vmem:[%s12377_s2 + $0x770] sm:$0xff] }
 0x17d   : > { %3613 = vmatprep.subr.bf16.mxu1 %v8235_v19  ;;  %v124_v19 = vld [vmem:[%s12377_s2 + $0x1f0] sm:$0xff] }
 0x17e   : > { %3573 = vmatpush2.bf16.msra.mxu0 %v7978_v24  ;;  %v7885_v24 = vcombine.high %v116_v18, %v124_v19  ;;  %v7884_v30 = vcombine.low %v116_v18, %v124_v19  ;;  %v548_v9 = vld [vmem:[%s12377_s2 + $0xf30] sm:$0xff] }
 0x17f   : > { %3574 = vmatprep.subr.bf16.mxu0 %v7963_v26  ;;  %v100_v26 = vld [vmem:[%s12377_s2 + $0x130] sm:$0xff] }
 0x180   : > { %3614 = vmatpush2.bf16.msra.mxu1 %v8234_v25  ;;  %v8141_v25 = vcombine.high %v372_v20, %v380_v21  ;;  %v532_v18 = vld [vmem:[%s12377_s2 + $0xeb0] sm:$0xff] }
 0x181   : > { %3615 = vmatprep.subr.bf16.mxu1 %v8219_v27  ;;  %v108_v27 = vld [vmem:[%s12377_s2 + $0x170] sm:$0xff] }
 0x182   : > { %3575 = vmatpush2.bf16.msra.mxu0 %v7962_v32  ;;  %v7869_v32 = vcombine.high %v100_v26, %v108_v27  ;;  %v7868_v42 = vcombine.low %v100_v26, %v108_v27  ;;  %v540_v19 = vld [vmem:[%s12377_s2 + $0xef0] sm:$0xff] }
 0x183   : > { %3626 = vmatprep.subr.bf16.mxu0 %v7949_v34  ;;  %v84_v34 = vld [vmem:[%s12377_s2 + $0xb0] sm:$0xff] }
 0x184   : > { %3616 = vmatpush2.bf16.msra.mxu1 %v8218_v33  ;;  %v8125_v33 = vcombine.high %v356_v28, %v364_v29  ;;  %v516_v26 = vld [vmem:[%s12377_s2 + $0xe30] sm:$0xff]  ;;  %v8300_v29 = vcombine.low %v532_v18, %v540_v19 }
 0x185   : > { %3667 = vmatprep.subr.bf16.mxu1 %v8205_v36  ;;  %v3332_v50 = vpop.f32.mrf.mxu0  ;;  %3577 = vmatmul.mubr.bf16.vlgmr.msra.gmra.mxu0 %v9259_v37  ;;  %v92_v36 = vld [vmem:[%s12377_s2 + $0xf0] sm:$0xff] }
 0x186   : > { %3627 = vmatpush1.bf16.msra.mxu0 %v7948_v46  ;;  %3658 = vmatprep.mubr.bf16.mxu0 %v9099_v51  ;;  %v7853_v46 = vcombine.high %v84_v34, %v92_v36  ;;  %v524_v27 = vld [vmem:[%s12377_s2 + $0xe70] sm:$0xff] }
 0x187   : > { %v3373_v55 = vpop.f32.mrf.mxu1  ;;  %3618 = vmatmul.mubr.bf16.vlgmr.msra.gmra.mxu1 %v9269_v41  ;;  %v3334_v58 = vpop.f32.mrf.mxu0  ;;  %3628 = vmatprep.subr.bf16.mxu0 %v7933_v48  ;;  %v68_v48 = vld [vmem:[%s12377_s2 + $0x30] sm:$0xff] }
 0x188   : > { %v10282_v57 = vadd.f32 %v3373_v55, %v3332_v50  ;;  %3668 = vmatpush1.bf16.msra.mxu1 %v8204_v47  ;;  %3699 = vmatprep.mubr.bf16.mxu1 %v9116_v61  ;;  %v8109_v47 = vcombine.high %v340_v38, %v348_v39  ;;  %v7852_v50 = vcombine.low %v84_v34, %v92_v36  ;;  %v500_v34 = vld [vmem:[%s12377_s2 + $0xdb0] sm:$0xff] }
 0x189   : > { %v3375_v63 = vpop.f32.mrf.mxu1  ;;  %3669 = vmatprep.subr.bf16.mxu1 %v8189_v40  ;;  %v3336_v7 = vpop.f32.mrf.mxu0  ;;  %v76_v40 = vld [vmem:[%s12377_s2 + $0x70] sm:$0xff]  ;;  %v8093_v55 = vcombine.high %v324_v53, %v332_v59  ;;  %v8284_v39 = vcombine.low %v516_v26, %v524_v27 }
 0x18a   : > { %v10291_v6 = vadd.f32 %v3375_v63, %v3334_v58  ;;  %3629 = vmatpush1.bf16.msra.mxu0 %v7932_v56  ;;  %v7837_v54 = vcombine.high %v68_v48, %v76_v40  ;;  %v308_v56 = vld [vmem:[%s12377_s2 + $0x7b0] sm:$0xff]  ;;  %v7836_v63 = vcombine.low %v68_v48, %v76_v40 }
 0x18b   : > { %v3377_v10 = vpop.f32.mrf.mxu1  ;;  %v3337_v13 = vpop.f32.mrf.mxu0  ;;  %3630 = vmatprep.subr.bf16.mxu0 %v7917_v62  ;;  %v316_v58 = vld [vmem:[%s12377_s2 + $0x7f0] sm:$0xff] }
 0x18c   : > { %v3823_v12 = vcombine.low %v10282_v57, %v10291_v6  ;;  %3670 = vmatpush1.bf16.msra.mxu1 %v8188_v60  ;;  %v564_v60 = vld [vmem:[%s12377_s2 + $0xfb0] sm:$0xff]  ;;  %v8077_v4 = vcombine.high %v308_v56, %v316_v58 }
 0x18d   : > { %v3378_v16 = vpop.f32.mrf.mxu1  ;;  %3671 = vmatprep.subr.bf16.mxu1 %v8173_v3  ;;  %v572_v62 = vld [vmem:[%s12377_s2 + $0xff0] sm:$0xff]  ;;  %v8092_v3 = vcombine.low %v324_v53, %v332_v59 }
 0x18e   : > { %3631 = vmatpush1.bf16.msra.mxu0 %v7916_v11  ;;  %v8333_v5 = vcombine.high %v564_v60, %v572_v62  ;;  %v292_v7 = vld [vmem:[%s12377_s2 + $0x730] sm:$0xff]  ;;  %v8076_v11 = vcombine.low %v308_v56, %v316_v58  ;;  %v8332_v13 = vcombine.low %v564_v60, %v572_v62 }
 0x18f   : > { %3632 = vmatprep.subr.bf16.mxu0 %v7901_v15  ;;  %v556_v10 = vld [vmem:[%s12377_s2 + $0xf70] sm:$0xff]  ;;  %v8060_v20 = vcombine.low %v292_v7, %v300_v8 }
 0x190   : > { %3672 = vmatpush1.bf16.msra.mxu1 %v8172_v14  ;;  %v8061_v14 = vcombine.high %v292_v7, %v300_v8  ;;  %v8317_v15 = vcombine.high %v548_v9, %v556_v10  ;;  %v276_v16 = vld [vmem:[%s12377_s2 + $0x6b0] sm:$0xff]  ;;  %v8316_v21 = vcombine.low %v548_v9, %v556_v10 }
 0x191   : > { %3673 = vmatprep.subr.bf16.mxu1 %v8157_v17  ;;  %v284_v17 = vld [vmem:[%s12377_s2 + $0x6f0] sm:$0xff] }
 0x192   : > { %3633 = vmatpush1.bf16.msra.mxu0 %v7900_v22  ;;  %v8045_v22 = vcombine.high %v276_v16, %v284_v17  ;;  %v8044_v28 = vcombine.low %v276_v16, %v284_v17  ;;  %v508_v36 = vld [vmem:[%s12377_s2 + $0xdf0] sm:$0xff]  ;;  %v437_v16 = vld [vmem:[%s12377_s2 + $0xbb8] sm:$0xff] }
 0x193   : > { %3634 = vmatprep.subr.bf16.mxu0 %v7885_v24  ;;  %v260_v24 = vld [vmem:[%s12377_s2 + $0x630] sm:$0xff]  ;;  %v8268_v59 = vcombine.low %v500_v34, %v508_v36  ;;  %v445_v17 = vld [vmem:[%s12377_s2 + $0xbf8] sm:$0xff] }
 0x194   : > { %3674 = vmatpush1.bf16.msra.mxu1 %v8156_v23  ;;  %v8301_v23 = vcombine.high %v532_v18, %v540_v19  ;;  %v484_v48 = vld [vmem:[%s12377_s2 + $0xd30] sm:$0xff] }
 0x195   : > { %3675 = vmatprep.subr.bf16.mxu1 %v8141_v25  ;;  %v268_v25 = vld [vmem:[%s12377_s2 + $0x670] sm:$0xff] }
 0x196   : > { %3635 = vmatpush1.bf16.msra.mxu0 %v7884_v30  ;;  %v8029_v30 = vcombine.high %v260_v24, %v268_v25  ;;  %v8028_v38 = vcombine.low %v260_v24, %v268_v25  ;;  %v492_v40 = vld [vmem:[%s12377_s2 + $0xd70] sm:$0xff]  ;;  %v421_v24 = vld [vmem:[%s12377_s2 + $0xb38] sm:$0xff] }
 0x197   : > { %3636 = vmatprep.subr.bf16.mxu0 %v7869_v32  ;;  %v244_v32 = vld [vmem:[%s12377_s2 + $0x5b0] sm:$0xff]  ;;  %v8252_v62 = vcombine.low %v484_v48, %v492_v40  ;;  %v429_v25 = vld [vmem:[%s12377_s2 + $0xb78] sm:$0xff] }
 0x198   : > { %3676 = vmatpush1.bf16.msra.mxu1 %v8140_v31  ;;  %v8285_v31 = vcombine.high %v516_v26, %v524_v27  ;;  %v468_v56 = vld [vmem:[%s12377_s2 + $0xcb0] sm:$0xff]  ;;  %v8206_v27 = vcombine.low %v437_v16, %v445_v17 }
 0x199   : > { %3677 = vmatprep.subr.bf16.mxu1 %v8125_v33  ;;  %v252_v33 = vld [vmem:[%s12377_s2 + $0x5f0] sm:$0xff] }
 0x19a   : > { %3637 = vmatpush1.bf16.msra.mxu0 %v7868_v42  ;;  %v8013_v42 = vcombine.high %v244_v32, %v252_v33  ;;  %v8012_v53 = vcombine.low %v244_v32, %v252_v33  ;;  %v476_v58 = vld [vmem:[%s12377_s2 + $0xcf0] sm:$0xff]  ;;  %v405_v33 = vld [vmem:[%s12377_s2 + $0xab8] sm:$0xff] }
 0x19b   : > { %3638 = vmatprep.subr.bf16.mxu0 %v7853_v46  ;;  %v228_v46 = vld [vmem:[%s12377_s2 + $0x530] sm:$0xff]  ;;  %v8236_v10 = vcombine.low %v468_v56, %v476_v58 }
 0x19c   : > { %3678 = vmatpush1.bf16.msra.mxu1 %v8124_v43  ;;  %v8269_v43 = vcombine.high %v500_v34, %v508_v36  ;;  %v452_v7 = vld [vmem:[%s12377_s2 + $0xc30] sm:$0xff]  ;;  %v413_v34 = vld [vmem:[%s12377_s2 + $0xaf8] sm:$0xff] }
 0x19d   : > { %3679 = vmatprep.subr.bf16.mxu1 %v8109_v47  ;;  %v236_v47 = vld [vmem:[%s12377_s2 + $0x570] sm:$0xff] }
 0x19e   : > { %3639 = vmatpush1.bf16.msra.mxu0 %v7852_v50  ;;  %v7997_v50 = vcombine.high %v228_v46, %v236_v47  ;;  %v7996_v60 = vcombine.low %v228_v46, %v236_v47  ;;  %v460_v8 = vld [vmem:[%s12377_s2 + $0xc70] sm:$0xff] }
 0x19f   : > { %3640 = vmatprep.subr.bf16.mxu0 %v7837_v54  ;;  %v212_v54 = vld [vmem:[%s12377_s2 + $0x4b0] sm:$0xff]  ;;  %v8220_v19 = vcombine.low %v452_v7, %v460_v8 }
 0x1a0   : > { %3680 = vmatpush1.bf16.msra.mxu1 %v8108_v52  ;;  %v8253_v52 = vcombine.high %v484_v48, %v492_v40  ;;  %v8175_v48 = vcombine.high %v405_v33, %v413_v34  ;;  %v133_v40 = vld [vmem:[%s12377_s2 + $0x238] sm:$0xff] }
 0x1a1   : > { %3681 = vmatprep.subr.bf16.mxu1 %v8093_v55  ;;  %v220_v55 = vld [vmem:[%s12377_s2 + $0x4f0] sm:$0xff] }
 0x1a2   : > { %3641 = vmatpush1.bf16.msra.mxu0 %v7836_v63  ;;  %v7981_v63 = vcombine.high %v212_v54, %v220_v55  ;;  %v7980_v9 = vcombine.low %v212_v54, %v220_v55  ;;  %v397_v54 = vld [vmem:[%s12377_s2 + $0xa78] sm:$0xff] }
 0x1a3   : > { %3642 = vmatprep.subr.bf16.mxu0 %v8077_v4  ;;  %v196_v4 = vld [vmem:[%s12377_s2 + $0x430] sm:$0xff] }
 0x1a4   : > { %3682 = vmatpush1.bf16.msra.mxu1 %v8092_v3  ;;  %v8237_v3 = vcombine.high %v468_v56, %v476_v58 }
 0x1a5   : > { %3683 = vmatprep.subr.bf16.mxu1 %v8333_v5  ;;  %v204_v5 = vld [vmem:[%s12377_s2 + $0x470] sm:$0xff] }
 0x1a6   : > { %3643 = vmatpush2.bf16.msra.mxu0 %v8076_v11  ;;  %v7965_v11 = vcombine.high %v196_v4, %v204_v5  ;;  %v7964_v18 = vcombine.low %v196_v4, %v204_v5  ;;  %v117_v4 = vld [vmem:[%s12377_s2 + $0x1b8] sm:$0xff]  ;;  %v10508_v5 = vrot.slane %v3823_v12, %v9077_v35 }
 0x1a7   : > { %3644 = vmatprep.subr.bf16.mxu0 %v8061_v14  ;;  %v181_v14 = vld [vmem:[%s12377_s2 + $0x3b8] sm:$0xff] }
 0x1a8   : > { %3684 = vmatpush2.bf16.msra.mxu1 %v8332_v13  ;;  %v8221_v13 = vcombine.high %v452_v7, %v460_v8  ;;  %v373_v8 = vld [vmem:[%s12377_s2 + $0x9b8] sm:$0xff] }
 0x1a9   : > { %3685 = vmatprep.subr.bf16.mxu1 %v8317_v15  ;;  %v189_v15 = vld [vmem:[%s12377_s2 + $0x3f8] sm:$0xff] }
 0x1aa   : > { %3645 = vmatpush2.bf16.msra.mxu0 %v8060_v20  ;;  %v7951_v20 = vcombine.high %v181_v14, %v189_v15  ;;  %v7950_v26 = vcombine.low %v181_v14, %v189_v15  ;;  %v109_v14 = vld [vmem:[%s12377_s2 + $0x178] sm:$0xff] }
 0x1ab   : > { %3646 = vmatprep.subr.bf16.mxu0 %v8045_v22  ;;  %v165_v22 = vld [vmem:[%s12377_s2 + $0x338] sm:$0xff] }
 0x1ac   : > { %3686 = vmatpush2.bf16.msra.mxu1 %v8316_v21  ;;  %v8207_v21 = vcombine.high %v437_v16, %v445_v17  ;;  %v357_v15 = vld [vmem:[%s12377_s2 + $0x938] sm:$0xff] }
 0x1ad   : > { %3687 = vmatprep.subr.bf16.mxu1 %v8301_v23  ;;  %v173_v23 = vld [vmem:[%s12377_s2 + $0x378] sm:$0xff] }
 0x1ae   : > { %3647 = vmatpush2.bf16.msra.mxu0 %v8044_v28  ;;  %v7935_v28 = vcombine.high %v165_v22, %v173_v23  ;;  %v365_v16 = vld [vmem:[%s12377_s2 + $0x978] sm:$0xff] }
 0x1af   : > { %3648 = vmatprep.subr.bf16.mxu0 %v8029_v30  ;;  %v149_v30 = vld [vmem:[%s12377_s2 + $0x2b8] sm:$0xff] }
 0x1b0   : > { %3688 = vmatpush2.bf16.msra.mxu1 %v8300_v29  ;;  %v8191_v29 = vcombine.high %v421_v24, %v429_v25 }
 0x1b1   : > { %3689 = vmatprep.subr.bf16.mxu1 %v8285_v31  ;;  %v157_v31 = vld [vmem:[%s12377_s2 + $0x2f8] sm:$0xff] }
 0x1b2   : > { %3649 = vmatpush2.bf16.msra.mxu0 %v8028_v38  ;;  %v7934_v38 = vcombine.low %v165_v22, %v173_v23  ;;  %v7919_v46 = vcombine.high %v149_v30, %v157_v31  ;;  %v7918_v56 = vcombine.low %v149_v30, %v157_v31  ;;  %v93_v22 = vld [vmem:[%s12377_s2 + $0xf8] sm:$0xff] }
 0x1b3   : > { %3650 = vmatprep.subr.bf16.mxu0 %v8013_v42  ;;  %v341_v23 = vld [vmem:[%s12377_s2 + $0x8b8] sm:$0xff] }
 0x1b4   : > { %3690 = vmatpush2.bf16.msra.mxu1 %v8284_v39  ;;  %v77_v30 = vld [vmem:[%s12377_s2 + $0x78] sm:$0xff] }
 0x1b5   : > { %3691 = vmatprep.subr.bf16.mxu1 %v8269_v43  ;;  %v8190_v43 = vcombine.low %v421_v24, %v429_v25  ;;  %v349_v24 = vld [vmem:[%s12377_s2 + $0x8f8] sm:$0xff] }
 0x1b6   : > { %3651 = vmatpush2.bf16.msra.mxu0 %v8012_v53  ;;  %v141_v53 = vld [vmem:[%s12377_s2 + $0x278] sm:$0xff] }
 0x1b7   : > { %3652 = vmatprep.subr.bf16.mxu0 %v7997_v50  ;;  %v325_v31 = vld [vmem:[%s12377_s2 + $0x838] sm:$0xff] }
 0x1b8   : > { %3692 = vmatpush2.bf16.msra.mxu1 %v8268_v59 }
 0x1b9   : > { %3693 = vmatprep.subr.bf16.mxu1 %v8253_v52  ;;  %v389_v52 = vld [vmem:[%s12377_s2 + $0xa38] sm:$0xff] }
 0x1ba   : > { %3653 = vmatpush2.bf16.msra.mxu0 %v7996_v60  ;;  %v8158_v57 = vcombine.low %v389_v52, %v397_v54 }
 0x1bb   : > { %3654 = vmatprep.subr.bf16.mxu0 %v7981_v63 }
 0x1bc   : > { %3694 = vmatpush2.bf16.msra.mxu1 %v8252_v62  ;;  %v7903_v62 = vcombine.high %v133_v40, %v141_v53 }
 0x1bd   : > { %3695 = vmatprep.subr.bf16.mxu1 %v8237_v3  ;;  %v8159_v3 = vcombine.high %v389_v52, %v397_v54  ;;  %v549_v52 = vld [vmem:[%s12377_s2 + $0xf38] sm:$0xff] }
 0x1be   : > { %3655 = vmatpush2.bf16.msra.mxu0 %v7980_v9  ;;  %v381_v9 = vld [vmem:[%s12377_s2 + $0x9f8] sm:$0xff] }
 0x1bf   : > { %3656 = vmatprep.subr.bf16.mxu0 %v7965_v11  ;;  %v8143_v12 = vcombine.high %v373_v8, %v381_v9  ;;  %v557_v54 = vld [vmem:[%s12377_s2 + $0xf78] sm:$0xff] }
 0x1c0   : > { %3696 = vmatpush2.bf16.msra.mxu1 %v8236_v10  ;;  %v7902_v10 = vcombine.low %v133_v40, %v141_v53 }
 0x1c1   : > { %3697 = vmatprep.subr.bf16.mxu1 %v8221_v13  ;;  %v101_v13 = vld [vmem:[%s12377_s2 + $0x138] sm:$0xff] }
 0x1c2   : > { %3657 = vmatpush2.bf16.msra.mxu0 %v7964_v18  ;;  %v8142_v18 = vcombine.low %v373_v8, %v381_v9  ;;  %v7870_v25 = vcombine.low %v101_v13, %v109_v14 }
 0x1c3   : > { %3708 = vmatprep.subr.bf16.mxu0 %v7951_v20  ;;  %v8127_v20 = vcombine.high %v357_v15, %v365_v16 }
 0x1c4   : > { %3698 = vmatpush2.bf16.msra.mxu1 %v8220_v19  ;;  %v7871_v19 = vcombine.high %v101_v13, %v109_v14 }
 0x1c5   : > { %3749 = vmatprep.subr.bf16.mxu1 %v8207_v21  ;;  %v3414_v32 = vpop.f32.mrf.mxu0  ;;  %3659 = vmatmul.mubr.bf16.vlgmr.msra.gmra.mxu0 %v9259_v37  ;;  %v85_v21 = vld [vmem:[%s12377_s2 + $0xb8] sm:$0xff] }
 0x1c6   : > { %3709 = vmatpush1.bf16.msra.mxu0 %v7950_v26  ;;  %3740 = vmatprep.mubr.bf16.mxu0 %v9099_v51  ;;  %v8174_v51 = vcombine.low %v405_v33, %v413_v34  ;;  %v8126_v26 = vcombine.low %v357_v15, %v365_v16  ;;  %v7854_v33 = vcombine.low %v85_v21, %v93_v22 }
 0x1c7   : > { %v3455_v36 = vpop.f32.mrf.mxu1  ;;  %3700 = vmatmul.mubr.bf16.vlgmr.msra.gmra.mxu1 %v9269_v41  ;;  %v3416_v42 = vpop.f32.mrf.mxu0  ;;  %3710 = vmatprep.subr.bf16.mxu0 %v7935_v28  ;;  %v8111_v28 = vcombine.high %v341_v23, %v349_v24  ;;  %v8110_v34 = vcombine.low %v341_v23, %v349_v24 }
 0x1c8   : > { %v3456_v39 = vadd.f32 %v3455_v36, %v3414_v32  ;;  %3750 = vmatpush1.bf16.msra.mxu1 %v8206_v27  ;;  %3781 = vmatprep.mubr.bf16.mxu1 %v9116_v61  ;;  %v125_v61 = vld [vmem:[%s12377_s2 + $0x1f8] sm:$0xff]  ;;  %v7855_v27 = vcombine.high %v85_v21, %v93_v22 }
 0x1c9   : > { %v3457_v47 = vpop.f32.mrf.mxu1  ;;  %3751 = vmatprep.subr.bf16.mxu1 %v8191_v29  ;;  %v3418_v50 = vpop.f32.mrf.mxu0  ;;  %v7887_v6 = vcombine.high %v117_v4, %v125_v61  ;;  %v7886_v17 = vcombine.low %v117_v4, %v125_v61  ;;  %v69_v29 = vld [vmem:[%s12377_s2 + $0x38] sm:$0xff]  ;;  %v8318_v61 = vcombine.low %v549_v52, %v557_v54 }
 0x1ca   : > { %v3458_v59 = vadd.f32 %v3457_v47, %v3416_v42  ;;  %3711 = vmatpush1.bf16.msra.mxu0 %v7934_v38  ;;  %v333_v32 = vld [vmem:[%s12377_s2 + $0x878] sm:$0xff]  ;;  %v7839_v36 = vcombine.high %v69_v29, %v77_v30  ;;  %v7838_v47 = vcombine.low %v69_v29, %v77_v30 }
 0x1cb   : > { %v3459_v55 = vpop.f32.mrf.mxu1  ;;  %v3419_v60 = vpop.f32.mrf.mxu0  ;;  %3712 = vmatprep.subr.bf16.mxu0 %v7919_v46  ;;  %v8095_v38 = vcombine.high %v325_v31, %v333_v32  ;;  %v317_v42 = vld [vmem:[%s12377_s2 + $0x7f8] sm:$0xff] }
 0x1cc   : > { %v3824_v58 = vcombine.low %v3456_v39, %v3458_v59  ;;  %3752 = vmatpush1.bf16.msra.mxu1 %v8190_v43  ;;  %v309_v39 = vld [vmem:[%s12377_s2 + $0x7b8] sm:$0xff]  ;;  %v8319_v60 = vcombine.high %v549_v52, %v557_v54 }
 0x1cd   : > { %v3460_v63 = vpop.f32.mrf.mxu1  ;;  %3753 = vmatprep.subr.bf16.mxu1 %v8175_v48  ;;  %v565_v43 = vld [vmem:[%s12377_s2 + $0xfb8] sm:$0xff]  ;;  %v8094_v48 = vcombine.low %v325_v31, %v333_v32  ;;  %v8079_v40 = vcombine.high %v309_v39, %v317_v42  ;;  %v8078_v55 = vcombine.low %v309_v39, %v317_v42 }
 0x1ce   : > { %v10511_v7 = vrot.slane %v3824_v58, %v9077_v35  ;;  %3713 = vmatpush1.bf16.msra.mxu0 %v7918_v56  ;;  %v573_v46 = vld [vmem:[%s12377_s2 + $0xff8] sm:$0xff] }
 0x1cf   : > { %3714 = vmatprep.subr.bf16.mxu0 %v7903_v62  ;;  %v8335_v53 = vcombine.high %v565_v43, %v573_v46  ;;  %v293_v59 = vld [vmem:[%s12377_s2 + $0x738] sm:$0xff]  ;;  %v8334_v56 = vcombine.low %v565_v43, %v573_v46 }
 0x1d0   : > { %v3839_v11 = vcombine.low %v10508_v5, %v10511_v7  ;;  %3754 = vmatpush1.bf16.msra.mxu1 %v8174_v51  ;;  %v301_v50 = vld [vmem:[%s12377_s2 + $0x778] sm:$0xff]  ;;  %v4042_v7 = vld [vmem:[%s12378_s3 + $0x400] sm:$0xff] }
 0x1d1   : > { %3755 = vmatprep.subr.bf16.mxu1 %v8159_v3  ;;  %v8063_v58 = vcombine.high %v293_v59, %v301_v50  ;;  %v277_v51 = vld [vmem:[%s12377_s2 + $0x6b8] sm:$0xff]  ;;  %v8062_v4 = vcombine.low %v293_v59, %v301_v50  ;;  %v3889_v59 = vcombine.high %v8961_v1, %v8961_v1 }
 0x1d2   : > { %3715 = vmatpush1.bf16.msra.mxu0 %v7902_v10  ;;  %v285_v62 = vld [vmem:[%s12377_s2 + $0x6f8] sm:$0xff] }
 0x1d3   : > { %3716 = vmatprep.subr.bf16.mxu0 %v7887_v6  ;;  %v533_v63 = vld [vmem:[%s12377_s2 + $0xeb8] sm:$0xff]  ;;  %v8047_v8 = vcombine.high %v277_v51, %v285_v62  ;;  %v8046_v13 = vcombine.low %v277_v51, %v285_v62  ;;  %v4282_v51 = vld [vmem:[%s12378_s3 + $0xb80] sm:$0xff] }
 0x1d4   : > { %3756 = vmatpush1.bf16.msra.mxu1 %v8158_v57  ;;  %v541_v3 = vld [vmem:[%s12377_s2 + $0xef8] sm:$0xff]  ;;  %v4290_v62 = vld [vmem:[%s12378_s3 + $0xbc0] sm:$0xff] }
 0x1d5   : > { %3757 = vmatprep.subr.bf16.mxu1 %v8143_v12  ;;  %v8303_v9 = vcombine.high %v533_v63, %v541_v3  ;;  %v261_v10 = vld [vmem:[%s12377_s2 + $0x638] sm:$0xff]  ;;  %v8302_v14 = vcombine.low %v533_v63, %v541_v3  ;;  %v10672_v63 = vrot.slane %v3889_v59, %v9077_v35  ;;  %v3970_v59 = vld [vmem:[%s12378_s3 + $0x1c0] sm:$0xff] }
 0x1d6   : > { %3717 = vmatpush1.bf16.msra.mxu0 %v7886_v17  ;;  %v269_v57 = vld [vmem:[%s12377_s2 + $0x678] sm:$0xff] }
 0x1d7   : > { %3718 = vmatprep.subr.bf16.mxu0 %v7871_v19  ;;  %v517_v6 = vld [vmem:[%s12377_s2 + $0xe38] sm:$0xff]  ;;  %v8031_v15 = vcombine.high %v261_v10, %v269_v57  ;;  %v8030_v21 = vcombine.low %v261_v10, %v269_v57  ;;  %v4266_v57 = vld [vmem:[%s12378_s3 + $0xb00] sm:$0xff] }
 0x1d8   : > { %3758 = vmatpush1.bf16.msra.mxu1 %v8142_v18  ;;  %v525_v12 = vld [vmem:[%s12377_s2 + $0xe78] sm:$0xff] }
 0x1d9   : > { %3759 = vmatprep.subr.bf16.mxu1 %v8127_v20  ;;  %v8287_v16 = vcombine.high %v517_v6, %v525_v12  ;;  %v245_v17 = vld [vmem:[%s12377_s2 + $0x5b8] sm:$0xff]  ;;  %v8286_v22 = vcombine.low %v517_v6, %v525_v12  ;;  %v4274_v6 = vld [vmem:[%s12378_s3 + $0xb40] sm:$0xff]  ;;  %v3905_v12 = vcombine.high %v10672_v63, %v10672_v63 }
 0x1da   : > { %3719 = vmatpush1.bf16.msra.mxu0 %v7870_v25  ;;  %v253_v18 = vld [vmem:[%s12377_s2 + $0x5f8] sm:$0xff] }
 0x1db   : > { %3720 = vmatprep.subr.bf16.mxu0 %v7855_v27  ;;  %v501_v19 = vld [vmem:[%s12377_s2 + $0xdb8] sm:$0xff]  ;;  %v8015_v23 = vcombine.high %v245_v17, %v253_v18  ;;  %v8014_v29 = vcombine.low %v245_v17, %v253_v18  ;;  %v3994_v17 = vld [vmem:[%s12378_s3 + $0x280] sm:$0xff] }
 0x1dc   : > { %3760 = vmatpush1.bf16.msra.mxu1 %v8126_v26  ;;  %v509_v20 = vld [vmem:[%s12377_s2 + $0xdf8] sm:$0xff]  ;;  %v4002_v18 = vld [vmem:[%s12378_s3 + $0x2c0] sm:$0xff] }
 0x1dd   : > { %3761 = vmatprep.subr.bf16.mxu1 %v8111_v28  ;;  %v8271_v24 = vcombine.high %v501_v19, %v509_v20  ;;  %v229_v25 = vld [vmem:[%s12377_s2 + $0x538] sm:$0xff]  ;;  %v8270_v30 = vcombine.low %v501_v19, %v509_v20 }
 0x1de   : > { %3721 = vmatpush1.bf16.msra.mxu0 %v7854_v33  ;;  %v237_v26 = vld [vmem:[%s12377_s2 + $0x578] sm:$0xff] }
 0x1df   : > { %3722 = vmatprep.subr.bf16.mxu0 %v7839_v36  ;;  %v485_v27 = vld [vmem:[%s12377_s2 + $0xd38] sm:$0xff]  ;;  %v7999_v31 = vcombine.high %v229_v25, %v237_v26  ;;  %v7998_v39 = vcombine.low %v229_v25, %v237_v26 }
 0x1e0   : > { %3762 = vmatpush1.bf16.msra.mxu1 %v8110_v34  ;;  %v493_v28 = vld [vmem:[%s12377_s2 + $0xd78] sm:$0xff] }
 0x1e1   : > { %3763 = vmatprep.subr.bf16.mxu1 %v8095_v38  ;;  %v8255_v32 = vcombine.high %v485_v27, %v493_v28  ;;  %v213_v33 = vld [vmem:[%s12377_s2 + $0x4b8] sm:$0xff]  ;;  %v8254_v42 = vcombine.low %v485_v27, %v493_v28  ;;  %v8418_v28 = vcombine.high %v3994_v17, %v4002_v18 }
 0x1e2   : > { %3723 = vmatpush1.bf16.msra.mxu0 %v7838_v47  ;;  %v221_v34 = vld [vmem:[%s12377_s2 + $0x4f8] sm:$0xff] }
 0x1e3   : > { %3724 = vmatprep.subr.bf16.mxu0 %v8079_v40  ;;  %v469_v36 = vld [vmem:[%s12377_s2 + $0xcb8] sm:$0xff]  ;;  %v7983_v43 = vcombine.high %v213_v33, %v221_v34  ;;  %v7982_v50 = vcombine.low %v213_v33, %v221_v34  ;;  %v4234_v34 = vld [vmem:[%s12378_s3 + $0xa00] sm:$0xff] }
 0x1e4   : > { %3764 = vmatpush1.bf16.msra.mxu1 %v8094_v48  ;;  %v477_v38 = vld [vmem:[%s12377_s2 + $0xcf8] sm:$0xff] }
 0x1e5   : > { %3765 = vmatprep.subr.bf16.mxu1 %v8335_v53  ;;  %v8239_v46 = vcombine.high %v469_v36, %v477_v38  ;;  %v197_v47 = vld [vmem:[%s12377_s2 + $0x438] sm:$0xff]  ;;  %v8238_v52 = vcombine.low %v469_v36, %v477_v38  ;;  %v4242_v36 = vld [vmem:[%s12378_s3 + $0xa40] sm:$0xff] }
 0x1e6   : > { %3725 = vmatpush2.bf16.msra.mxu0 %v8078_v55  ;;  %v205_v48 = vld [vmem:[%s12377_s2 + $0x478] sm:$0xff] }
 0x1e7   : > { %3726 = vmatprep.subr.bf16.mxu0 %v8063_v58  ;;  %v453_v40 = vld [vmem:[%s12377_s2 + $0xc38] sm:$0xff]  ;;  %v7967_v54 = vcombine.high %v197_v47, %v205_v48  ;;  %v4034_v58 = vld [vmem:[%s12378_s3 + $0x3c0] sm:$0xff]  ;;  %v7966_v3 = vcombine.low %v197_v47, %v205_v48 }
 0x1e8   : > { %3766 = vmatpush2.bf16.msra.mxu1 %v8334_v56  ;;  %v461_v53 = vld [vmem:[%s12377_s2 + $0xc78] sm:$0xff]  ;;  %v4026_v56 = vld [vmem:[%s12378_s3 + $0x380] sm:$0xff] }
 0x1e9   : > { %3767 = vmatprep.subr.bf16.mxu1 %v8319_v60  ;;  %v8223_v55 = vcombine.high %v453_v40, %v461_v53  ;;  %v10663_v60 = vrot.slane %v8961_v1, %v9077_v35  ;;  %v8706_v1 = vcombine.high %v4282_v51, %v4290_v62 }
 0x1ea   : > { %3727 = vmatpush2.bf16.msra.mxu0 %v8062_v4  ;;  %v8222_v4 = vcombine.low %v453_v40, %v461_v53  ;;  %v8658_v40 = vcombine.high %v4234_v34, %v4242_v36  ;;  %v3962_v53 = vld [vmem:[%s12378_s3 + $0x180] sm:$0xff] }
 0x1eb   : > { %3728 = vmatprep.subr.bf16.mxu0 %v8047_v8  ;;  %v4010_v8 = vld [vmem:[%s12378_s3 + $0x300] sm:$0xff]  ;;  %v3904_v10 = vcombine.high %v10663_v60, %v10663_v60 }
 0x1ec   : > { %3768 = vmatpush2.bf16.msra.mxu1 %v8318_v61  ;;  %v8450_v61 = vcombine.high %v4026_v56, %v4034_v58 }
 0x1ed   : > { %3769 = vmatprep.subr.bf16.mxu1 %v8303_v9  ;;  %v4018_v9 = vld [vmem:[%s12378_s3 + $0x340] sm:$0xff]  ;;  %v10696_v19 = vpack.c.bf16 %v3904_v10, %v3904_v10 }
 0x1ee   : > { %3729 = vmatpush2.bf16.msra.mxu0 %v8046_v13  ;;  %v8449_v13 = vcombine.low %v4026_v56, %v4034_v58  ;;  %v8433_v25 = vcombine.low %v4010_v8, %v4018_v9  ;;  %v8386_v56 = vcombine.high %v3962_v53, %v3970_v59  ;;  %v3930_v10 = vld [vmem:[%s12378_s3 + $0x80] sm:$0xff] }
 0x1ef   : > { %3730 = vmatprep.subr.bf16.mxu0 %v8031_v15  ;;  %v8434_v15 = vcombine.high %v4010_v8, %v4018_v9 }
 0x1f0   : > { %3770 = vmatpush2.bf16.msra.mxu1 %v8302_v14  ;;  %v8705_v14 = vcombine.low %v4282_v51, %v4290_v62  ;;  %v3946_v51 = vld [vmem:[%s12378_s3 + $0x100] sm:$0xff] }
 0x1f1   : > { %3771 = vmatprep.subr.bf16.mxu1 %v8287_v16  ;;  %v8690_v16 = vcombine.high %v4266_v57, %v4274_v6  ;;  %v3954_v62 = vld [vmem:[%s12378_s3 + $0x140] sm:$0xff] }
 0x1f2   : > { %3731 = vmatpush2.bf16.msra.mxu0 %v8030_v21  ;;  %v4250_v21 = vld [vmem:[%s12378_s3 + $0xa80] sm:$0xff]  ;;  %v8370_v8 = vcombine.high %v3946_v51, %v3954_v62 }
 0x1f3   : > { %3732 = vmatprep.subr.bf16.mxu0 %v8015_v23  ;;  %v10705_v23 = vpack.c.bf16 %v3905_v12, %v3905_v12  ;;  %v4194_v12 = vld [vmem:[%s12378_s3 + $0x8c0] sm:$0xff] }
 0x1f4   : > { %3772 = vmatpush2.bf16.msra.mxu1 %v8286_v22  ;;  %v4258_v22 = vld [vmem:[%s12378_s3 + $0xac0] sm:$0xff] }
 0x1f5   : > { %3773 = vmatprep.subr.bf16.mxu1 %v8271_v24 }
 0x1f6   : > { %3733 = vmatpush2.bf16.msra.mxu0 %v8014_v29 }
 0x1f7   : > { %3734 = vmatprep.subr.bf16.mxu0 %v7999_v31  ;;  %v3978_v31 = vld [vmem:[%s12378_s3 + $0x200] sm:$0xff] }
 0x1f8   : > { %3774 = vmatpush2.bf16.msra.mxu1 %v8270_v30  ;;  %v8674_v30 = vcombine.high %v4250_v21, %v4258_v22 }
 0x1f9   : > { %3775 = vmatprep.subr.bf16.mxu1 %v8255_v32 }
 0x1fa   : > { %3735 = vmatpush2.bf16.msra.mxu0 %v7998_v39  ;;  %v8417_v39 = vcombine.low %v3994_v17, %v4002_v18  ;;  %v3914_v17 = vld [vmem:[%s12378_s3] sm:$0xff] }
 0x1fb   : > { %3736 = vmatprep.subr.bf16.mxu0 %v7983_v43  ;;  %v3922_v18 = vld [vmem:[%s12378_s3 + $0x40] sm:$0xff] }
 0x1fc   : > { %3776 = vmatpush2.bf16.msra.mxu1 %v8254_v42 }
 0x1fd   : > { %3777 = vmatprep.subr.bf16.mxu1 %v8239_v46  ;;  %v8673_v46 = vcombine.low %v4250_v21, %v4258_v22  ;;  %v4178_v21 = vld [vmem:[%s12378_s3 + $0x840] sm:$0xff] }
 0x1fe   : > { %3737 = vmatpush2.bf16.msra.mxu0 %v7982_v50  ;;  %v4218_v50 = vld [vmem:[%s12378_s3 + $0x980] sm:$0xff] }
 0x1ff   : > { %3738 = vmatprep.subr.bf16.mxu0 %v7967_v54 }
 0x200   : > { %3778 = vmatpush2.bf16.msra.mxu1 %v8238_v52  ;;  %v4226_v52 = vld [vmem:[%s12378_s3 + $0x9c0] sm:$0xff] }
 0x201   : > { %3779 = vmatprep.subr.bf16.mxu1 %v8223_v55  ;;  %v8657_v55 = vcombine.low %v4234_v34, %v4242_v36  ;;  %v8642_v58 = vcombine.high %v4218_v50, %v4226_v52  ;;  %v4138_v36 = vld [vmem:[%s12378_s3 + $0x700] sm:$0xff] }
 0x202   : > { %3739 = vmatpush2.bf16.msra.mxu0 %v7966_v3  ;;  %v4202_v3 = vld [vmem:[%s12378_s3 + $0x900] sm:$0xff] }
 0x203   : > { %6986 = vmatprep.subr.bf16.mxu0 %v8450_v61  ;;  %v8385_v61 = vcombine.low %v3962_v53, %v3970_v59  ;;  %v4122_v53 = vld [vmem:[%s12378_s3 + $0x680] sm:$0xff] }
 0x204   : > { %3780 = vmatpush2.bf16.msra.mxu1 %v8222_v4  ;;  %v4210_v4 = vld [vmem:[%s12378_s3 + $0x940] sm:$0xff] }
 0x205   : > { %7027 = vmatprep.subr.bf16.mxu1 %v8706_v1  ;;  %v3496_v20 = vpop.f32.mrf.mxu0  ;;  %3741 = vmatmul.mubr.bf16.vlgmr.msra.gmra.mxu0 %v9259_v37  ;;  %v8689_v37 = vcombine.low %v4266_v57, %v4274_v6  ;;  %v8641_v1 = vcombine.low %v4218_v50, %v4226_v52  ;;  %v8626_v9 = vcombine.high %v4202_v3, %v4210_v4  ;;  %v3938_v57 = vld [vmem:[%s12378_s3 + $0xc0] sm:$0xff] }
 0x206   : > { %6987 = vmatpush1.bf16.msra.mxu0 %v8449_v13  ;;  %7018 = vmatprep.mubr.bf16.mxu0 %v10696_v19  ;;  %v4186_v6 = vld [vmem:[%s12378_s3 + $0x880] sm:$0xff]  ;;  %v8369_v13 = vcombine.low %v3946_v51, %v3954_v62  ;;  %v8353_v22 = vcombine.low %v3930_v10, %v3938_v57 }
 0x207   : > { %v3537_v24 = vpop.f32.mrf.mxu1  ;;  %3782 = vmatmul.mubr.bf16.vlgmr.msra.gmra.mxu1 %v9269_v41  ;;  %v3498_v27 = vpop.f32.mrf.mxu0  ;;  %6988 = vmatprep.subr.bf16.mxu0 %v8434_v15  ;;  %v3986_v41 = vld [vmem:[%s12378_s3 + $0x240] sm:$0xff]  ;;  %v8354_v15 = vcombine.high %v3930_v10, %v3938_v57 }
 0x208   : > { %v10708_v26 = vadd.f32 %v3537_v24, %v3496_v20  ;;  %7028 = vmatpush1.bf16.msra.mxu1 %v8705_v14  ;;  %7059 = vmatprep.mubr.bf16.mxu1 %v10705_v23  ;;  %v8402_v47 = vcombine.high %v3978_v31, %v3986_v41  ;;  %v8401_v54 = vcombine.low %v3978_v31, %v3986_v41  ;;  %v4170_v20 = vld [vmem:[%s12378_s3 + $0x800] sm:$0xff] }
 0x209   : > { %v3539_v29 = vpop.f32.mrf.mxu1  ;;  %7029 = vmatprep.subr.bf16.mxu1 %v8690_v16  ;;  %v3500_v33 = vpop.f32.mrf.mxu0  ;;  %v8625_v14 = vcombine.low %v4202_v3, %v4210_v4  ;;  %v8610_v16 = vcombine.high %v4186_v6, %v4194_v12  ;;  %v8609_v24 = vcombine.low %v4186_v6, %v4194_v12  ;;  %v8337_v31 = vcombine.low %v3914_v17, %v3922_v18  ;;  %v4130_v59 = vld [vmem:[%s12378_s3 + $0x6c0] sm:$0xff] }
 0x20a   : > { %v10717_v32 = vadd.f32 %v3539_v29, %v3498_v27  ;;  %6989 = vmatpush1.bf16.msra.mxu0 %v8433_v25  ;;  %v8338_v25 = vcombine.high %v3914_v17, %v3922_v18  ;;  %v8594_v27 = vcombine.high %v4170_v20, %v4178_v21  ;;  %v4410_v29 = vld [vmem:[%s12378_s3 + $0xf80] sm:$0xff]  ;;  %v8593_v41 = vcombine.low %v4170_v20, %v4178_v21 }
 0x20b   : > { %v3541_v38 = vpop.f32.mrf.mxu1  ;;  %v3501_v43 = vpop.f32.mrf.mxu0  ;;  %6990 = vmatprep.subr.bf16.mxu0 %v8418_v28  ;;  %v4162_v28 = vld [vmem:[%s12378_s3 + $0x7c0] sm:$0xff] }
 0x20c   : > { %v3840_v42 = vcombine.low %v10708_v26, %v10717_v32  ;;  %7030 = vmatpush1.bf16.msra.mxu1 %v8689_v37  ;;  %v4154_v37 = vld [vmem:[%s12378_s3 + $0x780] sm:$0xff] }
 0x20d   : > { %v3542_v48 = vpop.f32.mrf.mxu1  ;;  %7031 = vmatprep.subr.bf16.mxu1 %v8674_v30  ;;  %v4418_v30 = vld [vmem:[%s12378_s3 + $0xfc0] sm:$0xff]  ;;  %v8578_v33 = vcombine.high %v4154_v37, %v4162_v28 }
 0x20e   : > { %6991 = vmatpush1.bf16.msra.mxu0 %v8417_v39  ;;  %v8834_v34 = vcombine.high %v4410_v29, %v4418_v30  ;;  %v4146_v38 = vld [vmem:[%s12378_s3 + $0x740] sm:$0xff] }
 0x20f   : > { %6992 = vmatprep.subr.bf16.mxu0 %v8402_v47  ;;  %v4394_v39 = vld [vmem:[%s12378_s3 + $0xf00] sm:$0xff]  ;;  %v8833_v47 = vcombine.low %v4410_v29, %v4418_v30  ;;  %v8562_v48 = vcombine.high %v4138_v36, %v4146_v38 }
 0x210   : > { %7032 = vmatpush1.bf16.msra.mxu1 %v8673_v46  ;;  %v4402_v43 = vld [vmem:[%s12378_s3 + $0xf40] sm:$0xff]  ;;  %v8577_v46 = vcombine.low %v4154_v37, %v4162_v28 }
 0x211   : > { %7033 = vmatprep.subr.bf16.mxu1 %v8658_v40  ;;  %v8818_v40 = vcombine.high %v4394_v39, %v4402_v43  ;;  %v4378_v50 = vld [vmem:[%s12378_s3 + $0xe80] sm:$0xff] }
 0x212   : > { %6993 = vmatpush1.bf16.msra.mxu0 %v8401_v54  ;;  %v4386_v52 = vld [vmem:[%s12378_s3 + $0xec0] sm:$0xff]  ;;  %v8561_v54 = vcombine.low %v4138_v36, %v4146_v38 }
 0x213   : > { %6994 = vmatprep.subr.bf16.mxu0 %v8386_v56  ;;  %v8546_v56 = vcombine.high %v4122_v53, %v4130_v59  ;;  %v4106_v51 = vld [vmem:[%s12378_s3 + $0x600] sm:$0xff] }
 0x214   : > { %7034 = vmatpush1.bf16.msra.mxu1 %v8657_v55  ;;  %v8817_v55 = vcombine.low %v4394_v39, %v4402_v43  ;;  %v4114_v62 = vld [vmem:[%s12378_s3 + $0x640] sm:$0xff] }
 0x215   : > { %7035 = vmatprep.subr.bf16.mxu1 %v8642_v58  ;;  %v8802_v58 = vcombine.high %v4378_v50, %v4386_v52  ;;  %v4362_v3 = vld [vmem:[%s12378_s3 + $0xe00] sm:$0xff] }
 0x216   : > { %6995 = vmatpush1.bf16.msra.mxu0 %v8385_v61  ;;  %v4370_v4 = vld [vmem:[%s12378_s3 + $0xe40] sm:$0xff]  ;;  %v8545_v61 = vcombine.low %v4122_v53, %v4130_v59  ;;  %v4027_v53 = vld [vmem:[%s12378_s3 + $0x388] sm:$0xff] }
 0x217   : > { %6996 = vmatprep.subr.bf16.mxu0 %v8370_v8  ;;  %v8530_v8 = vcombine.high %v4106_v51, %v4114_v62  ;;  %v4090_v10 = vld [vmem:[%s12378_s3 + $0x580] sm:$0xff]  ;;  %v4035_v59 = vld [vmem:[%s12378_s3 + $0x3c8] sm:$0xff] }
 0x218   : > { %7036 = vmatpush1.bf16.msra.mxu1 %v8641_v1  ;;  %v8801_v1 = vcombine.low %v4378_v50, %v4386_v52  ;;  %v4098_v57 = vld [vmem:[%s12378_s3 + $0x5c0] sm:$0xff]  ;;  %v4283_v50 = vld [vmem:[%s12378_s3 + $0xb88] sm:$0xff] }
 0x219   : > { %7037 = vmatprep.subr.bf16.mxu1 %v8626_v9  ;;  %v8786_v9 = vcombine.high %v4362_v3, %v4370_v4  ;;  %v4346_v6 = vld [vmem:[%s12378_s3 + $0xd80] sm:$0xff]  ;;  %v4291_v52 = vld [vmem:[%s12378_s3 + $0xbc8] sm:$0xff] }
 0x21a   : > { %6997 = vmatpush1.bf16.msra.mxu0 %v8369_v13  ;;  %v4354_v12 = vld [vmem:[%s12378_s3 + $0xdc0] sm:$0xff]  ;;  %v8529_v13 = vcombine.low %v4106_v51, %v4114_v62  ;;  %v4011_v51 = vld [vmem:[%s12378_s3 + $0x308] sm:$0xff] }
 0x21b   : > { %6998 = vmatprep.subr.bf16.mxu0 %v8354_v15  ;;  %v8514_v15 = vcombine.high %v4090_v10, %v4098_v57  ;;  %v4074_v17 = vld [vmem:[%s12378_s3 + $0x500] sm:$0xff]  ;;  %v4019_v62 = vld [vmem:[%s12378_s3 + $0x348] sm:$0xff] }
 0x21c   : > { %7038 = vmatpush1.bf16.msra.mxu1 %v8625_v14  ;;  %v8785_v14 = vcombine.low %v4362_v3, %v4370_v4  ;;  %v4082_v18 = vld [vmem:[%s12378_s3 + $0x540] sm:$0xff]  ;;  %v10908_v3 = vpack.c.bf16 %v10663_v60, %v10663_v60  ;;  %v4267_v4 = vld [vmem:[%s12378_s3 + $0xb08] sm:$0xff] }
 0x21d   : > { %7039 = vmatprep.subr.bf16.mxu1 %v8610_v16  ;;  %v8770_v16 = vcombine.high %v4346_v6, %v4354_v12  ;;  %v4330_v20 = vld [vmem:[%s12378_s3 + $0xd00] sm:$0xff]  ;;  %v8498_v37 = vcombine.high %v4074_v17, %v4082_v18  ;;  %v8497_v36 = vcombine.low %v4074_v17, %v4082_v18 }
 0x21e   : > { %6999 = vmatpush1.bf16.msra.mxu0 %v8353_v22  ;;  %v4338_v21 = vld [vmem:[%s12378_s3 + $0xd40] sm:$0xff]  ;;  %v33_v22 = vld [vmem:[%s10842_s22 + $0x8] sm:$0xff] }
 0x21f   : > { %7000 = vmatprep.subr.bf16.mxu0 %v8338_v25  ;;  %v32_v25 = vld [vmem:[%s10842_s22] sm:$0xff]  ;;  %v8754_v28 = vcombine.high %v4330_v20, %v4338_v21  ;;  %v8753_v38 = vcombine.low %v4330_v20, %v4338_v21 }
 0x220   : > { %7040 = vmatpush1.bf16.msra.mxu1 %v8609_v24  ;;  %v8513_v24 = vcombine.low %v4090_v10, %v4098_v57  ;;  %v4058_v29 = vld [vmem:[%s12378_s3 + $0x480] sm:$0xff]  ;;  %v8436_v10 = vcombine.high %v4011_v51, %v4019_v62  ;;  %v3995_v57 = vld [vmem:[%s12378_s3 + $0x288] sm:$0xff] }
 0x221   : > { %7041 = vmatprep.subr.bf16.mxu1 %v8594_v27  ;;  %v8769_v27 = vcombine.low %v4346_v6, %v4354_v12  ;;  %v4066_v30 = vld [vmem:[%s12378_s3 + $0x4c0] sm:$0xff]  ;;  %v4003_v6 = vld [vmem:[%s12378_s3 + $0x2c8] sm:$0xff] }
 0x222   : > { %7001 = vmatpush1.bf16.msra.mxu0 %v8337_v31  ;;  %v3879_v31 = vadd.f32 %v3839_v11, %v33_v22  ;;  %v8482_v39 = vcombine.high %v4058_v29, %v4066_v30  ;;  %v4050_v11 = vld [vmem:[%s12378_s3 + $0x440] sm:$0xff]  ;;  %v8420_v20 = vcombine.high %v3995_v57, %v4003_v6 }
 0x223   : > { %7002 = vmatprep.subr.bf16.mxu0 %v8578_v33  ;;  %v4322_v33 = vld [vmem:[%s12378_s3 + $0xcc0] sm:$0xff] }
 0x224   : > { %7042 = vmatpush1.bf16.msra.mxu1 %v8593_v41  ;;  %v4314_v41 = vld [vmem:[%s12378_s3 + $0xc80] sm:$0xff]  ;;  %v8850_v43 = vmul.f32 -1.442695, %v3879_v31 }
 0x225   : > { %7043 = vmatprep.subr.bf16.mxu1 %v8834_v34  ;;  %v3878_v34 = vadd.f32 %v3822_v49, %v32_v25  ;;  %v8738_v5 = vcombine.high %v4314_v41, %v4322_v33  ;;  %v3987_v25 = vld [vmem:[%s12378_s3 + $0x248] sm:$0xff] }
 0x226   : > { %7003 = vmatpush2.bf16.msra.mxu0 %v8577_v46  ;;  %v8481_v46 = vcombine.low %v4058_v29, %v4066_v30  ;;  %8903 = vpow2.f32 %v8850_v43  ;;  %v4243_v29 = vld [vmem:[%s12378_s3 + $0xa48] sm:$0xff] }
 0x227   : > { %7004 = vmatprep.subr.bf16.mxu0 %v8562_v48  ;;  %v8849_v49 = vmul.f32 -1.442695, %v3878_v34  ;;  %v8466_v48 = vcombine.high %v4042_v7, %v4050_v11  ;;  %v3971_v43 = vld [vmem:[%s12378_s3 + $0x1c8] sm:$0xff] }
 0x228   : > { %7044 = vmatpush2.bf16.msra.mxu1 %v8833_v47  ;;  %v8737_v47 = vcombine.low %v4314_v41, %v4322_v33  ;;  %v8419_v41 = vcombine.low %v3995_v57, %v4003_v6 }
 0x229   : > { %7045 = vmatprep.subr.bf16.mxu1 %v8818_v40  ;;  %v8722_v40 = vcombine.high %v4298_v44, %v4306_v45  ;;  %8905 = vpow2.f32 %v8849_v49 }
 0x22a   : > { %7005 = vmatpush2.bf16.msra.mxu0 %v8561_v54  ;;  %v8465_v54 = vcombine.low %v4042_v7, %v4050_v11  ;;  %v3963_v11 = vld [vmem:[%s12378_s3 + $0x188] sm:$0xff] }
 0x22b   : > { %7006 = vmatprep.subr.bf16.mxu0 %v8546_v56  ;;  %v8452_v56 = vcombine.high %v4027_v53, %v4035_v59  ;;  %v8388_v26 = vcombine.high %v3963_v11, %v3971_v43 }
 0x22c   : > { %7046 = vmatpush2.bf16.msra.mxu1 %v8817_v55  ;;  %v8721_v55 = vcombine.low %v4298_v44, %v4306_v45  ;;  %v3848_v45 = vrot.slane %v3840_v42, %v9077_v35  ;;  %v3947_v42 = vld [vmem:[%s12378_s3 + $0x108] sm:$0xff] }
 0x22d   : > { %7047 = vmatprep.subr.bf16.mxu1 %v8802_v58  ;;  %v8708_v58 = vcombine.high %v4283_v50, %v4291_v52 }
 0x22e   : > { %7007 = vmatpush2.bf16.msra.mxu0 %v8545_v61  ;;  %v4275_v61 = vld [vmem:[%s12378_s3 + $0xb48] sm:$0xff] }
 0x22f   : > { %7008 = vmatprep.subr.bf16.mxu0 %v8530_v8  ;;  %v8451_v8 = vcombine.low %v4027_v53, %v4035_v59  ;;  %v8692_v60 = vcombine.high %v4267_v4, %v4275_v61  ;;  %v8691_v18 = vcombine.low %v4267_v4, %v4275_v61  ;;  %v3931_v61 = vld [vmem:[%s12378_s3 + $0x88] sm:$0xff] }
 0x230   : > { %7048 = vmatpush2.bf16.msra.mxu1 %v8801_v1  ;;  %v10918_v1 = vpack.c.bf16 %v10672_v63, %v10672_v63  ;;  %v4251_v63 = vld [vmem:[%s12378_s3 + $0xa88] sm:$0xff] }
 0x231   : > { %7049 = vmatprep.subr.bf16.mxu1 %v8786_v9  ;;  %v8707_v9 = vcombine.low %v4283_v50, %v4291_v52  ;;  %v3955_v52 = vld [vmem:[%s12378_s3 + $0x148] sm:$0xff] }
 0x232   : > { %7009 = vmatpush2.bf16.msra.mxu0 %v8529_v13  ;;  %v4259_v13 = vld [vmem:[%s12378_s3 + $0xac8] sm:$0xff] }
 0x233   : > { %7010 = vmatprep.subr.bf16.mxu0 %v8514_v15  ;;  %v8435_v15 = vcombine.low %v4011_v51, %v4019_v62  ;;  %v8676_v22 = vcombine.high %v4251_v63, %v4259_v13  ;;  %v8904_v30 = vpop.eup %8903  ;;  %v8372_v62 = vcombine.high %v3947_v42, %v3955_v52 }
 0x234   : > { %7050 = vmatpush2.bf16.msra.mxu1 %v8785_v14  ;;  %v7743_v44 = vadd.f32 1.0, %v8904_v30 }
 0x235   : > { %7051 = vmatprep.subr.bf16.mxu1 %v8770_v16 }
 0x236   : > { %7011 = vmatpush2.bf16.msra.mxu0 %v8513_v24  ;;  %v3979_v24 = vld [vmem:[%s12378_s3 + $0x208] sm:$0xff]  ;;  %v8906_v33 = vpop.eup %8905  ;;  %8907 = vrcp.f32 %v7743_v44 }
 0x237   : > { %7012 = vmatprep.subr.bf16.mxu0 %v8498_v37  ;;  %v8403_v53 = vcombine.low %v3979_v24, %v3987_v25 }
 0x238   : > { %7052 = vmatpush2.bf16.msra.mxu1 %v8769_v27 }
 0x239   : > { %7053 = vmatprep.subr.bf16.mxu1 %v8754_v28  ;;  %v4235_v28 = vld [vmem:[%s12378_s3 + $0xa08] sm:$0xff] }
 0x23a   : > { %7013 = vmatpush2.bf16.msra.mxu0 %v8497_v36  ;;  %v8660_v7 = vcombine.high %v4235_v28, %v4243_v29  ;;  %v8659_v50 = vcombine.low %v4235_v28, %v4243_v29 }
 0x23b   : > { %7014 = vmatprep.subr.bf16.mxu0 %v8482_v39  ;;  %v8404_v39 = vcombine.high %v3979_v24, %v3987_v25  ;;  %v4411_v24 = vld [vmem:[%s12378_s3 + $0xf88] sm:$0xff] }
 0x23c   : > { %7054 = vmatpush2.bf16.msra.mxu1 %v8753_v38  ;;  %v8675_v38 = vcombine.low %v4251_v63, %v4259_v13  ;;  %v3915_v63 = vld [vmem:[%s12378_s3 + $0x8] sm:$0xff] }
 0x23d   : > { %7055 = vmatprep.subr.bf16.mxu1 %v8738_v5  ;;  %v3923_v13 = vld [vmem:[%s12378_s3 + $0x48] sm:$0xff] }
 0x23e   : > { %7015 = vmatpush2.bf16.msra.mxu0 %v8481_v46  ;;  %v4219_v46 = vld [vmem:[%s12378_s3 + $0x988] sm:$0xff] }
 0x23f   : > { %7016 = vmatprep.subr.bf16.mxu0 %v8466_v48  ;;  %v7737_v48 = vadd.f32 1.0, %v8906_v33  ;;  %v4419_v25 = vld [vmem:[%s12378_s3 + $0xfc8] sm:$0xff] }
 0x240   : > { %7056 = vmatpush2.bf16.msra.mxu1 %v8737_v47  ;;  %v4227_v47 = vld [vmem:[%s12378_s3 + $0x9c8] sm:$0xff] }
 0x241   : > { %7057 = vmatprep.subr.bf16.mxu1 %v8722_v40  ;;  %v34_v40 = vld [vmem:[%s10842_s22 + $0x10] sm:$0xff]  ;;  %v8644_v32 = vcombine.high %v4219_v46, %v4227_v47  ;;  %8909 = vrcp.f32 %v7737_v48  ;;  %v8643_v51 = vcombine.low %v4219_v46, %v4227_v47  ;;  %v4139_v33 = vld [vmem:[%s12378_s3 + $0x708] sm:$0xff] }
 0x242   : > { %7017 = vmatpush2.bf16.msra.mxu0 %v8465_v54  ;;  %v4379_v46 = vld [vmem:[%s12378_s3 + $0xe88] sm:$0xff] }
 0x243   : > { %7068 = vmatprep.subr.bf16.mxu0 %v8452_v56  ;;  %v4211_v56 = vld [vmem:[%s12378_s3 + $0x948] sm:$0xff] }
 0x244   : > { %7058 = vmatpush2.bf16.msra.mxu1 %v8721_v55  ;;  %v4203_v55 = vld [vmem:[%s12378_s3 + $0x908] sm:$0xff] }
 0x245   : > { %7109 = vmatprep.subr.bf16.mxu1 %v8708_v58  ;;  %v3578_v12 = vpop.f32.mrf.mxu0  ;;  %7019 = vmatmul.mubr.bf16.vlgmr.msra.gmra.mxu0 %v10908_v3  ;;  %v8387_v58 = vcombine.low %v3963_v11, %v3971_v43  ;;  %v8628_v4 = vcombine.high %v4203_v55, %v4211_v56  ;;  %v8627_v57 = vcombine.low %v4203_v55, %v4211_v56  ;;  %v4387_v47 = vld [vmem:[%s12378_s3 + $0xec8] sm:$0xff] }
 0x246   : > { %7069 = vmatpush1.bf16.msra.mxu0 %v8451_v8  ;;  %7100 = vmatprep.mubr.bf16.mxu0 %v10696_v19  ;;  %v3939_v8 = vld [vmem:[%s12378_s3 + $0xc8] sm:$0xff]  ;;  %v8835_v11 = vcombine.low %v4411_v24, %v4419_v25 }
 0x247   : > { %v3619_v14 = vpop.f32.mrf.mxu1  ;;  %7060 = vmatmul.mubr.bf16.vlgmr.msra.gmra.mxu1 %v10918_v1  ;;  %v3580_v17 = vpop.f32.mrf.mxu0  ;;  %7070 = vmatprep.subr.bf16.mxu0 %v8436_v10  ;;  %v4195_v10 = vld [vmem:[%s12378_s3 + $0x8c8] sm:$0xff]  ;;  %v8356_v6 = vcombine.high %v3931_v61, %v3939_v8 }
 0x248   : > { %v3620_v16 = vadd.f32 %v3619_v14, %v3578_v12  ;;  %7110 = vmatpush1.bf16.msra.mxu1 %v8707_v9  ;;  %7141 = vmatprep.mubr.bf16.mxu1 %v10705_v23  ;;  %v4187_v9 = vld [vmem:[%s12378_s3 + $0x888] sm:$0xff] }
 0x249   : > { %v3621_v21 = vpop.f32.mrf.mxu1  ;;  %7111 = vmatprep.subr.bf16.mxu1 %v8692_v60  ;;  %v3582_v37 = vpop.f32.mrf.mxu0  ;;  %v8371_v60 = vcombine.low %v3947_v42, %v3955_v52  ;;  %v8612_v12 = vcombine.high %v4187_v9, %v4195_v10  ;;  %v4171_v14 = vld [vmem:[%s12378_s3 + $0x808] sm:$0xff] }
 0x24a   : > { %v3622_v27 = vadd.f32 %v3621_v21, %v3580_v17  ;;  %7071 = vmatpush1.bf16.msra.mxu0 %v8435_v15  ;;  %v4179_v15 = vld [vmem:[%s12378_s3 + $0x848] sm:$0xff]  ;;  %v8611_v17 = vcombine.low %v4187_v9, %v4195_v10  ;;  %v8339_v37 = vcombine.low %v3915_v63, %v3923_v13 }
 0x24b   : > { %v3623_v31 = vpop.f32.mrf.mxu1  ;;  %v3583_v36 = vpop.f32.mrf.mxu0  ;;  %7072 = vmatprep.subr.bf16.mxu0 %v8420_v20  ;;  %v8596_v20 = vcombine.high %v4171_v14, %v4179_v15  ;;  %v4155_v21 = vld [vmem:[%s12378_s3 + $0x788] sm:$0xff]  ;;  %v8595_v29 = vcombine.low %v4171_v14, %v4179_v15 }
 0x24c   : > { %v3841_v34 = vcombine.low %v3620_v16, %v3622_v27  ;;  %7112 = vmatpush1.bf16.msra.mxu1 %v8691_v18  ;;  %v8355_v16 = vcombine.low %v3931_v61, %v3939_v8  ;;  %v8340_v18 = vcombine.high %v3915_v63, %v3923_v13  ;;  %v8908_v27 = vpop.eup %8907  ;;  %v4371_v42 = vld [vmem:[%s12378_s3 + $0xe48] sm:$0xff] }
 0x24d   : > { %v3624_v5 = vpop.f32.mrf.mxu1  ;;  %7113 = vmatprep.subr.bf16.mxu1 %v8676_v22  ;;  %v4163_v22 = vld [vmem:[%s12378_s3 + $0x7c8] sm:$0xff]  ;;  %v7753_v36 = vmul.f32 %v8965_v2, %v8908_v27 }
 0x24e   : > { %v3855_v49 = vrot.slane %v3841_v34, %v9077_v35  ;;  %7073 = vmatpush1.bf16.msra.mxu0 %v8419_v41  ;;  %v8910_v28 = vpop.eup %8909  ;;  %v8580_v30 = vcombine.high %v4155_v21, %v4163_v22  ;;  %v8836_v41 = vcombine.high %v4411_v24, %v4419_v25  ;;  %v4147_v34 = vld [vmem:[%s12378_s3 + $0x748] sm:$0xff] }
 0x24f   : > { %7074 = vmatprep.subr.bf16.mxu0 %v8404_v39  ;;  %v4395_v39 = vld [vmem:[%s12378_s3 + $0xf08] sm:$0xff]  ;;  %v8564_v43 = vcombine.high %v4139_v33, %v4147_v34  ;;  %v8563_v48 = vcombine.low %v4139_v33, %v4147_v34  ;;  %v4028_v34 = vld [vmem:[%s12378_s3 + $0x390] sm:$0xff] }
 0x250   : > { %v3856_v59 = vcombine.low %v3848_v45, %v3855_v49  ;;  %7114 = vmatpush1.bf16.msra.mxu1 %v8675_v38  ;;  %v4403_v5 = vld [vmem:[%s12378_s3 + $0xf48] sm:$0xff] }
 0x251   : > { %7115 = vmatprep.subr.bf16.mxu1 %v8660_v7  ;;  %v8579_v7 = vcombine.low %v4155_v21, %v4163_v22  ;;  %v8820_v44 = vcombine.high %v4395_v39, %v4403_v5  ;;  %v4123_v45 = vld [vmem:[%s12378_s3 + $0x688] sm:$0xff] }
 0x252   : > { %v3880_v54 = vadd.f32 %v3856_v59, %v34_v40  ;;  %7075 = vmatpush1.bf16.msra.mxu0 %v8403_v53  ;;  %v4131_v49 = vld [vmem:[%s12378_s3 + $0x6c8] sm:$0xff]  ;;  %v8819_v40 = vcombine.low %v4395_v39, %v4403_v5  ;;  %v8804_v59 = vcombine.high %v4379_v46, %v4387_v47  ;;  %v4292_v39 = vld [vmem:[%s12378_s3 + $0xbd0] sm:$0xff] }
 0x253   : > { %7076 = vmatprep.subr.bf16.mxu0 %v8388_v26  ;;  %v8548_v53 = vcombine.high %v4123_v45, %v4131_v49  ;;  %v4115_v26 = vld [vmem:[%s12378_s3 + $0x648] sm:$0xff]  ;;  %v8547_v52 = vcombine.low %v4123_v45, %v4131_v49  ;;  %v4020_v45 = vld [vmem:[%s12378_s3 + $0x350] sm:$0xff] }
 0x254   : > { %8911 = vtanh.f32 %v3880_v54  ;;  %7116 = vmatpush1.bf16.msra.mxu1 %v8659_v50  ;;  %v4107_v50 = vld [vmem:[%s12378_s3 + $0x608] sm:$0xff]  ;;  %v8803_v54 = vcombine.low %v4379_v46, %v4387_v47  ;;  %v4268_v49 = vld [vmem:[%s12378_s3 + $0xb10] sm:$0xff] }
 0x255   : > { %7117 = vmatprep.subr.bf16.mxu1 %v8644_v32  ;;  %v4363_v32 = vld [vmem:[%s12378_s3 + $0xe08] sm:$0xff]  ;;  %v8532_v55 = vcombine.high %v4107_v50, %v4115_v26  ;;  %v8531_v61 = vcombine.low %v4107_v50, %v4115_v26  ;;  %v4276_v46 = vld [vmem:[%s12378_s3 + $0xb50] sm:$0xff] }
 0x256   : > { %7077 = vmatpush1.bf16.msra.mxu0 %v8387_v58  ;;  %v8788_v56 = vcombine.high %v4363_v32, %v4371_v42  ;;  %v4091_v58 = vld [vmem:[%s12378_s3 + $0x588] sm:$0xff]  ;;  %v8787_v8 = vcombine.low %v4363_v32, %v4371_v42  ;;  %v4004_v50 = vld [vmem:[%s12378_s3 + $0x2d0] sm:$0xff] }
 0x257   : > { %7078 = vmatprep.subr.bf16.mxu0 %v8372_v62  ;;  %v4347_v62 = vld [vmem:[%s12378_s3 + $0xd88] sm:$0xff]  ;;  %v4252_v32 = vld [vmem:[%s12378_s3 + $0xa90] sm:$0xff] }
 0x258   : > { %7118 = vmatpush1.bf16.msra.mxu1 %v8643_v51  ;;  %v4099_v51 = vld [vmem:[%s12378_s3 + $0x5c8] sm:$0xff]  ;;  %v4260_v42 = vld [vmem:[%s12378_s3 + $0xad0] sm:$0xff] }
 0x259   : > { %7119 = vmatprep.subr.bf16.mxu1 %v8628_v4  ;;  %v4355_v4 = vld [vmem:[%s12378_s3 + $0xdc8] sm:$0xff]  ;;  %v8516_v9 = vcombine.high %v4091_v58, %v4099_v51  ;;  %v8515_v63 = vcombine.low %v4091_v58, %v4099_v51  ;;  %v8693_v58 = vcombine.low %v4268_v49, %v4276_v46 }
 0x25a   : > { %7079 = vmatpush1.bf16.msra.mxu0 %v8371_v60  ;;  %v8772_v10 = vcombine.high %v4347_v62, %v4355_v4  ;;  %v4075_v60 = vld [vmem:[%s12378_s3 + $0x508] sm:$0xff]  ;;  %v8771_v13 = vcombine.low %v4347_v62, %v4355_v4  ;;  %v8678_v4 = vcombine.high %v4252_v32, %v4260_v42 }
 0x25b   : > { %7080 = vmatprep.subr.bf16.mxu0 %v8356_v6  ;;  %v4331_v6 = vld [vmem:[%s12378_s3 + $0xd08] sm:$0xff] }
 0x25c   : > { %7120 = vmatpush1.bf16.msra.mxu1 %v8627_v57  ;;  %v4083_v57 = vld [vmem:[%s12378_s3 + $0x548] sm:$0xff] }
 0x25d   : > { %7121 = vmatprep.subr.bf16.mxu1 %v8612_v12  ;;  %v4339_v12 = vld [vmem:[%s12378_s3 + $0xd48] sm:$0xff]  ;;  %v8500_v14 = vcombine.high %v4075_v60, %v4083_v57  ;;  %v8499_v21 = vcombine.low %v4075_v60, %v4083_v57  ;;  %v4236_v60 = vld [vmem:[%s12378_s3 + $0xa10] sm:$0xff] }
 0x25e   : > { %7081 = vmatpush1.bf16.msra.mxu0 %v8355_v16  ;;  %v8756_v15 = vcombine.high %v4331_v6, %v4339_v12  ;;  %v4059_v16 = vld [vmem:[%s12378_s3 + $0x488] sm:$0xff]  ;;  %v8755_v22 = vcombine.low %v4331_v6, %v4339_v12  ;;  %v4244_v57 = vld [vmem:[%s12378_s3 + $0xa50] sm:$0xff] }
 0x25f   : > { %7082 = vmatprep.subr.bf16.mxu0 %v8340_v18  ;;  %v4315_v18 = vld [vmem:[%s12378_s3 + $0xc88] sm:$0xff] }
 0x260   : > { %7122 = vmatpush1.bf16.msra.mxu1 %v8611_v17  ;;  %v4067_v17 = vld [vmem:[%s12378_s3 + $0x4c8] sm:$0xff] }
 0x261   : > { %v8912_v31 = vpop.eup %8911  ;;  %7123 = vmatprep.subr.bf16.mxu1 %v8596_v20  ;;  %v4323_v20 = vld [vmem:[%s12378_s3 + $0xcc8] sm:$0xff]  ;;  %v8484_v24 = vcombine.high %v4059_v16, %v4067_v17 }
 0x262   : > { %v7754_v38 = vmul.f32 %v8912_v31, %v8910_v28  ;;  %7083 = vmatpush1.bf16.msra.mxu0 %v8339_v37  ;;  %v8740_v25 = vcombine.high %v4315_v18, %v4323_v20  ;;  %v4043_v27 = vld [vmem:[%s12378_s3 + $0x408] sm:$0xff]  ;;  %v8739_v31 = vcombine.low %v4315_v18, %v4323_v20  ;;  %v3964_v18 = vld [vmem:[%s12378_s3 + $0x190] sm:$0xff] }
 0x263   : > { %7084 = vmatprep.subr.bf16.mxu0 %v8580_v30  ;;  %v4051_v37 = vld [vmem:[%s12378_s3 + $0x448] sm:$0xff]  ;;  %v8483_v30 = vcombine.low %v4059_v16, %v4067_v17  ;;  %v8662_v17 = vcombine.high %v4236_v60, %v4244_v57  ;;  %v3972_v20 = vld [vmem:[%s12378_s3 + $0x1d0] sm:$0xff] }
 0x264   : > { %v11027_v2 = vadd.f32 %v7754_v38, %v7753_v36   ;;  %7124 = vmatpush1.bf16.msra.mxu1 %v8595_v29  ;;  %v4299_v28 = vld [vmem:[%s12378_s3 + $0xc08] sm:$0xff]  ;;  %v4036_v36 = vld [vmem:[%s12378_s3 + $0x3d0] sm:$0xff]  ;;  %v8467_v5 = vcombine.low %v4043_v27, %v4051_v37 }
 0x265   : > { %7125 = vmatprep.subr.bf16.mxu1 %v8836_v41  ;;  %v4307_v29 = vld [vmem:[%s12378_s3 + $0xc48] sm:$0xff]  ;;  %v8468_v41 = vcombine.high %v4043_v27, %v4051_v37  ;;  %v4284_v38 = vld [vmem:[%s12378_s3 + $0xb90] sm:$0xff]  ;;  %v8453_v47 = vcombine.low %v4028_v34, %v4036_v36  ;;  %v8390_v27 = vcombine.high %v3964_v18, %v3972_v20 }
 0x266   : > { %7085 = vmatpush2.bf16.msra.mxu0 %v8579_v7  ;;  %v8724_v33 = vcombine.high %v4299_v28, %v4307_v29  ;;  %v8723_v7 = vcombine.low %v4299_v28, %v4307_v29  ;;  %v3948_v28 = vld [vmem:[%s12378_s3 + $0x110] sm:$0xff] }
 0x267   : > { %7086 = vmatprep.subr.bf16.mxu0 %v8564_v43  ;;  %v8710_v43 = vcombine.high %v4284_v38, %v4292_v39  ;;  %v3956_v29 = vld [vmem:[%s12378_s3 + $0x150] sm:$0xff] }
 0x268   : > { %7126 = vmatpush2.bf16.msra.mxu1 %v8835_v11  ;;  %v8454_v11 = vcombine.high %v4028_v34, %v4036_v36  ;;  %v8374_v34 = vcombine.high %v3948_v28, %v3956_v29 }
 0x269   : > { %7127 = vmatprep.subr.bf16.mxu1 %v8820_v44  ;;  %v4012_v44 = vld [vmem:[%s12378_s3 + $0x310] sm:$0xff] }
 0x26a   : > { %7087 = vmatpush2.bf16.msra.mxu0 %v8563_v48  ;;  %v8709_v48 = vcombine.low %v4284_v38, %v4292_v39  ;;  %v3932_v38 = vld [vmem:[%s12378_s3 + $0x90] sm:$0xff] }
 0x26b   : > { %7088 = vmatprep.subr.bf16.mxu0 %v8548_v53  ;;  %v8694_v53 = vcombine.high %v4268_v49, %v4276_v46  ;;  %v3940_v39 = vld [vmem:[%s12378_s3 + $0xd0] sm:$0xff] }
 0x26c   : > { %7128 = vmatpush2.bf16.msra.mxu1 %v8819_v40  ;;  %v8438_v40 = vcombine.high %v4012_v44, %v4020_v45  ;;  %v3916_v49 = vld [vmem:[%s12378_s3 + $0x10] sm:$0xff] }
 0x26d   : > { %7129 = vmatprep.subr.bf16.mxu1 %v8804_v59  ;;  %v3996_v59 = vld [vmem:[%s12378_s3 + $0x290] sm:$0xff] }
 0x26e   : > { %7089 = vmatpush2.bf16.msra.mxu0 %v8547_v52  ;;  %v8422_v51 = vcombine.high %v3996_v59, %v4004_v50  ;;  %v8421_v12 = vcombine.low %v3996_v59, %v4004_v50  ;;  %v3924_v46 = vld [vmem:[%s12378_s3 + $0x50] sm:$0xff] }
 0x26f   : > { %7090 = vmatprep.subr.bf16.mxu0 %v8532_v55  ;;  %v8342_v59 = vcombine.high %v3916_v49, %v3924_v46 }
 0x270   : > { %7130 = vmatpush2.bf16.msra.mxu1 %v8803_v54  ;;  %v8437_v54 = vcombine.low %v4012_v44, %v4020_v45  ;;  %v8358_v44 = vcombine.high %v3932_v38, %v3940_v39 }
 0x271   : > { %7131 = vmatprep.subr.bf16.mxu1 %v8788_v56 }
 0x272   : > { %7091 = vmatpush2.bf16.msra.mxu0 %v8531_v61  ;;  %v3980_v61 = vld [vmem:[%s12378_s3 + $0x210] sm:$0xff] }
 0x273   : > { %7092 = vmatprep.subr.bf16.mxu0 %v8516_v9 }
 0x274   : > { %7132 = vmatpush2.bf16.msra.mxu1 %v8787_v8  ;;  %v3988_v8 = vld [vmem:[%s12378_s3 + $0x250] sm:$0xff] }
 0x275   : > { %7133 = vmatprep.subr.bf16.mxu1 %v8772_v10 }
 0x276   : > { %7093 = vmatpush2.bf16.msra.mxu0 %v8515_v63 }
 0x277   : > { %7094 = vmatprep.subr.bf16.mxu0 %v8500_v14  ;;  %v8677_v14 = vcombine.low %v4252_v32, %v4260_v42  ;;  %v4164_v32 = vld [vmem:[%s12378_s3 + $0x7d0] sm:$0xff] }
 0x278   : > { %7134 = vmatpush2.bf16.msra.mxu1 %v8771_v13  ;;  %v4412_v42 = vld [vmem:[%s12378_s3 + $0xf90] sm:$0xff] }
 0x279   : > { %7135 = vmatprep.subr.bf16.mxu1 %v8756_v15  ;;  %v8406_v15 = vcombine.high %v3980_v61, %v3988_v8 }
 0x27a   : > { %7095 = vmatpush2.bf16.msra.mxu0 %v8499_v21  ;;  %v4220_v21 = vld [vmem:[%s12378_s3 + $0x990] sm:$0xff] }
 0x27b   : > { %7096 = vmatprep.subr.bf16.mxu0 %v8484_v24  ;;  %v8405_v24 = vcombine.low %v3980_v61, %v3988_v8  ;;  %v4396_v61 = vld [vmem:[%s12378_s3 + $0xf10] sm:$0xff] }
 0x27c   : > { %7136 = vmatpush2.bf16.msra.mxu1 %v8755_v22  ;;  %v4228_v22 = vld [vmem:[%s12378_s3 + $0x9d0] sm:$0xff] }
 0x27d   : > { %7137 = vmatprep.subr.bf16.mxu1 %v8740_v25  ;;  %v8661_v25 = vcombine.low %v4236_v60, %v4244_v57  ;;  %v8646_v37 = vcombine.high %v4220_v21, %v4228_v22  ;;  %v4404_v8 = vld [vmem:[%s12378_s3 + $0xf50] sm:$0xff] }
 0x27e   : > { %7097 = vmatpush2.bf16.msra.mxu0 %v8483_v30  ;;  %v4204_v30 = vld [vmem:[%s12378_s3 + $0x910] sm:$0xff] }
 0x27f   : > { %7098 = vmatprep.subr.bf16.mxu0 %v8468_v41  ;;  %v8389_v41 = vcombine.low %v3964_v18, %v3972_v20 }
 0x280   : > { %7138 = vmatpush2.bf16.msra.mxu1 %v8739_v31  ;;  %v4212_v31 = vld [vmem:[%s12378_s3 + $0x950] sm:$0xff] }
 0x281   : > { %7139 = vmatprep.subr.bf16.mxu1 %v8724_v33  ;;  %v8645_v33 = vcombine.low %v4220_v21, %v4228_v22  ;;  %v8630_v36 = vcombine.high %v4204_v30, %v4212_v31  ;;  %v4108_v21 = vld [vmem:[%s12378_s3 + $0x610] sm:$0xff] }
 0x282   : > { %7099 = vmatpush2.bf16.msra.mxu0 %v8467_v5  ;;  %v4188_v5 = vld [vmem:[%s12378_s3 + $0x890] sm:$0xff] }
 0x283   : > { %7150 = vmatprep.subr.bf16.mxu0 %v8454_v11  ;;  %v8373_v11 = vcombine.low %v3948_v28, %v3956_v29  ;;  %v4116_v22 = vld [vmem:[%s12378_s3 + $0x650] sm:$0xff] }
 0x284   : > { %7140 = vmatpush2.bf16.msra.mxu1 %v8723_v7  ;;  %v4196_v7 = vld [vmem:[%s12378_s3 + $0x8d0] sm:$0xff]  ;;  %v8534_v28 = vcombine.high %v4108_v21, %v4116_v22 }
 0x285   : > { %7191 = vmatprep.subr.bf16.mxu1 %v8710_v43  ;;  %v3660_v26 = vpop.f32.mrf.mxu0  ;;  %7101 = vmatmul.mubr.bf16.vlgmr.msra.gmra.mxu0 %v10908_v3  ;;  %v8629_v43 = vcombine.low %v4204_v30, %v4212_v31  ;;  %v8614_v45 = vcombine.high %v4188_v5, %v4196_v7  ;;  %v4092_v30 = vld [vmem:[%s12378_s3 + $0x590] sm:$0xff] }
 0x286   : > { %7151 = vmatpush1.bf16.msra.mxu0 %v8453_v47  ;;  %7182 = vmatprep.mubr.bf16.mxu0 %v10696_v19  ;;  %v4172_v47 = vld [vmem:[%s12378_s3 + $0x810] sm:$0xff] }
 0x287   : > { %v3701_v52 = vpop.f32.mrf.mxu1  ;;  %7142 = vmatmul.mubr.bf16.vlgmr.msra.gmra.mxu1 %v10918_v1  ;;  %v3662_v56 = vpop.f32.mrf.mxu0  ;;  %7152 = vmatprep.subr.bf16.mxu0 %v8438_v40  ;;  %v8357_v40 = vcombine.low %v3932_v38, %v3940_v39  ;;  %v4100_v31 = vld [vmem:[%s12378_s3 + $0x5d0] sm:$0xff] }
 0x288   : > { %v11139_v55 = vadd.f32 %v3701_v52, %v3660_v26  ;;  %7192 = vmatpush1.bf16.msra.mxu1 %v8709_v48  ;;  %7223 = vmatprep.mubr.bf16.mxu1 %v10705_v23  ;;  %v4180_v48 = vld [vmem:[%s12378_s3 + $0x850] sm:$0xff]  ;;  %v8518_v38 = vcombine.high %v4092_v30, %v4100_v31 }
 0x289   : > { %v3703_v62 = vpop.f32.mrf.mxu1  ;;  %7193 = vmatprep.subr.bf16.mxu1 %v8694_v53  ;;  %v3664_v10 = vpop.f32.mrf.mxu0  ;;  %v8613_v53 = vcombine.low %v4188_v5, %v4196_v7  ;;  %v8598_v50 = vcombine.high %v4172_v47, %v4180_v48  ;;  %v4156_v26 = vld [vmem:[%s12378_s3 + $0x790] sm:$0xff] }
 0x28a   : > { %v11148_v9 = vadd.f32 %v3703_v62, %v3662_v56  ;;  %7153 = vmatpush1.bf16.msra.mxu0 %v8437_v54  ;;  %v4420_v52 = vld [vmem:[%s12378_s3 + $0xfd0] sm:$0xff]  ;;  %v8341_v54 = vcombine.low %v3916_v49, %v3924_v46  ;;  %v8597_v56 = vcombine.low %v4172_v47, %v4180_v48  ;;  %v8581_v10 = vcombine.low %v4156_v26, %v4164_v32 }
 0x28b   : > { %v3705_v6 = vpop.f32.mrf.mxu1  ;;  %v3665_v13 = vpop.f32.mrf.mxu0  ;;  %7154 = vmatprep.subr.bf16.mxu0 %v8422_v51  ;;  %v8838_v51 = vcombine.high %v4412_v42, %v4420_v52  ;;  %v4140_v62 = vld [vmem:[%s12378_s3 + $0x710] sm:$0xff]  ;;  %v8837_v60 = vcombine.low %v4412_v42, %v4420_v52 }
 0x28c   : > { %v3857_v63 = vcombine.low %v11139_v55, %v11148_v9  ;;  %7194 = vmatpush1.bf16.msra.mxu1 %v8693_v58  ;;  %v8582_v58 = vcombine.high %v4156_v26, %v4164_v32  ;;  %v8822_v6 = vcombine.high %v4396_v61, %v4404_v8  ;;  %v4132_v13 = vld [vmem:[%s12378_s3 + $0x6d0] sm:$0xff]  ;;  %v3949_v9 = vld [vmem:[%s12378_s3 + $0x118] sm:$0xff] }
 0x28d   : > { %v3706_v16 = vpop.f32.mrf.mxu1  ;;  %7195 = vmatprep.subr.bf16.mxu1 %v8678_v4  ;;  %v4148_v4 = vld [vmem:[%s12378_s3 + $0x750] sm:$0xff] }
 0x28e   : > { %7155 = vmatpush1.bf16.msra.mxu0 %v8421_v12  ;;  %v8566_v57 = vcombine.high %v4140_v62, %v4148_v4  ;;  %v4124_v12 = vld [vmem:[%s12378_s3 + $0x690] sm:$0xff]  ;;  %v8565_v16 = vcombine.low %v4140_v62, %v4148_v4 }
 0x28f   : > { %7156 = vmatprep.subr.bf16.mxu0 %v8406_v15  ;;  %v4388_v15 = vld [vmem:[%s12378_s3 + $0xed0] sm:$0xff]  ;;  %v8550_v18 = vcombine.high %v4124_v12, %v4132_v13 }
 0x290   : > { %7196 = vmatpush1.bf16.msra.mxu1 %v8677_v14  ;;  %v4380_v14 = vld [vmem:[%s12378_s3 + $0xe90] sm:$0xff] }
 0x291   : > { %7197 = vmatprep.subr.bf16.mxu1 %v8662_v17  ;;  %v8821_v17 = vcombine.low %v4396_v61, %v4404_v8  ;;  %v8806_v20 = vcombine.high %v4380_v14, %v4388_v15  ;;  %v4076_v5 = vld [vmem:[%s12378_s3 + $0x510] sm:$0xff]  ;;  %v4029_v61 = vld [vmem:[%s12378_s3 + $0x398] sm:$0xff] }
 0x292   : > { %7157 = vmatpush1.bf16.msra.mxu0 %v8405_v24  ;;  %v4364_v24 = vld [vmem:[%s12378_s3 + $0xe10] sm:$0xff]  ;;  %v4037_v8 = vld [vmem:[%s12378_s3 + $0x3d8] sm:$0xff] }
 0x293   : > { %7158 = vmatprep.subr.bf16.mxu0 %v8390_v27  ;;  %v8549_v27 = vcombine.low %v4124_v12, %v4132_v13  ;;  %v4084_v7 = vld [vmem:[%s12378_s3 + $0x550] sm:$0xff]  ;;  %v8456_v12 = vcombine.high %v4029_v61, %v4037_v8 }
 0x294   : > { %7198 = vmatpush1.bf16.msra.mxu1 %v8661_v25  ;;  %v4372_v25 = vld [vmem:[%s12378_s3 + $0xe50] sm:$0xff]  ;;  %v8502_v49 = vcombine.high %v4076_v5, %v4084_v7 }
 0x295   : > { %7199 = vmatprep.subr.bf16.mxu1 %v8646_v37  ;;  %v8805_v37 = vcombine.low %v4380_v14, %v4388_v15  ;;  %v8790_v29 = vcombine.high %v4364_v24, %v4372_v25  ;;  %v4060_v47 = vld [vmem:[%s12378_s3 + $0x490] sm:$0xff]  ;;  %v4013_v14 = vld [vmem:[%s12378_s3 + $0x318] sm:$0xff] }
 0x296   : > { %7159 = vmatpush1.bf16.msra.mxu0 %v8389_v41  ;;  %v4348_v41 = vld [vmem:[%s12378_s3 + $0xd90] sm:$0xff]  ;;  %v4021_v15 = vld [vmem:[%s12378_s3 + $0x358] sm:$0xff] }
 0x297   : > { %7160 = vmatprep.subr.bf16.mxu0 %v8374_v34  ;;  %v8533_v34 = vcombine.low %v4108_v21, %v4116_v22  ;;  %v4068_v48 = vld [vmem:[%s12378_s3 + $0x4d0] sm:$0xff]  ;;  %v8440_v21 = vcombine.high %v4013_v14, %v4021_v15 }
 0x298   : > { %7200 = vmatpush1.bf16.msra.mxu1 %v8645_v33  ;;  %v4356_v33 = vld [vmem:[%s12378_s3 + $0xdd0] sm:$0xff]  ;;  %v8486_v26 = vcombine.high %v4060_v47, %v4068_v48 }
 0x299   : > { %7201 = vmatprep.subr.bf16.mxu1 %v8630_v36  ;;  %v8789_v36 = vcombine.low %v4364_v24, %v4372_v25  ;;  %v8774_v39 = vcombine.high %v4348_v41, %v4356_v33  ;;  %v4044_v42 = vld [vmem:[%s12378_s3 + $0x410] sm:$0xff]  ;;  %v3997_v24 = vld [vmem:[%s12378_s3 + $0x298] sm:$0xff] }
 0x29a   : > { %7161 = vmatpush1.bf16.msra.mxu0 %v8373_v11  ;;  %v4332_v11 = vld [vmem:[%s12378_s3 + $0xd10] sm:$0xff]  ;;  %v4005_v25 = vld [vmem:[%s12378_s3 + $0x2d8] sm:$0xff] }
 0x29b   : > { %7162 = vmatprep.subr.bf16.mxu0 %v8358_v44  ;;  %v8517_v44 = vcombine.low %v4092_v30, %v4100_v31  ;;  %v4052_v52 = vld [vmem:[%s12378_s3 + $0x450] sm:$0xff]  ;;  %v8439_v30 = vcombine.low %v4013_v14, %v4021_v15  ;;  %v3933_v14 = vld [vmem:[%s12378_s3 + $0x98] sm:$0xff] }
 0x29c   : > { %7202 = vmatpush1.bf16.msra.mxu1 %v8629_v43  ;;  %v4340_v43 = vld [vmem:[%s12378_s3 + $0xd50] sm:$0xff]  ;;  %v8470_v62 = vcombine.high %v4044_v42, %v4052_v52  ;;  %v3941_v15 = vld [vmem:[%s12378_s3 + $0xd8] sm:$0xff] }
 0x29d   : > { %7203 = vmatprep.subr.bf16.mxu1 %v8614_v45  ;;  %v8773_v45 = vcombine.low %v4348_v41, %v4356_v33  ;;  %v8758_v46 = vcombine.high %v4332_v11, %v4340_v43 }
 0x29e   : > { %7163 = vmatpush1.bf16.msra.mxu0 %v8357_v40  ;;  %v4316_v40 = vld [vmem:[%s12378_s3 + $0xc90] sm:$0xff] }
 0x29f   : > { %7164 = vmatprep.subr.bf16.mxu0 %v8342_v59  ;;  %v8501_v59 = vcombine.low %v4076_v5, %v4084_v7  ;;  %v3989_v5 = vld [vmem:[%s12378_s3 + $0x258] sm:$0xff] }
 0x2a0   : > { %7204 = vmatpush1.bf16.msra.mxu1 %v8613_v53  ;;  %v4324_v53 = vld [vmem:[%s12378_s3 + $0xcd0] sm:$0xff] }
 0x2a1   : > { %7205 = vmatprep.subr.bf16.mxu1 %v8598_v50  ;;  %v8757_v50 = vcombine.low %v4332_v11, %v4340_v43  ;;  %v8742_v32 = vcombine.high %v4316_v40, %v4324_v53  ;;  %v4237_v43 = vld [vmem:[%s12378_s3 + $0xa18] sm:$0xff] }
 0x2a2   : > { %7165 = vmatpush1.bf16.msra.mxu0 %v8341_v54  ;;  %v4300_v54 = vld [vmem:[%s12378_s3 + $0xc10] sm:$0xff] }
 0x2a3   : > { %7166 = vmatprep.subr.bf16.mxu0 %v8582_v58  ;;  %v8485_v58 = vcombine.low %v4060_v47, %v4068_v48 }
 0x2a4   : > { %7206 = vmatpush1.bf16.msra.mxu1 %v8597_v56  ;;  %v4308_v56 = vld [vmem:[%s12378_s3 + $0xc50] sm:$0xff] }
 0x2a5   : > { %7207 = vmatprep.subr.bf16.mxu1 %v8838_v51  ;;  %v8741_v51 = vcombine.low %v4316_v40, %v4324_v53  ;;  %v8726_v4 = vcombine.high %v4300_v54, %v4308_v56 }
 0x2a6   : > { %7167 = vmatpush2.bf16.msra.mxu0 %v8581_v10  ;;  %v4285_v10 = vld [vmem:[%s12378_s3 + $0xb98] sm:$0xff] }
 0x2a7   : > { %7168 = vmatprep.subr.bf16.mxu0 %v8566_v57  ;;  %v8469_v57 = vcombine.low %v4044_v42, %v4052_v52  ;;  %v4221_v52 = vld [vmem:[%s12378_s3 + $0x998] sm:$0xff] }
 0x2a8   : > { %7208 = vmatpush2.bf16.msra.mxu1 %v8837_v60  ;;  %v4293_v60 = vld [vmem:[%s12378_s3 + $0xbd8] sm:$0xff] }
 0x2a9   : > { %7209 = vmatprep.subr.bf16.mxu1 %v8822_v6  ;;  %v8725_v6 = vcombine.low %v4300_v54, %v4308_v56  ;;  %v8712_v13 = vcombine.high %v4285_v10, %v4293_v60  ;;  %v4229_v54 = vld [vmem:[%s12378_s3 + $0x9d8] sm:$0xff] }
 0x2aa   : > { %7169 = vmatpush2.bf16.msra.mxu0 %v8565_v16  ;;  %v4269_v16 = vld [vmem:[%s12378_s3 + $0xb18] sm:$0xff]  ;;  %v8648_v55 = vcombine.high %v4221_v52, %v4229_v54 }
 0x2ab   : > { %7170 = vmatprep.subr.bf16.mxu0 %v8550_v18  ;;  %v8455_v18 = vcombine.low %v4029_v61, %v4037_v8  ;;  %v35_v56 = vld [vmem:[%s10842_s22 + $0x18] sm:$0xff] }
 0x2ac   : > { %7210 = vmatpush2.bf16.msra.mxu1 %v8821_v17  ;;  %v4277_v17 = vld [vmem:[%s12378_s3 + $0xb58] sm:$0xff] }
 0x2ad   : > { %7211 = vmatprep.subr.bf16.mxu1 %v8806_v20  ;;  %v8711_v20 = vcombine.low %v4285_v10, %v4293_v60  ;;  %v8696_v22 = vcombine.high %v4269_v16, %v4277_v17  ;;  %v8695_v33 = vcombine.low %v4269_v16, %v4277_v17  ;;  %v4205_v8 = vld [vmem:[%s12378_s3 + $0x918] sm:$0xff] }
 0x2ae   : > { %7171 = vmatpush2.bf16.msra.mxu0 %v8549_v27  ;;  %v4213_v10 = vld [vmem:[%s12378_s3 + $0x958] sm:$0xff] }
 0x2af   : > { %7172 = vmatprep.subr.bf16.mxu0 %v8534_v28  ;;  %v4261_v28 = vld [vmem:[%s12378_s3 + $0xad8] sm:$0xff] }
 0x2b0   : > { %7212 = vmatpush2.bf16.msra.mxu1 %v8805_v37  ;;  %v4253_v37 = vld [vmem:[%s12378_s3 + $0xa98] sm:$0xff] }
 0x2b1   : > { %7213 = vmatprep.subr.bf16.mxu1 %v8790_v29  ;;  %v8679_v48 = vcombine.low %v4253_v37, %v4261_v28  ;;  %v4189_v16 = vld [vmem:[%s12378_s3 + $0x898] sm:$0xff] }
 0x2b2   : > { %7173 = vmatpush2.bf16.msra.mxu0 %v8533_v34  ;;  %v8424_v34 = vcombine.high %v3997_v24, %v4005_v25  ;;  %v4197_v17 = vld [vmem:[%s12378_s3 + $0x8d8] sm:$0xff] }
 0x2b3   : > { %7174 = vmatprep.subr.bf16.mxu0 %v8518_v38  ;;  %v8680_v38 = vcombine.high %v4253_v37, %v4261_v28  ;;  %v4181_v37 = vld [vmem:[%s12378_s3 + $0x858] sm:$0xff]  ;;  %v8359_v28 = vcombine.low %v3933_v14, %v3941_v15 }
 0x2b4   : > { %7214 = vmatpush2.bf16.msra.mxu1 %v8789_v36 }
 0x2b5   : > { %7215 = vmatprep.subr.bf16.mxu1 %v8774_v39  ;;  %v3981_v39 = vld [vmem:[%s12378_s3 + $0x218] sm:$0xff] }
 0x2b6   : > { %7175 = vmatpush2.bf16.msra.mxu0 %v8517_v44  ;;  %v4245_v44 = vld [vmem:[%s12378_s3 + $0xa58] sm:$0xff]  ;;  %v8408_v40 = vcombine.high %v3981_v39, %v3989_v5 }
 0x2b7   : > { %7176 = vmatprep.subr.bf16.mxu0 %v8502_v49  ;;  %v8423_v49 = vcombine.low %v3997_v24, %v4005_v25  ;;  %v3917_v24 = vld [vmem:[%s12378_s3 + $0x18] sm:$0xff] }
 0x2b8   : > { %7216 = vmatpush2.bf16.msra.mxu1 %v8773_v45  ;;  %v3925_v25 = vld [vmem:[%s12378_s3 + $0x58] sm:$0xff] }
 0x2b9   : > { %7217 = vmatprep.subr.bf16.mxu1 %v8758_v46 }
 0x2ba   : > { %7177 = vmatpush2.bf16.msra.mxu0 %v8501_v59  ;;  %v8664_v59 = vcombine.high %v4237_v43, %v4245_v44 }
 0x2bb   : > { %7178 = vmatprep.subr.bf16.mxu0 %v8486_v26  ;;  %v3973_v26 = vld [vmem:[%s12378_s3 + $0x1d8] sm:$0xff] }
 0x2bc   : > { %7218 = vmatpush2.bf16.msra.mxu1 %v8757_v50  ;;  %v3965_v50 = vld [vmem:[%s12378_s3 + $0x198] sm:$0xff] }
 0x2bd   : > { %7219 = vmatprep.subr.bf16.mxu1 %v8742_v32  ;;  %v3865_v32 = vrot.slane %v3857_v63, %v9077_v35  ;;  %v3957_v63 = vld [vmem:[%s12378_s3 + $0x158] sm:$0xff]  ;;  %v8391_v60 = vcombine.low %v3965_v50, %v3973_v26 }
 0x2be   : > { %7179 = vmatpush2.bf16.msra.mxu0 %v8485_v58  ;;  %v8407_v58 = vcombine.low %v3981_v39, %v3989_v5 }
 0x2bf   : > { %7180 = vmatprep.subr.bf16.mxu0 %v8470_v62  ;;  %v8663_v62 = vcombine.low %v4237_v43, %v4245_v44  ;;  %v4149_v43 = vld [vmem:[%s12378_s3 + $0x758] sm:$0xff] }
 0x2c0   : > { %7220 = vmatpush2.bf16.msra.mxu1 %v8741_v51  ;;  %v4397_v44 = vld [vmem:[%s12378_s3 + $0xf18] sm:$0xff] }
 0x2c1   : > { %7221 = vmatprep.subr.bf16.mxu1 %v8726_v4  ;;  %v8392_v4 = vcombine.high %v3965_v50, %v3973_v26  ;;  %v4133_v50 = vld [vmem:[%s12378_s3 + $0x6d8] sm:$0xff] }
 0x2c2   : > { %7181 = vmatpush2.bf16.msra.mxu0 %v8469_v57  ;;  %v4381_v26 = vld [vmem:[%s12378_s3 + $0xe98] sm:$0xff] }
 0x2c3   : > { %7232 = vmatprep.subr.bf16.mxu0 %v8456_v12  ;;  %v8376_v12 = vcombine.high %v3949_v9, %v3957_v63 }
 0x2c4   : > { %7222 = vmatpush2.bf16.msra.mxu1 %v8725_v6  ;;  %v8647_v6 = vcombine.low %v4221_v52, %v4229_v54 }
 0x2c5   : > { %7273 = vmatprep.subr.bf16.mxu1 %v8712_v13  ;;  %v3742_v27 = vpop.f32.mrf.mxu0  ;;  %7183 = vmatmul.mubr.bf16.vlgmr.msra.gmra.mxu0 %v10908_v3  ;;  %v8632_v13 = vcombine.high %v4205_v8, %v4213_v10 }
 0x2c6   : > { %7233 = vmatpush1.bf16.msra.mxu0 %v8455_v18  ;;  %7264 = vmatprep.mubr.bf16.mxu0 %v10696_v19  ;;  %v8375_v18 = vcombine.low %v3949_v9, %v3957_v63 }
 0x2c7   : > { %v3783_v29 = vpop.f32.mrf.mxu1  ;;  %7224 = vmatmul.mubr.bf16.vlgmr.msra.gmra.mxu1 %v10918_v1  ;;  %v3744_v41 = vpop.f32.mrf.mxu0  ;;  %7234 = vmatprep.subr.bf16.mxu0 %v8440_v21  ;;  %v8360_v21 = vcombine.high %v3933_v14, %v3941_v15  ;;  %v4077_v15 = vld [vmem:[%s12378_s3 + $0x518] sm:$0xff] }
 0x2c8   : > { %v3784_v31 = vadd.f32 %v3783_v29, %v3742_v27  ;;  %7274 = vmatpush1.bf16.msra.mxu1 %v8711_v20  ;;  %7305 = vmatprep.mubr.bf16.mxu1 %v10705_v23  ;;  %v8631_v20 = vcombine.low %v4205_v8, %v4213_v10  ;;  %v4173_v27 = vld [vmem:[%s12378_s3 + $0x818] sm:$0xff]  ;;  %v8615_v29 = vcombine.low %v4189_v16, %v4197_v17 }
 0x2c9   : > { %v3785_v36 = vpop.f32.mrf.mxu1  ;;  %7275 = vmatprep.subr.bf16.mxu1 %v8696_v22  ;;  %v3746_v11 = vpop.f32.mrf.mxu0  ;;  %v8616_v22 = vcombine.high %v4189_v16, %v4197_v17  ;;  %v8599_v39 = vcombine.low %v4173_v27, %v4181_v37  ;;  %v4093_v8 = vld [vmem:[%s12378_s3 + $0x598] sm:$0xff] }
 0x2ca   : > { %v3786_v7 = vadd.f32 %v3785_v36, %v3744_v41  ;;  %7235 = vmatpush1.bf16.msra.mxu0 %v8439_v30  ;;  %v8344_v30 = vcombine.high %v3917_v24, %v3925_v25  ;;  %v4157_v41 = vld [vmem:[%s12378_s3 + $0x798] sm:$0xff] }
 0x2cb   : > { %v3787_v45 = vpop.f32.mrf.mxu1  ;;  %v3747_v47 = vpop.f32.mrf.mxu0  ;;  %7236 = vmatprep.subr.bf16.mxu0 %v8424_v34  ;;  %v4413_v34 = vld [vmem:[%s12378_s3 + $0xf98] sm:$0xff] }
 0x2cc   : > { %v3858_v46 = vcombine.low %v3784_v31, %v3786_v7  ;;  %7276 = vmatpush1.bf16.msra.mxu1 %v8695_v33  ;;  %v8600_v31 = vcombine.high %v4173_v27, %v4181_v37  ;;  %v4165_v33 = vld [vmem:[%s12378_s3 + $0x7d8] sm:$0xff] }
 0x2cd   : > { %v3788_v53 = vpop.f32.mrf.mxu1  ;;  %7277 = vmatprep.subr.bf16.mxu1 %v8680_v38  ;;  %v4421_v36 = vld [vmem:[%s12378_s3 + $0xfd8] sm:$0xff]  ;;  %v8343_v38 = vcombine.low %v3917_v24, %v3925_v25  ;;  %v8584_v5 = vcombine.high %v4157_v41, %v4165_v33 }
 0x2ce   : > { %v3872_v42 = vrot.slane %v3858_v46, %v9077_v35  ;;  %7237 = vmatpush1.bf16.msra.mxu0 %v8423_v49  ;;  %v8840_v7 = vcombine.high %v4413_v34, %v4421_v36  ;;  %v4141_v11 = vld [vmem:[%s12378_s3 + $0x718] sm:$0xff]  ;;  %v8583_v46 = vcombine.low %v4157_v41, %v4165_v33 }
 0x2cf   : > { %7238 = vmatprep.subr.bf16.mxu0 %v8408_v40  ;;  %v4405_v45 = vld [vmem:[%s12378_s3 + $0xf58] sm:$0xff]  ;;  %v8568_v40 = vcombine.high %v4141_v11, %v4149_v43 }
 0x2d0   : > { %v3873_v51 = vcombine.low %v3865_v32, %v3872_v42  ;;  %7278 = vmatpush1.bf16.msra.mxu1 %v8679_v48  ;;  %v8839_v48 = vcombine.low %v4413_v34, %v4421_v36  ;;  %v8824_v53 = vcombine.high %v4397_v44, %v4405_v45  ;;  %v4389_v32 = vld [vmem:[%s12378_s3 + $0xed8] sm:$0xff]  ;;  %v8567_v42 = vcombine.low %v4141_v11, %v4149_v43 }
 0x2d1   : > { %7279 = vmatprep.subr.bf16.mxu1 %v8664_v59  ;;  %v4125_v59 = vld [vmem:[%s12378_s3 + $0x698] sm:$0xff]  ;;  %v8823_v52 = vcombine.low %v4397_v44, %v4405_v45  ;;  %v8807_v9 = vcombine.low %v4381_v26, %v4389_v32 }
 0x2d2   : > { %v3881_v61 = vadd.f32 %v3873_v51, %v35_v56  ;;  %7239 = vmatpush1.bf16.msra.mxu0 %v8407_v58  ;;  %v8552_v54 = vcombine.high %v4125_v59, %v4133_v50  ;;  %v8808_v56 = vcombine.high %v4381_v26, %v4389_v32  ;;  %v4109_v58 = vld [vmem:[%s12378_s3 + $0x618] sm:$0xff]  ;;  %v4014_v26 = vld [vmem:[%s12378_s3 + $0x320] sm:$0xff] }
 0x2d3   : > { %7240 = vmatprep.subr.bf16.mxu0 %v8392_v4  ;;  %v4117_v51 = vld [vmem:[%s12378_s3 + $0x658] sm:$0xff]  ;;  %v4022_v32 = vld [vmem:[%s12378_s3 + $0x360] sm:$0xff] }
 0x2d4   : > { %v8851_v57 = vmul.f32 -1.442695, %v3881_v61  ;;  %7280 = vmatpush1.bf16.msra.mxu1 %v8663_v62  ;;  %v4365_v62 = vld [vmem:[%s12378_s3 + $0xe18] sm:$0xff]  ;;  %v8536_v63 = vcombine.high %v4109_v58, %v4117_v51 }
 0x2d5   : > { %7281 = vmatprep.subr.bf16.mxu1 %v8648_v55  ;;  %v4373_v4 = vld [vmem:[%s12378_s3 + $0xe58] sm:$0xff]  ;;  %v8551_v55 = vcombine.low %v4125_v59, %v4133_v50 }
 0x2d6   : > { %8913 = vpow2.f32 %v8851_v57  ;;  %7241 = vmatpush1.bf16.msra.mxu0 %v8391_v60  ;;  %v8792_v61 = vcombine.high %v4365_v62, %v4373_v4  ;;  %v4101_v10 = vld [vmem:[%s12378_s3 + $0x5d8] sm:$0xff] }
 0x2d7   : > { %7242 = vmatprep.subr.bf16.mxu0 %v8376_v12  ;;  %8915 = vtanh.f32 %v11027_v2  ;;  %v4349_v60 = vld [vmem:[%s12378_s3 + $0xd98] sm:$0xff]  ;;  %v8791_v12 = vcombine.low %v4365_v62, %v4373_v4  ;;  %v3998_v62 = vld [vmem:[%s12378_s3 + $0x2a0] sm:$0xff] }
 0x2d8   : > { %7282 = vmatpush1.bf16.msra.mxu1 %v8647_v6  ;;  %v4357_v57 = vld [vmem:[%s12378_s3 + $0xdd8] sm:$0xff]  ;;  %v8535_v6 = vcombine.low %v4109_v58, %v4117_v51  ;;  %v8442_v58 = vcombine.high %v4014_v26, %v4022_v32  ;;  %v4006_v4 = vld [vmem:[%s12378_s3 + $0x2e0] sm:$0xff] }
 0x2d9   : > { %7283 = vmatprep.subr.bf16.mxu1 %v8632_v13  ;;  %v8520_v13 = vcombine.high %v4093_v8, %v4101_v10  ;;  %v8776_v14 = vcombine.high %v4349_v60, %v4357_v57  ;;  %v4085_v16 = vld [vmem:[%s12378_s3 + $0x558] sm:$0xff]  ;;  %v8775_v25 = vcombine.low %v4349_v60, %v4357_v57 }
 0x2da   : > { %7243 = vmatpush1.bf16.msra.mxu0 %v8375_v18  ;;  %v4333_v18 = vld [vmem:[%s12378_s3 + $0xd18] sm:$0xff]  ;;  %v8504_v27 = vcombine.high %v4077_v15, %v4085_v16  ;;  %v8503_v41 = vcombine.low %v4077_v15, %v4085_v16  ;;  %v3990_v15 = vld [vmem:[%s12378_s3 + $0x260] sm:$0xff] }
 0x2db   : > { %7244 = vmatprep.subr.bf16.mxu0 %v8360_v21 }
 0x2dc   : > { %7284 = vmatpush1.bf16.msra.mxu1 %v8631_v20  ;;  %v4341_v20 = vld [vmem:[%s12378_s3 + $0xd58] sm:$0xff] }
 0x2dd   : > { %7285 = vmatprep.subr.bf16.mxu1 %v8616_v22  ;;  %v8519_v22 = vcombine.low %v4093_v8, %v4101_v10  ;;  %v8760_v37 = vcombine.high %v4333_v18, %v4341_v20  ;;  %v8759_v33 = vcombine.low %v4333_v18, %v4341_v20  ;;  %v8441_v8 = vcombine.low %v4014_v26, %v4022_v32  ;;  %v4238_v18 = vld [vmem:[%s12378_s3 + $0xa20] sm:$0xff] }
 0x2de   : > { %7245 = vmatpush1.bf16.msra.mxu0 %v8359_v28  ;;  %v4061_v28 = vld [vmem:[%s12378_s3 + $0x498] sm:$0xff]  ;;  %v4246_v20 = vld [vmem:[%s12378_s3 + $0xa60] sm:$0xff] }
 0x2df   : > { %7246 = vmatprep.subr.bf16.mxu0 %v8344_v30  ;;  %v4317_v30 = vld [vmem:[%s12378_s3 + $0xc98] sm:$0xff] }
 0x2e0   : > { %7286 = vmatpush1.bf16.msra.mxu1 %v8615_v29  ;;  %v4069_v29 = vld [vmem:[%s12378_s3 + $0x4d8] sm:$0xff] }
 0x2e1   : > { %7287 = vmatprep.subr.bf16.mxu1 %v8600_v31  ;;  %v4325_v31 = vld [vmem:[%s12378_s3 + $0xcd8] sm:$0xff]  ;;  %v8488_v34 = vcombine.high %v4061_v28, %v4069_v29  ;;  %v8487_v11 = vcombine.low %v4061_v28, %v4069_v29 }
 0x2e2   : > { %7247 = vmatpush1.bf16.msra.mxu0 %v8343_v38  ;;  %v8744_v36 = vcombine.high %v4317_v30, %v4325_v31  ;;  %v4045_v38 = vld [vmem:[%s12378_s3 + $0x418] sm:$0xff]  ;;  %v8743_v43 = vcombine.low %v4317_v30, %v4325_v31  ;;  %v8666_v30 = vcombine.high %v4238_v18, %v4246_v20  ;;  %v3966_v31 = vld [vmem:[%s12378_s3 + $0x1a0] sm:$0xff] }
 0x2e3   : > { %v8914_v49 = vpop.eup %8913  ;;  %7248 = vmatprep.subr.bf16.mxu0 %v8584_v5  ;;  %v4301_v5 = vld [vmem:[%s12378_s3 + $0xc18] sm:$0xff] }
 0x2e4   : > { %v7750_v47 = vadd.f32 1.0, %v8914_v49  ;;  %7288 = vmatpush1.bf16.msra.mxu1 %v8599_v39  ;;  %v8916_v17 = vpop.eup %8915  ;;  %v4053_v39 = vld [vmem:[%s12378_s3 + $0x458] sm:$0xff]  ;;  %v4030_v49 = vld [vmem:[%s12378_s3 + $0x3a0] sm:$0xff] }
 0x2e5   : > { %7289 = vmatprep.subr.bf16.mxu1 %v8840_v7  ;;  %v4309_v7 = vld [vmem:[%s12378_s3 + $0xc58] sm:$0xff]  ;;  %v8472_v44 = vcombine.high %v4045_v38, %v4053_v39 }
 0x2e6   : > { %8917 = vrcp.f32 %v7750_v47  ;;  %7249 = vmatpush2.bf16.msra.mxu0 %v8583_v46  ;;  %v8728_v45 = vcombine.high %v4301_v5, %v4309_v7  ;;  %v4038_v46 = vld [vmem:[%s12378_s3 + $0x3e0] sm:$0xff] }
 0x2e7   : > { %7250 = vmatprep.subr.bf16.mxu0 %v8568_v40  ;;  %v4286_v47 = vld [vmem:[%s12378_s3 + $0xba0] sm:$0xff]  ;;  %v8471_v40 = vcombine.low %v4045_v38, %v4053_v39  ;;  %v8458_v59 = vcombine.high %v4030_v49, %v4038_v46  ;;  %v8665_v38 = vcombine.low %v4238_v18, %v4246_v20 }
 0x2e8   : > { %7290 = vmatpush2.bf16.msra.mxu1 %v8839_v48  ;;  %v4294_v48 = vld [vmem:[%s12378_s3 + $0xbe0] sm:$0xff] }
 0x2e9   : > { %7291 = vmatprep.subr.bf16.mxu1 %v8824_v53  ;;  %v8727_v53 = vcombine.low %v4301_v5, %v4309_v7  ;;  %v8714_v50 = vcombine.high %v4286_v47, %v4294_v48  ;;  %v3950_v7 = vld [vmem:[%s12378_s3 + $0x120] sm:$0xff] }
 0x2ea   : > { %7251 = vmatpush2.bf16.msra.mxu0 %v8567_v42  ;;  %v4270_v42 = vld [vmem:[%s12378_s3 + $0xb20] sm:$0xff] }
 0x2eb   : > { %7252 = vmatprep.subr.bf16.mxu0 %v8552_v54  ;;  %v8457_v54 = vcombine.low %v4030_v49, %v4038_v46 }
 0x2ec   : > { %7292 = vmatpush2.bf16.msra.mxu1 %v8823_v52  ;;  %v4278_v52 = vld [vmem:[%s12378_s3 + $0xb60] sm:$0xff] }
 0x2ed   : > { %7293 = vmatprep.subr.bf16.mxu1 %v8808_v56  ;;  %v8713_v56 = vcombine.low %v4286_v47, %v4294_v48  ;;  %v8698_v51 = vcombine.high %v4270_v42, %v4278_v52  ;;  %v8697_v57 = vcombine.low %v4270_v42, %v4278_v52  ;;  %v3934_v48 = vld [vmem:[%s12378_s3 + $0xa0] sm:$0xff] }
 0x2ee   : > { %7253 = vmatpush2.bf16.msra.mxu0 %v8551_v55  ;;  %v3918_v52 = vld [vmem:[%s12378_s3 + $0x20] sm:$0xff] }
 0x2ef   : > { %7254 = vmatprep.subr.bf16.mxu0 %v8536_v63  ;;  %v4262_v63 = vld [vmem:[%s12378_s3 + $0xae0] sm:$0xff] }
 0x2f0   : > { %7294 = vmatpush2.bf16.msra.mxu1 %v8807_v9  ;;  %v4254_v9 = vld [vmem:[%s12378_s3 + $0xaa0] sm:$0xff] }
 0x2f1   : > { %7295 = vmatprep.subr.bf16.mxu1 %v8792_v61 }
 0x2f2   : > { %7255 = vmatpush2.bf16.msra.mxu0 %v8535_v6  ;;  %v8426_v6 = vcombine.high %v3998_v62, %v4006_v4 }
 0x2f3   : > { %v8918_v21 = vpop.eup %8917  ;;  %7256 = vmatprep.subr.bf16.mxu0 %v8520_v13  ;;  %v8682_v13 = vcombine.high %v4254_v9, %v4262_v63 }
 0x2f4   : > { %v11488_v24 = vmul.f32 %v8918_v21, %v8916_v17   ;;  %7296 = vmatpush2.bf16.msra.mxu1 %v8791_v12 }
 0x2f5   : > { %7297 = vmatprep.subr.bf16.mxu1 %v8776_v14  ;;  %v3982_v14 = vld [vmem:[%s12378_s3 + $0x220] sm:$0xff] }
 0x2f6   : > { %7785 = vst [vmem:[%s7784_s16] sm:$0xff] %v11488_v24  ;;  %7257 = vmatpush2.bf16.msra.mxu0 %v8519_v22  ;;  %v8425_v22 = vcombine.low %v3998_v62, %v4006_v4  ;;  %v8410_v28 = vcombine.high %v3982_v14, %v3990_v15 }
 0x2f7   : > { %7258 = vmatprep.subr.bf16.mxu0 %v8504_v27 }
 0x2f8   : > { %7298 = vmatpush2.bf16.msra.mxu1 %v8775_v25 }
 0x2f9   : > { %7299 = vmatprep.subr.bf16.mxu1 %v8760_v37  ;;  %v8681_v37 = vcombine.low %v4254_v9, %v4262_v63  ;;  %v4158_v9 = vld [vmem:[%s12378_s3 + $0x7a0] sm:$0xff] }
 0x2fa   : > { %7259 = vmatpush2.bf16.msra.mxu0 %v8503_v41  ;;  %v3974_v41 = vld [vmem:[%s12378_s3 + $0x1e0] sm:$0xff] }
 0x2fb   : > { %7260 = vmatprep.subr.bf16.mxu0 %v8488_v34  ;;  %v4230_v34 = vld [vmem:[%s12378_s3 + $0x9e0] sm:$0xff]  ;;  %v8394_v39 = vcombine.high %v3966_v31, %v3974_v41 }
 0x2fc   : > { %7300 = vmatpush2.bf16.msra.mxu1 %v8759_v33  ;;  %v4222_v33 = vld [vmem:[%s12378_s3 + $0x9a0] sm:$0xff] }
 0x2fd   : > { %7301 = vmatprep.subr.bf16.mxu1 %v8744_v36  ;;  %v8409_v36 = vcombine.low %v3982_v14, %v3990_v15  ;;  %v8650_v5 = vcombine.high %v4222_v33, %v4230_v34  ;;  %v8649_v49 = vcombine.low %v4222_v33, %v4230_v34  ;;  %v4166_v63 = vld [vmem:[%s12378_s3 + $0x7e0] sm:$0xff] }
 0x2fe   : > { %7261 = vmatpush2.bf16.msra.mxu0 %v8487_v11  ;;  %v3958_v11 = vld [vmem:[%s12378_s3 + $0x160] sm:$0xff]  ;;  %v8585_v18 = vcombine.low %v4158_v9, %v4166_v63 }
 0x2ff   : > { %7262 = vmatprep.subr.bf16.mxu0 %v8472_v44  ;;  %v4214_v44 = vld [vmem:[%s12378_s3 + $0x960] sm:$0xff]  ;;  %v8378_v46 = vcombine.high %v3950_v7, %v3958_v11 }
 0x300   : > { %7302 = vmatpush2.bf16.msra.mxu1 %v8743_v43  ;;  %v4206_v43 = vld [vmem:[%s12378_s3 + $0x920] sm:$0xff] }
 0x301   : > { %7303 = vmatprep.subr.bf16.mxu1 %v8728_v45  ;;  %v8393_v45 = vcombine.low %v3966_v31, %v3974_v41  ;;  %v8634_v47 = vcombine.high %v4206_v43, %v4214_v44  ;;  %v8633_v26 = vcombine.low %v4206_v43, %v4214_v44  ;;  %v4150_v14 = vld [vmem:[%s12378_s3 + $0x760] sm:$0xff] }
 0x302   : > { %7263 = vmatpush2.bf16.msra.mxu0 %v8471_v40  ;;  %v3942_v40 = vld [vmem:[%s12378_s3 + $0xe0] sm:$0xff] }
 0x303   : > { %7314 = vmatprep.subr.bf16.mxu0 %v8458_v59  ;;  %v4198_v59 = vld [vmem:[%s12378_s3 + $0x8e0] sm:$0xff]  ;;  %v8362_v32 = vcombine.high %v3934_v48, %v3942_v40 }
 0x304   : > { %7304 = vmatpush2.bf16.msra.mxu1 %v8727_v53  ;;  %v4190_v53 = vld [vmem:[%s12378_s3 + $0x8a0] sm:$0xff] }
 0x305   : > { %7355 = vmatprep.subr.bf16.mxu1 %v8714_v50  ;;  %v7020_v55 = vpop.f32.mrf.mxu0  ;;  %7265 = vmatmul.mubr.bf16.vlgmr.msra.gmra.mxu0 %v10908_v3  ;;  %v8377_v50 = vcombine.low %v3950_v7, %v3958_v11  ;;  %v8618_v42 = vcombine.high %v4190_v53, %v4198_v59  ;;  %v8617_v62 = vcombine.low %v4190_v53, %v4198_v59  ;;  %v4398_v15 = vld [vmem:[%s12378_s3 + $0xf20] sm:$0xff] }
 0x306   : > { %7315 = vmatpush1.bf16.msra.mxu0 %v8457_v54  ;;  %7346 = vmatprep.mubr.bf16.mxu0 %v10696_v19  ;;  %v3926_v54 = vld [vmem:[%s12378_s3 + $0x60] sm:$0xff] }
 0x307   : > { %v7061_v61 = vpop.f32.mrf.mxu1  ;;  %7306 = vmatmul.mubr.bf16.vlgmr.msra.gmra.mxu1 %v10918_v1  ;;  %v7022_v60 = vpop.f32.mrf.mxu0  ;;  %7316 = vmatprep.subr.bf16.mxu0 %v8442_v58  ;;  %v4182_v58 = vld [vmem:[%s12378_s3 + $0x860] sm:$0xff]  ;;  %v8346_v4 = vcombine.high %v3918_v52, %v3926_v54 }
 0x308   : > { %v11553_v10 = vadd.f32 %v7061_v61, %v7020_v55  ;;  %7356 = vmatpush1.bf16.msra.mxu1 %v8713_v56  ;;  %7387 = vmatprep.mubr.bf16.mxu1 %v10705_v23  ;;  %v4174_v56 = vld [vmem:[%s12378_s3 + $0x820] sm:$0xff] }
 0x309   : > { %v7063_v12 = vpop.f32.mrf.mxu1  ;;  %7357 = vmatprep.subr.bf16.mxu1 %v8698_v51  ;;  %v7024_v17 = vpop.f32.mrf.mxu0  ;;  %v8361_v51 = vcombine.low %v3934_v48, %v3942_v40  ;;  %v8602_v55 = vcombine.high %v4174_v56, %v4182_v58  ;;  %v4414_v61 = vld [vmem:[%s12378_s3 + $0xfa0] sm:$0xff] }
 0x30a   : > { %v11562_v16 = vadd.f32 %v7063_v12, %v7022_v60  ;;  %7317 = vmatpush1.bf16.msra.mxu0 %v8441_v8  ;;  %v4422_v8 = vld [vmem:[%s12378_s3 + $0xfe0] sm:$0xff]  ;;  %v8345_v60 = vcombine.low %v3918_v52, %v3926_v54 }
 0x30b   : > { %v7065_v21 = vpop.f32.mrf.mxu1  ;;  %v7025_v27 = vpop.f32.mrf.mxu0  ;;  %7318 = vmatprep.subr.bf16.mxu0 %v8426_v6  ;;  %v8586_v6 = vcombine.high %v4158_v9, %v4166_v63  ;;  %v8842_v12 = vcombine.high %v4414_v61, %v4422_v8  ;;  %v4406_v17 = vld [vmem:[%s12378_s3 + $0xf60] sm:$0xff]  ;;  %v8841_v20 = vcombine.low %v4414_v61, %v4422_v8 }
 0x30c   : > { %v7658_v25 = vcombine.low %v11553_v10, %v11562_v16  ;;  %7358 = vmatpush1.bf16.msra.mxu1 %v8697_v57  ;;  %v8601_v57 = vcombine.low %v4174_v56, %v4182_v58  ;;  %v4126_v27 = vld [vmem:[%s12378_s3 + $0x6a0] sm:$0xff]  ;;  %v8825_v31 = vcombine.low %v4398_v15, %v4406_v17 }
 0x30d   : > { %v7066_v29 = vpop.f32.mrf.mxu1  ;;  %7359 = vmatprep.subr.bf16.mxu1 %v8682_v13  ;;  %v4142_v13 = vld [vmem:[%s12378_s3 + $0x720] sm:$0xff] }
 0x30e   : > { %7319 = vmatpush1.bf16.msra.mxu0 %v8425_v22  ;;  %v8570_v21 = vcombine.high %v4142_v13, %v4150_v14  ;;  %v8826_v22 = vcombine.high %v4398_v15, %v4406_v17  ;;  %v4390_v29 = vld [vmem:[%s12378_s3 + $0xee0] sm:$0xff]  ;;  %v4031_v17 = vld [vmem:[%s12378_s3 + $0x3a8] sm:$0xff] }
 0x30f   : > { %7320 = vmatprep.subr.bf16.mxu0 %v8410_v28  ;;  %v4382_v28 = vld [vmem:[%s12378_s3 + $0xea0] sm:$0xff] }
 0x310   : > { %7360 = vmatpush1.bf16.msra.mxu1 %v8681_v37  ;;  %v4134_v37 = vld [vmem:[%s12378_s3 + $0x6e0] sm:$0xff]  ;;  %v8810_v33 = vcombine.high %v4382_v28, %v4390_v29  ;;  %v8809_v7 = vcombine.low %v4382_v28, %v4390_v29  ;;  %v4015_v29 = vld [vmem:[%s12378_s3 + $0x328] sm:$0xff] }
 0x311   : > { %7361 = vmatprep.subr.bf16.mxu1 %v8666_v30  ;;  %v8569_v30 = vcombine.low %v4142_v13, %v4150_v14  ;;  %v8554_v41 = vcombine.high %v4126_v27, %v4134_v37  ;;  %v4110_v34 = vld [vmem:[%s12378_s3 + $0x620] sm:$0xff] }
 0x312   : > { %7321 = vmatpush1.bf16.msra.mxu0 %v8409_v36  ;;  %v4118_v36 = vld [vmem:[%s12378_s3 + $0x660] sm:$0xff] }
 0x313   : > { %7322 = vmatprep.subr.bf16.mxu0 %v8394_v39  ;;  %v4374_v39 = vld [vmem:[%s12378_s3 + $0xe60] sm:$0xff]  ;;  %v8538_v11 = vcombine.high %v4110_v34, %v4118_v36 }
 0x314   : > { %7362 = vmatpush1.bf16.msra.mxu1 %v8665_v38  ;;  %v4366_v38 = vld [vmem:[%s12378_s3 + $0xe20] sm:$0xff] }
 0x315   : > { %7363 = vmatprep.subr.bf16.mxu1 %v8650_v5  ;;  %v8553_v5 = vcombine.low %v4126_v27, %v4134_v37  ;;  %v8794_v43 = vcombine.high %v4366_v38, %v4374_v39  ;;  %v4094_v44 = vld [vmem:[%s12378_s3 + $0x5a0] sm:$0xff]  ;;  %v8793_v48 = vcombine.low %v4366_v38, %v4374_v39  ;;  %v3999_v39 = vld [vmem:[%s12378_s3 + $0x2a8] sm:$0xff] }
 0x316   : > { %7323 = vmatpush1.bf16.msra.mxu0 %v8393_v45  ;;  %v4102_v45 = vld [vmem:[%s12378_s3 + $0x5e0] sm:$0xff] }
 0x317   : > { %7324 = vmatprep.subr.bf16.mxu0 %v8378_v46  ;;  %v4358_v46 = vld [vmem:[%s12378_s3 + $0xde0] sm:$0xff]  ;;  %v8522_v40 = vcombine.high %v4094_v44, %v4102_v45 }
 0x318   : > { %7364 = vmatpush1.bf16.msra.mxu1 %v8649_v49  ;;  %v4350_v49 = vld [vmem:[%s12378_s3 + $0xda0] sm:$0xff] }
 0x319   : > { %7365 = vmatprep.subr.bf16.mxu1 %v8634_v47  ;;  %v8537_v47 = vcombine.low %v4110_v34, %v4118_v36  ;;  %v8778_v53 = vcombine.high %v4350_v49, %v4358_v46  ;;  %v4078_v59 = vld [vmem:[%s12378_s3 + $0x520] sm:$0xff]  ;;  %v8777_v52 = vcombine.low %v4350_v49, %v4358_v46 }
 0x31a   : > { %7325 = vmatpush1.bf16.msra.mxu0 %v8377_v50  ;;  %v4086_v50 = vld [vmem:[%s12378_s3 + $0x560] sm:$0xff] }
 0x31b   : > { %7326 = vmatprep.subr.bf16.mxu0 %v8362_v32  ;;  %v4342_v32 = vld [vmem:[%s12378_s3 + $0xd60] sm:$0xff]  ;;  %v8506_v54 = vcombine.high %v4078_v59, %v4086_v50 }
 0x31c   : > { %7366 = vmatpush1.bf16.msra.mxu1 %v8633_v26  ;;  %v4334_v26 = vld [vmem:[%s12378_s3 + $0xd20] sm:$0xff] }
 0x31d   : > { %7367 = vmatprep.subr.bf16.mxu1 %v8618_v42  ;;  %v8521_v42 = vcombine.low %v4094_v44, %v4102_v45  ;;  %v8762_v56 = vcombine.high %v4334_v26, %v4342_v32  ;;  %v4062_v58 = vld [vmem:[%s12378_s3 + $0x4a0] sm:$0xff]  ;;  %v8761_v9 = vcombine.low %v4334_v26, %v4342_v32 }
 0x31e   : > { %7327 = vmatpush1.bf16.msra.mxu0 %v8361_v51  ;;  %v4070_v51 = vld [vmem:[%s12378_s3 + $0x4e0] sm:$0xff] }
 0x31f   : > { %7328 = vmatprep.subr.bf16.mxu0 %v8346_v4  ;;  %v4326_v4 = vld [vmem:[%s12378_s3 + $0xce0] sm:$0xff]  ;;  %v8490_v63 = vcombine.high %v4062_v58, %v4070_v51 }
 0x320   : > { %7368 = vmatpush1.bf16.msra.mxu1 %v8617_v62  ;;  %v4318_v62 = vld [vmem:[%s12378_s3 + $0xca0] sm:$0xff] }
 0x321   : > { %7369 = vmatprep.subr.bf16.mxu1 %v8602_v55  ;;  %v8505_v55 = vcombine.low %v4078_v59, %v4086_v50  ;;  %v8746_v61 = vcombine.high %v4318_v62, %v4326_v4  ;;  %v4046_v8 = vld [vmem:[%s12378_s3 + $0x420] sm:$0xff]  ;;  %v8745_v13 = vcombine.low %v4318_v62, %v4326_v4  ;;  %v3983_v59 = vld [vmem:[%s12378_s3 + $0x228] sm:$0xff] }
 0x322   : > { %7329 = vmatpush1.bf16.msra.mxu0 %v8345_v60  ;;  %v4054_v60 = vld [vmem:[%s12378_s3 + $0x460] sm:$0xff]  ;;  %v3991_v50 = vld [vmem:[%s12378_s3 + $0x268] sm:$0xff] }
 0x323   : > { %7330 = vmatprep.subr.bf16.mxu0 %v8586_v6  ;;  %v4310_v6 = vld [vmem:[%s12378_s3 + $0xc60] sm:$0xff]  ;;  %v8474_v14 = vcombine.high %v4046_v8, %v4054_v60  ;;  %v8412_v4 = vcombine.high %v3983_v59, %v3991_v50 }
 0x324   : > { %7370 = vmatpush1.bf16.msra.mxu1 %v8601_v57  ;;  %v4302_v57 = vld [vmem:[%s12378_s3 + $0xc20] sm:$0xff] }
 0x325   : > { %7371 = vmatprep.subr.bf16.mxu1 %v8842_v12  ;;  %v8489_v12 = vcombine.low %v4062_v58, %v4070_v51  ;;  %v8730_v15 = vcombine.high %v4302_v57, %v4310_v6  ;;  %v8729_v27 = vcombine.low %v4302_v57, %v4310_v6  ;;  %v4223_v57 = vld [vmem:[%s12378_s3 + $0x9a8] sm:$0xff] }
 0x326   : > { %7331 = vmatpush2.bf16.msra.mxu0 %v8585_v18  ;;  %v4039_v18 = vld [vmem:[%s12378_s3 + $0x3e8] sm:$0xff] }
 0x327   : > { %7332 = vmatprep.subr.bf16.mxu0 %v8570_v21  ;;  %v4295_v21 = vld [vmem:[%s12378_s3 + $0xbe8] sm:$0xff]  ;;  %v8460_v37 = vcombine.high %v4031_v17, %v4039_v18 }
 0x328   : > { %7372 = vmatpush2.bf16.msra.mxu1 %v8841_v20  ;;  %v4287_v20 = vld [vmem:[%s12378_s3 + $0xba8] sm:$0xff] }
 0x329   : > { %7373 = vmatprep.subr.bf16.mxu1 %v8826_v22  ;;  %v8473_v22 = vcombine.low %v4046_v8, %v4054_v60  ;;  %v8716_v28 = vcombine.high %v4287_v20, %v4295_v21  ;;  %v8715_v34 = vcombine.low %v4287_v20, %v4295_v21  ;;  %v11779_v8 = vrot.slane %v7658_v25, %v9077_v35  ;;  %v4231_v6 = vld [vmem:[%s12378_s3 + $0x9e8] sm:$0xff] }
 0x32a   : > { %7333 = vmatpush2.bf16.msra.mxu0 %v8569_v30  ;;  %v4023_v30 = vld [vmem:[%s12378_s3 + $0x368] sm:$0xff]  ;;  %v8652_v25 = vcombine.high %v4223_v57, %v4231_v6  ;;  %v8651_v21 = vcombine.low %v4223_v57, %v4231_v6 }
 0x32b   : > { %7334 = vmatprep.subr.bf16.mxu0 %v8554_v41  ;;  %v4279_v41 = vld [vmem:[%s12378_s3 + $0xb68] sm:$0xff]  ;;  %v8444_v36 = vcombine.high %v4015_v29, %v4023_v30  ;;  %v8443_v45 = vcombine.low %v4015_v29, %v4023_v30 }
 0x32c   : > { %7374 = vmatpush2.bf16.msra.mxu1 %v8825_v31  ;;  %v4271_v31 = vld [vmem:[%s12378_s3 + $0xb28] sm:$0xff] }
 0x32d   : > { %7375 = vmatprep.subr.bf16.mxu1 %v8810_v33  ;;  %v8459_v33 = vcombine.low %v4031_v17, %v4039_v18  ;;  %v8700_v38 = vcombine.high %v4271_v31, %v4279_v41  ;;  %v4207_v17 = vld [vmem:[%s12378_s3 + $0x928] sm:$0xff] }
 0x32e   : > { %7335 = vmatpush2.bf16.msra.mxu0 %v8553_v5  ;;  %v4007_v5 = vld [vmem:[%s12378_s3 + $0x2e8] sm:$0xff] }
 0x32f   : > { %7336 = vmatprep.subr.bf16.mxu0 %v8538_v11  ;;  %v4255_v11 = vld [vmem:[%s12378_s3 + $0xaa8] sm:$0xff] }
 0x330   : > { %7376 = vmatpush2.bf16.msra.mxu1 %v8809_v7  ;;  %v4215_v18 = vld [vmem:[%s12378_s3 + $0x968] sm:$0xff] }
 0x331   : > { %7377 = vmatprep.subr.bf16.mxu1 %v8794_v43  ;;  %v4263_v43 = vld [vmem:[%s12378_s3 + $0xae8] sm:$0xff] }
 0x332   : > { %7337 = vmatpush2.bf16.msra.mxu0 %v8537_v47  ;;  %v8699_v47 = vcombine.low %v4271_v31, %v4279_v41  ;;  %v8683_v62 = vcombine.low %v4255_v11, %v4263_v43  ;;  %v4191_v29 = vld [vmem:[%s12378_s3 + $0x8a8] sm:$0xff]  ;;  %v8635_v41 = vcombine.low %v4207_v17, %v4215_v18 }
 0x333   : > { %7338 = vmatprep.subr.bf16.mxu0 %v8522_v40  ;;  %v4199_v30 = vld [vmem:[%s12378_s3 + $0x8e8] sm:$0xff] }
 0x334   : > { %7378 = vmatpush2.bf16.msra.mxu1 %v8793_v48  ;;  %v8428_v48 = vcombine.high %v3999_v39, %v4007_v5  ;;  %v4111_v6 = vld [vmem:[%s12378_s3 + $0x628] sm:$0xff] }
 0x335   : > { %7379 = vmatprep.subr.bf16.mxu1 %v8778_v53  ;;  %v8684_v53 = vcombine.high %v4255_v11, %v4263_v43  ;;  %v8619_v11 = vcombine.low %v4191_v29, %v4199_v30 }
 0x336   : > { %7339 = vmatpush2.bf16.msra.mxu0 %v8521_v42  ;;  %v4239_v42 = vld [vmem:[%s12378_s3 + $0xa28] sm:$0xff] }
 0x337   : > { %7340 = vmatprep.subr.bf16.mxu0 %v8506_v54 }
 0x338   : > { %7380 = vmatpush2.bf16.msra.mxu1 %v8777_v52  ;;  %v4247_v52 = vld [vmem:[%s12378_s3 + $0xa68] sm:$0xff] }
 0x339   : > { %7381 = vmatprep.subr.bf16.mxu1 %v8762_v56  ;;  %v8427_v56 = vcombine.low %v3999_v39, %v4007_v5  ;;  %v8667_v10 = vcombine.low %v4239_v42, %v4247_v52  ;;  %v4175_v39 = vld [vmem:[%s12378_s3 + $0x828] sm:$0xff] }
 0x33a   : > { %7341 = vmatpush2.bf16.msra.mxu0 %v8505_v55  ;;  %v4183_v5 = vld [vmem:[%s12378_s3 + $0x868] sm:$0xff] }
 0x33b   : > { %7342 = vmatprep.subr.bf16.mxu0 %v8490_v63  ;;  %v3967_v63 = vld [vmem:[%s12378_s3 + $0x1a8] sm:$0xff] }
 0x33c   : > { %7382 = vmatpush2.bf16.msra.mxu1 %v8761_v9  ;;  %v8668_v9 = vcombine.high %v4239_v42, %v4247_v52  ;;  %v4407_v42 = vld [vmem:[%s12378_s3 + $0xf68] sm:$0xff] }
 0x33d   : > { %7383 = vmatprep.subr.bf16.mxu1 %v8746_v61  ;;  %v3975_v61 = vld [vmem:[%s12378_s3 + $0x1e8] sm:$0xff] }
 0x33e   : > { %7343 = vmatpush2.bf16.msra.mxu0 %v8489_v12  ;;  %v8411_v12 = vcombine.low %v3983_v59, %v3991_v50  ;;  %v8396_v16 = vcombine.high %v3967_v63, %v3975_v61  ;;  %v8395_v20 = vcombine.low %v3967_v63, %v3975_v61  ;;  %v4143_v50 = vld [vmem:[%s12378_s3 + $0x728] sm:$0xff] }
 0x33f   : > { %7344 = vmatprep.subr.bf16.mxu0 %v8474_v14  ;;  %v3951_v14 = vld [vmem:[%s12378_s3 + $0x128] sm:$0xff] }
 0x340   : > { %7384 = vmatpush2.bf16.msra.mxu1 %v8745_v13 }
 0x341   : > { %7385 = vmatprep.subr.bf16.mxu1 %v8730_v15  ;;  %v3959_v15 = vld [vmem:[%s12378_s3 + $0x168] sm:$0xff] }
 0x342   : > { %7345 = vmatpush2.bf16.msra.mxu0 %v8473_v22  ;;  %v8380_v22 = vcombine.high %v3951_v14, %v3959_v15  ;;  %v8379_v31 = vcombine.low %v3951_v14, %v3959_v15 }
 0x343   : > { %7396 = vmatprep.subr.bf16.mxu0 %v8460_v37  ;;  %v3935_v37 = vld [vmem:[%s12378_s3 + $0xa8] sm:$0xff] }
 0x344   : > { %7386 = vmatpush2.bf16.msra.mxu1 %v8729_v27  ;;  %v8636_v27 = vcombine.high %v4207_v17, %v4215_v18  ;;  %v4095_v18 = vld [vmem:[%s12378_s3 + $0x5a8] sm:$0xff] }
 0x345   : > { %7437 = vmatprep.subr.bf16.mxu1 %v8716_v28  ;;  %v7102_v7 = vpop.f32.mrf.mxu0  ;;  %7347 = vmatmul.mubr.bf16.vlgmr.msra.gmra.mxu0 %v10908_v3  ;;  %v3943_v28 = vld [vmem:[%s12378_s3 + $0xe8] sm:$0xff] }
 0x346   : > { %7397 = vmatpush1.bf16.msra.mxu0 %v8459_v33  ;;  %7428 = vmatprep.mubr.bf16.mxu0 %v10696_v19  ;;  %v8364_v33 = vcombine.high %v3935_v37, %v3943_v28 }
 0x347   : > { %v7143_v44 = vpop.f32.mrf.mxu1  ;;  %7388 = vmatmul.mubr.bf16.vlgmr.msra.gmra.mxu1 %v10918_v1  ;;  %v7104_v46 = vpop.f32.mrf.mxu0  ;;  %7398 = vmatprep.subr.bf16.mxu0 %v8444_v36  ;;  %v3919_v36 = vld [vmem:[%s12378_s3 + $0x28] sm:$0xff] }
 0x348   : > { %v7144_v49 = vadd.f32 %v7143_v44, %v7102_v7  ;;  %7438 = vmatpush1.bf16.msra.mxu1 %v8715_v34  ;;  %7469 = vmatprep.mubr.bf16.mxu1 %v10705_v23  ;;  %v8620_v34 = vcombine.high %v4191_v29, %v4199_v30  ;;  %v8363_v7 = vcombine.low %v3935_v37, %v3943_v28  ;;  %v4079_v30 = vld [vmem:[%s12378_s3 + $0x528] sm:$0xff] }
 0x349   : > { %v7145_v40 = vpop.f32.mrf.mxu1  ;;  %7439 = vmatprep.subr.bf16.mxu1 %v8700_v38  ;;  %v7106_v32 = vpop.f32.mrf.mxu0  ;;  %v3927_v38 = vld [vmem:[%s12378_s3 + $0x68] sm:$0xff]  ;;  %v8604_v44 = vcombine.high %v4175_v39, %v4183_v5 }
 0x34a   : > { %v7146_v26 = vadd.f32 %v7145_v40, %v7104_v46  ;;  %7399 = vmatpush1.bf16.msra.mxu0 %v8443_v45  ;;  %v8348_v43 = vcombine.high %v3919_v36, %v3927_v38  ;;  %v4159_v45 = vld [vmem:[%s12378_s3 + $0x7a8] sm:$0xff]  ;;  %v8603_v40 = vcombine.low %v4175_v39, %v4183_v5 }
 0x34b   : > { %v7147_v54 = vpop.f32.mrf.mxu1  ;;  %v7107_v51 = vpop.f32.mrf.mxu0  ;;  %7400 = vmatprep.subr.bf16.mxu0 %v8428_v48  ;;  %v4415_v46 = vld [vmem:[%s12378_s3 + $0xfa8] sm:$0xff]  ;;  %v8347_v48 = vcombine.low %v3919_v36, %v3927_v38 }
 0x34c   : > { %v7659_v58 = vcombine.low %v7144_v49, %v7146_v26  ;;  %7440 = vmatpush1.bf16.msra.mxu1 %v8699_v47  ;;  %v4167_v49 = vld [vmem:[%s12378_s3 + $0x7e8] sm:$0xff] }
 0x34d   : > { %v7148_v55 = vpop.f32.mrf.mxu1  ;;  %7441 = vmatprep.subr.bf16.mxu1 %v8684_v53  ;;  %v4423_v47 = vld [vmem:[%s12378_s3 + $0xfe8] sm:$0xff]  ;;  %v8588_v53 = vcombine.high %v4159_v45, %v4167_v49  ;;  %v8587_v52 = vcombine.low %v4159_v45, %v4167_v49 }
 0x34e   : > { %v11782_v60 = vrot.slane %v7659_v58, %v9077_v35  ;;  %7401 = vmatpush1.bf16.msra.mxu0 %v8427_v56  ;;  %v8844_v59 = vcombine.high %v4415_v46, %v4423_v47  ;;  %v4151_v26 = vld [vmem:[%s12378_s3 + $0x768] sm:$0xff]  ;;  %v8843_v54 = vcombine.low %v4415_v46, %v4423_v47 }
 0x34f   : > { %7402 = vmatprep.subr.bf16.mxu0 %v8412_v4  ;;  %v4399_v32 = vld [vmem:[%s12378_s3 + $0xf28] sm:$0xff]  ;;  %v8572_v56 = vcombine.high %v4143_v50, %v4151_v26 }
 0x350   : > { %v7674_v13 = vcombine.low %v11779_v8, %v11782_v60  ;;  %7442 = vmatpush1.bf16.msra.mxu1 %v8683_v62  ;;  %v8828_v58 = vcombine.high %v4399_v32, %v4407_v42  ;;  %v4127_v51 = vld [vmem:[%s12378_s3 + $0x6a8] sm:$0xff]  ;;  %v8827_v63 = vcombine.low %v4399_v32, %v4407_v42  ;;  %v4032_v42 = vld [vmem:[%s12378_s3 + $0x3b0] sm:$0xff] }
 0x351   : > { %7443 = vmatprep.subr.bf16.mxu1 %v8668_v9  ;;  %v4135_v62 = vld [vmem:[%s12378_s3 + $0x6e8] sm:$0xff]  ;;  %v8571_v9 = vcombine.low %v4143_v50, %v4151_v26 }
 0x352   : > { %7403 = vmatpush1.bf16.msra.mxu0 %v8411_v12  ;;  %v4383_v4 = vld [vmem:[%s12378_s3 + $0xea8] sm:$0xff]  ;;  %v8556_v61 = vcombine.high %v4127_v51, %v4135_v62 }
 0x353   : > { %7404 = vmatprep.subr.bf16.mxu0 %v8396_v16  ;;  %v4391_v55 = vld [vmem:[%s12378_s3 + $0xee8] sm:$0xff] }
 0x354   : > { %7444 = vmatpush1.bf16.msra.mxu1 %v8667_v10  ;;  %v8812_v57 = vcombine.high %v4383_v4, %v4391_v55  ;;  %v4119_v12 = vld [vmem:[%s12378_s3 + $0x668] sm:$0xff]  ;;  %v8811_v14 = vcombine.low %v4383_v4, %v4391_v55  ;;  %v4016_v55 = vld [vmem:[%s12378_s3 + $0x330] sm:$0xff] }
 0x355   : > { %7445 = vmatprep.subr.bf16.mxu1 %v8652_v25  ;;  %v4367_v10 = vld [vmem:[%s12378_s3 + $0xe28] sm:$0xff]  ;;  %v8555_v25 = vcombine.low %v4127_v51, %v4135_v62  ;;  %v8540_v15 = vcombine.high %v4111_v6, %v4119_v12 }
 0x356   : > { %7405 = vmatpush1.bf16.msra.mxu0 %v8395_v20  ;;  %v4375_v16 = vld [vmem:[%s12378_s3 + $0xe68] sm:$0xff] }
 0x357   : > { %7406 = vmatprep.subr.bf16.mxu0 %v8380_v22  ;;  %v8796_v17 = vcombine.high %v4367_v10, %v4375_v16  ;;  %v4103_v20 = vld [vmem:[%s12378_s3 + $0x5e8] sm:$0xff]  ;;  %v8795_v37 = vcombine.low %v4367_v10, %v4375_v16  ;;  %v4000_v16 = vld [vmem:[%s12378_s3 + $0x2b0] sm:$0xff] }
 0x358   : > { %7446 = vmatpush1.bf16.msra.mxu1 %v8651_v21  ;;  %v4351_v21 = vld [vmem:[%s12378_s3 + $0xda8] sm:$0xff]  ;;  %v8524_v28 = vcombine.high %v4095_v18, %v4103_v20 }
 0x359   : > { %7447 = vmatprep.subr.bf16.mxu1 %v8636_v27  ;;  %v4359_v22 = vld [vmem:[%s12378_s3 + $0xde8] sm:$0xff]  ;;  %v8539_v27 = vcombine.low %v4111_v6, %v4119_v12 }
 0x35a   : > { %7407 = vmatpush1.bf16.msra.mxu0 %v8379_v31  ;;  %v8780_v29 = vcombine.high %v4351_v21, %v4359_v22  ;;  %v4087_v31 = vld [vmem:[%s12378_s3 + $0x568] sm:$0xff]  ;;  %v8779_v36 = vcombine.low %v4351_v21, %v4359_v22 }
 0x35b   : > { %7408 = vmatprep.subr.bf16.mxu0 %v8364_v33  ;;  %v4343_v33 = vld [vmem:[%s12378_s3 + $0xd68] sm:$0xff]  ;;  %v8508_v38 = vcombine.high %v4079_v30, %v4087_v31 }
 0x35c   : > { %7448 = vmatpush1.bf16.msra.mxu1 %v8635_v41  ;;  %v4335_v41 = vld [vmem:[%s12378_s3 + $0xd28] sm:$0xff] }
 0x35d   : > { %7449 = vmatprep.subr.bf16.mxu1 %v8620_v34  ;;  %v8523_v34 = vcombine.low %v4095_v18, %v4103_v20  ;;  %v8764_v39 = vcombine.high %v4335_v41, %v4343_v33  ;;  %v4063_v5 = vld [vmem:[%s12378_s3 + $0x4a8] sm:$0xff]  ;;  %v8763_v45 = vcombine.low %v4335_v41, %v4343_v33 }
 0x35e   : > { %7409 = vmatpush1.bf16.msra.mxu0 %v8363_v7  ;;  %v4071_v7 = vld [vmem:[%s12378_s3 + $0x4e8] sm:$0xff] }
 0x35f   : > { %7410 = vmatprep.subr.bf16.mxu0 %v8348_v43  ;;  %v4327_v43 = vld [vmem:[%s12378_s3 + $0xce8] sm:$0xff]  ;;  %v8492_v49 = vcombine.high %v4063_v5, %v4071_v7 }
 0x360   : > { %7450 = vmatpush1.bf16.msra.mxu1 %v8619_v11  ;;  %v4319_v11 = vld [vmem:[%s12378_s3 + $0xca8] sm:$0xff] }
 0x361   : > { %7451 = vmatprep.subr.bf16.mxu1 %v8604_v44  ;;  %v8507_v44 = vcombine.low %v4079_v30, %v4087_v31  ;;  %v8748_v46 = vcombine.high %v4319_v11, %v4327_v43  ;;  %v4047_v47 = vld [vmem:[%s12378_s3 + $0x428] sm:$0xff]  ;;  %v8747_v50 = vcombine.low %v4319_v11, %v4327_v43  ;;  %v3984_v30 = vld [vmem:[%s12378_s3 + $0x230] sm:$0xff] }
 0x362   : > { %7411 = vmatpush1.bf16.msra.mxu0 %v8347_v48  ;;  %v4055_v48 = vld [vmem:[%s12378_s3 + $0x468] sm:$0xff]  ;;  %v3992_v31 = vld [vmem:[%s12378_s3 + $0x270] sm:$0xff] }
 0x363   : > { %7412 = vmatprep.subr.bf16.mxu0 %v8588_v53  ;;  %v4311_v53 = vld [vmem:[%s12378_s3 + $0xc68] sm:$0xff]  ;;  %v8476_v26 = vcombine.high %v4047_v47, %v4055_v48  ;;  %v8414_v43 = vcombine.high %v3984_v30, %v3992_v31 }
 0x364   : > { %7452 = vmatpush1.bf16.msra.mxu1 %v8603_v40  ;;  %v4303_v40 = vld [vmem:[%s12378_s3 + $0xc28] sm:$0xff] }
 0x365   : > { %7453 = vmatprep.subr.bf16.mxu1 %v8844_v59  ;;  %v8491_v59 = vcombine.low %v4063_v5, %v4071_v7  ;;  %v8732_v32 = vcombine.high %v4303_v40, %v4311_v53  ;;  %v8731_v51 = vcombine.low %v4303_v40, %v4311_v53  ;;  %v8413_v40 = vcombine.low %v3984_v30, %v3992_v31 }
 0x366   : > { %7413 = vmatpush2.bf16.msra.mxu0 %v8587_v52  ;;  %v4040_v52 = vld [vmem:[%s12378_s3 + $0x3f0] sm:$0xff] }
 0x367   : > { %7414 = vmatprep.subr.bf16.mxu0 %v8572_v56  ;;  %v4296_v56 = vld [vmem:[%s12378_s3 + $0xbf0] sm:$0xff]  ;;  %v8462_v62 = vcombine.high %v4032_v42, %v4040_v52 }
 0x368   : > { %7454 = vmatpush2.bf16.msra.mxu1 %v8843_v54  ;;  %v4288_v54 = vld [vmem:[%s12378_s3 + $0xbb0] sm:$0xff] }
 0x369   : > { %7455 = vmatprep.subr.bf16.mxu1 %v8828_v58  ;;  %v8475_v58 = vcombine.low %v4047_v47, %v4055_v48  ;;  %v8718_v4 = vcombine.high %v4288_v54, %v4296_v56  ;;  %v8717_v6 = vcombine.low %v4288_v54, %v4296_v56  ;;  %v4224_v47 = vld [vmem:[%s12378_s3 + $0x9b0] sm:$0xff] }
 0x36a   : > { %7415 = vmatpush2.bf16.msra.mxu0 %v8571_v9  ;;  %v4024_v9 = vld [vmem:[%s12378_s3 + $0x370] sm:$0xff] }
 0x36b   : > { %7416 = vmatprep.subr.bf16.mxu0 %v8556_v61  ;;  %v4280_v61 = vld [vmem:[%s12378_s3 + $0xb70] sm:$0xff]  ;;  %v8446_v12 = vcombine.high %v4016_v55, %v4024_v9  ;;  %v8445_v20 = vcombine.low %v4016_v55, %v4024_v9 }
 0x36c   : > { %7456 = vmatpush2.bf16.msra.mxu1 %v8827_v63  ;;  %v4272_v63 = vld [vmem:[%s12378_s3 + $0xb30] sm:$0xff] }
 0x36d   : > { %7457 = vmatprep.subr.bf16.mxu1 %v8812_v57  ;;  %v8461_v57 = vcombine.low %v4032_v42, %v4040_v52  ;;  %v8702_v10 = vcombine.high %v4272_v63, %v4280_v61  ;;  %v4232_v48 = vld [vmem:[%s12378_s3 + $0x9f0] sm:$0xff] }
 0x36e   : > { %7417 = vmatpush2.bf16.msra.mxu0 %v8555_v25  ;;  %v4008_v25 = vld [vmem:[%s12378_s3 + $0x2f0] sm:$0xff]  ;;  %v8653_v56 = vcombine.low %v4224_v47, %v4232_v48 }
 0x36f   : > { %7418 = vmatprep.subr.bf16.mxu0 %v8540_v15  ;;  %v4256_v15 = vld [vmem:[%s12378_s3 + $0xab0] sm:$0xff] }
 0x370   : > { %7458 = vmatpush2.bf16.msra.mxu1 %v8811_v14  ;;  %v4208_v42 = vld [vmem:[%s12378_s3 + $0x930] sm:$0xff] }
 0x371   : > { %7459 = vmatprep.subr.bf16.mxu1 %v8796_v17  ;;  %v4264_v17 = vld [vmem:[%s12378_s3 + $0xaf0] sm:$0xff] }
 0x372   : > { %7419 = vmatpush2.bf16.msra.mxu0 %v8539_v27  ;;  %v8701_v27 = vcombine.low %v4272_v63, %v4280_v61  ;;  %v8685_v11 = vcombine.low %v4256_v15, %v4264_v17  ;;  %v4216_v52 = vld [vmem:[%s12378_s3 + $0x970] sm:$0xff] }
 0x373   : > { %7420 = vmatprep.subr.bf16.mxu0 %v8524_v28  ;;  %v4192_v55 = vld [vmem:[%s12378_s3 + $0x8b0] sm:$0xff]  ;;  %v8637_v61 = vcombine.low %v4208_v42, %v4216_v52 }
 0x374   : > { %7460 = vmatpush2.bf16.msra.mxu1 %v8795_v37  ;;  %v8430_v37 = vcombine.high %v4000_v16, %v4008_v25  ;;  %v4200_v9 = vld [vmem:[%s12378_s3 + $0x8f0] sm:$0xff] }
 0x375   : > { %7461 = vmatprep.subr.bf16.mxu1 %v8780_v29  ;;  %v8686_v29 = vcombine.high %v4256_v15, %v4264_v17  ;;  %v8621_v15 = vcombine.low %v4192_v55, %v4200_v9 }
 0x376   : > { %7421 = vmatpush2.bf16.msra.mxu0 %v8523_v34  ;;  %v4240_v34 = vld [vmem:[%s12378_s3 + $0xa30] sm:$0xff] }
 0x377   : > { %7422 = vmatprep.subr.bf16.mxu0 %v8508_v38 }
 0x378   : > { %7462 = vmatpush2.bf16.msra.mxu1 %v8779_v36  ;;  %v4248_v36 = vld [vmem:[%s12378_s3 + $0xa70] sm:$0xff] }
 0x379   : > { %7463 = vmatprep.subr.bf16.mxu1 %v8764_v39  ;;  %v8429_v39 = vcombine.low %v4000_v16, %v4008_v25  ;;  %v8669_v53 = vcombine.low %v4240_v34, %v4248_v36  ;;  %v4176_v16 = vld [vmem:[%s12378_s3 + $0x830] sm:$0xff] }
 0x37a   : > { %7423 = vmatpush2.bf16.msra.mxu0 %v8507_v44  ;;  %v4184_v25 = vld [vmem:[%s12378_s3 + $0x870] sm:$0xff] }
 0x37b   : > { %7424 = vmatprep.subr.bf16.mxu0 %v8492_v49  ;;  %v3968_v49 = vld [vmem:[%s12378_s3 + $0x1b0] sm:$0xff] }
 0x37c   : > { %7464 = vmatpush2.bf16.msra.mxu1 %v8763_v45  ;;  %v8670_v45 = vcombine.high %v4240_v34, %v4248_v36  ;;  %v4152_v34 = vld [vmem:[%s12378_s3 + $0x770] sm:$0xff] }
 0x37d   : > { %7465 = vmatprep.subr.bf16.mxu1 %v8748_v46  ;;  %v3976_v46 = vld [vmem:[%s12378_s3 + $0x1f0] sm:$0xff] }
 0x37e   : > { %7425 = vmatpush2.bf16.msra.mxu0 %v8491_v59  ;;  %v8398_v59 = vcombine.high %v3968_v49, %v3976_v46  ;;  %v8397_v54 = vcombine.low %v3968_v49, %v3976_v46  ;;  %v4400_v36 = vld [vmem:[%s12378_s3 + $0xf30] sm:$0xff] }
 0x37f   : > { %7426 = vmatprep.subr.bf16.mxu0 %v8476_v26  ;;  %v3952_v26 = vld [vmem:[%s12378_s3 + $0x130] sm:$0xff] }
 0x380   : > { %7466 = vmatpush2.bf16.msra.mxu1 %v8747_v50  ;;  %v8654_v50 = vcombine.high %v4224_v47, %v4232_v48  ;;  %v4384_v49 = vld [vmem:[%s12378_s3 + $0xeb0] sm:$0xff] }
 0x381   : > { %7467 = vmatprep.subr.bf16.mxu1 %v8732_v32  ;;  %v3960_v32 = vld [vmem:[%s12378_s3 + $0x170] sm:$0xff] }
 0x382   : > { %7427 = vmatpush2.bf16.msra.mxu0 %v8475_v58  ;;  %v8382_v58 = vcombine.high %v3952_v26, %v3960_v32  ;;  %v8381_v63 = vcombine.low %v3952_v26, %v3960_v32  ;;  %v4392_v46 = vld [vmem:[%s12378_s3 + $0xef0] sm:$0xff] }
 0x383   : > { %7478 = vmatprep.subr.bf16.mxu0 %v8462_v62  ;;  %v3936_v62 = vld [vmem:[%s12378_s3 + $0xb0] sm:$0xff] }
 0x384   : > { %7468 = vmatpush2.bf16.msra.mxu1 %v8731_v51  ;;  %v8638_v51 = vcombine.high %v4208_v42, %v4216_v52  ;;  %v4368_v26 = vld [vmem:[%s12378_s3 + $0xe30] sm:$0xff]  ;;  %v8813_v52 = vcombine.low %v4384_v49, %v4392_v46 }
 0x385   : > { %7519 = vmatprep.subr.bf16.mxu1 %v8718_v4  ;;  %v7184_v14 = vpop.f32.mrf.mxu0  ;;  %7429 = vmatmul.mubr.bf16.vlgmr.msra.gmra.mxu0 %v10908_v3  ;;  %v3944_v4 = vld [vmem:[%s12378_s3 + $0xf0] sm:$0xff] }
 0x386   : > { %7479 = vmatpush1.bf16.msra.mxu0 %v8461_v57  ;;  %7510 = vmatprep.mubr.bf16.mxu0 %v10696_v19  ;;  %v8366_v57 = vcombine.high %v3936_v62, %v3944_v4  ;;  %v4376_v32 = vld [vmem:[%s12378_s3 + $0xe70] sm:$0xff] }
 0x387   : > { %v7225_v18 = vpop.f32.mrf.mxu1  ;;  %7470 = vmatmul.mubr.bf16.vlgmr.msra.gmra.mxu1 %v10918_v1  ;;  %v7186_v22 = vpop.f32.mrf.mxu0  ;;  %7480 = vmatprep.subr.bf16.mxu0 %v8446_v12  ;;  %v3920_v12 = vld [vmem:[%s12378_s3 + $0x30] sm:$0xff] }
 0x388   : > { %v11962_v21 = vadd.f32 %v7225_v18, %v7184_v14  ;;  %7520 = vmatpush1.bf16.msra.mxu1 %v8717_v6  ;;  %7551 = vmatprep.mubr.bf16.mxu1 %v10705_v23  ;;  %v8622_v6 = vcombine.high %v4192_v55, %v4200_v9  ;;  %v8365_v14 = vcombine.low %v3936_v62, %v3944_v4  ;;  %v4352_v62 = vld [vmem:[%s12378_s3 + $0xdb0] sm:$0xff] }
 0x389   : > { %v7227_v28 = vpop.f32.mrf.mxu1  ;;  %7521 = vmatprep.subr.bf16.mxu1 %v8702_v10  ;;  %v7188_v33 = vpop.f32.mrf.mxu0  ;;  %v3928_v10 = vld [vmem:[%s12378_s3 + $0x70] sm:$0xff]  ;;  %v8606_v18 = vcombine.high %v4176_v16, %v4184_v25  ;;  %v8797_v9 = vcombine.low %v4368_v26, %v4376_v32 }
 0x38a   : > { %v11971_v41 = vadd.f32 %v7227_v28, %v7186_v22  ;;  %7481 = vmatpush1.bf16.msra.mxu0 %v8445_v20  ;;  %v8350_v17 = vcombine.high %v3920_v12, %v3928_v10  ;;  %v4160_v20 = vld [vmem:[%s12378_s3 + $0x7b0] sm:$0xff]  ;;  %v8349_v28 = vcombine.low %v3920_v12, %v3928_v10 }
 0x38b   : > { %v7229_v38 = vpop.f32.mrf.mxu1  ;;  %v7189_v7 = vpop.f32.mrf.mxu0  ;;  %7482 = vmatprep.subr.bf16.mxu0 %v8430_v37  ;;  %v4168_v22 = vld [vmem:[%s12378_s3 + $0x7f0] sm:$0xff] }
 0x38c   : > { %v7675_v5 = vcombine.low %v11962_v21, %v11971_v41  ;;  %7522 = vmatpush1.bf16.msra.mxu1 %v8701_v27  ;;  %v4416_v27 = vld [vmem:[%s12378_s3 + $0xfb0] sm:$0xff]  ;;  %v8590_v30 = vcombine.high %v4160_v20, %v4168_v22 }
 0x38d   : > { %v7230_v44 = vpop.f32.mrf.mxu1  ;;  %7523 = vmatprep.subr.bf16.mxu1 %v8686_v29  ;;  %v4424_v37 = vld [vmem:[%s12378_s3 + $0xff0] sm:$0xff]  ;;  %v8605_v29 = vcombine.low %v4176_v16, %v4184_v25 }
 0x38e   : > { %7483 = vmatpush1.bf16.msra.mxu0 %v8429_v39  ;;  %v8846_v31 = vcombine.high %v4416_v27, %v4424_v37  ;;  %v4144_v33 = vld [vmem:[%s12378_s3 + $0x730] sm:$0xff]  ;;  %v8589_v39 = vcombine.low %v4160_v20, %v4168_v22  ;;  %v8845_v7 = vcombine.low %v4416_v27, %v4424_v37 }
 0x38f   : > { %7484 = vmatprep.subr.bf16.mxu0 %v8414_v43  ;;  %v4408_v38 = vld [vmem:[%s12378_s3 + $0xf70] sm:$0xff]  ;;  %v8573_v47 = vcombine.low %v4144_v33, %v4152_v34 }
 0x390   : > { %7524 = vmatpush1.bf16.msra.mxu1 %v8685_v11  ;;  %v8574_v11 = vcombine.high %v4144_v33, %v4152_v34  ;;  %v8830_v43 = vcombine.high %v4400_v36, %v4408_v38  ;;  %v4128_v44 = vld [vmem:[%s12378_s3 + $0x6b0] sm:$0xff]  ;;  %v8829_v48 = vcombine.low %v4400_v36, %v4408_v38 }
 0x391   : > { %7525 = vmatprep.subr.bf16.mxu1 %v8670_v45  ;;  %v4136_v45 = vld [vmem:[%s12378_s3 + $0x6f0] sm:$0xff] }
 0x392   : > { %7485 = vmatpush1.bf16.msra.mxu0 %v8413_v40  ;;  %v8558_v40 = vcombine.high %v4128_v44, %v4136_v45  ;;  %v8557_v42 = vcombine.low %v4128_v44, %v4136_v45  ;;  %v4360_v4 = vld [vmem:[%s12378_s3 + $0xdf0] sm:$0xff]  ;;  %v4289_v44 = vld [vmem:[%s12378_s3 + $0xbb8] sm:$0xff] }
 0x393   : > { %7486 = vmatprep.subr.bf16.mxu0 %v8398_v59  ;;  %v4112_v59 = vld [vmem:[%s12378_s3 + $0x630] sm:$0xff]  ;;  %v8781_v25 = vcombine.low %v4352_v62, %v4360_v4  ;;  %v4297_v45 = vld [vmem:[%s12378_s3 + $0xbf8] sm:$0xff] }
 0x394   : > { %7526 = vmatpush1.bf16.msra.mxu1 %v8669_v53  ;;  %v8814_v53 = vcombine.high %v4384_v49, %v4392_v46  ;;  %v4336_v12 = vld [vmem:[%s12378_s3 + $0xd30] sm:$0xff] }
 0x395   : > { %7527 = vmatprep.subr.bf16.mxu1 %v8654_v50  ;;  %v4120_v50 = vld [vmem:[%s12378_s3 + $0x670] sm:$0xff] }
 0x396   : > { %7487 = vmatpush1.bf16.msra.mxu0 %v8397_v54  ;;  %v8542_v54 = vcombine.high %v4112_v59, %v4120_v50  ;;  %v8541_v55 = vcombine.low %v4112_v59, %v4120_v50  ;;  %v4344_v10 = vld [vmem:[%s12378_s3 + $0xd70] sm:$0xff]  ;;  %v4273_v59 = vld [vmem:[%s12378_s3 + $0xb38] sm:$0xff] }
 0x397   : > { %7488 = vmatprep.subr.bf16.mxu0 %v8382_v58  ;;  %v4096_v58 = vld [vmem:[%s12378_s3 + $0x5b0] sm:$0xff]  ;;  %v8765_v37 = vcombine.low %v4336_v12, %v4344_v10  ;;  %v4281_v50 = vld [vmem:[%s12378_s3 + $0xb78] sm:$0xff] }
 0x398   : > { %7528 = vmatpush1.bf16.msra.mxu1 %v8653_v56  ;;  %v8798_v56 = vcombine.high %v4368_v26, %v4376_v32  ;;  %v4320_v20 = vld [vmem:[%s12378_s3 + $0xcb0] sm:$0xff]  ;;  %v8719_v32 = vcombine.low %v4289_v44, %v4297_v45 }
 0x399   : > { %7529 = vmatprep.subr.bf16.mxu1 %v8638_v51  ;;  %v4104_v51 = vld [vmem:[%s12378_s3 + $0x5f0] sm:$0xff] }
 0x39a   : > { %7489 = vmatpush1.bf16.msra.mxu0 %v8381_v63  ;;  %v8526_v63 = vcombine.high %v4096_v58, %v4104_v51  ;;  %v8525_v16 = vcombine.low %v4096_v58, %v4104_v51  ;;  %v4328_v22 = vld [vmem:[%s12378_s3 + $0xcf0] sm:$0xff]  ;;  %v4257_v51 = vld [vmem:[%s12378_s3 + $0xab8] sm:$0xff] }
 0x39b   : > { %7490 = vmatprep.subr.bf16.mxu0 %v8366_v57  ;;  %v4080_v57 = vld [vmem:[%s12378_s3 + $0x530] sm:$0xff]  ;;  %v8749_v38 = vcombine.low %v4320_v20, %v4328_v22 }
 0x39c   : > { %7530 = vmatpush1.bf16.msra.mxu1 %v8637_v61  ;;  %v8782_v61 = vcombine.high %v4352_v62, %v4360_v4  ;;  %v4304_v33 = vld [vmem:[%s12378_s3 + $0xc30] sm:$0xff]  ;;  %v4265_v62 = vld [vmem:[%s12378_s3 + $0xaf8] sm:$0xff] }
 0x39d   : > { %7531 = vmatprep.subr.bf16.mxu1 %v8622_v6  ;;  %v4088_v6 = vld [vmem:[%s12378_s3 + $0x570] sm:$0xff] }
 0x39e   : > { %7491 = vmatpush1.bf16.msra.mxu0 %v8365_v14  ;;  %v8510_v14 = vcombine.high %v4080_v57, %v4088_v6  ;;  %v8509_v27 = vcombine.low %v4080_v57, %v4088_v6  ;;  %v4312_v34 = vld [vmem:[%s12378_s3 + $0xc70] sm:$0xff] }
 0x39f   : > { %7492 = vmatprep.subr.bf16.mxu0 %v8350_v17  ;;  %v4064_v17 = vld [vmem:[%s12378_s3 + $0x4b0] sm:$0xff]  ;;  %v8733_v46 = vcombine.low %v4304_v33, %v4312_v34 }
 0x3a0   : > { %7532 = vmatpush1.bf16.msra.mxu1 %v8621_v15  ;;  %v8766_v15 = vcombine.high %v4336_v12, %v4344_v10  ;;  %v8688_v12 = vcombine.high %v4257_v51, %v4265_v62  ;;  %v3985_v10 = vld [vmem:[%s12378_s3 + $0x238] sm:$0xff] }
 0x3a1   : > { %7533 = vmatprep.subr.bf16.mxu1 %v8606_v18  ;;  %v4072_v18 = vld [vmem:[%s12378_s3 + $0x4f0] sm:$0xff] }
 0x3a2   : > { %7493 = vmatpush1.bf16.msra.mxu0 %v8349_v28  ;;  %v8494_v28 = vcombine.high %v4064_v17, %v4072_v18  ;;  %v8493_v36 = vcombine.low %v4064_v17, %v4072_v18  ;;  %v4249_v17 = vld [vmem:[%s12378_s3 + $0xa78] sm:$0xff] }
 0x3a3   : > { %7494 = vmatprep.subr.bf16.mxu0 %v8590_v30  ;;  %v4048_v30 = vld [vmem:[%s12378_s3 + $0x430] sm:$0xff] }
 0x3a4   : > { %7534 = vmatpush1.bf16.msra.mxu1 %v8605_v29  ;;  %v8750_v29 = vcombine.high %v4320_v20, %v4328_v22 }
 0x3a5   : > { %7535 = vmatprep.subr.bf16.mxu1 %v8846_v31  ;;  %v4056_v31 = vld [vmem:[%s12378_s3 + $0x470] sm:$0xff] }
 0x3a6   : > { %7495 = vmatpush2.bf16.msra.mxu0 %v8589_v39  ;;  %v8478_v39 = vcombine.high %v4048_v30, %v4056_v31  ;;  %v8477_v49 = vcombine.low %v4048_v30, %v4056_v31  ;;  %v3969_v30 = vld [vmem:[%s12378_s3 + $0x1b8] sm:$0xff]  ;;  %v12188_v31 = vrot.slane %v7675_v5, %v9077_v35 }
 0x3a7   : > { %7496 = vmatprep.subr.bf16.mxu0 %v8574_v11  ;;  %v4033_v11 = vld [vmem:[%s12378_s3 + $0x3b8] sm:$0xff] }
 0x3a8   : > { %7536 = vmatpush2.bf16.msra.mxu1 %v8845_v7  ;;  %v8734_v7 = vcombine.high %v4304_v33, %v4312_v34  ;;  %v4225_v34 = vld [vmem:[%s12378_s3 + $0x9b8] sm:$0xff] }
 0x3a9   : > { %7537 = vmatprep.subr.bf16.mxu1 %v8830_v43  ;;  %v4041_v43 = vld [vmem:[%s12378_s3 + $0x3f8] sm:$0xff] }
 0x3aa   : > { %7497 = vmatpush2.bf16.msra.mxu0 %v8573_v47  ;;  %v8464_v47 = vcombine.high %v4033_v11, %v4041_v43  ;;  %v8463_v26 = vcombine.low %v4033_v11, %v4041_v43  ;;  %v3961_v11 = vld [vmem:[%s12378_s3 + $0x178] sm:$0xff] }
 0x3ab   : > { %7498 = vmatprep.subr.bf16.mxu0 %v8558_v40  ;;  %v4017_v40 = vld [vmem:[%s12378_s3 + $0x338] sm:$0xff] }
 0x3ac   : > { %7538 = vmatpush2.bf16.msra.mxu1 %v8829_v48  ;;  %v8720_v48 = vcombine.high %v4289_v44, %v4297_v45  ;;  %v4209_v43 = vld [vmem:[%s12378_s3 + $0x938] sm:$0xff] }
 0x3ad   : > { %7539 = vmatprep.subr.bf16.mxu1 %v8814_v53  ;;  %v4025_v53 = vld [vmem:[%s12378_s3 + $0x378] sm:$0xff] }
 0x3ae   : > { %7499 = vmatpush2.bf16.msra.mxu0 %v8557_v42  ;;  %v8448_v42 = vcombine.high %v4017_v40, %v4025_v53  ;;  %v4217_v44 = vld [vmem:[%s12378_s3 + $0x978] sm:$0xff] }
 0x3af   : > { %7500 = vmatprep.subr.bf16.mxu0 %v8542_v54  ;;  %v4001_v54 = vld [vmem:[%s12378_s3 + $0x2b8] sm:$0xff] }
 0x3b0   : > { %7540 = vmatpush2.bf16.msra.mxu1 %v8813_v52  ;;  %v8704_v52 = vcombine.high %v4273_v59, %v4281_v50 }
 0x3b1   : > { %7541 = vmatprep.subr.bf16.mxu1 %v8798_v56  ;;  %v4009_v56 = vld [vmem:[%s12378_s3 + $0x2f8] sm:$0xff] }
 0x3b2   : > { %7501 = vmatpush2.bf16.msra.mxu0 %v8541_v55  ;;  %v8447_v55 = vcombine.low %v4017_v40, %v4025_v53  ;;  %v8432_v57 = vcombine.high %v4001_v54, %v4009_v56  ;;  %v8431_v20 = vcombine.low %v4001_v54, %v4009_v56  ;;  %v3945_v40 = vld [vmem:[%s12378_s3 + $0xf8] sm:$0xff] }
 0x3b3   : > { %7502 = vmatprep.subr.bf16.mxu0 %v8526_v63  ;;  %v4193_v53 = vld [vmem:[%s12378_s3 + $0x8b8] sm:$0xff] }
 0x3b4   : > { %7542 = vmatpush2.bf16.msra.mxu1 %v8797_v9  ;;  %v3929_v54 = vld [vmem:[%s12378_s3 + $0x78] sm:$0xff] }
 0x3b5   : > { %7543 = vmatprep.subr.bf16.mxu1 %v8782_v61  ;;  %v8703_v61 = vcombine.low %v4273_v59, %v4281_v50  ;;  %v4201_v59 = vld [vmem:[%s12378_s3 + $0x8f8] sm:$0xff] }
 0x3b6   : > { %7503 = vmatpush2.bf16.msra.mxu0 %v8525_v16  ;;  %v3993_v16 = vld [vmem:[%s12378_s3 + $0x278] sm:$0xff] }
 0x3b7   : > { %7504 = vmatprep.subr.bf16.mxu0 %v8510_v14  ;;  %v4177_v56 = vld [vmem:[%s12378_s3 + $0x838] sm:$0xff] }
 0x3b8   : > { %7544 = vmatpush2.bf16.msra.mxu1 %v8781_v25 }
 0x3b9   : > { %7545 = vmatprep.subr.bf16.mxu1 %v8766_v15  ;;  %v4241_v15 = vld [vmem:[%s12378_s3 + $0xa38] sm:$0xff] }
 0x3ba   : > { %7505 = vmatpush2.bf16.msra.mxu0 %v8509_v27  ;;  %v8671_v21 = vcombine.low %v4241_v15, %v4249_v17 }
 0x3bb   : > { %7506 = vmatprep.subr.bf16.mxu0 %v8494_v28 }
 0x3bc   : > { %7546 = vmatpush2.bf16.msra.mxu1 %v8765_v37  ;;  %v8416_v37 = vcombine.high %v3985_v10, %v3993_v16 }
 0x3bd   : > { %7547 = vmatprep.subr.bf16.mxu1 %v8750_v29  ;;  %v8672_v29 = vcombine.high %v4241_v15, %v4249_v17  ;;  %v4401_v15 = vld [vmem:[%s12378_s3 + $0xf38] sm:$0xff] }
 0x3be   : > { %7507 = vmatpush2.bf16.msra.mxu0 %v8493_v36  ;;  %v4233_v36 = vld [vmem:[%s12378_s3 + $0x9f8] sm:$0xff] }
 0x3bf   : > { %7508 = vmatprep.subr.bf16.mxu0 %v8478_v39  ;;  %v8656_v5 = vcombine.high %v4225_v34, %v4233_v36  ;;  %v4409_v17 = vld [vmem:[%s12378_s3 + $0xf78] sm:$0xff] }
 0x3c0   : > { %7548 = vmatpush2.bf16.msra.mxu1 %v8749_v38  ;;  %v8415_v38 = vcombine.low %v3985_v10, %v3993_v16 }
 0x3c1   : > { %7549 = vmatprep.subr.bf16.mxu1 %v8734_v7  ;;  %v3953_v7 = vld [vmem:[%s12378_s3 + $0x138] sm:$0xff] }
 0x3c2   : > { %7509 = vmatpush2.bf16.msra.mxu0 %v8477_v49  ;;  %v8655_v49 = vcombine.low %v4225_v34, %v4233_v36  ;;  %v8383_v50 = vcombine.low %v3953_v7, %v3961_v11 }
 0x3c3   : > { %7560 = vmatprep.subr.bf16.mxu0 %v8464_v47  ;;  %v8640_v47 = vcombine.high %v4209_v43, %v4217_v44 }
 0x3c4   : > { %7550 = vmatpush2.bf16.msra.mxu1 %v8733_v46  ;;  %v8384_v46 = vcombine.high %v3953_v7, %v3961_v11 }
 0x3c5   : > { %7601 = vmatprep.subr.bf16.mxu1 %v8720_v48  ;;  %v7266_v58 = vpop.f32.mrf.mxu0  ;;  %7511 = vmatmul.mubr.bf16.vlgmr.msra.gmra.mxu0 %v10908_v3  ;;  %v3937_v48 = vld [vmem:[%s12378_s3 + $0xb8] sm:$0xff] }
 0x3c6   : > { %7561 = vmatpush1.bf16.msra.mxu0 %v8463_v26  ;;  %7592 = vmatprep.mubr.bf16.mxu0 %v10696_v19  ;;  %v8687_v19 = vcombine.low %v4257_v51, %v4265_v62  ;;  %v8639_v26 = vcombine.low %v4209_v43, %v4217_v44  ;;  %v8367_v51 = vcombine.low %v3937_v48, %v3945_v40 }
 0x3c7   : > { %v7307_v4 = vpop.f32.mrf.mxu1  ;;  %7552 = vmatmul.mubr.bf16.vlgmr.msra.gmra.mxu1 %v10918_v1  ;;  %v7268_v63 = vpop.f32.mrf.mxu0  ;;  %7562 = vmatprep.subr.bf16.mxu0 %v8448_v42  ;;  %v8624_v42 = vcombine.high %v4193_v53, %v4201_v59  ;;  %v8623_v62 = vcombine.low %v4193_v53, %v4201_v59 }
 0x3c8   : > { %v7308_v9 = vadd.f32 %v7307_v4, %v7266_v58  ;;  %7602 = vmatpush1.bf16.msra.mxu1 %v8719_v32  ;;  %7633 = vmatprep.mubr.bf16.mxu1 %v10705_v23  ;;  %v3977_v23 = vld [vmem:[%s12378_s3 + $0x1f8] sm:$0xff]  ;;  %v8368_v32 = vcombine.high %v3937_v48, %v3945_v40 }
 0x3c9   : > { %v7309_v6 = vpop.f32.mrf.mxu1  ;;  %7603 = vmatprep.subr.bf16.mxu1 %v8704_v52  ;;  %v7270_v14 = vpop.f32.mrf.mxu0  ;;  %v8400_v41 = vcombine.high %v3969_v30, %v3977_v23  ;;  %v8399_v45 = vcombine.low %v3969_v30, %v3977_v23  ;;  %v3921_v52 = vld [vmem:[%s12378_s3 + $0x38] sm:$0xff]  ;;  %v8831_v23 = vcombine.low %v4401_v15, %v4409_v17 }
 0x3ca   : > { %v7310_v25 = vadd.f32 %v7309_v6, %v7268_v63  ;;  %7563 = vmatpush1.bf16.msra.mxu0 %v8447_v55  ;;  %v4185_v58 = vld [vmem:[%s12378_s3 + $0x878] sm:$0xff]  ;;  %v8352_v4 = vcombine.high %v3921_v52, %v3929_v54  ;;  %v8351_v6 = vcombine.low %v3921_v52, %v3929_v54 }
 0x3cb   : > { %v7311_v18 = vpop.f32.mrf.mxu1  ;;  %v7271_v27 = vpop.f32.mrf.mxu0  ;;  %7564 = vmatprep.subr.bf16.mxu0 %v8432_v57  ;;  %v8608_v55 = vcombine.high %v4177_v56, %v4185_v58  ;;  %v4169_v63 = vld [vmem:[%s12378_s3 + $0x7f8] sm:$0xff] }
 0x3cc   : > { %v7676_v22 = vcombine.low %v7308_v9, %v7310_v25  ;;  %7604 = vmatpush1.bf16.msra.mxu1 %v8703_v61  ;;  %v4161_v9 = vld [vmem:[%s12378_s3 + $0x7b8] sm:$0xff]  ;;  %v8832_v27 = vcombine.high %v4401_v15, %v4409_v17 }
 0x3cd   : > { %v7312_v28 = vpop.f32.mrf.mxu1  ;;  %7605 = vmatprep.subr.bf16.mxu1 %v8688_v12  ;;  %v4417_v61 = vld [vmem:[%s12378_s3 + $0xfb8] sm:$0xff]  ;;  %v8607_v12 = vcombine.low %v4177_v56, %v4185_v58  ;;  %v8592_v10 = vcombine.high %v4161_v9, %v4169_v63  ;;  %v8591_v18 = vcombine.low %v4161_v9, %v4169_v63 }
 0x3ce   : > { %v12191_v33 = vrot.slane %v7676_v22, %v9077_v35  ;;  %7565 = vmatpush1.bf16.msra.mxu0 %v8431_v20  ;;  %v4425_v57 = vld [vmem:[%s12378_s3 + $0xff8] sm:$0xff] }
 0x3cf   : > { %7566 = vmatprep.subr.bf16.mxu0 %v8416_v37  ;;  %v8848_v16 = vcombine.high %v4417_v61, %v4425_v57  ;;  %v4145_v25 = vld [vmem:[%s12378_s3 + $0x738] sm:$0xff]  ;;  %v8847_v20 = vcombine.low %v4417_v61, %v4425_v57 }
 0x3d0   : > { %v7691_v39 = vcombine.low %v12188_v31, %v12191_v33  ;;  %7606 = vmatpush1.bf16.msra.mxu1 %v8687_v19  ;;  %v4153_v14 = vld [vmem:[%s12378_s3 + $0x778] sm:$0xff] }
 0x3d1   : > { %7607 = vmatprep.subr.bf16.mxu1 %v8672_v29  ;;  %v8576_v22 = vcombine.high %v4145_v25, %v4153_v14  ;;  %v4129_v19 = vld [vmem:[%s12378_s3 + $0x6b8] sm:$0xff]  ;;  %v8575_v30 = vcombine.low %v4145_v25, %v4153_v14 }
 0x3d2   : > { %7567 = vmatpush1.bf16.msra.mxu0 %v8415_v38  ;;  %v4137_v37 = vld [vmem:[%s12378_s3 + $0x6f8] sm:$0xff] }
 0x3d3   : > { %7568 = vmatprep.subr.bf16.mxu0 %v8400_v41  ;;  %v4385_v28 = vld [vmem:[%s12378_s3 + $0xeb8] sm:$0xff]  ;;  %v8560_v34 = vcombine.high %v4129_v19, %v4137_v37  ;;  %v8559_v7 = vcombine.low %v4129_v19, %v4137_v37 }
 0x3d4   : > { %7608 = vmatpush1.bf16.msra.mxu1 %v8671_v21  ;;  %v4393_v29 = vld [vmem:[%s12378_s3 + $0xef8] sm:$0xff] }
 0x3d5   : > { %7609 = vmatprep.subr.bf16.mxu1 %v8656_v5  ;;  %v8816_v36 = vcombine.high %v4385_v28, %v4393_v29  ;;  %v4113_v38 = vld [vmem:[%s12378_s3 + $0x638] sm:$0xff]  ;;  %v8815_v11 = vcombine.low %v4385_v28, %v4393_v29 }
 0x3d6   : > { %7569 = vmatpush1.bf16.msra.mxu0 %v8399_v45  ;;  %v4121_v21 = vld [vmem:[%s12378_s3 + $0x678] sm:$0xff] }
 0x3d7   : > { %7570 = vmatprep.subr.bf16.mxu0 %v8384_v46  ;;  %v4369_v41 = vld [vmem:[%s12378_s3 + $0xe38] sm:$0xff]  ;;  %v8544_v43 = vcombine.high %v4113_v38, %v4121_v21  ;;  %v8543_v48 = vcombine.low %v4113_v38, %v4121_v21  ;;  %v3884_v21 = vld [vmem:[%s12340_s20] sm:$0xff] }
 0x3d8   : > { %7610 = vmatpush1.bf16.msra.mxu1 %v8655_v49  ;;  %v4377_v5 = vld [vmem:[%s12378_s3 + $0xe78] sm:$0xff] }
 0x3d9   : > { %7611 = vmatprep.subr.bf16.mxu1 %v8640_v47  ;;  %v8800_v44 = vcombine.high %v4369_v41, %v4377_v5  ;;  %v4097_v45 = vld [vmem:[%s12378_s3 + $0x5b8] sm:$0xff]  ;;  %v8799_v40 = vcombine.low %v4369_v41, %v4377_v5  ;;  %v7730_v41 = vadd.f32 %v7674_v13, %v3884_v21 }
 0x3da   : > { %7571 = vmatpush1.bf16.msra.mxu0 %v8383_v50  ;;  %v4105_v49 = vld [vmem:[%s12378_s3 + $0x5f8] sm:$0xff] }
 0x3db   : > { %7572 = vmatprep.subr.bf16.mxu0 %v8368_v32  ;;  %v4353_v46 = vld [vmem:[%s12378_s3 + $0xdb8] sm:$0xff]  ;;  %v8528_v53 = vcombine.high %v4097_v45, %v4105_v49  ;;  %v8527_v52 = vcombine.low %v4097_v45, %v4105_v49 }
 0x3dc   : > { %7612 = vmatpush1.bf16.msra.mxu1 %v8639_v26  ;;  %v4361_v47 = vld [vmem:[%s12378_s3 + $0xdf8] sm:$0xff] }
 0x3dd   : > { %7613 = vmatprep.subr.bf16.mxu1 %v8624_v42  ;;  %v8784_v59 = vcombine.high %v4353_v46, %v4361_v47  ;;  %v4081_v50 = vld [vmem:[%s12378_s3 + $0x538] sm:$0xff]  ;;  %v8783_v54 = vcombine.low %v4353_v46, %v4361_v47 }
 0x3de   : > { %7573 = vmatpush1.bf16.msra.mxu0 %v8367_v51  ;;  %v4089_v26 = vld [vmem:[%s12378_s3 + $0x578] sm:$0xff] }
 0x3df   : > { %7574 = vmatprep.subr.bf16.mxu0 %v8352_v4  ;;  %v4337_v32 = vld [vmem:[%s12378_s3 + $0xd38] sm:$0xff]  ;;  %v8512_v56 = vcombine.high %v4081_v50, %v4089_v26  ;;  %v8511_v9 = vcombine.low %v4081_v50, %v4089_v26  ;;  %v3886_v50 = vld [vmem:[%s12340_s20 + $0x10] sm:$0xff] }
 0x3e0   : > { %7614 = vmatpush1.bf16.msra.mxu1 %v8623_v62  ;;  %v4345_v42 = vld [vmem:[%s12378_s3 + $0xd78] sm:$0xff] }
 0x3e1   : > { %7615 = vmatprep.subr.bf16.mxu1 %v8608_v55  ;;  %v8768_v58 = vcombine.high %v4337_v32, %v4345_v42  ;;  %v4065_v51 = vld [vmem:[%s12378_s3 + $0x4b8] sm:$0xff]  ;;  %v8767_v63 = vcombine.low %v4337_v32, %v4345_v42 }
 0x3e2   : > { %7575 = vmatpush1.bf16.msra.mxu0 %v8351_v6  ;;  %v4073_v62 = vld [vmem:[%s12378_s3 + $0x4f8] sm:$0xff] }
 0x3e3   : > { %7576 = vmatprep.subr.bf16.mxu0 %v8592_v10  ;;  %v4321_v4 = vld [vmem:[%s12378_s3 + $0xcb8] sm:$0xff]  ;;  %v8496_v61 = vcombine.high %v4065_v51, %v4073_v62  ;;  %v8495_v25 = vcombine.low %v4065_v51, %v4073_v62 }
 0x3e4   : > { %7616 = vmatpush1.bf16.msra.mxu1 %v8607_v12  ;;  %v4329_v55 = vld [vmem:[%s12378_s3 + $0xcf8] sm:$0xff] }
 0x3e5   : > { %7617 = vmatprep.subr.bf16.mxu1 %v8848_v16  ;;  %v8752_v57 = vcombine.high %v4321_v4, %v4329_v55  ;;  %v4049_v6 = vld [vmem:[%s12378_s3 + $0x438] sm:$0xff]  ;;  %v8751_v14 = vcombine.low %v4321_v4, %v4329_v55 }
 0x3e6   : > { %7577 = vmatpush2.bf16.msra.mxu0 %v8591_v18  ;;  %v4057_v12 = vld [vmem:[%s12378_s3 + $0x478] sm:$0xff] }
 0x3e7   : > { %7578 = vmatprep.subr.bf16.mxu0 %v8576_v22  ;;  %v4305_v10 = vld [vmem:[%s12378_s3 + $0xc38] sm:$0xff]  ;;  %v8480_v15 = vcombine.high %v4049_v6, %v4057_v12  ;;  %v8479_v18 = vcombine.low %v4049_v6, %v4057_v12 }
 0x3e8   : > { %7618 = vmatpush2.bf16.msra.mxu1 %v8847_v20  ;;  %v4313_v16 = vld [vmem:[%s12378_s3 + $0xc78] sm:$0xff] }
 0x3e9   : > { %7619 = vmatprep.subr.bf16.mxu1 %v8832_v27  ;;  %v8736_v17 = vcombine.high %v4305_v10, %v4313_v16  ;;  %v8735_v20 = vcombine.low %v4305_v10, %v4313_v16 }
 0x3ea   : > { %7579 = vmatpush2.bf16.msra.mxu0 %v8575_v30 }
 0x3eb   : > { %7580 = vmatprep.subr.bf16.mxu0 %v8560_v34 }
 0x3ec   : > { %7620 = vmatpush2.bf16.msra.mxu1 %v8831_v23 }
 0x3ed   : > { %7621 = vmatprep.subr.bf16.mxu1 %v8816_v36 }
 0x3ee   : > { %7581 = vmatpush2.bf16.msra.mxu0 %v8559_v7  ;;  %v8852_v7 = vmul.f32 -1.442695, %v7730_v41 }
 0x3ef   : > { %7582 = vmatprep.subr.bf16.mxu0 %v8544_v43 }
 0x3f0   : > { %7622 = vmatpush2.bf16.msra.mxu1 %v8815_v11 }
 0x3f1   : > { %7623 = vmatprep.subr.bf16.mxu1 %v8800_v44 }
 0x3f2   : > { %7583 = vmatpush2.bf16.msra.mxu0 %v8543_v48 }
 0x3f3   : > { %7584 = vmatprep.subr.bf16.mxu0 %v8528_v53 }
 0x3f4   : > { %7624 = vmatpush2.bf16.msra.mxu1 %v8799_v40 }
 0x3f5   : > { %7625 = vmatprep.subr.bf16.mxu1 %v8784_v59 }
 0x3f6   : > { %7585 = vmatpush2.bf16.msra.mxu0 %v8527_v52 }
 0x3f7   : > { %7586 = vmatprep.subr.bf16.mxu0 %v8512_v56 }
 0x3f8   : > { %7626 = vmatpush2.bf16.msra.mxu1 %v8783_v54 }
 0x3f9   : > { %7627 = vmatprep.subr.bf16.mxu1 %v8768_v58 }
 0x3fa   : > { %7587 = vmatpush2.bf16.msra.mxu0 %v8511_v9 }
 0x3fb   : > { %7588 = vmatprep.subr.bf16.mxu0 %v8496_v61 }
 0x3fc   : > { %7628 = vmatpush2.bf16.msra.mxu1 %v8767_v63 }
 0x3fd   : > { %7629 = vmatprep.subr.bf16.mxu1 %v8752_v57 }
 0x3fe   : > { %7589 = vmatpush2.bf16.msra.mxu0 %v8495_v25 }
 0x3ff   : > { %7590 = vmatprep.subr.bf16.mxu0 %v8480_v15 }
 0x400   : > { %7630 = vmatpush2.bf16.msra.mxu1 %v8751_v14 }
 0x401   : > { %7631 = vmatprep.subr.bf16.mxu1 %v8736_v17 }
 0x402   : > { %7591 = vmatpush2.bf16.msra.mxu0 %v8479_v18 }
 0x404   : > { %7632 = vmatpush2.bf16.msra.mxu1 %v8735_v20 }
 0x405   : > { %v7348_v22 = vpop.f32.mrf.mxu0  ;;  %7593 = vmatmul.mubr.bf16.vlgmr.msra.gmra.mxu0 %v10908_v3  ;;  %v3885_v3 = vld [vmem:[%s12340_s20 + $0x8] sm:$0xff] }
 0x407   : > { %v7389_v27 = vpop.f32.mrf.mxu1  ;;  %7634 = vmatmul.mubr.bf16.vlgmr.msra.gmra.mxu1 %v10918_v1  ;;  %v7350_v37 = vpop.f32.mrf.mxu0  ;;  %v7731_v1 = vadd.f32 %v7691_v39, %v3885_v3 }
 0x408   : > { %v7390_v19 = vadd.f32 %v7389_v27, %v7348_v22 }
 0x409   : > { %v7391_v28 = vpop.f32.mrf.mxu1  ;;  %v7352_v30 = vpop.f32.mrf.mxu0  ;;  %v8853_v5 = vmul.f32 -1.442695, %v7731_v1 }
 0x40a   : > { %v7392_v29 = vadd.f32 %v7391_v28, %v7350_v37  ;;  %v3887_v30 = vld [vmem:[%s12340_s20 + $0x18] sm:$0xff] }
 0x40b   : > { %v7393_v23 = vpop.f32.mrf.mxu1  ;;  %v7353_v36 = vpop.f32.mrf.mxu0  ;;  %8919 = vpow2.f32 %v8853_v5 }
 0x40c   : > { %v7692_v34 = vcombine.low %v7390_v19, %v7392_v29  ;;  %8921 = vpow2.f32 %v8852_v7 }
 0x40d   : > { %v7394_v38 = vpop.f32.mrf.mxu1 }
 0x40e   : > { %v7700_v60 = vrot.slane %v7692_v34, %v9077_v35 }
 0x418   : > { %v8920_v48 = vpop.eup %8919 }
 0x419   : > { %v8922_v31 = vpop.eup %8921  ;;  %v7767_v8 = vadd.f32 1.0, %v8920_v48 }
 0x41a   : > { %v7761_v59 = vadd.f32 1.0, %v8922_v31 }
 0x41b   : > { %8923 = vrcp.f32 %v7767_v8 }
 0x41c   : > { %8925 = vrcp.f32 %v7761_v59 }
 0x428   : > { %v8924_v42 = vpop.eup %8923 }
 0x429   : > { %v8926_v52 = vpop.eup %8925  ;;  %v7777_v56 = vmul.f32 %v8957_v0, %v8924_v42 }
 0x445   : > { %v7430_v11 = vpop.f32.mrf.mxu0 }
 0x447   : > { %v7471_v43 = vpop.f32.mrf.mxu1  ;;  %v7432_v45 = vpop.f32.mrf.mxu0 }
 0x448   : > { %v7472_v44 = vadd.f32 %v7471_v43, %v7430_v11 }
 0x449   : > { %v7473_v49 = vpop.f32.mrf.mxu1  ;;  %v7434_v47 = vpop.f32.mrf.mxu0 }
 0x44a   : > { %v7474_v46 = vadd.f32 %v7473_v49, %v7432_v45 }
 0x44b   : > { %v7475_v40 = vpop.f32.mrf.mxu1  ;;  %v7435_v39 = vpop.f32.mrf.mxu0 }
 0x44c   : > { %v7693_v33 = vcombine.low %v7472_v44, %v7474_v46 }
 0x44d   : > { %v7476_v53 = vpop.f32.mrf.mxu1 }
 0x44e   : > { %v7707_v13 = vrot.slane %v7693_v33, %v9077_v35 }
 0x450   : > { %v7708_v26 = vcombine.low %v7700_v60, %v7707_v13 }
 0x452   : > { %v7732_v32 = vadd.f32 %v7708_v26, %v3886_v50 }
 0x454   : > { %8927 = vtanh.f32 %v7732_v32 }
 0x461   : > { %v8928_v54 = vpop.eup %8927 }
 0x462   : > { %v7778_v58 = vmul.f32 %v8928_v54, %v8926_v52 }
 0x464   : > { %v7779_v0 = vadd.f32 %v7778_v58, %v7777_v56  }
 0x485   : > { %v7512_v51 = vpop.f32.mrf.mxu0 }
 0x487   : > { %v7553_v62 = vpop.f32.mrf.mxu1  ;;  %v7514_v55 = vpop.f32.mrf.mxu0 }
 0x488   : > { %v7554_v4 = vadd.f32 %v7553_v62, %v7512_v51 }
 0x489   : > { %v7555_v9 = vpop.f32.mrf.mxu1  ;;  %v7516_v61 = vpop.f32.mrf.mxu0 }
 0x48a   : > { %v7556_v63 = vadd.f32 %v7555_v9, %v7514_v55 }
 0x48b   : > { %v7557_v57 = vpop.f32.mrf.mxu1  ;;  %v7517_v12 = vpop.f32.mrf.mxu0 }
 0x48c   : > { %v7709_v6 = vcombine.low %v7554_v4, %v7556_v63 }
 0x48d   : > { %v7558_v10 = vpop.f32.mrf.mxu1 }
 0x48e   : > { %v7717_v28 = vrot.slane %v7709_v6, %v9077_v35 }
 0x4c5   : > { %v7594_v16 = vpop.f32.mrf.mxu0 }
 0x4c7   : > { %v7635_v25 = vpop.f32.mrf.mxu1  ;;  %v7596_v14 = vpop.f32.mrf.mxu0 }
 0x4c8   : > { %v7636_v17 = vadd.f32 %v7635_v25, %v7594_v16 }
 0x4c9   : > { %v7637_v15 = vpop.f32.mrf.mxu1  ;;  %v7598_v20 = vpop.f32.mrf.mxu0 }
 0x4ca   : > { %v7638_v18 = vadd.f32 %v7637_v15, %v7596_v14 }
 0x4cb   : > { %v7639_v22 = vpop.f32.mrf.mxu1  ;;  %v7599_v19 = vpop.f32.mrf.mxu0 }
 0x4cc   : > { %v7710_v27 = vcombine.low %v7636_v17, %v7638_v18 }
 0x4cd   : > { %v7640_v37 = vpop.f32.mrf.mxu1 }
 0x4ce   : > { %v7724_v29 = vrot.slane %v7710_v27, %v9077_v35 }
 0x4d0   : > { %v7725_v23 = vcombine.low %v7717_v28, %v7724_v29 }
 0x4d2   : > { %v7733_v34 = vadd.f32 %v7725_v23, %v3887_v30 }
 0x4d4   : > { %v8854_v36 = vmul.f32 -1.442695, %v7733_v34 }
 0x4d6   : > { %8929 = vpow2.f32 %v8854_v36 }
 0x4d7   : > { %8931 = vtanh.f32 %v7779_v0 }
 0x4e3   : > { %v8930_v38 = vpop.eup %8929 }
 0x4e4   : > { %v7774_v3 = vadd.f32 1.0, %v8930_v38  ;;  %v8932_v21 = vpop.eup %8931 }
 0x4e6   : > { %8933 = vrcp.f32 %v7774_v3  ;;  %v12381_v3 = vmov %v11488_v24 }
 0x4f2   :  { %23 = sbr.rel (!%p21_p0) target bundleno = 1 (0x1), region = 55 }
 0x4f3   : > { %v8934_v1 = vpop.eup %8933 }
 0x4f4   : > { %v7781_v1 = vmul.f32 %v8934_v1, %v8932_v21  }
 0x4f6   : > { %7788 = vst [vmem:[%s7787_s23] sm:$0xff] %v7781_v1 }

</bundles_post_ra>
